<compile_context>
chip_gen: v5e
topology: v5e:2x2
jax: 0.10.0
libtpu: 0.0.40
codegen_flags: <defaults>
</compile_context>

<pallas_src>
import math

import jax
import jax.numpy as jnp
from jax.experimental import pallas as pl
from jax.experimental.pallas import tpu as pltpu


# ----------------------------------------------------------------------------
# Small helpers
# ----------------------------------------------------------------------------
_SQRT_2_OVER_PI = math.sqrt(2.0 / math.pi)


def _gelu(x):
    # tanh-approximate GELU (see TODO above), f32 math.
    return 0.5 * x * (1.0 + jnp.tanh(_SQRT_2_OVER_PI * (x + 0.044715 * x * x * x)))


def _round_up(x, m):
    return ((x + m - 1) // m) * m


# ----------------------------------------------------------------------------
# Static packing layout (shared by the packer and the kernel)
# ----------------------------------------------------------------------------
def _layout(seq_len, input_dim, cde_hidden, d_model, output_dim):
    assert cde_hidden <= 128 and d_model <= 128, "encoder dims must fit one lane tile"
    assert output_dim + 22 <= 128, "packed head output must fit 128 lanes"

    kseq = _round_up(seq_len * input_dim, 128)        # flattened-sequence lanes
    xw = kseq + 512                                    # + tmdb(128 pad) + content(384)

    # weight slab placements: name -> (row0, col0, rows, cols)
    w = {
        "enc":    (0,            0,   kseq, 256),     # stacked (1/T) encoder weights
        "w1_top": (kseq,         0,   256, 1024),     # block-diag L1, enc part
        "w1_bot": (kseq + 256,   0,   512, 1024),     # block-diag L1, tmdb+content part
        "w2":     (kseq + 768,   0,   1024, 512),     # block-diag L2
        "w3":     (kseq + 768,   512, 512, 256),      # block-diag L3 -> combined(256)
        "wf2":    (kseq + 1280,  512, 512, 256),      # final_fusion L2
        "blk_f":  (kseq + 768,   768, 256, 128),      # final_fusion L3
        "blk_r":  (kseq + 1024,  768, 128, 128),      # rating head L2
        "blk_h":  (kseq + 1152,  768, 128, 128),      # cs/gp head L2
        "cmb1":   (kseq + 1792,  0,   256, 640),      # final_fusion L1 + rating L1
        "heads1": (kseq + 1792,  640, 256, 128),      # cs L1 + gp L1 (block rows)
    }
    wrows = kseq + 2048

    # bias slab placements: name -> (offset, width); all 128-aligned
    b, off = {}, 0
    for name, width in (("enc", 256), ("b1", 1024), ("b2", 512), ("b3", 256),
                        ("cmb1", 640), ("heads1", 128), ("f2", 256), ("final", 128)):
        b[name] = (off, width)
        off += width

    return dict(kseq=kseq, xw=xw, wrows=wrows, wcols=1024, bwidth=off,
                w=w, b=b, slab_out=384)


# ----------------------------------------------------------------------------
# Fused forward kernel
# ----------------------------------------------------------------------------
def _make_kernel(lay, has_tmdb, has_content):
    kseq = lay["kseq"]
    wpos = lay["w"]
    bpos = lay["b"]

    def kernel(x_ref, w_ref, b_ref, o_ref):
        def wsl(name):                                   # static, tile-aligned slice
            r0, c0, nr, nc = wpos[name]
            return w_ref[r0:r0 + nr, c0:c0 + nc]

        def bsl(name):
            o, n = bpos[name]
            return b_ref[:, o:o + n]

        def mm(x, name):                                 # bf16 x bf16 -> f32 acc
            return jnp.dot(x, wsl(name), preferred_element_type=jnp.float32)

        x_seq = x_ref[:, 0:kseq].astype(jnp.bfloat16)            # flattened sequence
        x_aux = x_ref[:, kseq:kseq + 512].astype(jnp.bfloat16)   # tmdb(pad) | content

        # stand-in sequence encoders (time-mean pool folded into the weights)
        enc = jnp.tanh(mm(x_seq, "enc") + bsl("enc")).astype(jnp.bfloat16)   # (B,256)

        # block-diagonal fused 4-branch fusion MLPs (cde | trf | tmdb | content)
        h1 = _gelu(mm(enc, "w1_top") + mm(x_aux, "w1_bot")
                   + bsl("b1")).astype(jnp.bfloat16)                          # (B,1024)
        h2 = _gelu(mm(h1, "w2") + bsl("b2")).astype(jnp.bfloat16)             # (B,512)
        combined = mm(h2, "w3") + bsl("b3")                                   # (B,256) f32

        if not (has_tmdb and has_content):
            # PyTorch semantics: missing branches produce all-zero features
            lane = jax.lax.broadcasted_iota(jnp.int32, combined.shape, 1)
            keep = jnp.ones(combined.shape, jnp.float32)
            if not has_tmdb:
                keep = jnp.where((lane >= 128) & (lane < 192), 0.0, keep)
            if not has_content:
                keep = jnp.where(lane >= 192, 0.0, keep)
            combined = combined * keep

        cmb = combined.astype(jnp.bfloat16)
        h_cmb = _gelu(mm(cmb, "cmb1") + bsl("cmb1"))                          # (B,640) f32
        hh = _gelu(mm(cmb, "heads1") + bsl("heads1")).astype(jnp.bfloat16)    # (B,128)
        f2 = _gelu(mm(h_cmb[:, 0:512].astype(jnp.bfloat16), "wf2")
                   + bsl("f2")).astype(jnp.bfloat16)                          # (B,256)
        h_rate = h_cmb[:, 512:640].astype(jnp.bfloat16)                       # (B,128)

        # packed last layers of all four heads, sigmoid epilogue
        heads = jax.nn.sigmoid(mm(f2, "blk_f") + mm(h_rate, "blk_r")
                               + mm(hh, "blk_h") + bsl("final"))              # (B,128)

        # lane-dense output slab: [combined(256) | heads(128)]
        o_ref[:, 0:256] = combined
        o_ref[:, 256:384] = heads

    return kernel


# ----------------------------------------------------------------------------
# Parameter construction (nn.Linear-style uniform init), packed into two slabs
# ----------------------------------------------------------------------------
def _linear(key, fan_in, fan_out):
    kw, kb = jax.random.split(key)
    bound = 1.0 / math.sqrt(fan_in)
    w = jax.random.uniform(kw, (fan_in, fan_out), jnp.float32, -bound, bound)
    b = jax.random.uniform(kb, (fan_out,), jnp.float32, -bound, bound)
    return w, b


def _mlp(key, dims):
    keys = jax.random.split(key, len(dims) - 1)
    return [_linear(k, dims[i], dims[i + 1]) for i, k in enumerate(keys)]


def build_params(key, input_dim, output_dim, cde_hidden, d_model, seq_len):
    lay = _layout(seq_len, input_dim, cde_hidden, d_model, output_dim)
    ks = jax.random.split(key, 10)

    cde_enc = _linear(ks[0], input_dim, cde_hidden)
    trf_enc = _linear(ks[1], input_dim, d_model)
    tmdb = _mlp(ks[2], (70, 256, 128, 64))
    content = _mlp(ks[3], (384, 256, 128, 64))
    cde_f = _mlp(ks[4], (cde_hidden, 256, 128, 64))
    trf_f = _mlp(ks[5], (d_model, 256, 128, 64))
    final = _mlp(ks[6], (256, 512, 256, output_dim))
    cs = _mlp(ks[7], (64, 32, 1))
    gp = _mlp(ks[8], (64, 32, 20))
    rate = _mlp(ks[9], (256, 128, 1))

    w_slab = jnp.zeros((lay["wrows"], lay["wcols"]), jnp.float32)
    b_slab = jnp.zeros((1, lay["bwidth"]), jnp.float32)

    def put_w(name, block, r_off=0, c_off=0):
        nonlocal w_slab
        r0, c0, _, _ = lay["w"][name]
        w_slab = w_slab.at[r0 + r_off:r0 + r_off + block.shape[0],
                           c0 + c_off:c0 + c_off + block.shape[1]].set(block)

    def put_b(name, vec, off=0):
        nonlocal b_slab
        o, _ = lay["b"][name]
        b_slab = b_slab.at[0, o + off:o + off + vec.shape[0]].set(vec)

    T = seq_len
    # encoders: time-mean pool folded in (tile over T, scale 1/T); cde -> lanes
    # [0,128), transformer -> lanes [128,256)
    put_w("enc", jnp.tile(cde_enc[0] / T, (T, 1)), 0, 0)
    put_w("enc", jnp.tile(trf_enc[0] / T, (T, 1)), 0, 128)
    put_b("enc", cde_enc[1], 0)
    put_b("enc", trf_enc[1], 128)

    # block-diagonal fusion L1 (columns: cde|trf|tmdb|content, 256 each)
    put_w("w1_top", cde_f[0][0], 0, 0)
    put_w("w1_top", trf_f[0][0], 128, 256)
    put_w("w1_bot", tmdb[0][0], 0, 512)
    put_w("w1_bot", content[0][0], 128, 768)
    put_b("b1", cde_f[0][1], 0)
    put_b("b1", trf_f[0][1], 256)
    put_b("b1", tmdb[0][1], 512)
    put_b("b1", content[0][1], 768)

    # block-diagonal fusion L2 / L3
    for i, br in enumerate((cde_f, trf_f, tmdb, content)):
        put_w("w2", br[1][0], 256 * i, 128 * i)
        put_b("b2", br[1][1], 128 * i)
        put_w("w3", br[2][0], 128 * i, 64 * i)
        put_b("b3", br[2][1], 64 * i)

    # final_fusion L1 + rating L1 packed on combined(256)
    put_w("cmb1", final[0][0], 0, 0)
    put_w("cmb1", rate[0][0], 0, 512)
    put_b("cmb1", final[0][1], 0)
    put_b("cmb1", rate[0][1], 512)

    # cs / gp head L1 packed (block rows select content / tmdb segments)
    put_w("heads1", cs[0][0], 192, 0)
    put_w("heads1", gp[0][0], 128, 32)
    put_b("heads1", cs[0][1], 0)
    put_b("heads1", gp[0][1], 32)

    # final_fusion L2
    put_w("wf2", final[1][0])
    put_b("f2", final[1][1])

    # packed last layers: output cols = [final(out) | cs(1) | gp(20) | rating(1)]
    put_w("blk_f", final[2][0], 0, 0)
    put_w("blk_h", cs[1][0], 0, output_dim)
    put_w("blk_h", gp[1][0], 32, output_dim + 1)
    put_w("blk_r", rate[1][0], 0, output_dim + 21)
    put_b("final", final[2][1], 0)
    put_b("final", cs[1][1], output_dim)
    put_b("final", gp[1][1], output_dim + 1)
    put_b("final", rate[1][1], output_dim + 21)

    return {
        "w": w_slab.astype(jnp.bfloat16),      # one bf16 weight slab
        "b": b_slab,                           # one f32 bias slab
        "layout": lay,
        "dims": {"input_dim": input_dim, "output_dim": output_dim,
                 "cde_hidden": cde_hidden, "d_model": d_model,
                 "seq_len": seq_len},
    }


# ----------------------------------------------------------------------------
# Full forward pass (one pallas_call)
# ----------------------------------------------------------------------------
def hybrid_forward(params, sequence, timestamps, tmdb_features=None,
                   content_embeddings=None):
    del timestamps  # TODO(synk): stand-in encoder does not solve a CDE over timestamps
    lay = params["layout"]
    dims = params["dims"]
    B, T, D = sequence.shape
    assert T == dims["seq_len"] and D == dims["input_dim"]
    out_dim = dims["output_dim"]
    kseq, xw = lay["kseq"], lay["xw"]

    has_tmdb = tmdb_features is not None and tmdb_features.shape[0] == B
    has_content = content_embeddings is not None and content_embeddings.shape[0] == B

    # batch tiling (parallel grid axis -> both v7x TensorCores at large batch)
    tb = min(128, _round_up(B, 8))
    b_pad = _round_up(B, tb)

    # lane-dense packed input slab: [seq_flat(pad) | tmdb(pad 128) | content(384)]
    x = jnp.zeros((b_pad, xw), jnp.float32)
    x = x.at[:B, :T * D].set(sequence.reshape(B, T * D).astype(jnp.float32))
    if has_tmdb:
        x = x.at[:B, kseq:kseq + 70].set(tmdb_features.astype(jnp.float32))
    if has_content:
        x = x.at[:B, kseq + 128:kseq + 512].set(content_embeddings.astype(jnp.float32))

    kernel = _make_kernel(lay, has_tmdb, has_content)

    mac = sum(nr * nc for (_, _, nr, nc) in lay["w"].values())
    cost = pl.CostEstimate(
        flops=2 * b_pad * mac,
        transcendentals=b_pad * 3072,
        bytes_accessed=(x.size * 4 + params["w"].size * 2 + params["b"].size * 4
                        + b_pad * lay["slab_out"] * 4))

    slab = pl.pallas_call(
        kernel,
        out_shape=jax.ShapeDtypeStruct((b_pad, lay["slab_out"]), jnp.float32),
        grid=(b_pad // tb,),
        in_specs=[
            pl.BlockSpec((tb, xw), lambda i: (i, 0)),
            pl.BlockSpec((lay["wrows"], lay["wcols"]), lambda i: (0, 0)),   # resident
            pl.BlockSpec((1, lay["bwidth"]), lambda i: (0, 0)),             # resident
        ],
        out_specs=pl.BlockSpec((tb, lay["slab_out"]), lambda i: (i, 0)),
        compiler_params=pltpu.CompilerParams(
            dimension_semantics=("parallel",),
            vmem_limit_bytes=32 * 1024 * 1024),
        cost_estimate=cost,
    )(x, params["w"], params["b"])

    slab = slab[:B]
    combined = slab[:, :256]
    off = 256
    final_traits = slab[:, off:off + out_dim]
    content_affinity = slab[:, off + out_dim:off + out_dim + 1]
    genre_preferences = slab[:, off + out_dim + 1:off + out_dim + 21]
    predicted_rating = slab[:, off + out_dim + 21:off + out_dim + 22]

    return {
        "psychological_traits": final_traits,
        "content_affinity_scores": content_affinity,
        "genre_preferences": genre_preferences,
        "predicted_rating": predicted_rating,
        "cde_traits": combined[:, 0:64],
        "transformer_traits": combined[:, 64:128],
        "tmdb_traits": combined[:, 128:192],
        "content_traits": combined[:, 192:256],
    }


# ----------------------------------------------------------------------------
# Main
# ----------------------------------------------------------------------------
if __name__ == "__main__":
    B, T = 8, 12
    INPUT_DIM, OUTPUT_DIM = 16, 10
    CDE_HIDDEN, D_MODEL = 32, 32

    key = jax.random.PRNGKey(0)
    k_param, k_seq, k_ts, k_tmdb, k_content = jax.random.split(key, 5)

    params = build_params(k_param, INPUT_DIM, OUTPUT_DIM, CDE_HIDDEN, D_MODEL, T)

    sequence = jax.random.normal(k_seq, (B, T, INPUT_DIM), jnp.float32)
    timestamps = jnp.cumsum(
        jax.random.uniform(k_ts, (B, T), jnp.float32, 0.1, 1.0), axis=1)
    tmdb_features = jax.random.normal(k_tmdb, (B, 70), jnp.float32)
    content_embeddings = jax.random.normal(k_content, (B, 384), jnp.float32)

    outputs = hybrid_forward(params, sequence, timestamps,
                             tmdb_features, content_embeddings)
    outputs = jax.block_until_ready(outputs)

    # basic sanity checks
    assert outputs["psychological_traits"].shape == (B, OUTPUT_DIM)
    assert outputs["content_affinity_scores"].shape == (B, 1)
    assert outputs["genre_preferences"].shape == (B, 20)
    assert outputs["predicted_rating"].shape == (B, 1)
    assert outputs["cde_traits"].shape == (B, 64)
    assert outputs["transformer_traits"].shape == (B, 64)
    assert outputs["tmdb_traits"].shape == (B, 64)
    assert outputs["content_traits"].shape == (B, 64)
    for name in ("psychological_traits", "content_affinity_scores",
                 "genre_preferences", "predicted_rating"):
        v = outputs[name]
        assert bool(jnp.all(jnp.isfinite(v)))
        assert bool(jnp.all((v >= 0.0) & (v <= 1.0)))   # sigmoid heads
    for name in ("cde_traits", "transformer_traits", "tmdb_traits", "content_traits"):
        assert bool(jnp.all(jnp.isfinite(outputs[name])))

    print("KERNEL_OK")
</pallas_src>

<mosaic_0001>
module attributes {stable_mosaic.version = 11 : i64} {
  func.func @kernel(%arg0: i32, %arg1: memref<8x768xf32, #tpu.memory_space<vmem>>, %arg2: memref<2304x1024xbf16, #tpu.memory_space<vmem>>, %arg3: memref<1x3200xf32, #tpu.memory_space<vmem>>, %arg4: memref<8x384xf32, #tpu.memory_space<vmem>>) attributes {dimension_semantics = [#tpu.dimension_semantics<parallel>], iteration_bounds = array<i64: 1>, scalar_prefetch = 0 : i64, scratch_operands = 0 : i64, tpu.core_type = #tpu.core_type<tc>, window_params = [{transform_indices = @transform_0, window_bounds = array<i64: 8, 768>}, {pipeline_mode = #tpu.pipeline_mode<synchronous>, transform_indices = @transform_1, window_bounds = array<i64: 2304, 1024>}, {pipeline_mode = #tpu.pipeline_mode<synchronous>, transform_indices = @transform_2, window_bounds = array<i64: 1, 3200>}, {transform_indices = @transform_3, window_bounds = array<i64: 8, 384>}]} {
    %c0 = arith.constant 0 : index
    %c0_0 = arith.constant 0 : index
    %0 = vector.load %arg1[%c0, %c0_0] : memref<8x768xf32, #tpu.memory_space<vmem>>, vector<8x256xf32>
    %1 = arith.truncf %0 : vector<8x256xf32> to vector<8x256xbf16>
    %c0_1 = arith.constant 0 : index
    %c256 = arith.constant 256 : index
    %2 = vector.load %arg1[%c0_1, %c256] : memref<8x768xf32, #tpu.memory_space<vmem>>, vector<8x512xf32>
    %3 = arith.truncf %2 : vector<8x512xf32> to vector<8x512xbf16>
    %c0_2 = arith.constant 0 : index
    %c0_3 = arith.constant 0 : index
    %4 = vector.load %arg2[%c0_2, %c0_3] : memref<2304x1024xbf16, #tpu.memory_space<vmem>>, vector<256x256xbf16>
    %cst = arith.constant dense<0.000000e+00> : vector<8x256xf32>
    %5 = tpu.matmul %1, %4, %cst {dimension_numbers = #tpu.dot_dimension_numbers<[1], [0], [0], [1], [0, 0, 1, 1], [], []>} : vector<8x256xbf16>, vector<256x256xbf16>, vector<8x256xf32> -> vector<8x256xf32>
    %c0_4 = arith.constant 0 : index
    %c0_5 = arith.constant 0 : index
    %6 = vector.load %arg3[%c0_4, %c0_5] : memref<1x3200xf32, #tpu.memory_space<vmem>>, vector<1x256xf32>
    %7 = vector.broadcast %6 : vector<1x256xf32> to vector<8x256xf32>
    %8 = arith.addf %5, %7 : vector<8x256xf32>
    %9 = math.tanh %8 : vector<8x256xf32>
    %10 = arith.truncf %9 : vector<8x256xf32> to vector<8x256xbf16>
    %c256_6 = arith.constant 256 : index
    %c0_7 = arith.constant 0 : index
    %11 = vector.load %arg2[%c256_6, %c0_7] : memref<2304x1024xbf16, #tpu.memory_space<vmem>>, vector<256x1024xbf16>
    %cst_8 = arith.constant dense<0.000000e+00> : vector<8x1024xf32>
    %12 = tpu.matmul %10, %11, %cst_8 {dimension_numbers = #tpu.dot_dimension_numbers<[1], [0], [0], [1], [0, 0, 1, 1], [], []>} : vector<8x256xbf16>, vector<256x1024xbf16>, vector<8x1024xf32> -> vector<8x1024xf32>
    %c512 = arith.constant 512 : index
    %c0_9 = arith.constant 0 : index
    %13 = vector.load %arg2[%c512, %c0_9] : memref<2304x1024xbf16, #tpu.memory_space<vmem>>, vector<512x1024xbf16>
    %cst_10 = arith.constant dense<0.000000e+00> : vector<8x1024xf32>
    %14 = tpu.matmul %3, %13, %cst_10 {dimension_numbers = #tpu.dot_dimension_numbers<[1], [0], [0], [1], [0, 0, 1, 1], [], []>} : vector<8x512xbf16>, vector<512x1024xbf16>, vector<8x1024xf32> -> vector<8x1024xf32>
    %15 = arith.addf %12, %14 : vector<8x1024xf32>
    %c0_11 = arith.constant 0 : index
    %c256_12 = arith.constant 256 : index
    %16 = vector.load %arg3[%c0_11, %c256_12] : memref<1x3200xf32, #tpu.memory_space<vmem>>, vector<1x1024xf32>
    %17 = vector.broadcast %16 : vector<1x1024xf32> to vector<8x1024xf32>
    %18 = arith.addf %15, %17 : vector<8x1024xf32>
    %cst_13 = arith.constant 5.000000e-01 : f32
    %19 = vector.broadcast %cst_13 : f32 to vector<8x1024xf32>
    %20 = arith.mulf %19, %18 : vector<8x1024xf32>
    %cst_14 = arith.constant 4.471500e-02 : f32
    %21 = vector.broadcast %cst_14 : f32 to vector<8x1024xf32>
    %22 = arith.mulf %21, %18 : vector<8x1024xf32>
    %23 = arith.mulf %22, %18 : vector<8x1024xf32>
    %24 = arith.mulf %23, %18 : vector<8x1024xf32>
    %25 = arith.addf %18, %24 : vector<8x1024xf32>
    %cst_15 = arith.constant 0.797884583 : f32
    %26 = vector.broadcast %cst_15 : f32 to vector<8x1024xf32>
    %27 = arith.mulf %26, %25 : vector<8x1024xf32>
    %28 = math.tanh %27 : vector<8x1024xf32>
    %cst_16 = arith.constant 1.000000e+00 : f32
    %29 = vector.broadcast %cst_16 : f32 to vector<8x1024xf32>
    %30 = arith.addf %29, %28 : vector<8x1024xf32>
    %31 = arith.mulf %20, %30 : vector<8x1024xf32>
    %32 = arith.truncf %31 : vector<8x1024xf32> to vector<8x1024xbf16>
    %c1024 = arith.constant 1024 : index
    %c0_17 = arith.constant 0 : index
    %33 = vector.load %arg2[%c1024, %c0_17] : memref<2304x1024xbf16, #tpu.memory_space<vmem>>, vector<1024x512xbf16>
    %cst_18 = arith.constant dense<0.000000e+00> : vector<8x512xf32>
    %34 = tpu.matmul %32, %33, %cst_18 {dimension_numbers = #tpu.dot_dimension_numbers<[1], [0], [0], [1], [0, 0, 1, 1], [], []>} : vector<8x1024xbf16>, vector<1024x512xbf16>, vector<8x512xf32> -> vector<8x512xf32>
    %c0_19 = arith.constant 0 : index
    %c1280 = arith.constant 1280 : index
    %35 = vector.load %arg3[%c0_19, %c1280] : memref<1x3200xf32, #tpu.memory_space<vmem>>, vector<1x512xf32>
    %36 = vector.broadcast %35 : vector<1x512xf32> to vector<8x512xf32>
    %37 = arith.addf %34, %36 : vector<8x512xf32>
    %cst_20 = arith.constant 5.000000e-01 : f32
    %38 = vector.broadcast %cst_20 : f32 to vector<8x512xf32>
    %39 = arith.mulf %38, %37 : vector<8x512xf32>
    %cst_21 = arith.constant 4.471500e-02 : f32
    %40 = vector.broadcast %cst_21 : f32 to vector<8x512xf32>
    %41 = arith.mulf %40, %37 : vector<8x512xf32>
    %42 = arith.mulf %41, %37 : vector<8x512xf32>
    %43 = arith.mulf %42, %37 : vector<8x512xf32>
    %44 = arith.addf %37, %43 : vector<8x512xf32>
    %cst_22 = arith.constant 0.797884583 : f32
    %45 = vector.broadcast %cst_22 : f32 to vector<8x512xf32>
    %46 = arith.mulf %45, %44 : vector<8x512xf32>
    %47 = math.tanh %46 : vector<8x512xf32>
    %cst_23 = arith.constant 1.000000e+00 : f32
    %48 = vector.broadcast %cst_23 : f32 to vector<8x512xf32>
    %49 = arith.addf %48, %47 : vector<8x512xf32>
    %50 = arith.mulf %39, %49 : vector<8x512xf32>
    %51 = arith.truncf %50 : vector<8x512xf32> to vector<8x512xbf16>
    %c1024_24 = arith.constant 1024 : index
    %c512_25 = arith.constant 512 : index
    %52 = vector.load %arg2[%c1024_24, %c512_25] : memref<2304x1024xbf16, #tpu.memory_space<vmem>>, vector<512x256xbf16>
    %cst_26 = arith.constant dense<0.000000e+00> : vector<8x256xf32>
    %53 = tpu.matmul %51, %52, %cst_26 {dimension_numbers = #tpu.dot_dimension_numbers<[1], [0], [0], [1], [0, 0, 1, 1], [], []>} : vector<8x512xbf16>, vector<512x256xbf16>, vector<8x256xf32> -> vector<8x256xf32>
    %c0_27 = arith.constant 0 : index
    %c1792 = arith.constant 1792 : index
    %54 = vector.load %arg3[%c0_27, %c1792] : memref<1x3200xf32, #tpu.memory_space<vmem>>, vector<1x256xf32>
    %55 = vector.broadcast %54 : vector<1x256xf32> to vector<8x256xf32>
    %56 = arith.addf %53, %55 : vector<8x256xf32>
    %57 = arith.truncf %56 : vector<8x256xf32> to vector<8x256xbf16>
    %c2048 = arith.constant 2048 : index
    %c0_28 = arith.constant 0 : index
    %58 = vector.load %arg2[%c2048, %c0_28] : memref<2304x1024xbf16, #tpu.memory_space<vmem>>, vector<256x640xbf16>
    %cst_29 = arith.constant dense<0.000000e+00> : vector<8x640xf32>
    %59 = tpu.matmul %57, %58, %cst_29 {dimension_numbers = #tpu.dot_dimension_numbers<[1], [0], [0], [1], [0, 0, 1, 1], [], []>} : vector<8x256xbf16>, vector<256x640xbf16>, vector<8x640xf32> -> vector<8x640xf32>
    %c0_30 = arith.constant 0 : index
    %c2048_31 = arith.constant 2048 : index
    %60 = vector.load %arg3[%c0_30, %c2048_31] : memref<1x3200xf32, #tpu.memory_space<vmem>>, vector<1x640xf32>
    %61 = vector.broadcast %60 : vector<1x640xf32> to vector<8x640xf32>
    %62 = arith.addf %59, %61 : vector<8x640xf32>
    %cst_32 = arith.constant 5.000000e-01 : f32
    %63 = vector.broadcast %cst_32 : f32 to vector<8x640xf32>
    %64 = arith.mulf %63, %62 : vector<8x640xf32>
    %cst_33 = arith.constant 4.471500e-02 : f32
    %65 = vector.broadcast %cst_33 : f32 to vector<8x640xf32>
    %66 = arith.mulf %65, %62 : vector<8x640xf32>
    %67 = arith.mulf %66, %62 : vector<8x640xf32>
    %68 = arith.mulf %67, %62 : vector<8x640xf32>
    %69 = arith.addf %62, %68 : vector<8x640xf32>
    %cst_34 = arith.constant 0.797884583 : f32
    %70 = vector.broadcast %cst_34 : f32 to vector<8x640xf32>
    %71 = arith.mulf %70, %69 : vector<8x640xf32>
    %72 = math.tanh %71 : vector<8x640xf32>
    %cst_35 = arith.constant 1.000000e+00 : f32
    %73 = vector.broadcast %cst_35 : f32 to vector<8x640xf32>
    %74 = arith.addf %73, %72 : vector<8x640xf32>
    %75 = arith.mulf %64, %74 : vector<8x640xf32>
    %c2048_36 = arith.constant 2048 : index
    %c640 = arith.constant 640 : index
    %76 = vector.load %arg2[%c2048_36, %c640] : memref<2304x1024xbf16, #tpu.memory_space<vmem>>, vector<256x128xbf16>
    %cst_37 = arith.constant dense<0.000000e+00> : vector<8x128xf32>
    %77 = tpu.matmul %57, %76, %cst_37 {dimension_numbers = #tpu.dot_dimension_numbers<[1], [0], [0], [1], [0, 0, 1, 1], [], []>} : vector<8x256xbf16>, vector<256x128xbf16>, vector<8x128xf32> -> vector<8x128xf32>
    %c0_38 = arith.constant 0 : index
    %c2688 = arith.constant 2688 : index
    %78 = vector.load %arg3[%c0_38, %c2688] : memref<1x3200xf32, #tpu.memory_space<vmem>>, vector<1x128xf32>
    %79 = vector.broadcast %78 : vector<1x128xf32> to vector<8x128xf32>
    %80 = arith.addf %77, %79 : vector<8x128xf32>
    %cst_39 = arith.constant 5.000000e-01 : f32
    %81 = vector.broadcast %cst_39 : f32 to vector<8x128xf32>
    %82 = arith.mulf %81, %80 : vector<8x128xf32>
    %cst_40 = arith.constant 4.471500e-02 : f32
    %83 = vector.broadcast %cst_40 : f32 to vector<8x128xf32>
    %84 = arith.mulf %83, %80 : vector<8x128xf32>
    %85 = arith.mulf %84, %80 : vector<8x128xf32>
    %86 = arith.mulf %85, %80 : vector<8x128xf32>
    %87 = arith.addf %80, %86 : vector<8x128xf32>
    %cst_41 = arith.constant 0.797884583 : f32
    %88 = vector.broadcast %cst_41 : f32 to vector<8x128xf32>
    %89 = arith.mulf %88, %87 : vector<8x128xf32>
    %90 = math.tanh %89 : vector<8x128xf32>
    %cst_42 = arith.constant 1.000000e+00 : f32
    %91 = vector.broadcast %cst_42 : f32 to vector<8x128xf32>
    %92 = arith.addf %91, %90 : vector<8x128xf32>
    %93 = arith.mulf %82, %92 : vector<8x128xf32>
    %94 = arith.truncf %93 : vector<8x128xf32> to vector<8x128xbf16>
    %95 = vector.extract_strided_slice %75 {offsets = [0, 0], sizes = [8, 512], strides = [1, 1]} : vector<8x640xf32> to vector<8x512xf32>
    %96 = arith.truncf %95 : vector<8x512xf32> to vector<8x512xbf16>
    %c1536 = arith.constant 1536 : index
    %c512_43 = arith.constant 512 : index
    %97 = vector.load %arg2[%c1536, %c512_43] : memref<2304x1024xbf16, #tpu.memory_space<vmem>>, vector<512x256xbf16>
    %cst_44 = arith.constant dense<0.000000e+00> : vector<8x256xf32>
    %98 = tpu.matmul %96, %97, %cst_44 {dimension_numbers = #tpu.dot_dimension_numbers<[1], [0], [0], [1], [0, 0, 1, 1], [], []>} : vector<8x512xbf16>, vector<512x256xbf16>, vector<8x256xf32> -> vector<8x256xf32>
    %c0_45 = arith.constant 0 : index
    %c2816 = arith.constant 2816 : index
    %99 = vector.load %arg3[%c0_45, %c2816] : memref<1x3200xf32, #tpu.memory_space<vmem>>, vector<1x256xf32>
    %100 = vector.broadcast %99 : vector<1x256xf32> to vector<8x256xf32>
    %101 = arith.addf %98, %100 : vector<8x256xf32>
    %cst_46 = arith.constant 5.000000e-01 : f32
    %102 = vector.broadcast %cst_46 : f32 to vector<8x256xf32>
    %103 = arith.mulf %102, %101 : vector<8x256xf32>
    %cst_47 = arith.constant 4.471500e-02 : f32
    %104 = vector.broadcast %cst_47 : f32 to vector<8x256xf32>
    %105 = arith.mulf %104, %101 : vector<8x256xf32>
    %106 = arith.mulf %105, %101 : vector<8x256xf32>
    %107 = arith.mulf %106, %101 : vector<8x256xf32>
    %108 = arith.addf %101, %107 : vector<8x256xf32>
    %cst_48 = arith.constant 0.797884583 : f32
    %109 = vector.broadcast %cst_48 : f32 to vector<8x256xf32>
    %110 = arith.mulf %109, %108 : vector<8x256xf32>
    %111 = math.tanh %110 : vector<8x256xf32>
    %cst_49 = arith.constant 1.000000e+00 : f32
    %112 = vector.broadcast %cst_49 : f32 to vector<8x256xf32>
    %113 = arith.addf %112, %111 : vector<8x256xf32>
    %114 = arith.mulf %103, %113 : vector<8x256xf32>
    %115 = arith.truncf %114 : vector<8x256xf32> to vector<8x256xbf16>
    %116 = vector.extract_strided_slice %75 {offsets = [0, 512], sizes = [8, 128], strides = [1, 1]} : vector<8x640xf32> to vector<8x128xf32>
    %117 = arith.truncf %116 : vector<8x128xf32> to vector<8x128xbf16>
    %c1024_50 = arith.constant 1024 : index
    %c768 = arith.constant 768 : index
    %118 = vector.load %arg2[%c1024_50, %c768] : memref<2304x1024xbf16, #tpu.memory_space<vmem>>, vector<256x128xbf16>
    %cst_51 = arith.constant dense<0.000000e+00> : vector<8x128xf32>
    %119 = tpu.matmul %115, %118, %cst_51 {dimension_numbers = #tpu.dot_dimension_numbers<[1], [0], [0], [1], [0, 0, 1, 1], [], []>} : vector<8x256xbf16>, vector<256x128xbf16>, vector<8x128xf32> -> vector<8x128xf32>
    %c1280_52 = arith.constant 1280 : index
    %c768_53 = arith.constant 768 : index
    %120 = vector.load %arg2[%c1280_52, %c768_53] : memref<2304x1024xbf16, #tpu.memory_space<vmem>>, vector<128x128xbf16>
    %cst_54 = arith.constant dense<0.000000e+00> : vector<8x128xf32>
    %121 = tpu.matmul %117, %120, %cst_54 {dimension_numbers = #tpu.dot_dimension_numbers<[1], [0], [0], [1], [0, 0, 1, 1], [], []>} : vector<8x128xbf16>, vector<128x128xbf16>, vector<8x128xf32> -> vector<8x128xf32>
    %122 = arith.addf %119, %121 : vector<8x128xf32>
    %c1408 = arith.constant 1408 : index
    %c768_55 = arith.constant 768 : index
    %123 = vector.load %arg2[%c1408, %c768_55] : memref<2304x1024xbf16, #tpu.memory_space<vmem>>, vector<128x128xbf16>
    %cst_56 = arith.constant dense<0.000000e+00> : vector<8x128xf32>
    %124 = tpu.matmul %94, %123, %cst_56 {dimension_numbers = #tpu.dot_dimension_numbers<[1], [0], [0], [1], [0, 0, 1, 1], [], []>} : vector<8x128xbf16>, vector<128x128xbf16>, vector<8x128xf32> -> vector<8x128xf32>
    %125 = arith.addf %122, %124 : vector<8x128xf32>
    %c0_57 = arith.constant 0 : index
    %c3072 = arith.constant 3072 : index
    %126 = vector.load %arg3[%c0_57, %c3072] : memref<1x3200xf32, #tpu.memory_space<vmem>>, vector<1x128xf32>
    %127 = vector.broadcast %126 : vector<1x128xf32> to vector<8x128xf32>
    %128 = arith.addf %125, %127 : vector<8x128xf32>
    %129 = arith.negf %128 : vector<8x128xf32>
    %130 = math.exp %129 : vector<8x128xf32>
    %cst_58 = arith.constant 1.000000e+00 : f32
    %131 = vector.broadcast %cst_58 : f32 to vector<8x128xf32>
    %132 = arith.addf %131, %130 : vector<8x128xf32>
    %133 = arith.divf %131, %132 : vector<8x128xf32>
    %c0_59 = arith.constant 0 : index
    %c0_60 = arith.constant 0 : index
    %134 = vector.load %arg4[%c0_59, %c0_60] : memref<8x384xf32, #tpu.memory_space<vmem>>, vector<8x256xf32>
    tpu.vector_store %arg4[%c0_59, %c0_60], %56 {strides = array<i32>} : memref<8x384xf32, #tpu.memory_space<vmem>>, vector<8x256xf32>,
    %c0_61 = arith.constant 0 : index
    %c256_62 = arith.constant 256 : index
    %135 = vector.load %arg4[%c0_61, %c256_62] : memref<8x384xf32, #tpu.memory_space<vmem>>, vector<8x128xf32>
    tpu.vector_store %arg4[%c0_61, %c256_62], %133 {strides = array<i32>} : memref<8x384xf32, #tpu.memory_space<vmem>>, vector<8x128xf32>,
    return
  }
  func.func @transform_0(%arg0: i32) -> (i32, i32) {
    %c0_i32 = arith.constant 0 : i32
    %c0_i32_0 = arith.constant 0 : i32
    return %arg0, %c0_i32 : i32, i32
  }
  func.func @transform_1(%arg0: i32) -> (i32, i32) {
    %c0_i32 = arith.constant 0 : i32
    %c0_i32_0 = arith.constant 0 : i32
    %c0_i32_1 = arith.constant 0 : i32
    return %c0_i32, %c0_i32_0 : i32, i32
  }
  func.func @transform_2(%arg0: i32) -> (i32, i32) {
    %c0_i32 = arith.constant 0 : i32
    %c0_i32_0 = arith.constant 0 : i32
    %c0_i32_1 = arith.constant 0 : i32
    return %c0_i32, %c0_i32_0 : i32, i32
  }
  func.func @transform_3(%arg0: i32) -> (i32, i32) {
    %c0_i32 = arith.constant 0 : i32
    %c0_i32_0 = arith.constant 0 : i32
    return %arg0, %c0_i32 : i32, i32
  }
}

</mosaic_0001>

<bundles_post_ra>
// kernel: tpu_custom_call.1
= control target key start
LH: loop header
LB: loop body
LE: loop exit
PB: predicated region body
PF: predicated region fallthrough
CT: control target
= control target key end

     0   :  { %8 = vsyncpa [#allocation3], 0  ;;  %s12758_s0 = inlined_call_operand.hbm [shape: f32[8,768], index: 0, kind: input, shape index: {}]   ;;  %s12759_s1 = inlined_call_operand.hbm [shape: bf16[2304,1024], index: 1, kind: input, shape index: {}]   ;;  %s12760_s2 = inlined_call_operand.hbm [shape: f32[1,3200], index: 2, kind: input, shape index: {}]   ;;  %s12761_s3 = inlined_call_operand.hbm [shape: f32[8,384], index: 3, kind: output, shape index: {}]  }
   0x1   :  { %9 = vsyncpa [#allocation6], 0  ;;  %s26_s14 = sshll.u32 %s12759_s1, 4  ;;  %s27_s14 = int_to_ptr.hbm [resolvable:$true] %s26_s14 }
   0x2   :  { %10 = vsyncpa [#allocation4], 0  ;;  %s12396_s15 = smov [#allocation5]   ;;  %s16_s19 = sshll.u32 %s12758_s0, 4  ;;  %s17_s19 = int_to_ptr.hbm [resolvable:$true] %s16_s19 }
   0x3   :  { %s28_s16 = sshll.u32 %s12396_s15, 4  ;;  %s12397_s20 = smov 512   ;;  %s29_s16 = int_to_ptr.vmem [resolvable:$true] %s28_s16 }
   0x4   :  { %s12398_s21 = smov 32   ;;  %s12399_s22 = smov [#allocation2]  }
   0x5   :  { %34 = dma.hbm_to_vmem [thread:$0]  %s27_s14, 147456, %s29_s16, [#allocation6], %s12397_s20, %s12397_s20, %s12398_s21  }
   0x6   :  { %s18_s23 = sshll.u32 %s12399_s22, 4  ;;  %s40_s26 = sshll.u32 %s12760_s2, 4  ;;  %s19_s23 = int_to_ptr.vmem [resolvable:$true] %s18_s23  ;;  %s41_s26 = int_to_ptr.hbm [resolvable:$true] %s40_s26 }
   0x7   :  { %21 = dma.hbm_to_vmem [thread:$0]  %s17_s19, 768, %s19_s23, [#allocation3]  }
   0x8   :  { %s12400_s1 = smov [#allocation7]  }
   0x9   :  { %s42_s27 = sshll.u32 %s12400_s1, 4  ;;  %s43_s27 = int_to_ptr.vmem [resolvable:$true] %s42_s27 }
   0xa   :  { %45 = dma.hbm_to_vmem [thread:$0]  %s41_s26, 400, %s43_s27, [#allocation6]  }
   0xb   :  { %12390 = dma.done.wait [#allocation3], 768  }
   0xc   :  { %12391 = vsyncadd [#allocation3], 4294966528 }
   0xd   :  { %12392 = dma.done.wait [#allocation6], 147856  }
   0xe   :  { %12393 = vsyncadd [#allocation6], 4294819440  ;;  %v7654_v0 = vld [vmem:[#allocation5 + $0x1c0] sm:$0xf]  ;;  %v11323_v5 = vld [vmem:[#allocation5 + $0x1c4] sm:$0xf] }
   0xf   :  { %v11324_v1 = vld [vmem:[#allocation5 + $0x1dc] sm:$0xf0]  ;;  %v7656_v6 = vld [vmem:[#allocation5 + $0x1e0] sm:$0xf0]  ;;  %s12401_s0 = smov [#allocation8]   ;;  %s7585_s30 = sshll.u32 %s12761_s3, 4  ;;  %s7586_s30 = int_to_ptr.hbm [resolvable:$true] %s7585_s30 }
  0x10   :  { %v7718_v2 = vld [vmem:[#allocation5 + $0x3c0] sm:$0xf]  ;;  %v7655_v3 = vor.u32 %v11324_v1, %v7654_v0  ;;  %v7659_v8 = vor.u32 %v11323_v5, %v7656_v6  ;;  %v11339_v9 = vld [vmem:[#allocation5 + $0x3c4] sm:$0xf]  ;;  %s7583_s2 = sshll.u32 %s12401_s0, 4  ;;  %s7584_s2 = int_to_ptr.vmem [resolvable:$true] %s7583_s2 }
  0x11   :  { %v11340_v4 = vld [vmem:[#allocation5 + $0x3dc] sm:$0xf0]  ;;  %v7720_v10 = vld [vmem:[#allocation5 + $0x3e0] sm:$0xf0] }
  0x12   :  { %v7719_v7 = vor.u32 %v11340_v4, %v7718_v2  ;;  %v7646_v11 = vld [vmem:[#allocation5 + $0x180] sm:$0xf]  ;;  %268 = vmatpush.bf16.msra.mxu0 %v7655_v3  ;;  %v7723_v12 = vor.u32 %v11339_v9, %v7720_v10  ;;  %294 = vmatpush.bf16.msra.mxu2 %v7659_v8  ;;  %v11321_v18 = vld [vmem:[#allocation5 + $0x184] sm:$0xf] }
  0x13   :  { %v11322_v13 = vld [vmem:[#allocation5 + $0x19c] sm:$0xf0]  ;;  %v7648_v19 = vld [vmem:[#allocation5 + $0x1a0] sm:$0xf0] }
  0x14   :  { %v7710_v14 = vld [vmem:[#allocation5 + $0x380] sm:$0xf]  ;;  %281 = vmatpush.bf16.msra.mxu1 %v7719_v7  ;;  %v7647_v16 = vor.u32 %v11322_v13, %v7646_v11  ;;  %v11337_v20 = vld [vmem:[#allocation5 + $0x384] sm:$0xf]  ;;  %307 = vmatpush.bf16.msra.mxu3 %v7723_v12  ;;  %v7651_v21 = vor.u32 %v11321_v18, %v7648_v19 }
  0x15   :  { %v11338_v15 = vld [vmem:[#allocation5 + $0x39c] sm:$0xf0]  ;;  %v7712_v22 = vld [vmem:[#allocation5 + $0x3a0] sm:$0xf0] }
  0x16   :  { %v7711_v17 = vor.u32 %v11338_v15, %v7710_v14  ;;  %v7638_v23 = vld [vmem:[#allocation5 + $0x140] sm:$0xf]  ;;  %v7715_v25 = vor.u32 %v11337_v20, %v7712_v22  ;;  %v11319_v28 = vld [vmem:[#allocation5 + $0x144] sm:$0xf]  ;;  %269 = vmatpush.bf16.msra.mxu0 %v7647_v16  ;;  %295 = vmatpush.bf16.msra.mxu2 %v7651_v21 }
  0x17   :  { %v11320_v24 = vld [vmem:[#allocation5 + $0x15c] sm:$0xf0]  ;;  %v7640_v30 = vld [vmem:[#allocation5 + $0x160] sm:$0xf0] }
  0x18   :  { %v7702_v26 = vld [vmem:[#allocation5 + $0x340] sm:$0xf]  ;;  %v7639_v29 = vor.u32 %v11320_v24, %v7638_v23  ;;  %v11335_v31 = vld [vmem:[#allocation5 + $0x344] sm:$0xf]  ;;  %282 = vmatpush.bf16.msra.mxu1 %v7711_v17  ;;  %v7643_v34 = vor.u32 %v11319_v28, %v7640_v30  ;;  %308 = vmatpush.bf16.msra.mxu3 %v7715_v25 }
  0x19   :  { %v11336_v27 = vld [vmem:[#allocation5 + $0x35c] sm:$0xf0]  ;;  %v7704_v32 = vld [vmem:[#allocation5 + $0x360] sm:$0xf0] }
  0x1a   :  { %v7703_v33 = vor.u32 %v11336_v27, %v7702_v26  ;;  %v7630_v35 = vld [vmem:[#allocation5 + $0x100] sm:$0xf]  ;;  %v7707_v38 = vor.u32 %v11335_v31, %v7704_v32  ;;  %v11317_v40 = vld [vmem:[#allocation5 + $0x104] sm:$0xf]  ;;  %270 = vmatpush.bf16.msra.mxu0 %v7639_v29  ;;  %296 = vmatpush.bf16.msra.mxu2 %v7643_v34 }
  0x1b   :  { %v11318_v36 = vld [vmem:[#allocation5 + $0x11c] sm:$0xf0]  ;;  %v7632_v41 = vld [vmem:[#allocation5 + $0x120] sm:$0xf0] }
  0x1c   :  { %v7694_v37 = vld [vmem:[#allocation5 + $0x300] sm:$0xf]  ;;  %v11333_v42 = vld [vmem:[#allocation5 + $0x304] sm:$0xf]  ;;  %v7631_v44 = vor.u32 %v11318_v36, %v7630_v35  ;;  %283 = vmatpush.bf16.msra.mxu1 %v7703_v33  ;;  %v7635_v46 = vor.u32 %v11317_v40, %v7632_v41  ;;  %309 = vmatpush.bf16.msra.mxu3 %v7707_v38 }
  0x1d   :  { %v11334_v39 = vld [vmem:[#allocation5 + $0x31c] sm:$0xf0]  ;;  %v7696_v43 = vld [vmem:[#allocation5 + $0x320] sm:$0xf0] }
  0x1e   :  { %v7695_v45 = vor.u32 %v11334_v39, %v7694_v37  ;;  %v7622_v47 = vld [vmem:[#allocation5 + $0xc0] sm:$0xf]  ;;  %v7699_v50 = vor.u32 %v11333_v42, %v7696_v43  ;;  %v11315_v52 = vld [vmem:[#allocation5 + $0xc4] sm:$0xf]  ;;  %271 = vmatpush.bf16.msra.mxu0 %v7631_v44  ;;  %297 = vmatpush.bf16.msra.mxu2 %v7635_v46 }
  0x1f   :  { %v11316_v48 = vld [vmem:[#allocation5 + $0xdc] sm:$0xf0]  ;;  %v7624_v53 = vld [vmem:[#allocation5 + $0xe0] sm:$0xf0] }
  0x20   :  { %v7686_v49 = vld [vmem:[#allocation5 + $0x2c0] sm:$0xf]  ;;  %v11331_v54 = vld [vmem:[#allocation5 + $0x2c4] sm:$0xf]  ;;  %v7623_v56 = vor.u32 %v11316_v48, %v7622_v47  ;;  %284 = vmatpush.bf16.msra.mxu1 %v7695_v45  ;;  %v7627_v58 = vor.u32 %v11315_v52, %v7624_v53  ;;  %310 = vmatpush.bf16.msra.mxu3 %v7699_v50 }
  0x21   :  { %v11332_v51 = vld [vmem:[#allocation5 + $0x2dc] sm:$0xf0]  ;;  %v7688_v55 = vld [vmem:[#allocation5 + $0x2e0] sm:$0xf0] }
  0x22   :  { %v7687_v57 = vor.u32 %v11332_v51, %v7686_v49  ;;  %v7614_v59 = vld [vmem:[#allocation5 + $0x80] sm:$0xf]  ;;  %v7691_v62 = vor.u32 %v11331_v54, %v7688_v55  ;;  %v11313_v0 = vld [vmem:[#allocation5 + $0x84] sm:$0xf]  ;;  %272 = vmatpush.bf16.msra.mxu0 %v7623_v56  ;;  %298 = vmatpush.bf16.msra.mxu2 %v7627_v58 }
  0x23   :  { %v11314_v60 = vld [vmem:[#allocation5 + $0x9c] sm:$0xf0]  ;;  %v7616_v1 = vld [vmem:[#allocation5 + $0xa0] sm:$0xf0] }
  0x24   :  { %v7678_v61 = vld [vmem:[#allocation5 + $0x280] sm:$0xf]  ;;  %v11329_v2 = vld [vmem:[#allocation5 + $0x284] sm:$0xf]  ;;  %v7615_v4 = vor.u32 %v11314_v60, %v7614_v59  ;;  %285 = vmatpush.bf16.msra.mxu1 %v7687_v57  ;;  %v7619_v6 = vor.u32 %v11313_v0, %v7616_v1  ;;  %311 = vmatpush.bf16.msra.mxu3 %v7691_v62 }
  0x25   :  { %v11330_v63 = vld [vmem:[#allocation5 + $0x29c] sm:$0xf0]  ;;  %v7680_v3 = vld [vmem:[#allocation5 + $0x2a0] sm:$0xf0] }
  0x26   :  { %v7679_v5 = vor.u32 %v11330_v63, %v7678_v61  ;;  %v7606_v7 = vld [vmem:[#allocation5 + $0x40] sm:$0xf]  ;;  %v7683_v10 = vor.u32 %v11329_v2, %v7680_v3  ;;  %v11311_v12 = vld [vmem:[#allocation5 + $0x44] sm:$0xf]  ;;  %273 = vmatpush.bf16.msra.mxu0 %v7615_v4  ;;  %299 = vmatpush.bf16.msra.mxu2 %v7619_v6  ;;  %v58_v2 = vld [vmem:[#allocation2] sm:$0xff] }
  0x27   :  { %v11312_v8 = vld [vmem:[#allocation5 + $0x5c] sm:$0xf0]  ;;  %v7608_v13 = vld [vmem:[#allocation5 + $0x60] sm:$0xf0]  ;;  %v59_v3 = vld [vmem:[#allocation2 + $0x8] sm:$0xff] }
  0x28   :  { %v7670_v9 = vld [vmem:[#allocation5 + $0x240] sm:$0xf]  ;;  %v11327_v14 = vld [vmem:[#allocation5 + $0x244] sm:$0xf]  ;;  %v7607_v16 = vor.u32 %v11312_v8, %v7606_v7  ;;  %286 = vmatpush.bf16.msra.mxu1 %v7679_v5  ;;  %v7611_v20 = vor.u32 %v11311_v12, %v7608_v13  ;;  %312 = vmatpush.bf16.msra.mxu3 %v7683_v10  ;;  %v60_v8 = vpack.c.bf16 %v58_v2, %v58_v2 }
  0x29   :  { %v11328_v11 = vld [vmem:[#allocation5 + $0x25c] sm:$0xf0]  ;;  %v7672_v15 = vld [vmem:[#allocation5 + $0x260] sm:$0xf0] }
  0x2a   :  { %v7598_v17 = vld [vmem:[#allocation5] sm:$0xf]  ;;  %v7671_v19 = vor.u32 %v11328_v11, %v7670_v9  ;;  %v11309_v23 = vld [vmem:[#allocation5 + $0x4] sm:$0xf]  ;;  %v7675_v24 = vor.u32 %v11327_v14, %v7672_v15  ;;  %274 = vmatpush.bf16.msra.mxu0 %v7607_v16  ;;  %300 = vmatpush.bf16.msra.mxu2 %v7611_v20  ;;  %v61_v9 = vpack.c.bf16 %v59_v3, %v59_v3 }
  0x2b   :  { %v11310_v18 = vld [vmem:[#allocation5 + $0x1c] sm:$0xf0]  ;;  %v7600_v25 = vld [vmem:[#allocation5 + $0x20] sm:$0xf0] }
  0x2c   :  { %v7662_v21 = vld [vmem:[#allocation5 + $0x200] sm:$0xf]  ;;  %v11325_v26 = vld [vmem:[#allocation5 + $0x204] sm:$0xf]  ;;  %v7599_v31 = vor.u32 %v11310_v18, %v7598_v17  ;;  %287 = vmatpush.bf16.msra.mxu1 %v7671_v19  ;;  %v7603_v36 = vor.u32 %v11309_v23, %v7600_v25  ;;  %313 = vmatpush.bf16.msra.mxu3 %v7675_v24 }
  0x2d   :  { %v11326_v22 = vld [vmem:[#allocation5 + $0x21c] sm:$0xf0]  ;;  %v7664_v27 = vld [vmem:[#allocation5 + $0x220] sm:$0xf0] }
  0x2e   :  { %v7950_v28 = vld [vmem:[#allocation5 + $0x9c0] sm:$0xf]  ;;  %v7663_v35 = vor.u32 %v11326_v22, %v7662_v21  ;;  %v7667_v39 = vor.u32 %v11325_v26, %v7664_v27  ;;  %275 = vmatpush.bf16.msra.mxu0 %v7599_v31  ;;  %301 = vmatpush.bf16.msra.mxu2 %v7603_v36  ;;  %v11589_v2 = vld [vmem:[#allocation5 + $0xbc4] sm:$0xf] }
  0x2f   :  { %v11529_v29 = vld [vmem:[#allocation5 + $0x9dc] sm:$0xf0] }
  0x30   :  { %v8206_v30 = vld [vmem:[#allocation5 + $0xbc0] sm:$0xf]  ;;  %v7951_v40 = vor.u32 %v11529_v29, %v7950_v28  ;;  %288 = vmatpush.bf16.msra.mxu1 %v7663_v35  ;;  %314 = vmatpush.bf16.msra.mxu3 %v7667_v39 }
  0x31   :  { %v11593_v32 = vld [vmem:[#allocation5 + $0xbdc] sm:$0xf0]  ;;  %302 = vmatmul.bf16.vlgmr.msra.gmra.mxu2 %v60_v8  ;;  %276 = vmatmul.bf16.vlgmr.msra.gmra.mxu0 %v60_v8 }
  0x32   :  { %v8462_v33 = vld [vmem:[#allocation5 + $0xdc0] sm:$0xf]  ;;  %v8207_v41 = vor.u32 %v11593_v32, %v8206_v30  ;;  %1988 = vmatpush.bf16.msrb.mxu0 %v7951_v40 }
  0x33   :  { %v11657_v34 = vld [vmem:[#allocation5 + $0xddc] sm:$0xf0]  ;;  %315 = vmatmul.bf16.vlgmr.msra.gmra.mxu3 %v61_v9  ;;  %289 = vmatmul.bf16.vlgmr.msra.gmra.mxu1 %v61_v9  ;;  %v11717_v9 = vld [vmem:[#allocation5 + $0xfc4] sm:$0xf] }
  0x34   :  { %v8718_v37 = vld [vmem:[#allocation5 + $0xfc0] sm:$0xf]  ;;  %v8463_v42 = vor.u32 %v11657_v34, %v8462_v33  ;;  %2001 = vmatpush.bf16.msrb.mxu1 %v8207_v41 }
  0x35   :  { %v11721_v38 = vld [vmem:[#allocation5 + $0xfdc] sm:$0xf0] }
  0x36   :  { %v7918_v43 = vld [vmem:[#allocation5 + $0x980] sm:$0xf]  ;;  %v8719_v46 = vor.u32 %v11721_v38, %v8718_v37  ;;  %2014 = vmatpush.bf16.msrb.mxu2 %v8463_v42 }
  0x37   :  { %v11521_v44 = vld [vmem:[#allocation5 + $0x99c] sm:$0xf0] }
  0x38   :  { %v8174_v45 = vld [vmem:[#allocation5 + $0xb80] sm:$0xf]  ;;  %v7919_v52 = vor.u32 %v11521_v44, %v7918_v43  ;;  %2027 = vmatpush.bf16.msrb.mxu3 %v8719_v46 }
  0x39   :  { %v11585_v47 = vld [vmem:[#allocation5 + $0xb9c] sm:$0xf0] }
  0x3a   :  { %v8430_v48 = vld [vmem:[#allocation5 + $0xd80] sm:$0xf]  ;;  %v8175_v54 = vor.u32 %v11585_v47, %v8174_v45  ;;  %1989 = vmatpush.bf16.msrb.mxu0 %v7919_v52 }
  0x3b   :  { %v11649_v49 = vld [vmem:[#allocation5 + $0xd9c] sm:$0xf0] }
  0x3c   :  { %v8686_v50 = vld [vmem:[#allocation5 + $0xf80] sm:$0xf]  ;;  %v8431_v55 = vor.u32 %v11649_v49, %v8430_v48  ;;  %2002 = vmatpush.bf16.msrb.mxu1 %v8175_v54 }
  0x3d   :  { %v11713_v51 = vld [vmem:[#allocation5 + $0xf9c] sm:$0xf0] }
  0x3e   :  { %v7886_v53 = vld [vmem:[#allocation5 + $0x940] sm:$0xf]  ;;  %v8687_v59 = vor.u32 %v11713_v51, %v8686_v50  ;;  %2015 = vmatpush.bf16.msrb.mxu2 %v8431_v55 }
  0x3f   :  { %v11513_v56 = vld [vmem:[#allocation5 + $0x95c] sm:$0xf0] }
  0x40   :  { %v8142_v57 = vld [vmem:[#allocation5 + $0xb40] sm:$0xf]  ;;  %v7887_v0 = vor.u32 %v11513_v56, %v7886_v53  ;;  %2028 = vmatpush.bf16.msrb.mxu3 %v8687_v59 }
  0x41   :  { %v11577_v58 = vld [vmem:[#allocation5 + $0xb5c] sm:$0xf0] }
  0x42   :  { %v8398_v60 = vld [vmem:[#allocation5 + $0xd40] sm:$0xf]  ;;  %v8143_v1 = vor.u32 %v11577_v58, %v8142_v57  ;;  %1990 = vmatpush.bf16.msrb.mxu0 %v7887_v0  ;;  %v11525_v0 = vld [vmem:[#allocation5 + $0x9c4] sm:$0xf] }
  0x43   :  { %v11641_v61 = vld [vmem:[#allocation5 + $0xd5c] sm:$0xf0] }
  0x44   :  { %v8654_v62 = vld [vmem:[#allocation5 + $0xf40] sm:$0xf]  ;;  %v8399_v4 = vor.u32 %v11641_v61, %v8398_v60  ;;  %2003 = vmatpush.bf16.msrb.mxu1 %v8143_v1  ;;  %v7952_v1 = vld [vmem:[#allocation5 + $0x9e0] sm:$0xf0] }
  0x45   :  { %v11705_v63 = vld [vmem:[#allocation5 + $0xf5c] sm:$0xf0] }
  0x46   :  { %v7854_v5 = vld [vmem:[#allocation5 + $0x900] sm:$0xf]  ;;  %v8655_v10 = vor.u32 %v11705_v63, %v8654_v62  ;;  %2016 = vmatpush.bf16.msrb.mxu2 %v8399_v4  ;;  %v8208_v4 = vld [vmem:[#allocation5 + $0xbe0] sm:$0xf0] }
  0x47   :  { %v11505_v6 = vld [vmem:[#allocation5 + $0x91c] sm:$0xf0] }
  0x48   :  { %v8110_v7 = vld [vmem:[#allocation5 + $0xb00] sm:$0xf]  ;;  %v7855_v16 = vor.u32 %v11505_v6, %v7854_v5  ;;  %2029 = vmatpush.bf16.msrb.mxu3 %v8655_v10  ;;  %v11653_v5 = vld [vmem:[#allocation5 + $0xdc4] sm:$0xf] }
  0x49   :  { %v11569_v11 = vld [vmem:[#allocation5 + $0xb1c] sm:$0xf0]  ;;  %v8464_v6 = vld [vmem:[#allocation5 + $0xde0] sm:$0xf0] }
  0x4a   :  { %v8366_v12 = vld [vmem:[#allocation5 + $0xd00] sm:$0xf]  ;;  %v8111_v17 = vor.u32 %v11569_v11, %v8110_v7  ;;  %1991 = vmatpush.bf16.msrb.mxu0 %v7855_v16  ;;  %v8720_v10 = vld [vmem:[#allocation5 + $0xfe0] sm:$0xf0]  ;;  %v8467_v16 = vor.u32 %v11653_v5, %v8464_v6 }
  0x4b   :  { %v11633_v13 = vld [vmem:[#allocation5 + $0xd1c] sm:$0xf0] }
  0x4c   :  { %v8622_v14 = vld [vmem:[#allocation5 + $0xf00] sm:$0xf]  ;;  %v8367_v18 = vor.u32 %v11633_v13, %v8366_v12  ;;  %2004 = vmatpush.bf16.msrb.mxu1 %v8111_v17  ;;  %v7955_v12 = vor.u32 %v11525_v0, %v7952_v1  ;;  %v64_v13 = vld [vmem:[#allocation2 + $0x20] sm:$0xff]  ;;  %v11517_v17 = vld [vmem:[#allocation5 + $0x984] sm:$0xf] }
  0x4d   :  { %v11697_v15 = vld [vmem:[#allocation5 + $0xf1c] sm:$0xf0]  ;;  %v11621_v0 = vld [vmem:[#allocation5 + $0xcc4] sm:$0xf] }
  0x4e   :  { %v7822_v19 = vld [vmem:[#allocation5 + $0x8c0] sm:$0xf]  ;;  %v8623_v22 = vor.u32 %v11697_v15, %v8622_v14  ;;  %2017 = vmatpush.bf16.msrb.mxu2 %v8367_v18  ;;  %v65_v14 = vld [vmem:[#allocation2 + $0x28] sm:$0xff]  ;;  %v8211_v15 = vor.u32 %v11589_v2, %v8208_v4  ;;  %v7920_v18 = vld [vmem:[#allocation5 + $0x9a0] sm:$0xf0] }
  0x4f   :  { %v11497_v20 = vld [vmem:[#allocation5 + $0x8dc] sm:$0xf0]  ;;  %v8336_v1 = vld [vmem:[#allocation5 + $0xce0] sm:$0xf0] }
  0x50   :  { %v8078_v21 = vld [vmem:[#allocation5 + $0xac0] sm:$0xf]  ;;  %v7823_v28 = vor.u32 %v11497_v20, %v7822_v19  ;;  %2030 = vmatpush.bf16.msrb.mxu3 %v8623_v22  ;;  %v11581_v19 = vld [vmem:[#allocation5 + $0xb84] sm:$0xf]  ;;  %v8723_v20 = vor.u32 %v11717_v9, %v8720_v10  ;;  %v8339_v6 = vor.u32 %v11621_v0, %v8336_v1  ;;  %v8438_v0 = vld [vmem:[#allocation5 + $0xd88] sm:$0xf] }
  0x51   :  { %v11561_v23 = vld [vmem:[#allocation5 + $0xadc] sm:$0xf0]  ;;  %v11645_v22 = vld [vmem:[#allocation5 + $0xd84] sm:$0xf]  ;;  %v11650_v1 = vld [vmem:[#allocation5 + $0xda4] sm:$0xf0] }
  0x52   :  { %v8334_v24 = vld [vmem:[#allocation5 + $0xcc0] sm:$0xf]  ;;  %v8079_v29 = vor.u32 %v11561_v23, %v8078_v21  ;;  %1992 = vmatpush.bf16.msrb.mxu0 %v7823_v28  ;;  %v8176_v21 = vld [vmem:[#allocation5 + $0xba0] sm:$0xf0] }
  0x53   :  { %v11625_v25 = vld [vmem:[#allocation5 + $0xcdc] sm:$0xf0]  ;;  %v8432_v23 = vld [vmem:[#allocation5 + $0xda0] sm:$0xf0] }
  0x54   :  { %v8590_v26 = vld [vmem:[#allocation5 + $0xec0] sm:$0xf]  ;;  %v8335_v30 = vor.u32 %v11625_v25, %v8334_v24  ;;  %2005 = vmatpush.bf16.msrb.mxu1 %v8079_v29  ;;  %v12431_v24 = vpack.c.bf16 %v64_v13, %v64_v13  ;;  %v11709_v25 = vld [vmem:[#allocation5 + $0xf84] sm:$0xf]  ;;  %v7923_v29 = vor.u32 %v11517_v17, %v7920_v18 }
  0x55   :  { %v11689_v27 = vld [vmem:[#allocation5 + $0xedc] sm:$0xf0]  ;;  %v11685_v2 = vld [vmem:[#allocation5 + $0xec4] sm:$0xf] }
  0x56   :  { %v7790_v31 = vld [vmem:[#allocation5 + $0x880] sm:$0xf]  ;;  %v8591_v34 = vor.u32 %v11689_v27, %v8590_v26  ;;  %2018 = vmatpush.bf16.msrb.mxu2 %v8335_v30  ;;  %v8688_v26 = vld [vmem:[#allocation5 + $0xfa0] sm:$0xf0]  ;;  %v12433_v27 = vpack.c.bf16 %v65_v14, %v65_v14 }
  0x57   :  { %v11489_v32 = vld [vmem:[#allocation5 + $0x89c] sm:$0xf0]  ;;  %v11549_v9 = vld [vmem:[#allocation5 + $0xa84] sm:$0xf] }
  0x58   :  { %v8046_v33 = vld [vmem:[#allocation5 + $0xa80] sm:$0xf]  ;;  %v7791_v40 = vor.u32 %v11489_v32, %v7790_v31  ;;  %2031 = vmatpush.bf16.msrb.mxu3 %v8591_v34  ;;  %v63_v31 = vld [vmem:[#allocation2 + $0x18] sm:$0xff]  ;;  %v8179_v32 = vor.u32 %v11581_v19, %v8176_v21  ;;  %v11509_v34 = vld [vmem:[#allocation5 + $0x944] sm:$0xf] }
  0x59   :  { %v11553_v35 = vld [vmem:[#allocation5 + $0xa9c] sm:$0xf0]  ;;  %v8304_v13 = vld [vmem:[#allocation5 + $0xca0] sm:$0xf0] }
  0x5a   :  { %v8302_v36 = vld [vmem:[#allocation5 + $0xc80] sm:$0xf]  ;;  %v8047_v41 = vor.u32 %v11553_v35, %v8046_v33  ;;  %1993 = vmatpush.bf16.msrb.mxu0 %v7791_v40  ;;  %v8435_v33 = vor.u32 %v11645_v22, %v8432_v23  ;;  %v7888_v35 = vld [vmem:[#allocation5 + $0x960] sm:$0xf0] }
  0x5b   :  { %v11617_v37 = vld [vmem:[#allocation5 + $0xc9c] sm:$0xf0]  ;;  %v11637_v40 = vld [vmem:[#allocation5 + $0xd44] sm:$0xf] }
  0x5c   :  { %v8558_v38 = vld [vmem:[#allocation5 + $0xe80] sm:$0xf]  ;;  %v8303_v42 = vor.u32 %v11617_v37, %v8302_v36  ;;  %2006 = vmatpush.bf16.msrb.mxu1 %v8047_v41  ;;  %v11573_v36 = vld [vmem:[#allocation5 + $0xb44] sm:$0xf]  ;;  %v12437_v37 = vpack.c.bf16 %v63_v31, %v63_v31 }
  0x5d   :  { %v11681_v39 = vld [vmem:[#allocation5 + $0xe9c] sm:$0xf0]  ;;  %v8400_v41 = vld [vmem:[#allocation5 + $0xd60] sm:$0xf0] }
  0x5e   :  { %v7758_v43 = vld [vmem:[#allocation5 + $0x840] sm:$0xf]  ;;  %v8559_v46 = vor.u32 %v11681_v39, %v8558_v38  ;;  %2019 = vmatpush.bf16.msrb.mxu2 %v8303_v42  ;;  %v8691_v38 = vor.u32 %v11709_v25, %v8688_v26  ;;  %v8144_v39 = vld [vmem:[#allocation5 + $0xb60] sm:$0xf0] }
  0x5f   :  { %v11481_v44 = vld [vmem:[#allocation5 + $0x85c] sm:$0xf0]  ;;  %v11701_v42 = vld [vmem:[#allocation5 + $0xf44] sm:$0xf] }
  0x60   :  { %v8014_v45 = vld [vmem:[#allocation5 + $0xa40] sm:$0xf]  ;;  %v7759_v52 = vor.u32 %v11481_v44, %v7758_v43  ;;  %2032 = vmatpush.bf16.msrb.mxu3 %v8559_v46  ;;  %v8656_v43 = vld [vmem:[#allocation5 + $0xf60] sm:$0xf0]  ;;  %v7891_v44 = vor.u32 %v11509_v34, %v7888_v35  ;;  %v8403_v46 = vor.u32 %v11637_v40, %v8400_v41 }
  0x61   :  { %v11545_v47 = vld [vmem:[#allocation5 + $0xa5c] sm:$0xf0]  ;;  %v11677_v14 = vld [vmem:[#allocation5 + $0xe84] sm:$0xf] }
  0x62   :  { %v8270_v48 = vld [vmem:[#allocation5 + $0xc40] sm:$0xf]  ;;  %v8015_v55 = vor.u32 %v11545_v47, %v8014_v45  ;;  %1994 = vmatpush.bf16.msrb.mxu0 %v7759_v52  ;;  %v8147_v45 = vor.u32 %v11573_v36, %v8144_v39  ;;  %v11501_v47 = vld [vmem:[#allocation5 + $0x904] sm:$0xf] }
  0x63   :  { %v11609_v49 = vld [vmem:[#allocation5 + $0xc5c] sm:$0xf0]  ;;  %v11629_v52 = vld [vmem:[#allocation5 + $0xd04] sm:$0xf] }
  0x64   :  { %v8526_v50 = vld [vmem:[#allocation5 + $0xe40] sm:$0xf]  ;;  %v8271_v56 = vor.u32 %v11609_v49, %v8270_v48  ;;  %2007 = vmatpush.bf16.msrb.mxu1 %v8015_v55  ;;  %v7856_v48 = vld [vmem:[#allocation5 + $0x920] sm:$0xf0] }
  0x65   :  { %v11673_v51 = vld [vmem:[#allocation5 + $0xe5c] sm:$0xf0]  ;;  %v11565_v49 = vld [vmem:[#allocation5 + $0xb04] sm:$0xf] }
  0x66   :  { %v7726_v53 = vld [vmem:[#allocation5 + $0x800] sm:$0xf]  ;;  %v8527_v60 = vor.u32 %v11673_v51, %v8526_v50  ;;  %2020 = vmatpush.bf16.msrb.mxu2 %v8271_v56  ;;  %v8659_v50 = vor.u32 %v11701_v42, %v8656_v43  ;;  %v8112_v51 = vld [vmem:[#allocation5 + $0xb20] sm:$0xf0]  ;;  %v7859_v56 = vor.u32 %v11501_v47, %v7856_v48  ;;  %v11594_v48 = vld [vmem:[#allocation5 + $0xbe4] sm:$0xf0] }
  0x67   :  { %v11473_v54 = vld [vmem:[#allocation5 + $0x81c] sm:$0xf0]  ;;  %v8624_v55 = vld [vmem:[#allocation5 + $0xf20] sm:$0xf0] }
  0x68   :  { %v7982_v57 = vld [vmem:[#allocation5 + $0xa00] sm:$0xf]  ;;  %v7727_v3 = vor.u32 %v11473_v54, %v7726_v53  ;;  %2033 = vmatpush.bf16.msrb.mxu3 %v8527_v60  ;;  %v8368_v53 = vld [vmem:[#allocation5 + $0xd20] sm:$0xf0] }
  0x69   :  { %v11537_v58 = vld [vmem:[#allocation5 + $0xa1c] sm:$0xf0]  ;;  %v11693_v54 = vld [vmem:[#allocation5 + $0xf04] sm:$0xf] }
  0x6a   :  { %v8238_v59 = vld [vmem:[#allocation5 + $0xc00] sm:$0xf]  ;;  %v7983_v7 = vor.u32 %v11537_v58, %v7982_v57  ;;  %1995 = vmatpush.bf16.msrb.mxu0 %v7727_v3  ;;  %v8115_v57 = vor.u32 %v11565_v49, %v8112_v51  ;;  %v8371_v58 = vor.u32 %v11629_v52, %v8368_v53  ;;  %v7824_v60 = vld [vmem:[#allocation5 + $0x8e0] sm:$0xf0]  ;;  %v8470_v49 = vld [vmem:[#allocation5 + $0xdc8] sm:$0xf] }
  0x6b   :  { %v11601_v61 = vld [vmem:[#allocation5 + $0xc1c] sm:$0xf0]  ;;  %v8592_v3 = vld [vmem:[#allocation5 + $0xee0] sm:$0xf0]  ;;  %v8726_v53 = vld [vmem:[#allocation5 + $0xfc8] sm:$0xf] }
  0x6c   :  { %v8494_v62 = vld [vmem:[#allocation5 + $0xe00] sm:$0xf]  ;;  %v8239_v8 = vor.u32 %v11601_v61, %v8238_v59  ;;  %2008 = vmatpush.bf16.msrb.mxu1 %v7983_v7  ;;  %v11493_v59 = vld [vmem:[#allocation5 + $0x8c4] sm:$0xf]  ;;  %v8595_v10 = vor.u32 %v11685_v2, %v8592_v3  ;;  %v8694_v2 = vld [vmem:[#allocation5 + $0xf88] sm:$0xf] }
  0x6d   :  { %v11665_v63 = vld [vmem:[#allocation5 + $0xe1c] sm:$0xf0]  ;;  %v11557_v61 = vld [vmem:[#allocation5 + $0xac4] sm:$0xf]  ;;  %v7827_v4 = vor.u32 %v11493_v59, %v7824_v60  ;;  %v7926_v59 = vld [vmem:[#allocation5 + $0x988] sm:$0xf] }
  0x6e   :  { %v8495_v11 = vor.u32 %v11665_v63, %v8494_v62  ;;  %2021 = vmatpush.bf16.msrb.mxu2 %v8239_v8  ;;  %v62_v28 = vld [vmem:[#allocation2 + $0x10] sm:$0xff]  ;;  %2040 = vmatpush.bf16.msra.mxu0 %v7955_v12  ;;  %v8627_v62 = vor.u32 %v11693_v54, %v8624_v55  ;;  %v11722_v54 = vld [vmem:[#allocation5 + $0xfe4] sm:$0xf0] }
  0x6f   :  { %v12435_v30 = vpack.c.bf16 %v62_v28, %v62_v28  ;;  %2009 = vmatmul.bf16.vlgmr.msrb.gmra.mxu1 %v12437_v37  ;;  %v8080_v63 = vld [vmem:[#allocation5 + $0xae0] sm:$0xf0]  ;;  %v11522_v60 = vld [vmem:[#allocation5 + $0x9a4] sm:$0xf0] }
  0x70   :  { %2034 = vmatpush.bf16.msrb.mxu3 %v8495_v11  ;;  %2053 = vmatpush.bf16.msra.mxu1 %v8211_v15  ;;  %v8083_v5 = vor.u32 %v11557_v61, %v8080_v63  ;;  %v11485_v7 = vld [vmem:[#allocation5 + $0x884] sm:$0xf]  ;;  %v8182_v61 = vld [vmem:[#allocation5 + $0xb88] sm:$0xf] }
  0x71   :  { %2022 = vmatmul.bf16.vlgmr.msrb.gmra.mxu2 %v12431_v24  ;;  %1996 = vmatmul.bf16.vlgmr.msrb.gmra.mxu0 %v12435_v30  ;;  %v7792_v8 = vld [vmem:[#allocation5 + $0x8a0] sm:$0xf0]  ;;  %v11586_v63 = vld [vmem:[#allocation5 + $0xba4] sm:$0xf0] }
  0x72   :  { %2066 = vmatpush.bf16.msra.mxu2 %v8467_v16  ;;  %2041 = vmatpush.bf16.msra.mxu0 %v7923_v29  ;;  %v8048_v11 = vld [vmem:[#allocation5 + $0xaa0] sm:$0xf0]  ;;  %v7795_v16 = vor.u32 %v11485_v7, %v7792_v8  ;;  %v11714_v3 = vld [vmem:[#allocation5 + $0xfa4] sm:$0xf0] }
  0x73   :  { %2035 = vmatmul.bf16.vlgmr.msrb.gmra.mxu3 %v12433_v27  ;;  %v11613_v12 = vld [vmem:[#allocation5 + $0xc84] sm:$0xf]  ;;  %v8051_v18 = vor.u32 %v11549_v9, %v8048_v11  ;;  %v7894_v7 = vld [vmem:[#allocation5 + $0x948] sm:$0xf] }
  0x74   :  { %2079 = vmatpush.bf16.msra.mxu3 %v8723_v20  ;;  %2054 = vmatpush.bf16.msra.mxu1 %v8179_v32  ;;  %v8560_v15 = vld [vmem:[#allocation5 + $0xea0] sm:$0xf0]  ;;  %v8307_v19 = vor.u32 %v11613_v12, %v8304_v13  ;;  %v11514_v8 = vld [vmem:[#allocation5 + $0x964] sm:$0xf0] }
  0x75   :  { %v11477_v17 = vld [vmem:[#allocation5 + $0x844] sm:$0xf]  ;;  %v8563_v23 = vor.u32 %v11677_v14, %v8560_v15  ;;  %v8150_v9 = vld [vmem:[#allocation5 + $0xb48] sm:$0xf] }
  0x76   :  { %2067 = vmatpush.bf16.msra.mxu2 %v8435_v33  ;;  %2042 = vmatpush.bf16.msra.mxu0 %v7891_v44  ;;  %v7760_v20 = vld [vmem:[#allocation5 + $0x860] sm:$0xf0]  ;;  %v7958_v44 = vld [vmem:[#allocation5 + $0x9c8] sm:$0xf] }
  0x77   :  { %v11541_v21 = vld [vmem:[#allocation5 + $0xa44] sm:$0xf]  ;;  %v7763_v31 = vor.u32 %v11477_v17, %v7760_v20  ;;  %v11578_v11 = vld [vmem:[#allocation5 + $0xb64] sm:$0xf0] }
  0x78   :  { %2080 = vmatpush.bf16.msra.mxu3 %v8691_v38  ;;  %2055 = vmatpush.bf16.msra.mxu1 %v8147_v45  ;;  %v8016_v22 = vld [vmem:[#allocation5 + $0xa60] sm:$0xf0]  ;;  %v11530_v45 = vld [vmem:[#allocation5 + $0x9e4] sm:$0xf0]  ;;  %v8151_v17 = vor.u32 %v11578_v11, %v8150_v9 }
  0x79   :  { %v11605_v25 = vld [vmem:[#allocation5 + $0xc44] sm:$0xf]  ;;  %v8019_v34 = vor.u32 %v11541_v21, %v8016_v22  ;;  %v8406_v12 = vld [vmem:[#allocation5 + $0xd48] sm:$0xf] }
  0x7a   :  { %2068 = vmatpush.bf16.msra.mxu2 %v8403_v46  ;;  %2043 = vmatpush.bf16.msra.mxu0 %v7859_v56  ;;  %v8272_v26 = vld [vmem:[#allocation5 + $0xc60] sm:$0xf0]  ;;  %v8214_v46 = vld [vmem:[#allocation5 + $0xbc8] sm:$0xf]  ;;  %v7959_v56 = vor.u32 %v11530_v45, %v7958_v44 }
  0x7b   :  { %v11669_v28 = vld [vmem:[#allocation5 + $0xe44] sm:$0xf]  ;;  %v8275_v35 = vor.u32 %v11605_v25, %v8272_v26  ;;  %v11642_v13 = vld [vmem:[#allocation5 + $0xd64] sm:$0xf0] }
  0x7c   :  { %2081 = vmatpush.bf16.msra.mxu3 %v8659_v50  ;;  %2056 = vmatpush.bf16.msra.mxu1 %v8115_v57  ;;  %v8528_v29 = vld [vmem:[#allocation5 + $0xe60] sm:$0xf0]  ;;  %v11658_v50 = vld [vmem:[#allocation5 + $0xde4] sm:$0xf0]  ;;  %v8215_v57 = vor.u32 %v11594_v48, %v8214_v46 }
  0x7d   :  { %v11469_v32 = vld [vmem:[#allocation5 + $0x804] sm:$0xf]  ;;  %v8531_v40 = vor.u32 %v11669_v28, %v8528_v29  ;;  %v8662_v14 = vld [vmem:[#allocation5 + $0xf48] sm:$0xf] }
  0x7e   :  { %2069 = vmatpush.bf16.msra.mxu2 %v8371_v58  ;;  %2044 = vmatpush.bf16.msra.mxu0 %v7827_v4  ;;  %v7728_v33 = vld [vmem:[#allocation5 + $0x820] sm:$0xf0]  ;;  %v8471_v58 = vor.u32 %v11658_v50, %v8470_v49  ;;  %v7927_v4 = vor.u32 %v11522_v60, %v7926_v59  ;;  %v11706_v15 = vld [vmem:[#allocation5 + $0xf64] sm:$0xf0] }
  0x7f   :  { %v11533_v36 = vld [vmem:[#allocation5 + $0xa04] sm:$0xf]  ;;  %v7731_v47 = vor.u32 %v11469_v32, %v7728_v33  ;;  %v11506_v20 = vld [vmem:[#allocation5 + $0x924] sm:$0xf0]  ;;  %v8663_v22 = vor.u32 %v11706_v15, %v8662_v14 }
  0x80   :  { %2082 = vmatpush.bf16.msra.mxu3 %v8627_v62  ;;  %2057 = vmatpush.bf16.msra.mxu1 %v8083_v5  ;;  %v7984_v38 = vld [vmem:[#allocation5 + $0xa20] sm:$0xf0]  ;;  %v8727_v62 = vor.u32 %v11722_v54, %v8726_v53  ;;  %v8183_v5 = vor.u32 %v11586_v63, %v8182_v61  ;;  %v8118_v21 = vld [vmem:[#allocation5 + $0xb08] sm:$0xf] }
  0x81   :  { %v11597_v39 = vld [vmem:[#allocation5 + $0xc04] sm:$0xf]  ;;  %v7987_v51 = vor.u32 %v11533_v36, %v7984_v38  ;;  %v8374_v25 = vld [vmem:[#allocation5 + $0xd08] sm:$0xf] }
  0x82   :  { %2070 = vmatpush.bf16.msra.mxu2 %v8339_v6  ;;  %2045 = vmatpush.bf16.msra.mxu0 %v7795_v16  ;;  %v8240_v41 = vld [vmem:[#allocation5 + $0xc20] sm:$0xf0]  ;;  %v8439_v6 = vor.u32 %v11650_v1, %v8438_v0  ;;  %v7895_v16 = vor.u32 %v11514_v8, %v7894_v7  ;;  %v11634_v26 = vld [vmem:[#allocation5 + $0xd24] sm:$0xf0] }
  0x83   :  { %v11661_v42 = vld [vmem:[#allocation5 + $0xe04] sm:$0xf]  ;;  %v8243_v52 = vor.u32 %v11597_v39, %v8240_v41  ;;  %v8630_v28 = vld [vmem:[#allocation5 + $0xf08] sm:$0xf]  ;;  %v8375_v33 = vor.u32 %v11634_v26, %v8374_v25  ;;  %v11718_v26 = vld [vmem:[#allocation5 + $0xfcc] sm:$0xf] }
  0x84   :  { %2083 = vmatpush.bf16.msra.mxu3 %v8595_v10  ;;  %2058 = vmatpush.bf16.msra.mxu1 %v8051_v18  ;;  %v8496_v43 = vld [vmem:[#allocation5 + $0xe20] sm:$0xf0]  ;;  %v8695_v10 = vor.u32 %v11714_v3, %v8694_v2  ;;  %v8407_v18 = vor.u32 %v11642_v13, %v8406_v12  ;;  %v11698_v29 = vld [vmem:[#allocation5 + $0xf24] sm:$0xf0] }
  0x85   :  { %v8499_v55 = vor.u32 %v11661_v42, %v8496_v43  ;;  %v8086_v36 = vld [vmem:[#allocation5 + $0xac8] sm:$0xf]  ;;  %v8631_v38 = vor.u32 %v11698_v29, %v8630_v28  ;;  %v8728_v28 = vld [vmem:[#allocation5 + $0xfe8] sm:$0xf0] }
  0x86   :  { %2071 = vmatpush.bf16.msra.mxu2 %v8307_v19  ;;  %2046 = vmatpush.bf16.msra.mxu0 %v7763_v31  ;;  %v7862_v19 = vld [vmem:[#allocation5 + $0x908] sm:$0xf] }
  0x87   :  { %v7863_v31 = vor.u32 %v11506_v20, %v7862_v19  ;;  %v11562_v39 = vld [vmem:[#allocation5 + $0xae4] sm:$0xf0]  ;;  %v8216_v20 = vld [vmem:[#allocation5 + $0xbe8] sm:$0xf0] }
  0x88   :  { %2084 = vmatpush.bf16.msra.mxu3 %v8563_v23  ;;  %2059 = vmatpush.bf16.msra.mxu1 %v8019_v34  ;;  %v11570_v23 = vld [vmem:[#allocation5 + $0xb24] sm:$0xf0]  ;;  %v8087_v45 = vor.u32 %v11562_v39, %v8086_v36  ;;  %v11582_v36 = vld [vmem:[#allocation5 + $0xb8c] sm:$0xf] }
  0x89   :  { %v8119_v32 = vor.u32 %v11570_v23, %v8118_v21  ;;  %v7830_v34 = vld [vmem:[#allocation5 + $0x8c8] sm:$0xf]  ;;  %v11654_v21 = vld [vmem:[#allocation5 + $0xdcc] sm:$0xf] }
  0x8a   :  { %2072 = vmatpush.bf16.msra.mxu2 %v8275_v35  ;;  %2047 = vmatpush.bf16.msra.mxu0 %v7731_v47  ;;  %v11498_v35 = vld [vmem:[#allocation5 + $0x8e4] sm:$0xf0]  ;;  %v8184_v39 = vld [vmem:[#allocation5 + $0xba8] sm:$0xf0] }
  0x8b   :  { %v11626_v41 = vld [vmem:[#allocation5 + $0xce4] sm:$0xf0]  ;;  %v7831_v44 = vor.u32 %v11498_v35, %v7830_v34  ;;  %v11518_v34 = vld [vmem:[#allocation5 + $0x98c] sm:$0xf] }
  0x8c   :  { %2085 = vmatpush.bf16.msra.mxu3 %v8531_v40  ;;  %2060 = vmatpush.bf16.msra.mxu1 %v7987_v51  ;;  %v8342_v40 = vld [vmem:[#allocation5 + $0xcc8] sm:$0xf]  ;;  %v7928_v35 = vld [vmem:[#allocation5 + $0x9a8] sm:$0xf0] }
  0x8d   :  { %2048 = vmatmul.bf16.vlgmr.msra.gmra.mxu0 %v12435_v30  ;;  %v8598_v42 = vld [vmem:[#allocation5 + $0xec8] sm:$0xf]  ;;  %v8343_v46 = vor.u32 %v11626_v41, %v8342_v40  ;;  %v11646_v40 = vld [vmem:[#allocation5 + $0xd8c] sm:$0xf] }
  0x8e   :  { %2073 = vmatpush.bf16.msra.mxu2 %v8243_v52  ;;  %2092 = vmatpush.bf16.msrb.mxu0 %v7959_v56  ;;  %v11690_v43 = vld [vmem:[#allocation5 + $0xee4] sm:$0xf0]  ;;  %v8440_v41 = vld [vmem:[#allocation5 + $0xda8] sm:$0xf0] }
  0x8f   :  { %2061 = vmatmul.bf16.vlgmr.msra.gmra.mxu1 %v12437_v37  ;;  %v7798_v47 = vld [vmem:[#allocation5 + $0x888] sm:$0xf]  ;;  %v8599_v50 = vor.u32 %v11690_v43, %v8598_v42  ;;  %v11710_v42 = vld [vmem:[#allocation5 + $0xf8c] sm:$0xf] }
  0x90   :  { %2086 = vmatpush.bf16.msra.mxu3 %v8499_v55  ;;  %2105 = vmatpush.bf16.msrb.mxu1 %v8215_v57  ;;  %v11490_v48 = vld [vmem:[#allocation5 + $0x8a4] sm:$0xf0]  ;;  %v8696_v43 = vld [vmem:[#allocation5 + $0xfa8] sm:$0xf0] }
  0x91   :  { %2074 = vmatmul.bf16.vlgmr.msra.gmra.mxu2 %v12431_v24  ;;  %v8054_v49 = vld [vmem:[#allocation5 + $0xa88] sm:$0xf]  ;;  %v7799_v56 = vor.u32 %v11490_v48, %v7798_v47  ;;  %v11510_v47 = vld [vmem:[#allocation5 + $0x94c] sm:$0xf] }
  0x92   :  { %2118 = vmatpush.bf16.msrb.mxu2 %v8471_v58  ;;  %2093 = vmatpush.bf16.msrb.mxu0 %v7927_v4  ;;  %v11554_v51 = vld [vmem:[#allocation5 + $0xaa4] sm:$0xf0]  ;;  %v7896_v48 = vld [vmem:[#allocation5 + $0x968] sm:$0xf0] }
  0x93   :  { %2087 = vmatmul.bf16.vlgmr.msra.gmra.mxu3 %v12433_v27  ;;  %v8310_v52 = vld [vmem:[#allocation5 + $0xc88] sm:$0xf]  ;;  %v8055_v57 = vor.u32 %v11554_v51, %v8054_v49  ;;  %v11574_v49 = vld [vmem:[#allocation5 + $0xb4c] sm:$0xf] }
  0x94   :  { %2131 = vmatpush.bf16.msrb.mxu3 %v8727_v62  ;;  %2106 = vmatpush.bf16.msrb.mxu1 %v8183_v5  ;;  %v11618_v53 = vld [vmem:[#allocation5 + $0xca4] sm:$0xf0]  ;;  %v8152_v51 = vld [vmem:[#allocation5 + $0xb68] sm:$0xf0] }
  0x95   :  { %v8566_v54 = vld [vmem:[#allocation5 + $0xe88] sm:$0xf]  ;;  %v8311_v58 = vor.u32 %v11618_v53, %v8310_v52  ;;  %v11638_v52 = vld [vmem:[#allocation5 + $0xd4c] sm:$0xf] }
  0x96   :  { %2119 = vmatpush.bf16.msrb.mxu2 %v8439_v6  ;;  %2094 = vmatpush.bf16.msrb.mxu0 %v7895_v16  ;;  %v11682_v55 = vld [vmem:[#allocation5 + $0xea4] sm:$0xf0]  ;;  %v11526_v16 = vld [vmem:[#allocation5 + $0x9cc] sm:$0xf] }
  0x97   :  { %v7766_v59 = vld [vmem:[#allocation5 + $0x848] sm:$0xf]  ;;  %v8567_v62 = vor.u32 %v11682_v55, %v8566_v54  ;;  %v8408_v53 = vld [vmem:[#allocation5 + $0xd68] sm:$0xf0] }
  0x98   :  { %2132 = vmatpush.bf16.msrb.mxu3 %v8695_v10  ;;  %2107 = vmatpush.bf16.msrb.mxu1 %v8151_v17  ;;  %v11482_v60 = vld [vmem:[#allocation5 + $0x864] sm:$0xf0]  ;;  %v7960_v17 = vld [vmem:[#allocation5 + $0x9e8] sm:$0xf0] }
  0x99   :  { %v8022_v61 = vld [vmem:[#allocation5 + $0xa48] sm:$0xf]  ;;  %v7767_v4 = vor.u32 %v11482_v60, %v7766_v59  ;;  %v11702_v54 = vld [vmem:[#allocation5 + $0xf4c] sm:$0xf] }
  0x9a   :  { %2120 = vmatpush.bf16.msrb.mxu2 %v8407_v18  ;;  %2095 = vmatpush.bf16.msrb.mxu0 %v7863_v31  ;;  %v11546_v63 = vld [vmem:[#allocation5 + $0xa64] sm:$0xf0]  ;;  %v11590_v18 = vld [vmem:[#allocation5 + $0xbcc] sm:$0xf]  ;;  %v7963_v31 = vor.u32 %v11526_v16, %v7960_v17 }
  0x9b   :  { %v8278_v0 = vld [vmem:[#allocation5 + $0xc48] sm:$0xf]  ;;  %v8023_v7 = vor.u32 %v11546_v63, %v8022_v61  ;;  %v8664_v55 = vld [vmem:[#allocation5 + $0xf68] sm:$0xf0] }
  0x9c   :  { %2133 = vmatpush.bf16.msrb.mxu3 %v8663_v22  ;;  %2108 = vmatpush.bf16.msrb.mxu1 %v8119_v32  ;;  %v11610_v1 = vld [vmem:[#allocation5 + $0xc64] sm:$0xf0]  ;;  %v8472_v22 = vld [vmem:[#allocation5 + $0xde8] sm:$0xf0]  ;;  %v8219_v32 = vor.u32 %v11590_v18, %v8216_v20 }
  0x9d   :  { %v8534_v2 = vld [vmem:[#allocation5 + $0xe48] sm:$0xf]  ;;  %v8279_v8 = vor.u32 %v11610_v1, %v8278_v0  ;;  %v11502_v59 = vld [vmem:[#allocation5 + $0x90c] sm:$0xf] }
  0x9e   :  { %2121 = vmatpush.bf16.msrb.mxu2 %v8375_v33  ;;  %2096 = vmatpush.bf16.msrb.mxu0 %v7831_v44  ;;  %v11674_v3 = vld [vmem:[#allocation5 + $0xe64] sm:$0xf0]  ;;  %v8475_v33 = vor.u32 %v11654_v21, %v8472_v22  ;;  %v7931_v44 = vor.u32 %v11518_v34, %v7928_v35  ;;  %v7864_v60 = vld [vmem:[#allocation5 + $0x928] sm:$0xf0] }
  0x9f   :  { %v7734_v5 = vld [vmem:[#allocation5 + $0x808] sm:$0xf]  ;;  %v8535_v12 = vor.u32 %v11674_v3, %v8534_v2  ;;  %v11566_v61 = vld [vmem:[#allocation5 + $0xb0c] sm:$0xf] }
  0xa0   :  { %2134 = vmatpush.bf16.msrb.mxu3 %v8631_v38  ;;  %2109 = vmatpush.bf16.msrb.mxu1 %v8087_v45  ;;  %v11474_v6 = vld [vmem:[#allocation5 + $0x824] sm:$0xf0]  ;;  %v8731_v38 = vor.u32 %v11718_v26, %v8728_v28  ;;  %v8187_v45 = vor.u32 %v11582_v36, %v8184_v39  ;;  %v8120_v63 = vld [vmem:[#allocation5 + $0xb28] sm:$0xf0] }
  0xa1   :  { %v7990_v9 = vld [vmem:[#allocation5 + $0xa08] sm:$0xf]  ;;  %v7735_v19 = vor.u32 %v11474_v6, %v7734_v5  ;;  %v11630_v0 = vld [vmem:[#allocation5 + $0xd0c] sm:$0xf]  ;;  %v8123_v5 = vor.u32 %v11566_v61, %v8120_v63  ;;  %v8478_v61 = vld [vmem:[#allocation5 + $0xdd0] sm:$0xf] }
  0xa2   :  { %2122 = vmatpush.bf16.msrb.mxu2 %v8343_v46  ;;  %2097 = vmatpush.bf16.msrb.mxu0 %v7799_v56  ;;  %v11538_v10 = vld [vmem:[#allocation5 + $0xa24] sm:$0xf0]  ;;  %v8443_v46 = vor.u32 %v11646_v40, %v8440_v41  ;;  %v7899_v56 = vor.u32 %v11510_v47, %v7896_v48  ;;  %v8376_v1 = vld [vmem:[#allocation5 + $0xd28] sm:$0xf0] }
  0xa3   :  { %v8246_v11 = vld [vmem:[#allocation5 + $0xc08] sm:$0xf]  ;;  %v7991_v23 = vor.u32 %v11538_v10, %v7990_v9  ;;  %v11694_v2 = vld [vmem:[#allocation5 + $0xf0c] sm:$0xf]  ;;  %v8379_v6 = vor.u32 %v11630_v0, %v8376_v1  ;;  %v8734_v1 = vld [vmem:[#allocation5 + $0xfd0] sm:$0xf] }
  0xa4   :  { %2135 = vmatpush.bf16.msrb.mxu3 %v8599_v50  ;;  %2110 = vmatpush.bf16.msrb.mxu1 %v8055_v57  ;;  %v11602_v13 = vld [vmem:[#allocation5 + $0xc24] sm:$0xf0]  ;;  %v8699_v50 = vor.u32 %v11710_v42, %v8696_v43  ;;  %v8155_v57 = vor.u32 %v11574_v49, %v8152_v51  ;;  %v8632_v3 = vld [vmem:[#allocation5 + $0xf28] sm:$0xf0] }
  0xa5   :  { %v8502_v14 = vld [vmem:[#allocation5 + $0xe08] sm:$0xf]  ;;  %v8247_v25 = vor.u32 %v11602_v13, %v8246_v11  ;;  %v11558_v9 = vld [vmem:[#allocation5 + $0xacc] sm:$0xf]  ;;  %v8635_v10 = vor.u32 %v11694_v2, %v8632_v3  ;;  %v11723_v2 = vld [vmem:[#allocation5 + $0xfec] sm:$0xf0] }
  0xa6   :  { %2123 = vmatpush.bf16.msrb.mxu2 %v8311_v58  ;;  %v11666_v15 = vld [vmem:[#allocation5 + $0xe24] sm:$0xf0]  ;;  %2098 = vmatpush.bf16.msrb.mxu0 %v7767_v4  ;;  %v8411_v58 = vor.u32 %v11638_v52, %v8408_v53  ;;  %v7867_v4 = vor.u32 %v11502_v59, %v7864_v60  ;;  %v8088_v11 = vld [vmem:[#allocation5 + $0xae8] sm:$0xf0]  ;;  %v11595_v60 = vld [vmem:[#allocation5 + $0xbec] sm:$0xf0] }
  0xa7   :  { %v8503_v29 = vor.u32 %v11666_v15, %v8502_v14  ;;  %v8344_v13 = vld [vmem:[#allocation5 + $0xce8] sm:$0xf0]  ;;  %v8091_v17 = vor.u32 %v11558_v9, %v8088_v11  ;;  %v8190_v9 = vld [vmem:[#allocation5 + $0xb90] sm:$0xf] }
  0xa8   :  { %2136 = vmatpush.bf16.msrb.mxu3 %v8567_v62  ;;  %2111 = vmatpush.bf16.msrb.mxu1 %v8023_v7  ;;  %v8667_v62 = vor.u32 %v11702_v54, %v8664_v55  ;;  %v11494_v7 = vld [vmem:[#allocation5 + $0x8cc] sm:$0xf]  ;;  %v11587_v11 = vld [vmem:[#allocation5 + $0xbac] sm:$0xf0] }
  0xa9   :  { %v11686_v14 = vld [vmem:[#allocation5 + $0xecc] sm:$0xf] }
  0xaa   :  { %2124 = vmatpush.bf16.msrb.mxu2 %v8279_v8  ;;  %2099 = vmatpush.bf16.msrb.mxu0 %v7735_v19  ;;  %v7832_v8 = vld [vmem:[#allocation5 + $0x8e8] sm:$0xf0] }
  0xab   :  { %v8600_v15 = vld [vmem:[#allocation5 + $0xee8] sm:$0xf0]  ;;  %v7835_v16 = vor.u32 %v11494_v7, %v7832_v8  ;;  %v7934_v7 = vld [vmem:[#allocation5 + $0x990] sm:$0xf] }
  0xac   :  { %2137 = vmatpush.bf16.msrb.mxu3 %v8535_v12  ;;  %2112 = vmatpush.bf16.msrb.mxu1 %v7991_v23  ;;  %v11622_v12 = vld [vmem:[#allocation5 + $0xccc] sm:$0xf]  ;;  %v8603_v22 = vor.u32 %v11686_v14, %v8600_v15  ;;  %v11523_v8 = vld [vmem:[#allocation5 + $0x9ac] sm:$0xf0] }
  0xad   :  { %2100 = vmatmul.bf16.vlgmr.msrb.gmra.mxu0 %v12435_v30  ;;  %v8347_v18 = vor.u32 %v11622_v12, %v8344_v13  ;;  %v11486_v19 = vld [vmem:[#allocation5 + $0x88c] sm:$0xf]  ;;  %v8446_v12 = vld [vmem:[#allocation5 + $0xd90] sm:$0xf] }
  0xae   :  { %2125 = vmatpush.bf16.msrb.mxu2 %v8247_v25  ;;  %2144 = vmatpush.bf16.msra.mxu0 %v7963_v31  ;;  %v7800_v20 = vld [vmem:[#allocation5 + $0x8a8] sm:$0xf0]  ;;  %v11651_v13 = vld [vmem:[#allocation5 + $0xdac] sm:$0xf0] }
  0xaf   :  { %2113 = vmatmul.bf16.vlgmr.msrb.gmra.mxu1 %v12437_v37  ;;  %v11550_v21 = vld [vmem:[#allocation5 + $0xa8c] sm:$0xf]  ;;  %v7803_v31 = vor.u32 %v11486_v19, %v7800_v20  ;;  %v8702_v14 = vld [vmem:[#allocation5 + $0xf90] sm:$0xf] }
  0xb0   :  { %2138 = vmatpush.bf16.msrb.mxu3 %v8503_v29  ;;  %2157 = vmatpush.bf16.msra.mxu1 %v8219_v32  ;;  %v8056_v23 = vld [vmem:[#allocation5 + $0xaa8] sm:$0xf0]  ;;  %v11715_v15 = vld [vmem:[#allocation5 + $0xfac] sm:$0xf0] }
  0xb1   :  { %2126 = vmatmul.bf16.vlgmr.msrb.gmra.mxu2 %v12431_v24  ;;  %v11614_v25 = vld [vmem:[#allocation5 + $0xc8c] sm:$0xf]  ;;  %v8059_v32 = vor.u32 %v11550_v21, %v8056_v23  ;;  %v7902_v19 = vld [vmem:[#allocation5 + $0x950] sm:$0xf] }
  0xb2   :  { %2170 = vmatpush.bf16.msra.mxu2 %v8475_v33  ;;  %2145 = vmatpush.bf16.msra.mxu0 %v7931_v44  ;;  %v8312_v26 = vld [vmem:[#allocation5 + $0xca8] sm:$0xf0]  ;;  %v11515_v20 = vld [vmem:[#allocation5 + $0x96c] sm:$0xf0] }
  0xb3   :  { %2139 = vmatmul.bf16.vlgmr.msrb.gmra.mxu3 %v12433_v27  ;;  %v11678_v28 = vld [vmem:[#allocation5 + $0xe8c] sm:$0xf]  ;;  %v8315_v33 = vor.u32 %v11614_v25, %v8312_v26  ;;  %v8158_v21 = vld [vmem:[#allocation5 + $0xb50] sm:$0xf] }
  0xb4   :  { %2183 = vmatpush.bf16.msra.mxu3 %v8731_v38  ;;  %2158 = vmatpush.bf16.msra.mxu1 %v8187_v45  ;;  %v8568_v29 = vld [vmem:[#allocation5 + $0xea8] sm:$0xf0]  ;;  %v11579_v23 = vld [vmem:[#allocation5 + $0xb6c] sm:$0xf0] }
  0xb5   :  { %v11478_v34 = vld [vmem:[#allocation5 + $0x84c] sm:$0xf]  ;;  %v8571_v38 = vor.u32 %v11678_v28, %v8568_v29  ;;  %v8414_v25 = vld [vmem:[#allocation5 + $0xd50] sm:$0xf] }
  0xb6   :  { %2171 = vmatpush.bf16.msra.mxu2 %v8443_v46  ;;  %2146 = vmatpush.bf16.msra.mxu0 %v7899_v56  ;;  %v7768_v35 = vld [vmem:[#allocation5 + $0x868] sm:$0xf0]  ;;  %v7966_v56 = vld [vmem:[#allocation5 + $0x9d0] sm:$0xf] }
  0xb7   :  { %v11542_v36 = vld [vmem:[#allocation5 + $0xa4c] sm:$0xf]  ;;  %v7771_v44 = vor.u32 %v11478_v34, %v7768_v35  ;;  %v11643_v26 = vld [vmem:[#allocation5 + $0xd6c] sm:$0xf0] }
  0xb8   :  { %2184 = vmatpush.bf16.msra.mxu3 %v8699_v50  ;;  %2159 = vmatpush.bf16.msra.mxu1 %v8155_v57  ;;  %v8024_v39 = vld [vmem:[#allocation5 + $0xa68] sm:$0xf0]  ;;  %v11531_v57 = vld [vmem:[#allocation5 + $0x9ec] sm:$0xf0] }
  0xb9   :  { %v11606_v40 = vld [vmem:[#allocation5 + $0xc4c] sm:$0xf]  ;;  %v8027_v47 = vor.u32 %v11542_v36, %v8024_v39  ;;  %v8670_v28 = vld [vmem:[#allocation5 + $0xf50] sm:$0xf] }
  0xba   :  { %2172 = vmatpush.bf16.msra.mxu2 %v8411_v58  ;;  %2147 = vmatpush.bf16.msra.mxu0 %v7867_v4  ;;  %v8280_v41 = vld [vmem:[#allocation5 + $0xc68] sm:$0xf0]  ;;  %v8222_v58 = vld [vmem:[#allocation5 + $0xbd0] sm:$0xf]  ;;  %v7967_v4 = vor.u32 %v11531_v57, %v7966_v56 }
  0xbb   :  { %v11670_v42 = vld [vmem:[#allocation5 + $0xe4c] sm:$0xf]  ;;  %v8283_v48 = vor.u32 %v11606_v40, %v8280_v41  ;;  %v11707_v29 = vld [vmem:[#allocation5 + $0xf6c] sm:$0xf0] }
  0xbc   :  { %2185 = vmatpush.bf16.msra.mxu3 %v8667_v62  ;;  %2160 = vmatpush.bf16.msra.mxu1 %v8123_v5  ;;  %v8536_v43 = vld [vmem:[#allocation5 + $0xe68] sm:$0xf0]  ;;  %v11659_v62 = vld [vmem:[#allocation5 + $0xdec] sm:$0xf0]  ;;  %v8223_v5 = vor.u32 %v11595_v60, %v8222_v58 }
  0xbd   :  { %v11470_v45 = vld [vmem:[#allocation5 + $0x80c] sm:$0xf]  ;;  %v8539_v52 = vor.u32 %v11670_v42, %v8536_v43  ;;  %v7870_v34 = vld [vmem:[#allocation5 + $0x910] sm:$0xf] }
  0xbe   :  { %2173 = vmatpush.bf16.msra.mxu2 %v8379_v6  ;;  %2148 = vmatpush.bf16.msra.mxu0 %v7835_v16  ;;  %v7736_v46 = vld [vmem:[#allocation5 + $0x828] sm:$0xf0]  ;;  %v8479_v6 = vor.u32 %v11659_v62, %v8478_v61  ;;  %v7935_v16 = vor.u32 %v11523_v8, %v7934_v7  ;;  %v11507_v35 = vld [vmem:[#allocation5 + $0x92c] sm:$0xf0]  ;;  %v277_v7 = vpop.f32.mrf.mxu0 }
  0xbf   :  { %v11534_v49 = vld [vmem:[#allocation5 + $0xa0c] sm:$0xf]  ;;  %v7739_v59 = vor.u32 %v11470_v45, %v7736_v46  ;;  %v8126_v36 = vld [vmem:[#allocation5 + $0xb10] sm:$0xf] }
  0xc0   :  { %2186 = vmatpush.bf16.msra.mxu3 %v8635_v10  ;;  %2161 = vmatpush.bf16.msra.mxu1 %v8091_v17  ;;  %v7992_v50 = vld [vmem:[#allocation5 + $0xa28] sm:$0xf0]  ;;  %v8735_v10 = vor.u32 %v11723_v2, %v8734_v1  ;;  %v8191_v17 = vor.u32 %v11587_v11, %v8190_v9  ;;  %v11571_v39 = vld [vmem:[#allocation5 + $0xb2c] sm:$0xf0] }
  0xc1   :  { %v11598_v51 = vld [vmem:[#allocation5 + $0xc0c] sm:$0xf]  ;;  %v7995_v63 = vor.u32 %v11534_v49, %v7992_v50  ;;  %v8382_v40 = vld [vmem:[#allocation5 + $0xd10] sm:$0xf]  ;;  %v8127_v46 = vor.u32 %v11571_v39, %v8126_v36  ;;  %v102_v50 = vld [vmem:[#allocation7] sm:$0x3] }
  0xc2   :  { %2174 = vmatpush.bf16.msra.mxu2 %v8347_v18  ;;  %2149 = vmatpush.bf16.msra.mxu0 %v7803_v31  ;;  %v8248_v53 = vld [vmem:[#allocation5 + $0xc28] sm:$0xf0]  ;;  %v8447_v18 = vor.u32 %v11651_v13, %v8446_v12  ;;  %v7903_v31 = vor.u32 %v11515_v20, %v7902_v19  ;;  %v11635_v41 = vld [vmem:[#allocation5 + $0xd2c] sm:$0xf0]  ;;  %v104_v58 = vperm.slane %v102_v50, 0  ;;  %v105_v8 = vperm.slane %v102_v50, 1 }
  0xc3   :  { %v11662_v54 = vld [vmem:[#allocation5 + $0xe0c] sm:$0xf]  ;;  %v8251_v0 = vor.u32 %v11598_v51, %v8248_v53  ;;  %v8638_v42 = vld [vmem:[#allocation5 + $0xf10] sm:$0xf]  ;;  %v11655_v50 = vld [vmem:[#allocation5 + $0xdd4] sm:$0xf] }
  0xc4   :  { %2187 = vmatpush.bf16.msra.mxu3 %v8603_v22  ;;  %2162 = vmatpush.bf16.msra.mxu1 %v8059_v32  ;;  %v8504_v55 = vld [vmem:[#allocation5 + $0xe28] sm:$0xf0]  ;;  %v8703_v22 = vor.u32 %v11715_v15, %v8702_v14  ;;  %v8159_v32 = vor.u32 %v11579_v23, %v8158_v21  ;;  %v11699_v43 = vld [vmem:[#allocation5 + $0xf2c] sm:$0xf0]  ;;  %v303_v21 = vpop.f32.mrf.mxu2 }
  0xc5   :  { %v8507_v3 = vor.u32 %v11662_v54, %v8504_v55  ;;  %v7838_v45 = vld [vmem:[#allocation5 + $0x8d0] sm:$0xf]  ;;  %v8639_v51 = vor.u32 %v11699_v43, %v8638_v42 }
  0xc6   :  { %2175 = vmatpush.bf16.msra.mxu2 %v8315_v33  ;;  %2150 = vmatpush.bf16.msra.mxu0 %v7771_v44  ;;  %v8415_v33 = vor.u32 %v11643_v26, %v8414_v25  ;;  %v7871_v44 = vor.u32 %v11507_v35, %v7870_v34  ;;  %v8094_v49 = vld [vmem:[#allocation5 + $0xad0] sm:$0xf]  ;;  %v304_v26 = vadd.f32 %v303_v21, %v105_v8 }
  0xc7   :  { %v8350_v53 = vld [vmem:[#allocation5 + $0xcd0] sm:$0xf] }
  0xc8   :  { %2188 = vmatpush.bf16.msra.mxu3 %v8571_v38  ;;  %2163 = vmatpush.bf16.msra.mxu1 %v8027_v47  ;;  %v8671_v38 = vor.u32 %v11707_v29, %v8670_v28  ;;  %v8383_v47 = vor.u32 %v11635_v41, %v8382_v40  ;;  %v11627_v54 = vld [vmem:[#allocation5 + $0xcec] sm:$0xf0] }
  0xc9   :  { %v8606_v55 = vld [vmem:[#allocation5 + $0xed0] sm:$0xf]  ;;  %v8351_v60 = vor.u32 %v11627_v54, %v8350_v53  ;;  %v11719_v54 = vld [vmem:[#allocation5 + $0xfd4] sm:$0xf] }
  0xca   :  { %2176 = vmatpush.bf16.msra.mxu2 %v8283_v48  ;;  %2151 = vmatpush.bf16.msra.mxu0 %v7739_v59  ;;  %v11499_v48 = vld [vmem:[#allocation5 + $0x8ec] sm:$0xf0] }
  0xcb   :  { %v11691_v56 = vld [vmem:[#allocation5 + $0xeec] sm:$0xf0]  ;;  %v7839_v57 = vor.u32 %v11499_v48, %v7838_v45  ;;  %v7968_v45 = vld [vmem:[#allocation5 + $0x9f0] sm:$0xf0] }
  0xcc   :  { %2189 = vmatpush.bf16.msra.mxu3 %v8539_v52  ;;  %2164 = vmatpush.bf16.msra.mxu1 %v7995_v63  ;;  %v11563_v52 = vld [vmem:[#allocation5 + $0xaec] sm:$0xf0]  ;;  %v8607_v1 = vor.u32 %v11691_v56, %v8606_v55  ;;  %v8736_v55 = vld [vmem:[#allocation5 + $0xff0] sm:$0xf0] }
  0xcd   :  { %2152 = vmatmul.bf16.vlgmr.msra.gmra.mxu0 %v12435_v30  ;;  %v8095_v59 = vor.u32 %v11563_v52, %v8094_v49  ;;  %v7806_v61 = vld [vmem:[#allocation5 + $0x890] sm:$0xf]  ;;  %v8224_v49 = vld [vmem:[#allocation5 + $0xbf0] sm:$0xf0] }
  0xce   :  { %2177 = vmatpush.bf16.msra.mxu2 %v8251_v0  ;;  %2196 = vmatpush.bf16.msrb.mxu0 %v7967_v4  ;;  %v11491_v62 = vld [vmem:[#allocation5 + $0x8ac] sm:$0xf0]  ;;  %v290_v0 = vpop.f32.mrf.mxu1 }
  0xcf   :  { %2165 = vmatmul.bf16.vlgmr.msra.gmra.mxu1 %v12437_v37  ;;  %v8062_v63 = vld [vmem:[#allocation5 + $0xa90] sm:$0xf]  ;;  %v7807_v9 = vor.u32 %v11491_v62, %v7806_v61  ;;  %v11519_v62 = vld [vmem:[#allocation5 + $0x994] sm:$0xf] }
  0xd0   :  { %2190 = vmatpush.bf16.msra.mxu3 %v8507_v3  ;;  %2209 = vmatpush.bf16.msrb.mxu1 %v8223_v5  ;;  %v11555_v2 = vld [vmem:[#allocation5 + $0xaac] sm:$0xf0] }
  0xd1   :  { %2178 = vmatmul.bf16.vlgmr.msra.gmra.mxu2 %v12431_v24  ;;  %v8318_v3 = vld [vmem:[#allocation5 + $0xc90] sm:$0xf]  ;;  %v8063_v11 = vor.u32 %v11555_v2, %v8062_v63  ;;  %v7936_v63 = vld [vmem:[#allocation5 + $0x9b0] sm:$0xf0] }
  0xd2   :  { %2222 = vmatpush.bf16.msrb.mxu2 %v8479_v6  ;;  %2197 = vmatpush.bf16.msrb.mxu0 %v7935_v16  ;;  %v11619_v4 = vld [vmem:[#allocation5 + $0xcac] sm:$0xf0]  ;;  %v8192_v2 = vld [vmem:[#allocation5 + $0xbb0] sm:$0xf0] }
  0xd3   :  { %2191 = vmatmul.bf16.vlgmr.msra.gmra.mxu3 %v12433_v27  ;;  %v8574_v5 = vld [vmem:[#allocation5 + $0xe90] sm:$0xf]  ;;  %v8319_v12 = vor.u32 %v11619_v4, %v8318_v3  ;;  %v11647_v3 = vld [vmem:[#allocation5 + $0xd94] sm:$0xf] }
  0xd4   :  { %2235 = vmatpush.bf16.msrb.mxu3 %v8735_v10  ;;  %2210 = vmatpush.bf16.msrb.mxu1 %v8191_v17  ;;  %v11683_v6 = vld [vmem:[#allocation5 + $0xeac] sm:$0xf0]  ;;  %v278_v10 = vadd.f32 %v277_v7, %v104_v58  ;;  %v305_v58 = vpop.f32.mrf.mxu2  ;;  %v8448_v4 = vld [vmem:[#allocation5 + $0xdb0] sm:$0xf0]  ;;  %v7939_v7 = vor.u32 %v11519_v62, %v7936_v63 }
  0xd5   :  { %v7774_v13 = vld [vmem:[#allocation5 + $0x850] sm:$0xf]  ;;  %v8575_v16 = vor.u32 %v11683_v6, %v8574_v5  ;;  %v11711_v5 = vld [vmem:[#allocation5 + $0xf94] sm:$0xf] }
  0xd6   :  { %2223 = vmatpush.bf16.msrb.mxu2 %v8447_v18  ;;  %2198 = vmatpush.bf16.msrb.mxu0 %v7903_v31  ;;  %v11483_v14 = vld [vmem:[#allocation5 + $0x86c] sm:$0xf0]  ;;  %v12455_v20 = vadd.f32 %v290_v0, %v278_v10  ;;  %v292_v39 = vpop.f32.mrf.mxu1  ;;  %v11583_v0 = vld [vmem:[#allocation5 + $0xb94] sm:$0xf] }
  0xd7   :  { %v8030_v15 = vld [vmem:[#allocation5 + $0xa50] sm:$0xf]  ;;  %v7775_v28 = vor.u32 %v11483_v14, %v7774_v13  ;;  %v8704_v6 = vld [vmem:[#allocation5 + $0xfb0] sm:$0xf0]  ;;  %v8195_v8 = vor.u32 %v11583_v0, %v8192_v2 }
  0xd8   :  { %2236 = vmatpush.bf16.msrb.mxu3 %v8703_v22  ;;  %2211 = vmatpush.bf16.msrb.mxu1 %v8159_v32  ;;  %v11547_v17 = vld [vmem:[#allocation5 + $0xa6c] sm:$0xf0]  ;;  %v316_v22 = vpop.f32.mrf.mxu3  ;;  %v11511_v10 = vld [vmem:[#allocation5 + $0x954] sm:$0xf]  ;;  %v8707_v13 = vor.u32 %v11711_v5, %v8704_v6  ;;  %12245 = vtanh.f32 %v12455_v20 }
  0xd9   :  { %v8286_v18 = vld [vmem:[#allocation5 + $0xc50] sm:$0xf]  ;;  %v8031_v32 = vor.u32 %v11547_v17, %v8030_v15  ;;  %v8160_v14 = vld [vmem:[#allocation5 + $0xb70] sm:$0xf0] }
  0xda   :  { %2224 = vmatpush.bf16.msrb.mxu2 %v8415_v33  ;;  %2199 = vmatpush.bf16.msrb.mxu0 %v7871_v44  ;;  %v11611_v19 = vld [vmem:[#allocation5 + $0xc6c] sm:$0xf0]  ;;  %v11527_v44 = vld [vmem:[#allocation5 + $0x9d4] sm:$0xf] }
  0xdb   :  { %v8542_v23 = vld [vmem:[#allocation5 + $0xe50] sm:$0xf]  ;;  %v8287_v33 = vor.u32 %v11611_v19, %v8286_v18  ;;  %v11639_v15 = vld [vmem:[#allocation5 + $0xd54] sm:$0xf] }
  0xdc   :  { %2237 = vmatpush.bf16.msrb.mxu3 %v8671_v38  ;;  %2212 = vmatpush.bf16.msrb.mxu1 %v8127_v46  ;;  %v11675_v25 = vld [vmem:[#allocation5 + $0xe6c] sm:$0xf0]  ;;  %v12457_v38 = vadd.f32 %v316_v22, %v304_v26  ;;  %v11591_v46 = vld [vmem:[#allocation5 + $0xbd4] sm:$0xf] }
  0xdd   :  { %v7742_v29 = vld [vmem:[#allocation5 + $0x810] sm:$0xf]  ;;  %v8543_v40 = vor.u32 %v11675_v25, %v8542_v23  ;;  %v11703_v17 = vld [vmem:[#allocation5 + $0xf54] sm:$0xf] }
  0xde   :  { %2225 = vmatpush.bf16.msrb.mxu2 %v8383_v47  ;;  %2200 = vmatpush.bf16.msrb.mxu0 %v7839_v57  ;;  %v11475_v31 = vld [vmem:[#allocation5 + $0x82c] sm:$0xf0]  ;;  %v279_v47 = vpop.f32.mrf.mxu0  ;;  %v7971_v57 = vor.u32 %v11527_v44, %v7968_v45  ;;  %v8672_v18 = vld [vmem:[#allocation5 + $0xf70] sm:$0xf0]  ;;  %12247 = vtanh.f32 %v12457_v38  ;;  %v9240_v38 = vld [vmem:[#allocation5 + $0x7e8] sm:$0xf0] }
  0xdf   :  { %v7998_v34 = vld [vmem:[#allocation5 + $0xa10] sm:$0xf]  ;;  %v7743_v48 = vor.u32 %v11475_v31, %v7742_v29  ;;  %v11503_v23 = vld [vmem:[#allocation5 + $0x914] sm:$0xf] }
  0xe0   :  { %2238 = vmatpush.bf16.msrb.mxu3 %v8639_v51  ;;  %2213 = vmatpush.bf16.msrb.mxu1 %v8095_v59  ;;  %v11539_v35 = vld [vmem:[#allocation5 + $0xa2c] sm:$0xf0]  ;;  %v8480_v51 = vld [vmem:[#allocation5 + $0xdf0] sm:$0xf0]  ;;  %v318_v59 = vpop.f32.mrf.mxu3 }
  0xe1   :  { %v8254_v36 = vld [vmem:[#allocation5 + $0xc10] sm:$0xf]  ;;  %v7999_v52 = vor.u32 %v11539_v35, %v7998_v34  ;;  %v8483_v61 = vor.u32 %v11655_v50, %v8480_v51  ;;  %v7872_v25 = vld [vmem:[#allocation5 + $0x930] sm:$0xf0] }
  0xe2   :  { %2226 = vmatpush.bf16.msrb.mxu2 %v8351_v60  ;;  %2201 = vmatpush.bf16.msrb.mxu0 %v7807_v9  ;;  %v11603_v41 = vld [vmem:[#allocation5 + $0xc2c] sm:$0xf0]  ;;  %v8227_v60 = vor.u32 %v11591_v46, %v8224_v49  ;;  %v8451_v9 = vor.u32 %v11647_v3, %v8448_v4  ;;  %v11567_v26 = vld [vmem:[#allocation5 + $0xb14] sm:$0xf]  ;;  %v7875_v35 = vor.u32 %v11503_v23, %v7872_v25 }
  0xe3   :  { %v8510_v42 = vld [vmem:[#allocation5 + $0xe10] sm:$0xf]  ;;  %v8255_v53 = vor.u32 %v11603_v41, %v8254_v36  ;;  %v8128_v29 = vld [vmem:[#allocation5 + $0xb30] sm:$0xf0] }
  0xe4   :  { %2239 = vmatpush.bf16.msrb.mxu3 %v8607_v1  ;;  %2214 = vmatpush.bf16.msrb.mxu1 %v8063_v11  ;;  %v11667_v43 = vld [vmem:[#allocation5 + $0xe2c] sm:$0xf0]  ;;  %v8739_v1 = vor.u32 %v11719_v54, %v8736_v55  ;;  %v7904_v11 = vld [vmem:[#allocation5 + $0x970] sm:$0xf0]  ;;  %v8131_v39 = vor.u32 %v11567_v26, %v8128_v29 }
  0xe5   :  { %v8511_v56 = vor.u32 %v11667_v43, %v8510_v42  ;;  %v7907_v19 = vor.u32 %v11511_v10, %v7904_v11  ;;  %v11631_v31 = vld [vmem:[#allocation5 + $0xd14] sm:$0xf] }
  0xe6   :  { %2227 = vmatpush.bf16.msrb.mxu2 %v8319_v12  ;;  %2202 = vmatpush.bf16.msrb.mxu0 %v7775_v28  ;;  %v11575_v12 = vld [vmem:[#allocation5 + $0xb54] sm:$0xf]  ;;  %v8675_v28 = vor.u32 %v11703_v17, %v8672_v18 }
  0xe7   :  { %v8163_v21 = vor.u32 %v11575_v12, %v8160_v14  ;;  %v8640_v34 = vld [vmem:[#allocation5 + $0xf30] sm:$0xf0] }
  0xe8   :  { %2240 = vmatpush.bf16.msrb.mxu3 %v8575_v16  ;;  %2215 = vmatpush.bf16.msrb.mxu1 %v8031_v32  ;;  %v8416_v16 = vld [vmem:[#allocation5 + $0xd70] sm:$0xf0] }
  0xe9   :  { %v8419_v22 = vor.u32 %v11639_v15, %v8416_v16  ;;  %v8384_v32 = vld [vmem:[#allocation5 + $0xd30] sm:$0xf0] }
  0xea   :  { %2228 = vmatpush.bf16.msrb.mxu2 %v8287_v33  ;;  %2203 = vmatpush.bf16.msrb.mxu0 %v7743_v48  ;;  %v11695_v33 = vld [vmem:[#allocation5 + $0xf14] sm:$0xf] }
  0xeb   :  { %v11495_v41 = vld [vmem:[#allocation5 + $0x8d4] sm:$0xf]  ;;  %v8643_v45 = vor.u32 %v11695_v33, %v8640_v34 }
  0xec   :  { %2241 = vmatpush.bf16.msrb.mxu3 %v8543_v40  ;;  %2216 = vmatpush.bf16.msrb.mxu1 %v7999_v52  ;;  %v8387_v40 = vor.u32 %v11631_v31, %v8384_v32  ;;  %v7840_v42 = vld [vmem:[#allocation5 + $0x8f0] sm:$0xf0]  ;;  %v2010_v44 = vpop.f32.mrf.mxu1 }
  0xed   :  { %2204 = vmatmul.bf16.vlgmr.msrb.gmra.mxu0 %v12435_v30  ;;  %v11559_v43 = vld [vmem:[#allocation5 + $0xad4] sm:$0xf]  ;;  %v7843_v52 = vor.u32 %v11495_v41, %v7840_v42  ;;  %v11596_v42 = vld [vmem:[#allocation5 + $0xbf4] sm:$0xf0] }
  0xee   :  { %2229 = vmatpush.bf16.msrb.mxu2 %v8255_v53  ;;  %2248 = vmatpush.bf16.msra.mxu0 %v7971_v57  ;;  %v1997_v36 = vpop.f32.mrf.mxu0  ;;  %v8096_v46 = vld [vmem:[#allocation5 + $0xaf0] sm:$0xf0] }
  0xef   :  { %2217 = vmatmul.bf16.vlgmr.msrb.gmra.mxu1 %v12437_v37  ;;  %v11623_v47 = vld [vmem:[#allocation5 + $0xcd4] sm:$0xf]  ;;  %v2011_v49 = vadd.f32 %v2010_v44, %v1997_v36  ;;  %v8099_v53 = vor.u32 %v11559_v43, %v8096_v46  ;;  %v7974_v36 = vld [vmem:[#allocation5 + $0x9d8] sm:$0xf] }
  0xf0   :  { %2242 = vmatpush.bf16.msrb.mxu3 %v8511_v56  ;;  %2261 = vmatpush.bf16.msra.mxu1 %v8227_v60  ;;  %v8352_v48 = vld [vmem:[#allocation5 + $0xcf0] sm:$0xf0]  ;;  %v8486_v43 = vld [vmem:[#allocation5 + $0xdd8] sm:$0xf] }
  0xf1   :  { %2230 = vmatmul.bf16.vlgmr.msrb.gmra.mxu2 %v12431_v24  ;;  %v11687_v50 = vld [vmem:[#allocation5 + $0xed4] sm:$0xf]  ;;  %v8355_v54 = vor.u32 %v11623_v47, %v8352_v48  ;;  %v11660_v44 = vld [vmem:[#allocation5 + $0xdf4] sm:$0xf0] }
  0xf2   :  { %2274 = vmatpush.bf16.msra.mxu2 %v8483_v61  ;;  %2249 = vmatpush.bf16.msra.mxu0 %v7939_v7  ;;  %v8608_v51 = vld [vmem:[#allocation5 + $0xef0] sm:$0xf0]  ;;  %v8742_v47 = vld [vmem:[#allocation5 + $0xfd8] sm:$0xf] }
  0xf3   :  { %2243 = vmatmul.bf16.vlgmr.msrb.gmra.mxu3 %v12433_v27  ;;  %v11487_v55 = vld [vmem:[#allocation5 + $0x894] sm:$0xf]  ;;  %v8611_v59 = vor.u32 %v11687_v50, %v8608_v51  ;;  %v11724_v48 = vld [vmem:[#allocation5 + $0xff4] sm:$0xf0] }
  0xf4   :  { %2287 = vmatpush.bf16.msra.mxu3 %v8739_v1  ;;  %2262 = vmatpush.bf16.msra.mxu1 %v8195_v8  ;;  %v7808_v56 = vld [vmem:[#allocation5 + $0x8b0] sm:$0xf0]  ;;  %v2023_v58 = vpop.f32.mrf.mxu2  ;;  %v2012_v11 = vpop.f32.mrf.mxu1 }
  0xf5   :  { %v11551_v57 = vld [vmem:[#allocation5 + $0xa94] sm:$0xf]  ;;  %v2024_v63 = vadd.f32 %v2023_v58, %v2011_v49  ;;  %v7811_v3 = vor.u32 %v11487_v55, %v7808_v56  ;;  %v8198_v55 = vld [vmem:[#allocation5 + $0xb98] sm:$0xf]  ;;  %v8743_v56 = vor.u32 %v11724_v48, %v8742_v47 }
  0xf6   :  { %2275 = vmatpush.bf16.msra.mxu2 %v8451_v9  ;;  %2250 = vmatpush.bf16.msra.mxu0 %v7907_v19  ;;  %v8064_v60 = vld [vmem:[#allocation5 + $0xab0] sm:$0xf0]  ;;  %v2036_v0 = vpop.f32.mrf.mxu3  ;;  %v1999_v5 = vpop.f32.mrf.mxu0  ;;  %v8454_v58 = vld [vmem:[#allocation5 + $0xd98] sm:$0xf] }
  0xf7   :  { %v11615_v61 = vld [vmem:[#allocation5 + $0xc94] sm:$0xf]  ;;  %v12463_v4 = vadd.f32 %v2036_v0, %v2024_v63  ;;  %v8067_v6 = vor.u32 %v11551_v57, %v8064_v60  ;;  %v11588_v57 = vld [vmem:[#allocation5 + $0xbb4] sm:$0xf0] }
  0xf8   :  { %2288 = vmatpush.bf16.msra.mxu3 %v8707_v13  ;;  %2263 = vmatpush.bf16.msra.mxu1 %v8163_v21  ;;  %v8320_v62 = vld [vmem:[#allocation5 + $0xcb0] sm:$0xf0]  ;;  %v8710_v60 = vld [vmem:[#allocation5 + $0xf98] sm:$0xf]  ;;  %v8199_v63 = vor.u32 %v11588_v57, %v8198_v55 }
  0xf9   :  { %v11679_v1 = vld [vmem:[#allocation5 + $0xe94] sm:$0xf]  ;;  %v8323_v7 = vor.u32 %v11615_v61, %v8320_v62  ;;  %v11716_v61 = vld [vmem:[#allocation5 + $0xfb4] sm:$0xf0] }
  0xfa   :  { %2276 = vmatpush.bf16.msra.mxu2 %v8419_v22  ;;  %2251 = vmatpush.bf16.msra.mxu0 %v7875_v35  ;;  %v8576_v2 = vld [vmem:[#allocation5 + $0xeb0] sm:$0xf0]  ;;  %v8711_v5 = vor.u32 %v11716_v61, %v8710_v60  ;;  %v7814_v47 = vld [vmem:[#allocation5 + $0x898] sm:$0xf] }
  0xfb   :  { %v11479_v8 = vld [vmem:[#allocation5 + $0x854] sm:$0xf]  ;;  %v8579_v12 = vor.u32 %v11679_v1, %v8576_v2  ;;  %v7910_v1 = vld [vmem:[#allocation5 + $0x958] sm:$0xf] }
  0xfc   :  { %2289 = vmatpush.bf16.msra.mxu3 %v8675_v28  ;;  %2264 = vmatpush.bf16.msra.mxu1 %v8131_v39  ;;  %v7776_v9 = vld [vmem:[#allocation5 + $0x870] sm:$0xf0]  ;;  %v2025_v29 = vpop.f32.mrf.mxu2  ;;  %v11532_v39 = vld [vmem:[#allocation5 + $0x9f4] sm:$0xf0] }
  0xfd   :  { %v11543_v10 = vld [vmem:[#allocation5 + $0xa54] sm:$0xf]  ;;  %v7779_v18 = vor.u32 %v11479_v8, %v7776_v9  ;;  %v7975_v50 = vor.u32 %v11532_v39, %v7974_v36  ;;  %v11516_v2 = vld [vmem:[#allocation5 + $0x974] sm:$0xf0] }
  0xfe   :  { %2277 = vmatpush.bf16.msra.mxu2 %v8387_v40  ;;  %2252 = vmatpush.bf16.msra.mxu0 %v7843_v52  ;;  %v8032_v13 = vld [vmem:[#allocation5 + $0xa70] sm:$0xf0]  ;;  %v2038_v35 = vpop.f32.mrf.mxu3  ;;  %v8230_v40 = vld [vmem:[#allocation5 + $0xbd8] sm:$0xf]  ;;  %v8487_v52 = vor.u32 %v11660_v44, %v8486_v43  ;;  %v7911_v11 = vor.u32 %v11516_v2, %v7910_v1 }
  0xff   :  { %v11607_v14 = vld [vmem:[#allocation5 + $0xc54] sm:$0xf]  ;;  %v8035_v22 = vor.u32 %v11543_v10, %v8032_v13  ;;  %v8231_v51 = vor.u32 %v11596_v42, %v8230_v40  ;;  %v11644_v8 = vld [vmem:[#allocation5 + $0xd74] sm:$0xf0] }
 0x100   :  { %2290 = vmatpush.bf16.msra.mxu3 %v8643_v45  ;;  %2265 = vmatpush.bf16.msra.mxu1 %v8099_v53  ;;  %v8288_v15 = vld [vmem:[#allocation5 + $0xc70] sm:$0xf0]  ;;  %v7942_v53 = vld [vmem:[#allocation5 + $0x998] sm:$0xf] }
 0x101   :  { %v11671_v16 = vld [vmem:[#allocation5 + $0xe54] sm:$0xf]  ;;  %v8291_v23 = vor.u32 %v11607_v14, %v8288_v15  ;;  %v8678_v9 = vld [vmem:[#allocation5 + $0xf58] sm:$0xf] }
 0x102   :  { %2278 = vmatpush.bf16.msra.mxu2 %v8355_v54  ;;  %v8544_v17 = vld [vmem:[#allocation5 + $0xe70] sm:$0xf0]  ;;  %2253 = vmatpush.bf16.msra.mxu0 %v7811_v3  ;;  %v11524_v54 = vld [vmem:[#allocation5 + $0x9b4] sm:$0xf0] }
 0x103   :  { %v11471_v19 = vld [vmem:[#allocation5 + $0x814] sm:$0xf]  ;;  %v8547_v31 = vor.u32 %v11671_v16, %v8544_v17  ;;  %v7943_v62 = vor.u32 %v11524_v54, %v7942_v53  ;;  %v8166_v3 = vld [vmem:[#allocation5 + $0xb58] sm:$0xf] }
 0x104   :  { %2291 = vmatpush.bf16.msra.mxu3 %v8611_v59  ;;  %v7744_v21 = vld [vmem:[#allocation5 + $0x830] sm:$0xf0]  ;;  %2266 = vmatpush.bf16.msra.mxu1 %v8067_v6  ;;  %v11652_v59 = vld [vmem:[#allocation5 + $0xdb4] sm:$0xf0] }
 0x105   :  { %v11535_v25 = vld [vmem:[#allocation5 + $0xa14] sm:$0xf]  ;;  %v7747_v41 = vor.u32 %v11471_v19, %v7744_v21  ;;  %v8455_v0 = vor.u32 %v11652_v59, %v8454_v58  ;;  %v11580_v6 = vld [vmem:[#allocation5 + $0xb74] sm:$0xf0] }
 0x106   :  { %2279 = vmatpush.bf16.msra.mxu2 %v8323_v7  ;;  %v8000_v26 = vld [vmem:[#allocation5 + $0xa30] sm:$0xf0]  ;;  %2254 = vmatpush.bf16.msra.mxu0 %v7779_v18  ;;  %v8422_v7 = vld [vmem:[#allocation5 + $0xd58] sm:$0xf] }
 0x107   :  { %v11599_v28 = vld [vmem:[#allocation5 + $0xc14] sm:$0xf]  ;;  %v8003_v45 = vor.u32 %v11535_v25, %v8000_v26  ;;  %v11708_v10 = vld [vmem:[#allocation5 + $0xf74] sm:$0xf0]  ;;  %v8423_v13 = vor.u32 %v11644_v8, %v8422_v7 }
 0x108   :  { %2292 = vmatpush.bf16.msra.mxu3 %v8579_v12  ;;  %v8256_v32 = vld [vmem:[#allocation5 + $0xc30] sm:$0xf0]  ;;  %2267 = vmatpush.bf16.msra.mxu1 %v8035_v22  ;;  %v8167_v12 = vor.u32 %v11580_v6, %v8166_v3  ;;  %v7878_v14 = vld [vmem:[#allocation5 + $0x918] sm:$0xf]  ;;  %v8679_v17 = vor.u32 %v11708_v10, %v8678_v9 }
 0x109   :  { %v11663_v33 = vld [vmem:[#allocation5 + $0xe14] sm:$0xf]  ;;  %v8259_v46 = vor.u32 %v11599_v28, %v8256_v32  ;;  %v11508_v15 = vld [vmem:[#allocation5 + $0x934] sm:$0xf0] }
 0x10a   :  { %v8512_v34 = vld [vmem:[#allocation5 + $0xe30] sm:$0xf0]  ;;  %2280 = vmatpush.bf16.msra.mxu2 %v8291_v23  ;;  %2255 = vmatpush.bf16.msra.mxu0 %v7747_v41  ;;  %v8134_v16 = vld [vmem:[#allocation5 + $0xb18] sm:$0xf]  ;;  %v7879_v25 = vor.u32 %v11508_v15, %v7878_v14  ;;  %v2049_v26 = vpop.f32.mrf.mxu0 }
 0x10b   :  { %v8515_v49 = vor.u32 %v11663_v33, %v8512_v34  ;;  %v11572_v18 = vld [vmem:[#allocation5 + $0xb34] sm:$0xf0] }
 0x10c   :  { %2293 = vmatpush.bf16.msra.mxu3 %v8547_v31  ;;  %2268 = vmatpush.bf16.msra.mxu1 %v8003_v45  ;;  %v8390_v19 = vld [vmem:[#allocation5 + $0xd18] sm:$0xf]  ;;  %v8135_v28 = vor.u32 %v11572_v18, %v8134_v16  ;;  %v2062_v34 = vpop.f32.mrf.mxu1 }
 0x10d   :  { %2256 = vmatmul.bf16.vlgmr.msra.gmra.mxu0 %v12435_v30  ;;  %v11636_v21 = vld [vmem:[#allocation5 + $0xd34] sm:$0xf0]  ;;  %v2063_v41 = vadd.f32 %v2062_v34, %v2049_v26  ;;  %v11656_v34 = vld [vmem:[#allocation5 + $0xddc] sm:$0xf] }
 0x10e   :  { %2281 = vmatpush.bf16.msra.mxu2 %v8259_v46  ;;  %2300 = vmatpush.bf16.msrb.mxu0 %v7975_v50  ;;  %v8646_v22 = vld [vmem:[#allocation5 + $0xf18] sm:$0xf]  ;;  %v8391_v29 = vor.u32 %v11636_v21, %v8390_v19 }
 0x10f   :  { %2269 = vmatmul.bf16.vlgmr.msra.gmra.mxu1 %v12437_v37  ;;  %v11700_v23 = vld [vmem:[#allocation5 + $0xf34] sm:$0xf0] }
 0x110   :  { %2294 = vmatpush.bf16.msra.mxu3 %v8515_v49  ;;  %2313 = vmatpush.bf16.msrb.mxu1 %v8231_v51  ;;  %v7846_v31 = vld [vmem:[#allocation5 + $0x8d8] sm:$0xf]  ;;  %v8647_v35 = vor.u32 %v11700_v23, %v8646_v22 }
 0x111   :  { %2282 = vmatmul.bf16.vlgmr.msra.gmra.mxu2 %v12431_v24  ;;  %v11500_v32 = vld [vmem:[#allocation5 + $0x8f4] sm:$0xf0] }
 0x112   :  { %2326 = vmatpush.bf16.msrb.mxu2 %v8487_v52  ;;  %2301 = vmatpush.bf16.msrb.mxu0 %v7943_v62  ;;  %v8102_v33 = vld [vmem:[#allocation5 + $0xad8] sm:$0xf]  ;;  %v7847_v44 = vor.u32 %v11500_v32, %v7846_v31  ;;  %v2051_v61 = vpop.f32.mrf.mxu0  ;;  %v11592_v31 = vld [vmem:[#allocation5 + $0xbdc] sm:$0xf] }
 0x113   :  { %2295 = vmatmul.bf16.vlgmr.msra.gmra.mxu3 %v12433_v27  ;;  %v11564_v36 = vld [vmem:[#allocation5 + $0xaf4] sm:$0xf0]  ;;  %v11576_v61 = vld [vmem:[#allocation5 + $0xb5c] sm:$0xf] }
 0x114   :  { %2339 = vmatpush.bf16.msrb.mxu3 %v8743_v56  ;;  %2314 = vmatpush.bf16.msrb.mxu1 %v8199_v63  ;;  %v8358_v39 = vld [vmem:[#allocation5 + $0xcd8] sm:$0xf]  ;;  %v8103_v45 = vor.u32 %v11564_v36, %v8102_v33  ;;  %v2075_v50 = vpop.f32.mrf.mxu2  ;;  %v2064_v3 = vpop.f32.mrf.mxu1  ;;  %v8232_v33 = vld [vmem:[#allocation5 + $0xbf8] sm:$0xf0] }
 0x115   :  { %v11628_v40 = vld [vmem:[#allocation5 + $0xcf4] sm:$0xf0]  ;;  %v2076_v55 = vadd.f32 %v2075_v50, %v2063_v41  ;;  %v8744_v41 = vld [vmem:[#allocation5 + $0xff8] sm:$0xf0] }
 0x116   :  { %2327 = vmatpush.bf16.msrb.mxu2 %v8455_v0  ;;  %2302 = vmatpush.bf16.msrb.mxu0 %v7911_v11  ;;  %v8614_v42 = vld [vmem:[#allocation5 + $0xed8] sm:$0xf]  ;;  %v8359_v46 = vor.u32 %v11628_v40, %v8358_v39  ;;  %v2088_v56 = vpop.f32.mrf.mxu3  ;;  %v11720_v40 = vld [vmem:[#allocation5 + $0xfdc] sm:$0xf] }
 0x117   :  { %v11692_v43 = vld [vmem:[#allocation5 + $0xef4] sm:$0xf0]  ;;  %v12469_v60 = vadd.f32 %v2088_v56, %v2076_v55  ;;  %v8200_v50 = vld [vmem:[#allocation5 + $0xbb8] sm:$0xf0] }
 0x118   :  { %2340 = vmatpush.bf16.msrb.mxu3 %v8711_v5  ;;  %2315 = vmatpush.bf16.msrb.mxu1 %v8167_v12  ;;  %v11492_v48 = vld [vmem:[#allocation5 + $0x8b4] sm:$0xf0]  ;;  %v8615_v51 = vor.u32 %v11692_v43, %v8614_v42  ;;  %v8680_v3 = vld [vmem:[#allocation5 + $0xf78] sm:$0xf0] }
 0x119   :  { %v8070_v49 = vld [vmem:[#allocation5 + $0xa98] sm:$0xf]  ;;  %v7815_v59 = vor.u32 %v11492_v48, %v7814_v47  ;;  %v7944_v47 = vld [vmem:[#allocation5 + $0x9b8] sm:$0xf0] }
 0x11a   :  { %2328 = vmatpush.bf16.msrb.mxu2 %v8423_v13  ;;  %2303 = vmatpush.bf16.msrb.mxu0 %v7879_v25  ;;  %v11556_v52 = vld [vmem:[#allocation5 + $0xab4] sm:$0xf0]  ;;  %v11584_v48 = vld [vmem:[#allocation5 + $0xb9c] sm:$0xf] }
 0x11b   :  { %v8326_v53 = vld [vmem:[#allocation5 + $0xc98] sm:$0xf]  ;;  %v8071_v62 = vor.u32 %v11556_v52, %v8070_v49  ;;  %v8747_v49 = vor.u32 %v11720_v40, %v8744_v41  ;;  %v8456_v52 = vld [vmem:[#allocation5 + $0xdb8] sm:$0xf0]  ;;  %v8203_v56 = vor.u32 %v11584_v48, %v8200_v50 }
 0x11c   :  { %2341 = vmatpush.bf16.msrb.mxu3 %v8679_v17  ;;  %2316 = vmatpush.bf16.msrb.mxu1 %v8135_v28  ;;  %v11620_v54 = vld [vmem:[#allocation5 + $0xcb4] sm:$0xf0]  ;;  %v2077_v19 = vpop.f32.mrf.mxu2  ;;  %v11528_v28 = vld [vmem:[#allocation5 + $0x9dc] sm:$0xf] }
 0x11d   :  { %v8582_v57 = vld [vmem:[#allocation5 + $0xe98] sm:$0xf]  ;;  %v8327_v63 = vor.u32 %v11620_v54, %v8326_v53  ;;  %v11712_v53 = vld [vmem:[#allocation5 + $0xf9c] sm:$0xf] }
 0x11e   :  { %2329 = vmatpush.bf16.msrb.mxu2 %v8391_v29  ;;  %v11684_v58 = vld [vmem:[#allocation5 + $0xeb4] sm:$0xf0]  ;;  %2304 = vmatpush.bf16.msrb.mxu0 %v7847_v44  ;;  %v2090_v26 = vpop.f32.mrf.mxu3  ;;  %v7976_v29 = vld [vmem:[#allocation5 + $0x9f8] sm:$0xf0]  ;;  %v8235_v44 = vor.u32 %v11592_v31, %v8232_v33 }
 0x11f   :  { %v7782_v0 = vld [vmem:[#allocation5 + $0x858] sm:$0xf]  ;;  %v8583_v5 = vor.u32 %v11684_v58, %v8582_v57  ;;  %v7979_v43 = vor.u32 %v11528_v28, %v7976_v29  ;;  %v8712_v54 = vld [vmem:[#allocation5 + $0xfb8] sm:$0xf0] }
 0x120   :  { %2342 = vmatpush.bf16.msrb.mxu3 %v8647_v35  ;;  %2317 = vmatpush.bf16.msrb.mxu1 %v8103_v45  ;;  %v11484_v1 = vld [vmem:[#allocation5 + $0x874] sm:$0xf0]  ;;  %v8488_v35 = vld [vmem:[#allocation5 + $0xdf8] sm:$0xf0] }
 0x121   :  { %v8038_v2 = vld [vmem:[#allocation5 + $0xa58] sm:$0xf]  ;;  %v7783_v11 = vor.u32 %v11484_v1, %v7782_v0  ;;  %v8491_v45 = vor.u32 %v11656_v34, %v8488_v35  ;;  %v11512_v58 = vld [vmem:[#allocation5 + $0x95c] sm:$0xf] }
 0x122   :  { %2330 = vmatpush.bf16.msrb.mxu2 %v8359_v46  ;;  %v11548_v6 = vld [vmem:[#allocation5 + $0xa74] sm:$0xf0]  ;;  %2305 = vmatpush.bf16.msrb.mxu0 %v7815_v59  ;;  %v11520_v46 = vld [vmem:[#allocation5 + $0x99c] sm:$0xf] }
 0x123   :  { %v8294_v7 = vld [vmem:[#allocation5 + $0xc58] sm:$0xf]  ;;  %v8039_v14 = vor.u32 %v11548_v6, %v8038_v2  ;;  %v7947_v55 = vor.u32 %v11520_v46, %v7944_v47  ;;  %v7912_v59 = vld [vmem:[#allocation5 + $0x978] sm:$0xf0] }
 0x124   :  { %2343 = vmatpush.bf16.msrb.mxu3 %v8615_v51  ;;  %v11612_v8 = vld [vmem:[#allocation5 + $0xc74] sm:$0xf0]  ;;  %2318 = vmatpush.bf16.msrb.mxu1 %v8071_v62  ;;  %v11648_v51 = vld [vmem:[#allocation5 + $0xd9c] sm:$0xf]  ;;  %v8715_v62 = vor.u32 %v11712_v53, %v8712_v54 }
 0x125   :  { %v8550_v9 = vld [vmem:[#allocation5 + $0xe58] sm:$0xf]  ;;  %v8295_v15 = vor.u32 %v11612_v8, %v8294_v7  ;;  %v8459_v57 = vor.u32 %v11648_v51, %v8456_v52  ;;  %v11640_v0 = vld [vmem:[#allocation5 + $0xd5c] sm:$0xf] }
 0x126   :  { %v11676_v10 = vld [vmem:[#allocation5 + $0xe74] sm:$0xf0]  ;;  %2331 = vmatpush.bf16.msrb.mxu2 %v8327_v63  ;;  %2306 = vmatpush.bf16.msrb.mxu0 %v7783_v11  ;;  %v8168_v63 = vld [vmem:[#allocation5 + $0xb78] sm:$0xf0] }
 0x127   :  { %v7750_v12 = vld [vmem:[#allocation5 + $0x818] sm:$0xf]  ;;  %v8551_v21 = vor.u32 %v11676_v10, %v8550_v9  ;;  %v8424_v1 = vld [vmem:[#allocation5 + $0xd78] sm:$0xf0]  ;;  %v8171_v6 = vor.u32 %v11576_v61, %v8168_v63 }
 0x128   :  { %v11476_v13 = vld [vmem:[#allocation5 + $0x834] sm:$0xf0]  ;;  %2344 = vmatpush.bf16.msrb.mxu3 %v8583_v5  ;;  %2319 = vmatpush.bf16.msrb.mxu1 %v8039_v14  ;;  %v11704_v2 = vld [vmem:[#allocation5 + $0xf5c] sm:$0xf]  ;;  %v7915_v5 = vor.u32 %v11512_v58, %v7912_v59  ;;  %v8427_v7 = vor.u32 %v11640_v0, %v8424_v1 }
 0x129   :  { %v8006_v16 = vld [vmem:[#allocation5 + $0xa18] sm:$0xf]  ;;  %v7751_v32 = vor.u32 %v11476_v13, %v7750_v12  ;;  %v11504_v8 = vld [vmem:[#allocation5 + $0x91c] sm:$0xf]  ;;  %v8683_v11 = vor.u32 %v11704_v2, %v8680_v3 }
 0x12a   :  { %v11540_v17 = vld [vmem:[#allocation5 + $0xa34] sm:$0xf0]  ;;  %2332 = vmatpush.bf16.msrb.mxu2 %v8295_v15  ;;  %v7880_v9 = vld [vmem:[#allocation5 + $0x938] sm:$0xf0] }
 0x12b   :  { %v8262_v18 = vld [vmem:[#allocation5 + $0xc18] sm:$0xf]  ;;  %v8007_v36 = vor.u32 %v11540_v17, %v8006_v16  ;;  %2307 = vmatpush.bf16.msrb.mxu0 %v7751_v32  ;;  %v11568_v10 = vld [vmem:[#allocation5 + $0xb1c] sm:$0xf]  ;;  %v7883_v17 = vor.u32 %v11504_v8, %v7880_v9 }
 0x12c   :  { %v11604_v22 = vld [vmem:[#allocation5 + $0xc34] sm:$0xf0]  ;;  %2345 = vmatpush.bf16.msrb.mxu3 %v8551_v21  ;;  %v8136_v12 = vld [vmem:[#allocation5 + $0xb38] sm:$0xf0]  ;;  %v2114_v26 = vpop.f32.mrf.mxu1 }
 0x12d   :  { %v8518_v23 = vld [vmem:[#allocation5 + $0xe18] sm:$0xf]  ;;  %v8263_v39 = vor.u32 %v11604_v22, %v8262_v18  ;;  %2320 = vmatpush.bf16.msrb.mxu1 %v8007_v36  ;;  %v11632_v13 = vld [vmem:[#allocation5 + $0xd1c] sm:$0xf]  ;;  %v2101_v18 = vpop.f32.mrf.mxu0  ;;  %v8139_v19 = vor.u32 %v11568_v10, %v8136_v12 }
 0x12e   :  { %v11668_v25 = vld [vmem:[#allocation5 + $0xe34] sm:$0xf0]  ;;  %2308 = vmatmul.bf16.vlgmr.msrb.gmra.mxu0 %v12435_v30  ;;  %v8392_v14 = vld [vmem:[#allocation5 + $0xd38] sm:$0xf0]  ;;  %v2115_v33 = vadd.f32 %v2114_v26, %v2101_v18  ;;  %v11465_v26 = vld [vmem:[#allocation5 + $0x7dc] sm:$0xf0] }
 0x12f   :  { %v8519_v42 = vor.u32 %v11668_v25, %v8518_v23  ;;  %2333 = vmatpush.bf16.msrb.mxu2 %v8263_v39  ;;  %2352 = vmatpush.bf16.msra.mxu0 %v7979_v43  ;;  %v11696_v15 = vld [vmem:[#allocation5 + $0xf1c] sm:$0xf]  ;;  %v8395_v21 = vor.u32 %v11632_v13, %v8392_v14 }
 0x130   :  { %2321 = vmatmul.bf16.vlgmr.msrb.gmra.mxu1 %v12437_v37  ;;  %v8648_v16 = vld [vmem:[#allocation5 + $0xf38] sm:$0xf0] }
 0x131   :  { %2346 = vmatpush.bf16.msrb.mxu3 %v8519_v42  ;;  %2365 = vmatpush.bf16.msra.mxu1 %v8235_v44  ;;  %v11496_v22 = vld [vmem:[#allocation5 + $0x8dc] sm:$0xf]  ;;  %v8651_v28 = vor.u32 %v11696_v15, %v8648_v16 }
 0x132   :  { %2334 = vmatmul.bf16.vlgmr.msrb.gmra.mxu2 %v12431_v24  ;;  %v7848_v23 = vld [vmem:[#allocation5 + $0x8f8] sm:$0xf0] }
 0x133   :  { %2378 = vmatpush.bf16.msra.mxu2 %v8491_v45  ;;  %2353 = vmatpush.bf16.msra.mxu0 %v7947_v55  ;;  %v11560_v25 = vld [vmem:[#allocation5 + $0xadc] sm:$0xf]  ;;  %v7851_v36 = vor.u32 %v11496_v22, %v7848_v23  ;;  %v11401_v22 = vld [vmem:[#allocation5 + $0x5dc] sm:$0xf0] }
 0x134   :  { %2347 = vmatmul.bf16.vlgmr.msrb.gmra.mxu3 %v12433_v27  ;;  %v8104_v29 = vld [vmem:[#allocation5 + $0xaf8] sm:$0xf0]  ;;  %v2127_v44 = vpop.f32.mrf.mxu2  ;;  %v9230_v23 = vld [vmem:[#allocation5 + $0x7c0] sm:$0xf] }
 0x135   :  { %2391 = vmatpush.bf16.msra.mxu3 %v8747_v49  ;;  %2366 = vmatpush.bf16.msra.mxu1 %v8203_v56  ;;  %v11624_v31 = vld [vmem:[#allocation5 + $0xcdc] sm:$0xf]  ;;  %v8107_v39 = vor.u32 %v11560_v25, %v8104_v29  ;;  %v2128_v49 = vadd.f32 %v2127_v44, %v2115_v33  ;;  %v2103_v55 = vpop.f32.mrf.mxu0  ;;  %v8976_v29 = vld [vmem:[#allocation5 + $0x5e0] sm:$0xf0] }
 0x136   :  { %v8360_v32 = vld [vmem:[#allocation5 + $0xcf8] sm:$0xf0]  ;;  %v2140_v50 = vpop.f32.mrf.mxu3  ;;  %v11461_v33 = vld [vmem:[#allocation5 + $0x7c4] sm:$0xf]  ;;  %v11385_v55 = vld [vmem:[#allocation5 + $0x55c] sm:$0xf0] }
 0x137   :  { %2379 = vmatpush.bf16.msra.mxu2 %v8459_v57  ;;  %2354 = vmatpush.bf16.msra.mxu0 %v7915_v5  ;;  %v11688_v34 = vld [vmem:[#allocation5 + $0xedc] sm:$0xf]  ;;  %v8363_v40 = vor.u32 %v11624_v31, %v8360_v32  ;;  %v12475_v54 = vadd.f32 %v2140_v50, %v2128_v49  ;;  %v9200_v49 = vld [vmem:[#allocation5 + $0x7a0] sm:$0xf0] }
 0x138   :  { %v8616_v35 = vld [vmem:[#allocation5 + $0xef8] sm:$0xf0] }
 0x139   :  { %2392 = vmatpush.bf16.msra.mxu3 %v8715_v62  ;;  %2367 = vmatpush.bf16.msra.mxu1 %v8171_v6  ;;  %v11488_v41 = vld [vmem:[#allocation5 + $0x89c] sm:$0xf]  ;;  %v8619_v45 = vor.u32 %v11688_v34, %v8616_v35  ;;  %v2116_v62 = vpop.f32.mrf.mxu1  ;;  %v9232_v34 = vld [vmem:[#allocation5 + $0x7e0] sm:$0xf0] }
 0x13a   :  { %v7816_v42 = vld [vmem:[#allocation5 + $0x8b8] sm:$0xf0]  ;;  %v9235_v44 = vor.u32 %v11461_v33, %v9232_v34  ;;  %v11445_v62 = vld [vmem:[#allocation5 + $0x744] sm:$0xf]  ;;  %v9070_v33 = vld [vmem:[#allocation5 + $0x680] sm:$0xf] }
 0x13b   :  { %2380 = vmatpush.bf16.msra.mxu2 %v8427_v7  ;;  %2355 = vmatpush.bf16.msra.mxu0 %v7883_v17  ;;  %v11552_v43 = vld [vmem:[#allocation5 + $0xa9c] sm:$0xf]  ;;  %v7819_v53 = vor.u32 %v11488_v41, %v7816_v42  ;;  %v8942_v41 = vld [vmem:[#allocation5 + $0x580] sm:$0xf] }
 0x13c   :  { %v8072_v46 = vld [vmem:[#allocation5 + $0xab8] sm:$0xf0]  ;;  %v2129_v14 = vpop.f32.mrf.mxu2  ;;  %v11393_v42 = vld [vmem:[#allocation5 + $0x59c] sm:$0xf0] }
 0x13d   :  { %2393 = vmatpush.bf16.msra.mxu3 %v8683_v11  ;;  %2368 = vmatpush.bf16.msra.mxu1 %v8139_v19  ;;  %v11616_v47 = vld [vmem:[#allocation5 + $0xc9c] sm:$0xf]  ;;  %v8075_v56 = vor.u32 %v11552_v43, %v8072_v46  ;;  %v9198_v43 = vld [vmem:[#allocation5 + $0x780] sm:$0xf]  ;;  %v11389_v46 = vld [vmem:[#allocation5 + $0x584] sm:$0xf]  ;;  %v8943_v50 = vor.u32 %v11393_v42, %v8942_v41 }
 0x13e   :  { %v8328_v48 = vld [vmem:[#allocation5 + $0xcb8] sm:$0xf0]  ;;  %v2142_v19 = vpop.f32.mrf.mxu3  ;;  %v11369_v14 = vld [vmem:[#allocation5 + $0x4dc] sm:$0xf0] }
 0x13f   :  { %2381 = vmatpush.bf16.msra.mxu2 %v8395_v21  ;;  %v11680_v51 = vld [vmem:[#allocation5 + $0xe9c] sm:$0xf]  ;;  %2356 = vmatpush.bf16.msra.mxu0 %v7851_v36  ;;  %v8331_v57 = vor.u32 %v11616_v47, %v8328_v48  ;;  %v8974_v21 = vld [vmem:[#allocation5 + $0x5c0] sm:$0xf]  ;;  %v8944_v47 = vld [vmem:[#allocation5 + $0x5a0] sm:$0xf0] }
 0x140   :  { %v8584_v52 = vld [vmem:[#allocation5 + $0xeb8] sm:$0xf0]  ;;  %v8975_v36 = vor.u32 %v11401_v22, %v8974_v21  ;;  %v11453_v48 = vld [vmem:[#allocation5 + $0x784] sm:$0xf] }
 0x141   :  { %2394 = vmatpush.bf16.msra.mxu3 %v8651_v28  ;;  %2369 = vmatpush.bf16.msra.mxu1 %v8107_v39  ;;  %v11480_v58 = vld [vmem:[#allocation5 + $0x85c] sm:$0xf]  ;;  %v8587_v63 = vor.u32 %v11680_v51, %v8584_v52  ;;  %v11397_v28 = vld [vmem:[#allocation5 + $0x5c4] sm:$0xf]  ;;  %v9231_v39 = vor.u32 %v11465_v26, %v9230_v23  ;;  %v8947_v52 = vor.u32 %v11389_v46, %v8944_v47 }
 0x142   :  { %v7784_v59 = vld [vmem:[#allocation5 + $0x878] sm:$0xf0]  ;;  %v11365_v19 = vld [vmem:[#allocation5 + $0x4c4] sm:$0xf] }
 0x143   :  { %2382 = vmatpush.bf16.msra.mxu2 %v8363_v40  ;;  %v11544_v61 = vld [vmem:[#allocation5 + $0xa5c] sm:$0xf]  ;;  %2357 = vmatpush.bf16.msra.mxu0 %v7819_v53  ;;  %v7787_v6 = vor.u32 %v11480_v58, %v7784_v59  ;;  %v8979_v40 = vor.u32 %v11397_v28, %v8976_v29  ;;  %v8910_v53 = vld [vmem:[#allocation5 + $0x540] sm:$0xf]  ;;  %v11381_v59 = vld [vmem:[#allocation5 + $0x544] sm:$0xf] }
 0x144   :  { %v8040_v0 = vld [vmem:[#allocation5 + $0xa78] sm:$0xf0]  ;;  %v11449_v58 = vld [vmem:[#allocation5 + $0x75c] sm:$0xf0]  ;;  %v8848_v21 = vld [vmem:[#allocation5 + $0x4e0] sm:$0xf0] }
 0x145   :  { %2395 = vmatpush.bf16.msra.mxu3 %v8619_v45  ;;  %v11608_v1 = vld [vmem:[#allocation5 + $0xc5c] sm:$0xf]  ;;  %2370 = vmatpush.bf16.msra.mxu1 %v8075_v56  ;;  %v8043_v9 = vor.u32 %v11544_v61, %v8040_v0  ;;  %v11457_v45 = vld [vmem:[#allocation5 + $0x79c] sm:$0xf0]  ;;  %v8912_v61 = vld [vmem:[#allocation5 + $0x560] sm:$0xf0]  ;;  %v8911_v0 = vor.u32 %v11385_v55, %v8910_v53  ;;  %v8851_v29 = vor.u32 %v11365_v19, %v8848_v21  ;;  %v12246_v21 = vpop.eup %12245 }
 0x146   :  { %v8296_v2 = vld [vmem:[#allocation5 + $0xc78] sm:$0xf0]  ;;  %v9199_v51 = vor.u32 %v11457_v45, %v9198_v43  ;;  %v9166_v56 = vld [vmem:[#allocation5 + $0x740] sm:$0xf]  ;;  %v11429_v23 = vld [vmem:[#allocation5 + $0x6c4] sm:$0xf] }
 0x147   :  { %v11672_v3 = vld [vmem:[#allocation5 + $0xe5c] sm:$0xf]  ;;  %2383 = vmatpush.bf16.msra.mxu2 %v8331_v57  ;;  %v8299_v10 = vor.u32 %v11608_v1, %v8296_v2  ;;  %2358 = vmatpush.bf16.msra.mxu0 %v7787_v6  ;;  %v9203_v57 = vor.u32 %v11453_v48, %v9200_v49  ;;  %v9167_v1 = vor.u32 %v11449_v58, %v9166_v56  ;;  %v9134_v6 = vld [vmem:[#allocation5 + $0x700] sm:$0xf]  ;;  %v11421_v43 = vld [vmem:[#allocation5 + $0x684] sm:$0xf] }
 0x148   :  { %v8552_v5 = vld [vmem:[#allocation5 + $0xe78] sm:$0xf0]  ;;  %v8915_v2 = vor.u32 %v11381_v59, %v8912_v61  ;;  %v11417_v56 = vld [vmem:[#allocation5 + $0x65c] sm:$0xf0]  ;;  %v8784_v58 = vld [vmem:[#allocation5 + $0x460] sm:$0xf0] }
 0x149   :  { %v11472_v7 = vld [vmem:[#allocation5 + $0x81c] sm:$0xf]  ;;  %2396 = vmatpush.bf16.msra.mxu3 %v8587_v63  ;;  %v8555_v15 = vor.u32 %v11672_v3, %v8552_v5  ;;  %2371 = vmatpush.bf16.msra.mxu1 %v8043_v9  ;;  %v9168_v63 = vld [vmem:[#allocation5 + $0x760] sm:$0xf0]  ;;  %v8878_v3 = vld [vmem:[#allocation5 + $0x500] sm:$0xf] }
 0x14a   :  { %v7752_v8 = vld [vmem:[#allocation5 + $0x838] sm:$0xf0]  ;;  %v11377_v5 = vld [vmem:[#allocation5 + $0x51c] sm:$0xf0]  ;;  %v8880_v9 = vld [vmem:[#allocation5 + $0x520] sm:$0xf0] }
 0x14b   :  { %v11536_v11 = vld [vmem:[#allocation5 + $0xa1c] sm:$0xf]  ;;  %v7755_v25 = vor.u32 %v11472_v7, %v7752_v8  ;;  %2384 = vmatpush.bf16.msra.mxu2 %v8299_v10  ;;  %v9171_v7 = vor.u32 %v11445_v62, %v9168_v63  ;;  %v11373_v8 = vld [vmem:[#allocation5 + $0x504] sm:$0xf]  ;;  %v8750_v63 = vld [vmem:[#allocation5 + $0x400] sm:$0xf] }
 0x14c   :  { %v8008_v12 = vld [vmem:[#allocation5 + $0xa38] sm:$0xf0]  ;;  %v11437_v10 = vld [vmem:[#allocation5 + $0x704] sm:$0xf] }
 0x14d   :  { %v11600_v13 = vld [vmem:[#allocation5 + $0xc1c] sm:$0xf]  ;;  %v8011_v31 = vor.u32 %v11536_v11, %v8008_v12  ;;  %2397 = vmatpush.bf16.msra.mxu3 %v8555_v15  ;;  %2359 = vmatpush.bf16.msra.mxu0 %v7755_v25  ;;  %v2153_v11 = vpop.f32.mrf.mxu0  ;;  %v8883_v12 = vor.u32 %v11373_v8, %v8880_v9  ;;  %v9102_v15 = vld [vmem:[#allocation5 + $0x6c0] sm:$0xf]  ;;  %v9104_v25 = vld [vmem:[#allocation5 + $0x6e0] sm:$0xf0] }
 0x14e   :  { %v8264_v16 = vld [vmem:[#allocation5 + $0xc38] sm:$0xf0]  ;;  %v11413_v59 = vld [vmem:[#allocation5 + $0x644] sm:$0xf] }
 0x14f   :  { %v11664_v17 = vld [vmem:[#allocation5 + $0xe1c] sm:$0xf]  ;;  %v8267_v32 = vor.u32 %v11600_v13, %v8264_v16  ;;  %2372 = vmatpush.bf16.msra.mxu1 %v8011_v31  ;;  %v8846_v13 = vld [vmem:[#allocation5 + $0x4c0] sm:$0xf]  ;;  %v2166_v16 = vpop.f32.mrf.mxu1  ;;  %v9040_v61 = vld [vmem:[#allocation5 + $0x660] sm:$0xf0] }
 0x150   :  { %v8520_v18 = vld [vmem:[#allocation5 + $0xe38] sm:$0xf0]  ;;  %2360 = vmatmul.bf16.vlgmr.msra.gmra.mxu0 %v12435_v30  ;;  %v11441_v30 = vld [vmem:[#allocation5 + $0x71c] sm:$0xf0]  ;;  %v2167_v22 = vadd.f32 %v2166_v16, %v2153_v11  ;;  %v8847_v26 = vor.u32 %v11369_v14, %v8846_v13  ;;  %v8752_v8 = vld [vmem:[#allocation5 + $0x420] sm:$0xf0] }
 0x151   :  { %v8523_v35 = vor.u32 %v11664_v17, %v8520_v18  ;;  %2385 = vmatpush.bf16.msra.mxu2 %v8267_v32  ;;  %3044 = vmatpush.bf16.msrb.mxu0 %v8975_v36  ;;  %v11433_v18 = vld [vmem:[#allocation5 + $0x6dc] sm:$0xf0]  ;;  %v11405_v9 = vld [vmem:[#allocation5 + $0x604] sm:$0xf]  ;;  %v11402_v11 = vld [vmem:[#allocation5 + $0x5e4] sm:$0xf0] }
 0x152   :  { %2373 = vmatmul.bf16.vlgmr.msra.gmra.mxu1 %v12437_v37  ;;  %v9136_v37 = vld [vmem:[#allocation5 + $0x720] sm:$0xf0]  ;;  %v9103_v28 = vor.u32 %v11433_v18, %v9102_v15  ;;  %v8814_v31 = vld [vmem:[#allocation5 + $0x480] sm:$0xf]  ;;  %v11398_v13 = vld [vmem:[#allocation5 + $0x5cc] sm:$0xf] }
 0x153   :  { %2398 = vmatpush.bf16.msra.mxu3 %v8523_v35  ;;  %3057 = vmatpush.bf16.msrb.mxu1 %v9231_v39  ;;  %v9139_v17 = vor.u32 %v11437_v10, %v9136_v37  ;;  %v11361_v32 = vld [vmem:[#allocation5 + $0x49c] sm:$0xf0]  ;;  %v9107_v35 = vor.u32 %v11429_v23, %v9104_v25  ;;  %v11357_v39 = vld [vmem:[#allocation5 + $0x484] sm:$0xf]  ;;  %v8984_v14 = vld [vmem:[#allocation5 + $0x5e8] sm:$0xf0] }
 0x154   :  { %2386 = vmatmul.bf16.vlgmr.msra.gmra.mxu2 %v12431_v24  ;;  %v8879_v24 = vor.u32 %v11377_v5, %v8878_v3  ;;  %v2179_v34 = vpop.f32.mrf.mxu2  ;;  %v11425_v36 = vld [vmem:[#allocation5 + $0x69c] sm:$0xf0]  ;;  %v8815_v45 = vor.u32 %v11361_v32, %v8814_v31  ;;  %v9008_v10 = vld [vmem:[#allocation5 + $0x620] sm:$0xf0]  ;;  %v8987_v23 = vor.u32 %v11398_v13, %v8984_v14  ;;  %v8950_v25 = vld [vmem:[#allocation5 + $0x588] sm:$0xf] }
 0x155   :  { %3070 = vmatpush.bf16.msrb.mxu2 %v8979_v40  ;;  %3045 = vmatpush.bf16.msrb.mxu0 %v8943_v50  ;;  %v8816_v40 = vld [vmem:[#allocation5 + $0x4a0] sm:$0xf0]  ;;  %v2180_v41 = vadd.f32 %v2179_v34, %v2167_v22  ;;  %v2155_v47 = vpop.f32.mrf.mxu0  ;;  %v9071_v48 = vor.u32 %v11425_v36, %v9070_v33  ;;  %v8782_v50 = vld [vmem:[#allocation5 + $0x440] sm:$0xf]  ;;  %v9011_v18 = vor.u32 %v11405_v9, %v9008_v10  ;;  %v11458_v32 = vld [vmem:[#allocation5 + $0x7a4] sm:$0xf0] }
 0x156   :  { %2399 = vmatmul.bf16.vlgmr.msra.gmra.mxu3 %v12433_v27  ;;  %v9135_v27 = vor.u32 %v11441_v30, %v9134_v6  ;;  %v2192_v42 = vpop.f32.mrf.mxu3  ;;  %v8819_v49 = vor.u32 %v11357_v39, %v8816_v40  ;;  %v9006_v3 = vld [vmem:[#allocation5 + $0x600] sm:$0xf]  ;;  %v11341_v6 = vld [vmem:[#allocation5 + $0x404] sm:$0xf]  ;;  %v9043_v30 = vor.u32 %v11413_v59, %v9040_v61  ;;  %v11390_v33 = vld [vmem:[#allocation5 + $0x58c] sm:$0xf]  ;;  %v12485_v39 = vpack.c.bf16 %v12246_v21, %v12246_v21 }
 0x157   :  { %3083 = vmatpush.bf16.msrb.mxu3 %v9235_v44  ;;  %3058 = vmatpush.bf16.msrb.mxu1 %v9199_v51  ;;  %v9072_v44 = vld [vmem:[#allocation5 + $0x6a0] sm:$0xf0]  ;;  %v12481_v46 = vadd.f32 %v2192_v42, %v2180_v41  ;;  %v11353_v51 = vld [vmem:[#allocation5 + $0x45c] sm:$0xf0]  ;;  %v2168_v53 = vpop.f32.mrf.mxu1  ;;  %v8755_v16 = vor.u32 %v11341_v6, %v8752_v8  ;;  %v8952_v34 = vld [vmem:[#allocation5 + $0x5a8] sm:$0xf0] }
 0x158   :  { %v9075_v55 = vor.u32 %v11421_v43, %v9072_v44  ;;  %v8783_v62 = vor.u32 %v11353_v51, %v8782_v50  ;;  %v11409_v5 = vld [vmem:[#allocation5 + $0x61c] sm:$0xf0]  ;;  %v9208_v36 = vld [vmem:[#allocation5 + $0x7a8] sm:$0xf0]  ;;  %v8955_v43 = vor.u32 %v11390_v33, %v8952_v34  ;;  %v8918_v44 = vld [vmem:[#allocation5 + $0x548] sm:$0xf] }
 0x159   :  { %3071 = vmatpush.bf16.msrb.mxu2 %v8947_v52  ;;  %3046 = vmatpush.bf16.msrb.mxu0 %v8911_v0  ;;  %v9038_v52 = vld [vmem:[#allocation5 + $0x640] sm:$0xf]  ;;  %v9007_v15 = vor.u32 %v11409_v5, %v9006_v3  ;;  %v9174_v47 = vld [vmem:[#allocation5 + $0x748] sm:$0xf]  ;;  %v11382_v50 = vld [vmem:[#allocation5 + $0x54c] sm:$0xf] }
 0x15a   :  { %v11345_v0 = vld [vmem:[#allocation5 + $0x41c] sm:$0xf0]  ;;  %v8920_v51 = vld [vmem:[#allocation5 + $0x568] sm:$0xf0]  ;;  %v11378_v59 = vld [vmem:[#allocation5 + $0x524] sm:$0xf0] }
 0x15b   :  { %3084 = vmatpush.bf16.msrb.mxu3 %v9203_v57  ;;  %3059 = vmatpush.bf16.msrb.mxu1 %v9167_v1  ;;  %v11349_v57 = vld [vmem:[#allocation5 + $0x444] sm:$0xf]  ;;  %v9039_v1 = vor.u32 %v11417_v56, %v9038_v52  ;;  %v8751_v20 = vor.u32 %v11345_v0, %v8750_v63  ;;  %v11446_v52 = vld [vmem:[#allocation5 + $0x74c] sm:$0xf]  ;;  %v9142_v61 = vld [vmem:[#allocation5 + $0x708] sm:$0xf] }
 0x15c   :  { %v9176_v53 = vld [vmem:[#allocation5 + $0x768] sm:$0xf0]  ;;  %v11442_v63 = vld [vmem:[#allocation5 + $0x724] sm:$0xf0] }
 0x15d   :  { %3072 = vmatpush.bf16.msrb.mxu2 %v8915_v2  ;;  %3047 = vmatpush.bf16.msrb.mxu0 %v8879_v24  ;;  %v8787_v2 = vor.u32 %v11349_v57, %v8784_v58  ;;  %v8982_v24 = vld [vmem:[#allocation5 + $0x5c8] sm:$0xf]  ;;  %v8923_v57 = vor.u32 %v11382_v50, %v8920_v51  ;;  %v11374_v0 = vld [vmem:[#allocation5 + $0x50c] sm:$0xf] }
 0x15e   :  { %v2194_v37 = vpop.f32.mrf.mxu3  ;;  %v8983_v19 = vor.u32 %v11402_v11, %v8982_v24  ;;  %v8886_v58 = vld [vmem:[#allocation5 + $0x508] sm:$0xf]  ;;  %v9144_v3 = vld [vmem:[#allocation5 + $0x728] sm:$0xf0] }
 0x15f   :  { %3085 = vmatpush.bf16.msrb.mxu3 %v9171_v7  ;;  %3060 = vmatpush.bf16.msrb.mxu1 %v9135_v27  ;;  %v2181_v7 = vpop.f32.mrf.mxu2  ;;  %v9238_v27 = vld [vmem:[#allocation5 + $0x7c8] sm:$0xf]  ;;  %v8887_v5 = vor.u32 %v11378_v59, %v8886_v58  ;;  %v11430_v13 = vld [vmem:[#allocation5 + $0x6cc] sm:$0xf] }
 0x160   :  { %v9143_v7 = vor.u32 %v11442_v63, %v9142_v61  ;;  %v8854_v8 = vld [vmem:[#allocation5 + $0x4c8] sm:$0xf]  ;;  %v9112_v14 = vld [vmem:[#allocation5 + $0x6e8] sm:$0xf0] }
 0x161   :  { %3073 = vmatpush.bf16.msrb.mxu2 %v8883_v12  ;;  %3048 = vmatpush.bf16.msrb.mxu0 %v8847_v26  ;;  %v11466_v12 = vld [vmem:[#allocation5 + $0x7e4] sm:$0xf0]  ;;  %v8792_v50 = vld [vmem:[#allocation5 + $0x468] sm:$0xf0] }
 0x162   :  { %v9239_v22 = vor.u32 %v11466_v12, %v9238_v27  ;;  %v11394_v26 = vld [vmem:[#allocation5 + $0x5a4] sm:$0xf0]  ;;  %v11366_v27 = vld [vmem:[#allocation5 + $0x4cc] sm:$0xf] }
 0x163   :  { %3086 = vmatpush.bf16.msrb.mxu3 %v9139_v17  ;;  %3061 = vmatpush.bf16.msrb.mxu1 %v9103_v28  ;;  %v11462_v17 = vld [vmem:[#allocation5 + $0x7cc] sm:$0xf]  ;;  %v9206_v28 = vld [vmem:[#allocation5 + $0x788] sm:$0xf]  ;;  %v8951_v40 = vor.u32 %v11394_v26, %v8950_v25 }
 0x164   :  { %v9243_v31 = vor.u32 %v11462_v17, %v9240_v38  ;;  %v9207_v42 = vor.u32 %v11458_v32, %v9206_v28  ;;  %v11370_v9 = vld [vmem:[#allocation5 + $0x4e4] sm:$0xf0]  ;;  %v11358_v25 = vld [vmem:[#allocation5 + $0x48c] sm:$0xf] }
 0x165   :  { %3074 = vmatpush.bf16.msrb.mxu2 %v8851_v29  ;;  %3049 = vmatpush.bf16.msrb.mxu0 %v8815_v45  ;;  %v12248_v29 = vpop.eup %12247  ;;  %v11386_v45 = vld [vmem:[#allocation5 + $0x564] sm:$0xf0]  ;;  %v8824_v26 = vld [vmem:[#allocation5 + $0x4a8] sm:$0xf0] }
 0x166   :  { %v12487_v41 = vpack.c.bf16 %v12248_v29, %v12248_v29  ;;  %v9110_v10 = vld [vmem:[#allocation5 + $0x6c8] sm:$0xf]  ;;  %v9080_v32 = vld [vmem:[#allocation5 + $0x6a8] sm:$0xf0] }
 0x167   :  { %3087 = vmatpush.bf16.msrb.mxu3 %v9107_v35  ;;  %3062 = vmatpush.bf16.msrb.mxu1 %v9071_v48  ;;  %v11454_v35 = vld [vmem:[#allocation5 + $0x78c] sm:$0xf]  ;;  %v11434_v11 = vld [vmem:[#allocation5 + $0x6e4] sm:$0xf0] }
 0x168   :  { %v9211_v48 = vor.u32 %v11454_v35, %v9208_v36  ;;  %v8822_v38 = vld [vmem:[#allocation5 + $0x488] sm:$0xf]  ;;  %v11414_v51 = vld [vmem:[#allocation5 + $0x64c] sm:$0xf] }
 0x169   :  { %3075 = vmatpush.bf16.msrb.mxu2 %v8819_v49  ;;  %3050 = vmatpush.bf16.msrb.mxu0 %v8783_v62  ;;  %v11450_v49 = vld [vmem:[#allocation5 + $0x764] sm:$0xf0]  ;;  %v9179_v62 = vor.u32 %v11446_v52, %v9176_v53  ;;  %v9048_v52 = vld [vmem:[#allocation5 + $0x668] sm:$0xf0] }
 0x16a   :  { %v9175_v56 = vor.u32 %v11450_v49, %v9174_v47  ;;  %v2205_v6 = vpop.f32.mrf.mxu0  ;;  %v11350_v49 = vld [vmem:[#allocation5 + $0x44c] sm:$0xf]  ;;  %v9014_v59 = vld [vmem:[#allocation5 + $0x608] sm:$0xf] }
 0x16b   :  { %3088 = vmatpush.bf16.msrb.mxu3 %v9075_v55  ;;  %3063 = vmatpush.bf16.msrb.mxu1 %v9039_v1  ;;  %v8919_v55 = vor.u32 %v11386_v45, %v8918_v44  ;;  %v8888_v1 = vld [vmem:[#allocation5 + $0x528] sm:$0xf0]  ;;  %v9046_v44 = vld [vmem:[#allocation5 + $0x648] sm:$0xf]  ;;  %v8795_v58 = vor.u32 %v11350_v49, %v8792_v50  ;;  %v8894_v49 = vld [vmem:[#allocation5 + $0x510] sm:$0xf] }
 0x16c   :  { %v2218_v37 = vpop.f32.mrf.mxu1  ;;  %v11410_v61 = vld [vmem:[#allocation5 + $0x624] sm:$0xf0]  ;;  %v11379_v50 = vld [vmem:[#allocation5 + $0x52c] sm:$0xf0] }
 0x16d   :  { %3076 = vmatpush.bf16.msrb.mxu2 %v8787_v2  ;;  %3051 = vmatpush.bf16.msrb.mxu0 %v8751_v20  ;;  %v11438_v2 = vld [vmem:[#allocation5 + $0x70c] sm:$0xf]  ;;  %v2219_v12 = vadd.f32 %v2218_v37, %v2205_v6  ;;  %v8990_v6 = vld [vmem:[#allocation5 + $0x5d0] sm:$0xf]  ;;  %v8992_v37 = vld [vmem:[#allocation5 + $0x5f0] sm:$0xf0] }
 0x16e   :  { %v9147_v24 = vor.u32 %v11438_v2, %v9144_v3  ;;  %v8856_v20 = vld [vmem:[#allocation5 + $0x4e8] sm:$0xf0] }
 0x16f   :  { %3089 = vmatpush.bf16.msrb.mxu3 %v9043_v30  ;;  %3064 = vmatpush.bf16.msrb.mxu1 %v9007_v15  ;;  %v8891_v30 = vor.u32 %v11374_v0, %v8888_v1  ;;  %v8855_v15 = vor.u32 %v11370_v9, %v8854_v8  ;;  %v8859_v17 = vor.u32 %v11366_v27, %v8856_v20  ;;  %v8760_v1 = vld [vmem:[#allocation5 + $0x428] sm:$0xf0]  ;;  %v11467_v9 = vld [vmem:[#allocation5 + $0x7ec] sm:$0xf0]  ;;  %v11463_v27 = vld [vmem:[#allocation5 + $0x7d4] sm:$0xf] }
 0x170   :  { %3052 = vmatmul.bf16.vlgmr.msrb.gmra.mxu0 %v12485_v39  ;;  %v9051_v0 = vor.u32 %v11414_v51, %v9048_v52  ;;  %v11406_v2 = vld [vmem:[#allocation5 + $0x60c] sm:$0xf]  ;;  %v9248_v20 = vld [vmem:[#allocation5 + $0x7f0] sm:$0xf0]  ;;  %v9150_v51 = vld [vmem:[#allocation5 + $0x710] sm:$0xf] }
 0x171   :  { %3077 = vmatpush.bf16.msrb.mxu2 %v8755_v16  ;;  %3096 = vmatpush.bf16.msra.mxu0 %v8983_v19  ;;  %v9111_v16 = vor.u32 %v11434_v11, %v9110_v10  ;;  %v9078_v19 = vld [vmem:[#allocation5 + $0x688] sm:$0xf]  ;;  %v9016_v3 = vld [vmem:[#allocation5 + $0x628] sm:$0xf0]  ;;  %v11399_v10 = vld [vmem:[#allocation5 + $0x5d4] sm:$0xf] }
 0x172   :  { %3065 = vmatmul.bf16.vlgmr.msrb.gmra.mxu1 %v12487_v41  ;;  %v2207_v35 = vpop.f32.mrf.mxu0 }
 0x173   :  { %3090 = vmatpush.bf16.msrb.mxu3 %v9011_v18  ;;  %3109 = vmatpush.bf16.msra.mxu1 %v9239_v22  ;;  %v11362_v18 = vld [vmem:[#allocation5 + $0x4a4] sm:$0xf0]  ;;  %v9115_v22 = vor.u32 %v11430_v13, %v9112_v14 }
 0x174   :  { %3078 = vmatmul.bf16.vlgmr.msrb.gmra.mxu2 %v12485_v39  ;;  %v2231_v21 = vpop.f32.mrf.mxu2  ;;  %v8823_v33 = vor.u32 %v11362_v18, %v8822_v38  ;;  %v2220_v45 = vpop.f32.mrf.mxu1  ;;  %v9214_v38 = vld [vmem:[#allocation5 + $0x790] sm:$0xf]  ;;  %v9251_v18 = vor.u32 %v11463_v27, %v9248_v20 }
 0x175   :  { %3122 = vmatpush.bf16.msra.mxu2 %v8987_v23  ;;  %3097 = vmatpush.bf16.msra.mxu0 %v8951_v40  ;;  %v11426_v23 = vld [vmem:[#allocation5 + $0x6a4] sm:$0xf0]  ;;  %v2232_v28 = vadd.f32 %v2231_v21, %v2219_v12  ;;  %v8827_v40 = vor.u32 %v11358_v25, %v8824_v26  ;;  %v9019_v12 = vor.u32 %v11406_v2, %v9016_v3  ;;  %v11391_v21 = vld [vmem:[#allocation5 + $0x594] sm:$0xf]  ;;  %v9118_v2 = vld [vmem:[#allocation5 + $0x6d0] sm:$0xf] }
 0x176   :  { %3091 = vmatmul.bf16.vlgmr.msrb.gmra.mxu3 %v12487_v41  ;;  %v2244_v29 = vpop.f32.mrf.mxu3  ;;  %v9079_v36 = vor.u32 %v11426_v23, %v9078_v19  ;;  %v11459_v19 = vld [vmem:[#allocation5 + $0x7ac] sm:$0xf0]  ;;  %v11455_v23 = vld [vmem:[#allocation5 + $0x794] sm:$0xf] }
 0x177   :  { %3135 = vmatpush.bf16.msra.mxu3 %v9243_v31  ;;  %3110 = vmatpush.bf16.msra.mxu1 %v9207_v42  ;;  %v11422_v31 = vld [vmem:[#allocation5 + $0x68c] sm:$0xf]  ;;  %v12493_v34 = vadd.f32 %v2244_v29, %v2232_v28  ;;  %v8790_v42 = vld [vmem:[#allocation5 + $0x448] sm:$0xf]  ;;  %v9216_v25 = vld [vmem:[#allocation5 + $0x7b0] sm:$0xf0]  ;;  %v9215_v28 = vor.u32 %v11459_v19, %v9214_v38 }
 0x178   :  { %v9083_v47 = vor.u32 %v11422_v31, %v9080_v32  ;;  %v8926_v31 = vld [vmem:[#allocation5 + $0x550] sm:$0xf]  ;;  %v9219_v35 = vor.u32 %v11455_v23, %v9216_v25  ;;  %v11423_v19 = vld [vmem:[#allocation5 + $0x694] sm:$0xf] }
 0x179   :  { %3123 = vmatpush.bf16.msra.mxu2 %v8955_v43  ;;  %3098 = vmatpush.bf16.msra.mxu0 %v8919_v55  ;;  %v11354_v43 = vld [vmem:[#allocation5 + $0x464] sm:$0xf0]  ;;  %v11387_v32 = vld [vmem:[#allocation5 + $0x56c] sm:$0xf0] }
 0x17a   :  { %v8791_v53 = vor.u32 %v11354_v43, %v8790_v42  ;;  %v8758_v55 = vld [vmem:[#allocation5 + $0x408] sm:$0xf]  ;;  %v8928_v42 = vld [vmem:[#allocation5 + $0x570] sm:$0xf0]  ;;  %v8927_v45 = vor.u32 %v11387_v32, %v8926_v31  ;;  %v8830_v27 = vld [vmem:[#allocation5 + $0x490] sm:$0xf] }
 0x17b   :  { %3136 = vmatpush.bf16.msra.mxu3 %v9211_v48  ;;  %3111 = vmatpush.bf16.msra.mxu1 %v9175_v56  ;;  %v11418_v48 = vld [vmem:[#allocation5 + $0x664] sm:$0xf0]  ;;  %v11447_v43 = vld [vmem:[#allocation5 + $0x754] sm:$0xf]  ;;  %v11363_v20 = vld [vmem:[#allocation5 + $0x4ac] sm:$0xf0] }
 0x17c   :  { %v11346_v56 = vld [vmem:[#allocation5 + $0x424] sm:$0xf0]  ;;  %v2233_v63 = vpop.f32.mrf.mxu2  ;;  %v11355_v31 = vld [vmem:[#allocation5 + $0x46c] sm:$0xf0] }
 0x17d   :  { %3124 = vmatpush.bf16.msra.mxu2 %v8923_v57  ;;  %3099 = vmatpush.bf16.msra.mxu0 %v8887_v5  ;;  %v9047_v57 = vor.u32 %v11418_v48, %v9046_v44  ;;  %v8759_v8 = vor.u32 %v11346_v56, %v8758_v55  ;;  %v9184_v44 = vld [vmem:[#allocation5 + $0x770] sm:$0xf0]  ;;  %v9054_v32 = vld [vmem:[#allocation5 + $0x650] sm:$0xf] }
 0x17e   :  { %v2246_v5 = vpop.f32.mrf.mxu3  ;;  %v9187_v52 = vor.u32 %v11447_v43, %v9184_v44  ;;  %v11375_v55 = vld [vmem:[#allocation5 + $0x514] sm:$0xf] }
 0x17f   :  { %3137 = vmatpush.bf16.msra.mxu3 %v9179_v62  ;;  %3112 = vmatpush.bf16.msra.mxu1 %v9143_v7  ;;  %v11342_v62 = vld [vmem:[#allocation5 + $0x40c] sm:$0xf]  ;;  %v11403_v7 = vld [vmem:[#allocation5 + $0x5ec] sm:$0xf0]  ;;  %v8896_v56 = vld [vmem:[#allocation5 + $0x530] sm:$0xf0] }
 0x180   :  { %v8763_v11 = vor.u32 %v11342_v62, %v8760_v1  ;;  %v8991_v13 = vor.u32 %v11403_v7, %v8990_v6  ;;  %v8899_v63 = vor.u32 %v11375_v55, %v8896_v56  ;;  %v11371_v1 = vld [vmem:[#allocation5 + $0x4ec] sm:$0xf0]  ;;  %v11367_v7 = vld [vmem:[#allocation5 + $0x4d4] sm:$0xf] }
 0x181   :  { %3125 = vmatpush.bf16.msra.mxu2 %v8891_v30  ;;  %3100 = vmatpush.bf16.msra.mxu0 %v8855_v15  ;;  %v9246_v30 = vld [vmem:[#allocation5 + $0x7d0] sm:$0xf]  ;;  %v8995_v15 = vor.u32 %v11399_v10, %v8992_v37  ;;  %v9120_v10 = vld [vmem:[#allocation5 + $0x6f0] sm:$0xf0] }
 0x182   :  { %v9247_v14 = vor.u32 %v11467_v9, %v9246_v30  ;;  %v11435_v6 = vld [vmem:[#allocation5 + $0x6ec] sm:$0xf0]  ;;  %v8864_v30 = vld [vmem:[#allocation5 + $0x4f0] sm:$0xf0] }
 0x183   :  { %3138 = vmatpush.bf16.msra.mxu3 %v9147_v24  ;;  %3113 = vmatpush.bf16.msra.mxu1 %v9111_v16  ;;  %v9015_v24 = vor.u32 %v11410_v61, %v9014_v59  ;;  %v8958_v16 = vld [vmem:[#allocation5 + $0x590] sm:$0xf]  ;;  %v8895_v59 = vor.u32 %v11379_v50, %v8894_v49  ;;  %v11431_v9 = vld [vmem:[#allocation5 + $0x6d4] sm:$0xf] }
 0x184   :  { %v11415_v43 = vld [vmem:[#allocation5 + $0x654] sm:$0xf] }
 0x185   :  { %3126 = vmatpush.bf16.msra.mxu2 %v8859_v17  ;;  %3101 = vmatpush.bf16.msra.mxu0 %v8823_v33  ;;  %v11395_v17 = vld [vmem:[#allocation5 + $0x5ac] sm:$0xf0]  ;;  %v9056_v44 = vld [vmem:[#allocation5 + $0x670] sm:$0xf0] }
 0x186   :  { %v8959_v26 = vor.u32 %v11395_v17, %v8958_v16  ;;  %v9182_v33 = vld [vmem:[#allocation5 + $0x750] sm:$0xf]  ;;  %v11359_v16 = vld [vmem:[#allocation5 + $0x494] sm:$0xf]  ;;  %v9059_v56 = vor.u32 %v11415_v43, %v9056_v44  ;;  %v11380_v43 = vld [vmem:[#allocation5 + $0x534] sm:$0xf0] }
 0x187   :  { %3139 = vmatpush.bf16.msra.mxu3 %v9115_v22  ;;  %3114 = vmatpush.bf16.msra.mxu1 %v9079_v36  ;;  %v8960_v22 = vld [vmem:[#allocation5 + $0x5b0] sm:$0xf0]  ;;  %v11451_v36 = vld [vmem:[#allocation5 + $0x76c] sm:$0xf0]  ;;  %v9158_v44 = vld [vmem:[#allocation5 + $0x718] sm:$0xf] }
 0x188   :  { %v8963_v29 = vor.u32 %v11391_v21, %v8960_v22  ;;  %v8832_v17 = vld [vmem:[#allocation5 + $0x4b0] sm:$0xf0]  ;;  %v8831_v22 = vor.u32 %v11363_v20, %v8830_v27  ;;  %v11396_v27 = vld [vmem:[#allocation5 + $0x5b4] sm:$0xf0] }
 0x189   :  { %3127 = vmatpush.bf16.msra.mxu2 %v8827_v40  ;;  %3102 = vmatpush.bf16.msra.mxu0 %v8791_v53  ;;  %v11383_v40 = vld [vmem:[#allocation5 + $0x554] sm:$0xf]  ;;  %v11443_v53 = vld [vmem:[#allocation5 + $0x72c] sm:$0xf0]  ;;  %v9222_v20 = vld [vmem:[#allocation5 + $0x798] sm:$0xf] }
 0x18a   :  { %v8931_v48 = vor.u32 %v11383_v40, %v8928_v42  ;;  %v2257_v61 = vpop.f32.mrf.mxu0  ;;  %v9151_v62 = vor.u32 %v11443_v53, %v9150_v51  ;;  %v9088_v21 = vld [vmem:[#allocation5 + $0x6b0] sm:$0xf0]  ;;  %v9022_v51 = vld [vmem:[#allocation5 + $0x610] sm:$0xf] }
 0x18b   :  { %3140 = vmatpush.bf16.msra.mxu3 %v9083_v47  ;;  %3115 = vmatpush.bf16.msra.mxu1 %v9047_v57  ;;  %v9183_v47 = vor.u32 %v11451_v36, %v9182_v33  ;;  %v11439_v57 = vld [vmem:[#allocation5 + $0x714] sm:$0xf]  ;;  %v11419_v36 = vld [vmem:[#allocation5 + $0x66c] sm:$0xf0] }
 0x18c   :  { %v2270_v3 = vpop.f32.mrf.mxu1  ;;  %v11351_v40 = vld [vmem:[#allocation5 + $0x454] sm:$0xf]  ;;  %v9055_v49 = vor.u32 %v11419_v36, %v9054_v32  ;;  %v11448_v32 = vld [vmem:[#allocation5 + $0x75c] sm:$0xf] }
 0x18d   :  { %3128 = vmatpush.bf16.msra.mxu2 %v8795_v58  ;;  %3103 = vmatpush.bf16.msra.mxu0 %v8759_v8  ;;  %v9152_v58 = vld [vmem:[#allocation5 + $0x730] sm:$0xf0]  ;;  %v2271_v8 = vadd.f32 %v2270_v3, %v2257_v61  ;;  %v11400_v3 = vld [vmem:[#allocation5 + $0x5dc] sm:$0xf] }
 0x18e   :  { %v9155_v5 = vor.u32 %v11439_v57, %v9152_v58  ;;  %v8800_v42 = vld [vmem:[#allocation5 + $0x470] sm:$0xf0] }
 0x18f   :  { %3141 = vmatpush.bf16.msra.mxu3 %v9051_v0  ;;  %3116 = vmatpush.bf16.msra.mxu1 %v9015_v24  ;;  %v8862_v0 = vld [vmem:[#allocation5 + $0x4d0] sm:$0xf]  ;;  %v9119_v24 = vor.u32 %v11435_v6, %v9118_v2  ;;  %v8803_v50 = vor.u32 %v11351_v40, %v8800_v42  ;;  %v11343_v53 = vld [vmem:[#allocation5 + $0x414] sm:$0xf]  ;;  %v11468_v2 = vld [vmem:[#allocation5 + $0x7f4] sm:$0xf0] }
 0x190   :  { %3104 = vmatmul.bf16.vlgmr.msra.gmra.mxu0 %v12485_v39  ;;  %v8863_v37 = vor.u32 %v11371_v1, %v8862_v0  ;;  %v8768_v57 = vld [vmem:[#allocation5 + $0x430] sm:$0xf0]  ;;  %v9254_v0 = vld [vmem:[#allocation5 + $0x7d8] sm:$0xf] }
 0x191   :  { %3129 = vmatpush.bf16.msra.mxu2 %v8763_v11  ;;  %3148 = vmatpush.bf16.msrb.mxu0 %v8991_v13  ;;  %v8867_v11 = vor.u32 %v11367_v7, %v8864_v30  ;;  %v11407_v58 = vld [vmem:[#allocation5 + $0x614] sm:$0xf]  ;;  %v8771_v7 = vor.u32 %v11343_v53, %v8768_v57  ;;  %v11464_v30 = vld [vmem:[#allocation5 + $0x7dc] sm:$0xf]  ;;  %v8902_v42 = vld [vmem:[#allocation5 + $0x518] sm:$0xf] }
 0x192   :  { %3117 = vmatmul.bf16.vlgmr.msra.gmra.mxu1 %v12487_v41  ;;  %v2259_v25 = vpop.f32.mrf.mxu0  ;;  %v8870_v57 = vld [vmem:[#allocation5 + $0x4d8] sm:$0xf] }
 0x193   :  { %3142 = vmatpush.bf16.msra.mxu3 %v9019_v12  ;;  %3161 = vmatpush.bf16.msrb.mxu1 %v9247_v14  ;;  %v9086_v12 = vld [vmem:[#allocation5 + $0x690] sm:$0xf]  ;;  %v9123_v14 = vor.u32 %v11431_v9, %v9120_v10  ;;  %v9190_v25 = vld [vmem:[#allocation5 + $0x758] sm:$0xf] }
 0x194   :  { %3130 = vmatmul.bf16.vlgmr.msra.gmra.mxu2 %v12485_v39  ;;  %v2283_v13 = vpop.f32.mrf.mxu2  ;;  %v2272_v33 = vpop.f32.mrf.mxu1 }
 0x195   :  { %3174 = vmatpush.bf16.msrb.mxu2 %v8995_v15  ;;  %3149 = vmatpush.bf16.msrb.mxu0 %v8959_v26  ;;  %v11427_v15 = vld [vmem:[#allocation5 + $0x6ac] sm:$0xf0]  ;;  %v2284_v38 = vadd.f32 %v2283_v13, %v2271_v8  ;;  %v9256_v8 = vld [vmem:[#allocation5 + $0x7f8] sm:$0xf0]  ;;  %v11460_v13 = vld [vmem:[#allocation5 + $0x7b4] sm:$0xf0] }
 0x196   :  { %3143 = vmatmul.bf16.vlgmr.msra.gmra.mxu3 %v12487_v41  ;;  %v9087_v26 = vor.u32 %v11427_v15, %v9086_v12  ;;  %v9259_v12 = vor.u32 %v11464_v30, %v9256_v8  ;;  %v8968_v15 = vld [vmem:[#allocation5 + $0x5b8] sm:$0xf0]  ;;  %v8838_v8 = vld [vmem:[#allocation5 + $0x498] sm:$0xf] }
 0x197   :  { %3187 = vmatpush.bf16.msrb.mxu3 %v9251_v18  ;;  %3162 = vmatpush.bf16.msrb.mxu1 %v9215_v28  ;;  %v2296_v18 = vpop.f32.mrf.mxu3  ;;  %v8835_v28 = vor.u32 %v11359_v16, %v8832_v17  ;;  %v11456_v16 = vld [vmem:[#allocation5 + $0x79c] sm:$0xf] }
 0x198   :  { %v12499_v23 = vadd.f32 %v2296_v18, %v2284_v38  ;;  %v9224_v17 = vld [vmem:[#allocation5 + $0x7b8] sm:$0xf0]  ;;  %v9223_v18 = vor.u32 %v11460_v13, %v9222_v20 }
 0x199   :  { %3175 = vmatpush.bf16.msrb.mxu2 %v8963_v29  ;;  %3150 = vmatpush.bf16.msrb.mxu0 %v8927_v45  ;;  %v8798_v29 = vld [vmem:[#allocation5 + $0x450] sm:$0xf]  ;;  %v9192_v33 = vld [vmem:[#allocation5 + $0x778] sm:$0xf0] }
 0x19a   :  { %v8799_v45 = vor.u32 %v11355_v31, %v8798_v29  ;;  %v11384_v29 = vld [vmem:[#allocation5 + $0x55c] sm:$0xf] }
 0x19b   :  { %3188 = vmatpush.bf16.msrb.mxu3 %v9219_v35  ;;  %3163 = vmatpush.bf16.msrb.mxu1 %v9183_v47  ;;  %v9091_v35 = vor.u32 %v11423_v19, %v9088_v21  ;;  %v8766_v47 = vld [vmem:[#allocation5 + $0x410] sm:$0xf]  ;;  %v8934_v21 = vld [vmem:[#allocation5 + $0x558] sm:$0xf]  ;;  %v8936_v31 = vld [vmem:[#allocation5 + $0x578] sm:$0xf0] }
 0x19c   :  { %v2285_v55 = vpop.f32.mrf.mxu2  ;;  %v8939_v40 = vor.u32 %v11384_v29, %v8936_v31  ;;  %v8840_v20 = vld [vmem:[#allocation5 + $0x4b8] sm:$0xf0]  ;;  %v11420_v29 = vld [vmem:[#allocation5 + $0x674] sm:$0xf0] }
 0x19d   :  { %3176 = vmatpush.bf16.msrb.mxu2 %v8931_v48  ;;  %3151 = vmatpush.bf16.msrb.mxu0 %v8895_v59  ;;  %v11347_v48 = vld [vmem:[#allocation5 + $0x42c] sm:$0xf0]  ;;  %v9024_v59 = vld [vmem:[#allocation5 + $0x630] sm:$0xf0]  ;;  %v11352_v31 = vld [vmem:[#allocation5 + $0x45c] sm:$0xf] }
 0x19e   :  { %v8767_v1 = vor.u32 %v11347_v48, %v8766_v47  ;;  %v9027_v9 = vor.u32 %v11407_v58, %v9024_v59  ;;  %v11444_v47 = vld [vmem:[#allocation5 + $0x734] sm:$0xf0]  ;;  %v11376_v48 = vld [vmem:[#allocation5 + $0x51c] sm:$0xf] }
 0x19f   :  { %3189 = vmatpush.bf16.msrb.mxu3 %v9187_v52  ;;  %3164 = vmatpush.bf16.msrb.mxu1 %v9151_v62  ;;  %v11411_v52 = vld [vmem:[#allocation5 + $0x62c] sm:$0xf0]  ;;  %v2298_v61 = vpop.f32.mrf.mxu3  ;;  %v8998_v62 = vld [vmem:[#allocation5 + $0x5d8] sm:$0xf]  ;;  %v9159_v55 = vor.u32 %v11444_v47, %v9158_v44 }
 0x1a0   :  { %v9023_v6 = vor.u32 %v11411_v52, %v9022_v51  ;;  %v9160_v51 = vld [vmem:[#allocation5 + $0x738] sm:$0xf0]  ;;  %v8903_v52 = vor.u32 %v11380_v43, %v8902_v42  ;;  %v11372_v58 = vld [vmem:[#allocation5 + $0x4f4] sm:$0xf0] }
 0x1a1   :  { %3177 = vmatpush.bf16.msrb.mxu2 %v8899_v63  ;;  %3152 = vmatpush.bf16.msrb.mxu0 %v8863_v37  ;;  %v11404_v63 = vld [vmem:[#allocation5 + $0x5f4] sm:$0xf0]  ;;  %v9255_v37 = vor.u32 %v11468_v2, %v9254_v0  ;;  %v11368_v0 = vld [vmem:[#allocation5 + $0x4dc] sm:$0xf] }
 0x1a2   :  { %v8999_v10 = vor.u32 %v11404_v63, %v8998_v62  ;;  %v9126_v59 = vld [vmem:[#allocation5 + $0x6d8] sm:$0xf] }
 0x1a3   :  { %3190 = vmatpush.bf16.msrb.mxu3 %v9155_v5  ;;  %3165 = vmatpush.bf16.msrb.mxu1 %v9119_v24  ;;  %v9000_v5 = vld [vmem:[#allocation5 + $0x5f8] sm:$0xf0]  ;;  %v11436_v63 = vld [vmem:[#allocation5 + $0x6f4] sm:$0xf0] }
 0x1a4   :  { %v9003_v24 = vor.u32 %v11400_v3, %v9000_v5  ;;  %v11432_v3 = vld [vmem:[#allocation5 + $0x6dc] sm:$0xf]  ;;  %v11348_v44 = vld [vmem:[#allocation5 + $0x434] sm:$0xf0] }
 0x1a5   :  { %3178 = vmatpush.bf16.msrb.mxu2 %v8867_v11  ;;  %3153 = vmatpush.bf16.msrb.mxu0 %v8831_v22  ;;  %v8966_v11 = vld [vmem:[#allocation5 + $0x598] sm:$0xf]  ;;  %v9128_v5 = vld [vmem:[#allocation5 + $0x6f8] sm:$0xf0] }
 0x1a6   :  { %v8967_v38 = vor.u32 %v11396_v27, %v8966_v11  ;;  %v11388_v22 = vld [vmem:[#allocation5 + $0x574] sm:$0xf0]  ;;  %v11360_v27 = vld [vmem:[#allocation5 + $0x49c] sm:$0xf] }
 0x1a7   :  { %3191 = vmatpush.bf16.msrb.mxu3 %v9123_v14  ;;  %3166 = vmatpush.bf16.msrb.mxu1 %v9087_v26  ;;  %v11392_v14 = vld [vmem:[#allocation5 + $0x59c] sm:$0xf]  ;;  %v9227_v26 = vor.u32 %v11456_v16, %v9224_v17  ;;  %v11428_v11 = vld [vmem:[#allocation5 + $0x6b4] sm:$0xf0] }
 0x1a8   :  { %v8971_v19 = vor.u32 %v11392_v14, %v8968_v15  ;;  %v11424_v14 = vld [vmem:[#allocation5 + $0x69c] sm:$0xf]  ;;  %v11412_v47 = vld [vmem:[#allocation5 + $0x634] sm:$0xf0] }
 0x1a9   :  { %3179 = vmatpush.bf16.msrb.mxu2 %v8835_v28  ;;  %3154 = vmatpush.bf16.msrb.mxu0 %v8799_v45  ;;  %v11452_v28 = vld [vmem:[#allocation5 + $0x774] sm:$0xf0]  ;;  %v9195_v45 = vor.u32 %v11448_v32, %v9192_v33  ;;  %v9096_v15 = vld [vmem:[#allocation5 + $0x6b8] sm:$0xf0] }
 0x1aa   :  { %v9191_v36 = vor.u32 %v11452_v28, %v9190_v25  ;;  %v9062_v25 = vld [vmem:[#allocation5 + $0x658] sm:$0xf]  ;;  %v9099_v28 = vor.u32 %v11424_v14, %v9096_v15  ;;  %v8808_v32 = vld [vmem:[#allocation5 + $0x478] sm:$0xf0]  ;;  %v9326_v15 = vld [vmem:[#allocation5 + $0x1100] sm:$0xf] }
 0x1ab   :  { %3192 = vmatpush.bf16.msrb.mxu3 %v9091_v35  ;;  %3167 = vmatpush.bf16.msrb.mxu1 %v9055_v49  ;;  %v8935_v35 = vor.u32 %v11388_v22, %v8934_v21  ;;  %v8904_v49 = vld [vmem:[#allocation5 + $0x538] sm:$0xf0]  ;;  %v2309_v53 = vpop.f32.mrf.mxu0  ;;  %v8806_v21 = vld [vmem:[#allocation5 + $0x458] sm:$0xf]  ;;  %v9063_v42 = vor.u32 %v11420_v29, %v9062_v25  ;;  %v8811_v43 = vor.u32 %v11352_v31, %v8808_v32  ;;  %v11739_v25 = vld [vmem:[#allocation5 + $0x10dc] sm:$0xf0] }
 0x1ac   :  { %v11356_v22 = vld [vmem:[#allocation5 + $0x474] sm:$0xf0]  ;;  %v11416_v33 = vld [vmem:[#allocation5 + $0x65c] sm:$0xf]  ;;  %v9454_v31 = vld [vmem:[#allocation5 + $0x1300] sm:$0xf] }
 0x1ad   :  { %3180 = vmatpush.bf16.msrb.mxu2 %v8803_v50  ;;  %3155 = vmatpush.bf16.msrb.mxu0 %v8767_v1  ;;  %v11440_v50 = vld [vmem:[#allocation5 + $0x71c] sm:$0xf]  ;;  %v2322_v61 = vpop.f32.mrf.mxu1  ;;  %v11775_v32 = vld [vmem:[#allocation5 + $0x131c] sm:$0xf0] }
 0x1ae   :  { %v9163_v62 = vor.u32 %v11440_v50, %v9160_v51  ;;  %v8872_v1 = vld [vmem:[#allocation5 + $0x4f8] sm:$0xf0]  ;;  %v2323_v2 = vadd.f32 %v2322_v61, %v2309_v53 }
 0x1af   :  { %3193 = vmatpush.bf16.msrb.mxu3 %v9059_v56  ;;  %3168 = vmatpush.bf16.msrb.mxu1 %v9023_v6  ;;  %v8907_v56 = vor.u32 %v11376_v48, %v8904_v49  ;;  %v8871_v6 = vor.u32 %v11372_v58, %v8870_v57  ;;  %v8875_v30 = vor.u32 %v11368_v0, %v8872_v1  ;;  %v11344_v50 = vld [vmem:[#allocation5 + $0x41c] sm:$0xf]  ;;  %v11755_v57 = vld [vmem:[#allocation5 + $0x11dc] sm:$0xf0] }
 0x1b0   :  { %3156 = vmatmul.bf16.vlgmr.msrb.gmra.mxu0 %v12485_v39  ;;  %v8776_v51 = vld [vmem:[#allocation5 + $0x438] sm:$0xf0] }
 0x1b1   :  { %3181 = vmatpush.bf16.msrb.mxu2 %v8771_v7  ;;  %3200 = vmatpush.bf16.msra.mxu0 %v8999_v10  ;;  %v9127_v7 = vor.u32 %v11436_v63, %v9126_v59  ;;  %v9094_v10 = vld [vmem:[#allocation5 + $0x698] sm:$0xf]  ;;  %v8779_v61 = vor.u32 %v11344_v50, %v8776_v51  ;;  %v11767_v50 = vld [vmem:[#allocation5 + $0x129c] sm:$0xf0] }
 0x1b2   :  { %3169 = vmatmul.bf16.vlgmr.msrb.gmra.mxu1 %v12487_v41  ;;  %v9262_v51 = vld [vmem:[#allocation5 + $0x1000] sm:$0xf] }
 0x1b3   :  { %3194 = vmatpush.bf16.msrb.mxu3 %v9027_v9  ;;  %3213 = vmatpush.bf16.msra.mxu1 %v9255_v37  ;;  %v11364_v9 = vld [vmem:[#allocation5 + $0x4b4] sm:$0xf0] }
 0x1b4   :  { %3182 = vmatmul.bf16.vlgmr.msrb.gmra.mxu2 %v12485_v39  ;;  %v8839_v16 = vor.u32 %v11364_v9, %v8838_v8  ;;  %v9342_v9 = vld [vmem:[#allocation5 + $0x1140] sm:$0xf] }
 0x1b5   :  { %3226 = vmatpush.bf16.msra.mxu2 %v9003_v24  ;;  %3201 = vmatpush.bf16.msra.mxu0 %v8967_v38  ;;  %v2335_v37 = vpop.f32.mrf.mxu2  ;;  %v9131_v24 = vor.u32 %v11432_v3, %v9128_v5  ;;  %v2311_v38 = vpop.f32.mrf.mxu0  ;;  %v9358_v3 = vld [vmem:[#allocation5 + $0x1180] sm:$0xf] }
 0x1b6   :  { %3195 = vmatmul.bf16.vlgmr.msrb.gmra.mxu3 %v12487_v41  ;;  %v11751_v5 = vld [vmem:[#allocation5 + $0x119c] sm:$0xf0] }
 0x1b7   :  { %3239 = vmatpush.bf16.msra.mxu3 %v9259_v12  ;;  %3214 = vmatpush.bf16.msra.mxu1 %v9223_v18  ;;  %v2336_v12 = vadd.f32 %v2335_v37, %v2323_v2  ;;  %v2348_v13 = vpop.f32.mrf.mxu3  ;;  %v9095_v18 = vor.u32 %v11428_v11, %v9094_v10  ;;  %v11747_v10 = vld [vmem:[#allocation5 + $0x115c] sm:$0xf0] }
 0x1b9   :  { %3227 = vmatpush.bf16.msra.mxu2 %v8971_v19  ;;  %3202 = vmatpush.bf16.msra.mxu0 %v8935_v35  ;;  %v12505_v17 = vadd.f32 %v2348_v13, %v2336_v12  ;;  %v8843_v19 = vor.u32 %v11360_v27, %v8840_v20  ;;  %v9064_v35 = vld [vmem:[#allocation5 + $0x678] sm:$0xf0]  ;;  %v9486_v20 = vld [vmem:[#allocation5 + $0x1380] sm:$0xf] }
 0x1ba   :  { %v9067_v49 = vor.u32 %v11416_v33, %v9064_v35  ;;  %v9455_v33 = vor.u32 %v11775_v32, %v9454_v31  ;;  %v9294_v35 = vld [vmem:[#allocation5 + $0x1080] sm:$0xf] }
 0x1bb   :  { %3240 = vmatpush.bf16.msra.mxu3 %v9227_v26  ;;  %3215 = vmatpush.bf16.msra.mxu1 %v9191_v36  ;;  %v2324_v26 = vpop.f32.mrf.mxu1  ;;  %v8807_v36 = vor.u32 %v11356_v22, %v8806_v21  ;;  %v9310_v22 = vld [vmem:[#allocation5 + $0x10c0] sm:$0xf] }
 0x1bd   :  { %3228 = vmatpush.bf16.msra.mxu2 %v8939_v40  ;;  %3203 = vmatpush.bf16.msra.mxu0 %v8903_v52  ;;  %v8774_v40 = vld [vmem:[#allocation5 + $0x418] sm:$0xf]  ;;  %v2337_v48 = vpop.f32.mrf.mxu2  ;;  %v11408_v52 = vld [vmem:[#allocation5 + $0x61c] sm:$0xf] }
 0x1be   :  { %v8775_v58 = vor.u32 %v11348_v44, %v8774_v40  ;;  %v9422_v48 = vld [vmem:[#allocation5 + $0x1280] sm:$0xf] }
 0x1bf   :  { %3241 = vmatpush.bf16.msra.mxu3 %v9195_v45  ;;  %3216 = vmatpush.bf16.msra.mxu1 %v9159_v55  ;;  %v9030_v45 = vld [vmem:[#allocation5 + $0x618] sm:$0xf]  ;;  %v2350_v53 = vpop.f32.mrf.mxu3  ;;  %v9032_v55 = vld [vmem:[#allocation5 + $0x638] sm:$0xf0] }
 0x1c0   :  { %v9031_v59 = vor.u32 %v11412_v47, %v9030_v45  ;;  %v9278_v45 = vld [vmem:[#allocation5 + $0x1040] sm:$0xf]  ;;  %v9423_v53 = vor.u32 %v11767_v50, %v9422_v48 }
 0x1c1   :  { %3229 = vmatpush.bf16.msra.mxu2 %v8907_v56  ;;  %3204 = vmatpush.bf16.msra.mxu0 %v8871_v6  ;;  %v9374_v56 = vld [vmem:[#allocation5 + $0x11c0] sm:$0xf]  ;;  %v9359_v6 = vor.u32 %v11751_v5, %v9358_v3 }
 0x1c2   :  { %v9375_v63 = vor.u32 %v11755_v57, %v9374_v56  ;;  %v11731_v47 = vld [vmem:[#allocation5 + $0x105c] sm:$0xf0] }
 0x1c3   :  { %3242 = vmatpush.bf16.msra.mxu3 %v9163_v62  ;;  %3217 = vmatpush.bf16.msra.mxu1 %v9127_v7  ;;  %v9035_v62 = vor.u32 %v11408_v52, %v9032_v55  ;;  %v9502_v7 = vld [vmem:[#allocation5 + $0x13c0] sm:$0xf] }
 0x1c4   :  { %v11727_v52 = vld [vmem:[#allocation5 + $0x101c] sm:$0xf0] }
 0x1c5   :  { %3230 = vmatpush.bf16.msra.mxu2 %v8875_v30  ;;  %3205 = vmatpush.bf16.msra.mxu0 %v8839_v16  ;;  %v11787_v30 = vld [vmem:[#allocation5 + $0x13dc] sm:$0xf0]  ;;  %v9263_v57 = vor.u32 %v11727_v52, %v9262_v51 }
 0x1c6   :  { %v9503_v8 = vor.u32 %v11787_v30, %v9502_v7  ;;  %v11743_v16 = vld [vmem:[#allocation5 + $0x111c] sm:$0xf0] }
 0x1c7   :  { %3243 = vmatpush.bf16.msra.mxu3 %v9131_v24  ;;  %3218 = vmatpush.bf16.msra.mxu1 %v9095_v18  ;;  %v9343_v24 = vor.u32 %v11747_v10, %v9342_v9  ;;  %v9327_v38 = vor.u32 %v11743_v16, %v9326_v15  ;;  %v9470_v18 = vld [vmem:[#allocation5 + $0x1340] sm:$0xf] }
 0x1c8   :  { %v9630_v55 = vld [vmem:[#allocation5 + $0x15c0] sm:$0xf] }
 0x1c9   :  { %3231 = vmatpush.bf16.msra.mxu2 %v8843_v19  ;;  %3206 = vmatpush.bf16.msra.mxu0 %v8807_v36  ;;  %v11779_v19 = vld [vmem:[#allocation5 + $0x135c] sm:$0xf0] }
 0x1ca   :  { %v9471_v21 = vor.u32 %v11779_v19, %v9470_v18  ;;  %v11735_v36 = vld [vmem:[#allocation5 + $0x109c] sm:$0xf0] }
 0x1cb   :  { %3244 = vmatpush.bf16.msra.mxu3 %v9099_v28  ;;  %3219 = vmatpush.bf16.msra.mxu1 %v9063_v42  ;;  %v9311_v28 = vor.u32 %v11739_v25, %v9310_v22  ;;  %v9295_v40 = vor.u32 %v11735_v36, %v9294_v35  ;;  %v9438_v42 = vld [vmem:[#allocation5 + $0x12c0] sm:$0xf] }
 0x1cc   :  { %v11819_v56 = vld [vmem:[#allocation5 + $0x15dc] sm:$0xf0] }
 0x1cd   :  { %3232 = vmatpush.bf16.msra.mxu2 %v8811_v43  ;;  %3207 = vmatpush.bf16.msra.mxu0 %v8775_v58  ;;  %v2361_v0 = vpop.f32.mrf.mxu0  ;;  %v11771_v43 = vld [vmem:[#allocation5 + $0x12dc] sm:$0xf0]  ;;  %v9631_v58 = vor.u32 %v11819_v56, %v9630_v55 }
 0x1ce   :  { %v9439_v44 = vor.u32 %v11771_v43, %v9438_v42  ;;  %v9614_v30 = vld [vmem:[#allocation5 + $0x1580] sm:$0xf] }
 0x1cf   :  { %3245 = vmatpush.bf16.msra.mxu3 %v9067_v49  ;;  %3220 = vmatpush.bf16.msra.mxu1 %v9031_v59  ;;  %v2374_v1 = vpop.f32.mrf.mxu1  ;;  %v9279_v49 = vor.u32 %v11731_v47, %v9278_v45  ;;  %v12513_v59 = vld [vmem:[#allocation7 + $0x2] sm:$0xff] }
 0x1d0   :  { %3208 = vmatmul.bf16.vlgmr.msra.gmra.mxu0 %v12485_v39  ;;  %v2375_v2 = vadd.f32 %v2374_v1, %v2361_v0  ;;  %v9886_v0 = vld [vmem:[#allocation5 + $0x19c0] sm:$0xf]  ;;  %v3254_v7 = vperm.slane %v12513_v59, 0  ;;  %v3255_v25 = vperm.slane %v12513_v59, 1 }
 0x1d1   :  { %3233 = vmatpush.bf16.msra.mxu2 %v8779_v61  ;;  %4904 = vmatpush.bf16.msrb.mxu0 %v9375_v63  ;;  %v9406_v61 = vld [vmem:[#allocation5 + $0x1240] sm:$0xf] }
 0x1d2   :  { %3221 = vmatmul.bf16.vlgmr.msra.gmra.mxu1 %v12487_v41  ;;  %v11883_v1 = vld [vmem:[#allocation5 + $0x19dc] sm:$0xf0] }
 0x1d3   :  { %3246 = vmatpush.bf16.msra.mxu3 %v9035_v62  ;;  %4917 = vmatpush.bf16.msrb.mxu1 %v9503_v8  ;;  %v11763_v62 = vld [vmem:[#allocation5 + $0x125c] sm:$0xf0]  ;;  %v9887_v3 = vor.u32 %v11883_v1, %v9886_v0 }
 0x1d4   :  { %3234 = vmatmul.bf16.vlgmr.msra.gmra.mxu2 %v12485_v39  ;;  %v9407_v63 = vor.u32 %v11763_v62, %v9406_v61  ;;  %v11815_v8 = vld [vmem:[#allocation5 + $0x159c] sm:$0xf0] }
 0x1d5   :  { %4905 = vmatpush.bf16.msrb.mxu0 %v9359_v6  ;;  %v2363_v39 = vpop.f32.mrf.mxu0  ;;  %4930 = vmatpush.bf16.msrb.mxu2 %v9631_v58  ;;  %v9615_v9 = vor.u32 %v11815_v8, %v9614_v30  ;;  %v9390_v10 = vld [vmem:[#allocation5 + $0x1200] sm:$0xf] }
 0x1d6   :  { %3247 = vmatmul.bf16.vlgmr.msra.gmra.mxu3 %v12487_v41  ;;  %v11783_v41 = vld [vmem:[#allocation5 + $0x139c] sm:$0xf0] }
 0x1d7   :  { %v2387_v37 = vpop.f32.mrf.mxu2  ;;  %v2376_v12 = vpop.f32.mrf.mxu1  ;;  %v9487_v13 = vor.u32 %v11783_v41, %v9486_v20  ;;  %v11851_v39 = vld [vmem:[#allocation5 + $0x17dc] sm:$0xf0] }
 0x1d8   :  { %v2388_v11 = vadd.f32 %v2387_v37, %v2375_v2  ;;  %v11759_v37 = vld [vmem:[#allocation5 + $0x121c] sm:$0xf0] }
 0x1d9   :  { %v2400_v27 = vpop.f32.mrf.mxu3  ;;  %4906 = vmatpush.bf16.msrb.mxu0 %v9343_v24  ;;  %4918 = vmatpush.bf16.msrb.mxu1 %v9487_v13  ;;  %v9870_v20 = vld [vmem:[#allocation5 + $0x1980] sm:$0xf] }
 0x1da   :  { %v12511_v14 = vadd.f32 %v2400_v27, %v2388_v11  ;;  %v9391_v11 = vor.u32 %v11759_v37, %v9390_v10  ;;  %v9758_v27 = vld [vmem:[#allocation5 + $0x17c0] sm:$0xf]  ;;  %4931 = vmatpush.bf16.msrb.mxu2 %v9615_v9 }
 0x1db   :  { %v9759_v41 = vor.u32 %v11851_v39, %v9758_v27  ;;  %v11879_v12 = vld [vmem:[#allocation5 + $0x199c] sm:$0xf0] }
 0x1dc   :  { %v9598_v15 = vld [vmem:[#allocation5 + $0x1540] sm:$0xf] }
 0x1dd   :  { %4907 = vmatpush.bf16.msrb.mxu0 %v9327_v38  ;;  %4919 = vmatpush.bf16.msrb.mxu1 %v9471_v21  ;;  %v11811_v16 = vld [vmem:[#allocation5 + $0x155c] sm:$0xf0] }
 0x1de   :  { %v10014_v38 = vld [vmem:[#allocation5 + $0x1bc0] sm:$0xf]  ;;  %4943 = vmatpush.bf16.msrb.mxu3 %v9759_v41  ;;  %v9599_v18 = vor.u32 %v11811_v16, %v9598_v15 }
 0x1df   :  { %v2389_v26 = vpop.f32.mrf.mxu2  ;;  %v11915_v19 = vld [vmem:[#allocation5 + $0x1bdc] sm:$0xf0] }
 0x1e0   :  { %v10015_v26 = vor.u32 %v11915_v19, %v10014_v38  ;;  %4932 = vmatpush.bf16.msrb.mxu2 %v9599_v18  ;;  %v9854_v35 = vld [vmem:[#allocation5 + $0x1940] sm:$0xf] }
 0x1e1   :  { %v2402_v29 = vpop.f32.mrf.mxu3  ;;  %4908 = vmatpush.bf16.msrb.mxu0 %v9311_v28  ;;  %4920 = vmatpush.bf16.msrb.mxu1 %v9455_v33  ;;  %v9742_v28 = vld [vmem:[#allocation5 + $0x1780] sm:$0xf] }
 0x1e2   :  { %v11847_v33 = vld [vmem:[#allocation5 + $0x179c] sm:$0xf0] }
 0x1e3   :  { %v11875_v36 = vld [vmem:[#allocation5 + $0x195c] sm:$0xf0]  ;;  %v9743_v43 = vor.u32 %v11847_v33, %v9742_v28 }
 0x1e4   :  { %v9582_v45 = vld [vmem:[#allocation5 + $0x1500] sm:$0xf] }
 0x1e5   :  { %4909 = vmatpush.bf16.msrb.mxu0 %v9295_v40  ;;  %4921 = vmatpush.bf16.msrb.mxu1 %v9439_v44  ;;  %v9855_v44 = vor.u32 %v11875_v36, %v9854_v35  ;;  %v11807_v47 = vld [vmem:[#allocation5 + $0x151c] sm:$0xf0] }
 0x1e6   :  { %v9998_v48 = vld [vmem:[#allocation5 + $0x1b80] sm:$0xf]  ;;  %v9583_v50 = vor.u32 %v11807_v47, %v9582_v45  ;;  %4944 = vmatpush.bf16.msrb.mxu3 %v9743_v43 }
 0x1e7   :  { %v11911_v51 = vld [vmem:[#allocation5 + $0x1b9c] sm:$0xf0] }
 0x1e8   :  { %v9999_v52 = vor.u32 %v11911_v51, %v9998_v48  ;;  %v11843_v55 = vld [vmem:[#allocation5 + $0x175c] sm:$0xf0]  ;;  %4933 = vmatpush.bf16.msrb.mxu2 %v9583_v50 }
 0x1e9   :  { %4910 = vmatpush.bf16.msrb.mxu0 %v9279_v49  ;;  %4922 = vmatpush.bf16.msrb.mxu1 %v9423_v53  ;;  %v9726_v53 = vld [vmem:[#allocation5 + $0x1740] sm:$0xf] }
 0x1ea   :  { %v9838_v56 = vld [vmem:[#allocation5 + $0x1900] sm:$0xf]  ;;  %v9727_v58 = vor.u32 %v11843_v55, %v9726_v53 }
 0x1eb   :  { %v11871_v61 = vld [vmem:[#allocation5 + $0x191c] sm:$0xf0] }
 0x1ec   :  { %v9566_v0 = vld [vmem:[#allocation5 + $0x14c0] sm:$0xf]  ;;  %4945 = vmatpush.bf16.msrb.mxu3 %v9727_v58 }
 0x1ed   :  { %4911 = vmatpush.bf16.msrb.mxu0 %v9263_v57  ;;  %v3053_v2 = vpop.f32.mrf.mxu0  ;;  %4923 = vmatpush.bf16.msrb.mxu1 %v9407_v63  ;;  %v9839_v63 = vor.u32 %v11871_v61, %v9838_v56  ;;  %v11803_v1 = vld [vmem:[#allocation5 + $0x14dc] sm:$0xf0] }
 0x1ee   :  { %v3054_v5 = vadd.f32 %v3053_v2, %v12463_v4  ;;  %v9871_v4 = vor.u32 %v11879_v12, %v9870_v20  ;;  %v9982_v2 = vld [vmem:[#allocation5 + $0x1b40] sm:$0xf] }
 0x1ef   :  { %v3066_v6 = vpop.f32.mrf.mxu1  ;;  %v9710_v9 = vld [vmem:[#allocation5 + $0x1700] sm:$0xf] }
 0x1f0   :  { %v3067_v24 = vadd.f32 %v3066_v6, %v3054_v5  ;;  %v9567_v5 = vor.u32 %v11803_v1, %v9566_v0  ;;  %v11907_v6 = vld [vmem:[#allocation5 + $0x1b5c] sm:$0xf0] }
 0x1f1   :  { %4956 = vmatpush.bf16.msra.mxu0 %v9887_v3  ;;  %4924 = vmatpush.bf16.msrb.mxu1 %v9391_v11  ;;  %v9983_v8 = vor.u32 %v11907_v6, %v9982_v2  ;;  %v11839_v10 = vld [vmem:[#allocation5 + $0x171c] sm:$0xf0] }
 0x1f2   :  { %v12517_v13 = vadd.f32 %v3254_v7, %v3067_v24  ;;  %4934 = vmatpush.bf16.msrb.mxu2 %v9567_v5  ;;  %v9711_v11 = vor.u32 %v11839_v10, %v9710_v9  ;;  %v9822_v27 = vld [vmem:[#allocation5 + $0x18c0] sm:$0xf]  ;;  %v9376_v9 = vld [vmem:[#allocation5 + $0x11e0] sm:$0xf0] }
 0x1f3   :  { %v11867_v39 = vld [vmem:[#allocation5 + $0x18dc] sm:$0xf0] }
 0x1f4   :  { %v3286_v21 = vmul.f32 0.044715, %v12517_v13  ;;  %v9823_v20 = vor.u32 %v11867_v39, %v9822_v27  ;;  %v9550_v41 = vld [vmem:[#allocation5 + $0x1480] sm:$0xf]  ;;  %4946 = vmatpush.bf16.msrb.mxu3 %v9711_v11  ;;  %v3256_v11 = vperm.slane %v12513_v59, 2 }
 0x1f5   :  { %4957 = vmatpush.bf16.msra.mxu0 %v9871_v4  ;;  %v3055_v32 = vpop.f32.mrf.mxu0  ;;  %4969 = vmatpush.bf16.msra.mxu1 %v10015_v26  ;;  %v11799_v12 = vld [vmem:[#allocation5 + $0x149c] sm:$0xf0]  ;;  %v3278_v26 = vmul.f32 0.5, %v12517_v13 }
 0x1f6   :  { %v3294_v40 = vmul.f32 %v3286_v21, %v12517_v13  ;;  %v9966_v4 = vld [vmem:[#allocation5 + $0x1b00] sm:$0xf]  ;;  %v9551_v16 = vor.u32 %v11799_v12, %v9550_v41 }
 0x1f7   :  { %v3079_v22 = vpop.f32.mrf.mxu2  ;;  %v3068_v42 = vpop.f32.mrf.mxu1  ;;  %v11903_v38 = vld [vmem:[#allocation5 + $0x1b1c] sm:$0xf0] }
 0x1f8   :  { %v3080_v29 = vadd.f32 %v3079_v22, %v12469_v60  ;;  %v3302_v60 = vmul.f32 %v3294_v40, %v12517_v13  ;;  %v9967_v18 = vor.u32 %v11903_v38, %v9966_v4  ;;  %v9694_v19 = vld [vmem:[#allocation5 + $0x16c0] sm:$0xf]  ;;  %4935 = vmatpush.bf16.msrb.mxu2 %v9551_v16 }
 0x1f9   :  { %v3092_v31 = vpop.f32.mrf.mxu3  ;;  %4958 = vmatpush.bf16.msra.mxu0 %v9855_v44  ;;  %4970 = vmatpush.bf16.msra.mxu1 %v9999_v52  ;;  %v11835_v21 = vld [vmem:[#allocation5 + $0x16dc] sm:$0xf0] }
 0x1fa   :  { %v3093_v49 = vadd.f32 %v3092_v31, %v3080_v29  ;;  %v3310_v62 = vadd.f32 %v3302_v60, %v12517_v13  ;;  %v9806_v22 = vld [vmem:[#allocation5 + $0x1880] sm:$0xf]  ;;  %v9695_v28 = vor.u32 %v11835_v21, %v9694_v19 }
 0x1fb   :  { %v11863_v29 = vld [vmem:[#allocation5 + $0x189c] sm:$0xf0] }
 0x1fc   :  { %v12524_v57 = vadd.f32 %v3255_v25, %v3093_v49  ;;  %v3318_v7 = vmul.f32 0.7978846, %v3310_v62  ;;  %v9807_v31 = vor.u32 %v11863_v29, %v9806_v22  ;;  %v9534_v32 = vld [vmem:[#allocation5 + $0x1440] sm:$0xf]  ;;  %4947 = vmatpush.bf16.msrb.mxu3 %v9695_v28  ;;  %v11749_v22 = vld [vmem:[#allocation5 + $0x1184] sm:$0xf] }
 0x1fd   :  { %4959 = vmatpush.bf16.msra.mxu0 %v9839_v63  ;;  %4971 = vmatpush.bf16.msra.mxu1 %v9983_v8  ;;  %v11795_v33 = vld [vmem:[#allocation5 + $0x145c] sm:$0xf0]  ;;  %v11753_v8 = vld [vmem:[#allocation5 + $0x11c4] sm:$0xf] }
 0x1fe   :  { %v3287_v3 = vmul.f32 0.044715, %v12524_v57  ;;  %12249 = vtanh.f32 %v3318_v7  ;;  %v9950_v35 = vld [vmem:[#allocation5 + $0x1ac0] sm:$0xf]  ;;  %v9535_v40 = vor.u32 %v11795_v33, %v9534_v32  ;;  %v9379_v27 = vor.u32 %v11753_v8, %v9376_v9 }
 0x1ff   :  { %v3081_v30 = vpop.f32.mrf.mxu2  ;;  %v11899_v42 = vld [vmem:[#allocation5 + $0x1adc] sm:$0xf0]  ;;  %v3279_v12 = vmul.f32 0.5, %v12524_v57 }
 0x200   :  { %v3295_v37 = vmul.f32 %v3287_v3, %v12524_v57  ;;  %v9678_v43 = vld [vmem:[#allocation5 + $0x1680] sm:$0xf]  ;;  %v9951_v45 = vor.u32 %v11899_v42, %v9950_v35  ;;  %4936 = vmatpush.bf16.msrb.mxu2 %v9535_v40 }
 0x201   :  { %v3094_v24 = vpop.f32.mrf.mxu3  ;;  %4960 = vmatpush.bf16.msra.mxu0 %v9823_v20  ;;  %4972 = vmatpush.bf16.msra.mxu1 %v9967_v18  ;;  %v11831_v47 = vld [vmem:[#allocation5 + $0x169c] sm:$0xf0] }
 0x202   :  { %v3303_v15 = vmul.f32 %v3295_v37, %v12524_v57  ;;  %v9790_v48 = vld [vmem:[#allocation5 + $0x1840] sm:$0xf]  ;;  %v9679_v50 = vor.u32 %v11831_v47, %v9678_v43 }
 0x203   :  { %v11859_v49 = vld [vmem:[#allocation5 + $0x185c] sm:$0xf0] }
 0x204   :  { %v3311_v25 = vadd.f32 %v3303_v15, %v12524_v57  ;;  %v12250_v44 = vpop.eup %12249  ;;  %v9791_v51 = vor.u32 %v11859_v49, %v9790_v48  ;;  %v9518_v60 = vld [vmem:[#allocation5 + $0x1400] sm:$0xf]  ;;  %4948 = vmatpush.bf16.msrb.mxu3 %v9679_v50  ;;  %v11745_v49 = vld [vmem:[#allocation5 + $0x1144] sm:$0xf] }
 0x205   :  { %4961 = vmatpush.bf16.msra.mxu0 %v9807_v31  ;;  %v3334_v13 = vadd.f32 1.0, %v12250_v44  ;;  %v11791_v52 = vld [vmem:[#allocation5 + $0x141c] sm:$0xf0]  ;;  %4973 = vmatpush.bf16.msra.mxu1 %v9951_v45  ;;  %v9504_v44 = vld [vmem:[#allocation5 + $0x13e0] sm:$0xf0] }
 0x206   :  { %v3319_v36 = vmul.f32 0.7978846, %v3311_v25  ;;  %v9519_v53 = vor.u32 %v11791_v52, %v9518_v60  ;;  %v9934_v55 = vld [vmem:[#allocation5 + $0x1a80] sm:$0xf]  ;;  %v9344_v52 = vld [vmem:[#allocation5 + $0x1160] sm:$0xf0] }
 0x207   :  { %v11895_v56 = vld [vmem:[#allocation5 + $0x1a9c] sm:$0xf0]  ;;  %v3342_v58 = vmul.f32 %v3334_v13, %v3278_v26 }
 0x208   :  { %12251 = vtanh.f32 %v3319_v36  ;;  %v9935_v61 = vor.u32 %v11895_v56, %v9934_v55  ;;  %v9662_v62 = vld [vmem:[#allocation5 + $0x1640] sm:$0xf]  ;;  %4937 = vmatpush.bf16.msrb.mxu2 %v9519_v53  ;;  %v11785_v36 = vld [vmem:[#allocation5 + $0x13c4] sm:$0xf] }
 0x209   :  { %4962 = vmatpush.bf16.msra.mxu0 %v9791_v51  ;;  %v11827_v63 = vld [vmem:[#allocation5 + $0x165c] sm:$0xf0]  ;;  %v12532_v1 = vpack.c.bf16 %v3342_v58, %v3342_v58  ;;  %v9507_v45 = vor.u32 %v11785_v36, %v9504_v44  ;;  %v3257_v51 = vperm.slane %v12513_v59, 3  ;;  %v9347_v58 = vor.u32 %v11745_v49, %v9344_v52  ;;  %v9296_v49 = vld [vmem:[#allocation5 + $0x10a0] sm:$0xf0] }
 0x20a   :  { %v9774_v0 = vld [vmem:[#allocation5 + $0x1800] sm:$0xf]  ;;  %v9663_v2 = vor.u32 %v11827_v63, %v9662_v62  ;;  %4974 = vmatpush.bf16.msra.mxu1 %v9935_v61  ;;  %v11781_v63 = vld [vmem:[#allocation5 + $0x1384] sm:$0xf] }
 0x20b   :  { %v11855_v3 = vld [vmem:[#allocation5 + $0x181c] sm:$0xf0]  ;;  %4912 = vmatmul.bf16.vlgmr.msrb.gmra.mxu0 %v12532_v1  ;;  %v11769_v52 = vld [vmem:[#allocation5 + $0x12c4] sm:$0xf] }
 0x20c   :  { %v10142_v5 = vld [vmem:[#allocation5 + $0x1dc0] sm:$0xf]  ;;  %v9775_v7 = vor.u32 %v11855_v3, %v9774_v0  ;;  %4949 = vmatpush.bf16.msrb.mxu3 %v9663_v2 }
 0x20d   :  { %v11947_v6 = vld [vmem:[#allocation5 + $0x1ddc] sm:$0xf0]  ;;  %v3105_v24 = vpop.f32.mrf.mxu0 }
 0x20e   :  { %v10143_v30 = vor.u32 %v11947_v6, %v10142_v5  ;;  %v9918_v10 = vld [vmem:[#allocation5 + $0x1a40] sm:$0xf]  ;;  %v12252_v37 = vpop.eup %12251  ;;  %v3106_v20 = vadd.f32 %v3105_v24, %v12475_v54  ;;  %4963 = vmatpush.bf16.msra.mxu0 %v9775_v7  ;;  %v9360_v54 = vld [vmem:[#allocation5 + $0x11a0] sm:$0xf0] }
 0x20f   :  { %v11891_v39 = vld [vmem:[#allocation5 + $0x1a5c] sm:$0xf0]  ;;  %v3118_v41 = vpop.f32.mrf.mxu1  ;;  %v3335_v4 = vadd.f32 1.0, %v12252_v37  ;;  %v9363_v57 = vor.u32 %v11749_v22, %v9360_v54  ;;  %v9488_v5 = vld [vmem:[#allocation5 + $0x13a0] sm:$0xf0] }
 0x210   :  { %v9919_v15 = vor.u32 %v11891_v39, %v9918_v10  ;;  %v9646_v16 = vld [vmem:[#allocation5 + $0x1600] sm:$0xf]  ;;  %4982 = vmatpush.bf16.msra.mxu2 %v10143_v30  ;;  %v3119_v25 = vadd.f32 %v3118_v41, %v3106_v20  ;;  %v9491_v7 = vor.u32 %v11781_v63, %v9488_v5  ;;  %v9328_v37 = vld [vmem:[#allocation5 + $0x1120] sm:$0xf0] }
 0x211   :  { %v11823_v38 = vld [vmem:[#allocation5 + $0x161c] sm:$0xf0]  ;;  %v3343_v26 = vmul.f32 %v3335_v4, %v3279_v12  ;;  %v11777_v20 = vld [vmem:[#allocation5 + $0x1344] sm:$0xf] }
 0x212   :  { %5008 = vmatpush.bf16.msrb.mxu0 %v9379_v27  ;;  %v9647_v18 = vor.u32 %v11823_v38, %v9646_v16  ;;  %v10126_v19 = vld [vmem:[#allocation5 + $0x1d80] sm:$0xf]  ;;  %4975 = vmatpush.bf16.msra.mxu1 %v9919_v15  ;;  %v12538_v40 = vadd.f32 %v3256_v11, %v3119_v25  ;;  %v9472_v4 = vld [vmem:[#allocation5 + $0x1360] sm:$0xf0] }
 0x213   :  { %v11943_v21 = vld [vmem:[#allocation5 + $0x1d9c] sm:$0xf0]  ;;  %v12540_v42 = vpack.c.bf16 %v3343_v26, %v3343_v26  ;;  %v9475_v16 = vor.u32 %v11777_v20, %v9472_v4  ;;  %v11737_v22 = vld [vmem:[#allocation5 + $0x10c4] sm:$0xf] }
 0x214   :  { %v10127_v28 = vor.u32 %v11943_v21, %v10126_v19  ;;  %v9902_v29 = vld [vmem:[#allocation5 + $0x1a00] sm:$0xf]  ;;  %4950 = vmatpush.bf16.msrb.mxu3 %v9647_v18  ;;  %v3288_v13 = vmul.f32 0.044715, %v12538_v40  ;;  %v9312_v54 = vld [vmem:[#allocation5 + $0x10e0] sm:$0xf0] }
 0x215   :  { %v11887_v31 = vld [vmem:[#allocation5 + $0x1a1c] sm:$0xf0]  ;;  %4925 = vmatmul.bf16.vlgmr.msrb.gmra.mxu1 %v12540_v42  ;;  %v3107_v56 = vpop.f32.mrf.mxu0  ;;  %v11725_v20 = vld [vmem:[#allocation5 + $0x1004] sm:$0xf] }
 0x216   :  { %v9903_v32 = vor.u32 %v11887_v31, %v9902_v29  ;;  %v10270_v33 = vld [vmem:[#allocation5 + $0x1fc0] sm:$0xf]  ;;  %4983 = vmatpush.bf16.msra.mxu2 %v10127_v28  ;;  %5009 = vmatpush.bf16.msrb.mxu0 %v9363_v57  ;;  %v3296_v0 = vmul.f32 %v3288_v13, %v12538_v40  ;;  %v9315_v57 = vor.u32 %v11737_v22, %v9312_v54  ;;  %v11817_v4 = vld [vmem:[#allocation5 + $0x15c4] sm:$0xf] }
 0x217   :  { %v11979_v35 = vld [vmem:[#allocation5 + $0x1fdc] sm:$0xf0]  ;;  %v3131_v50 = vpop.f32.mrf.mxu2  ;;  %v3120_v2 = vpop.f32.mrf.mxu1  ;;  %v9408_v22 = vld [vmem:[#allocation5 + $0x1260] sm:$0xf0] }
 0x218   :  { %v10271_v43 = vor.u32 %v11979_v35, %v10270_v33  ;;  %v10110_v47 = vld [vmem:[#allocation5 + $0x1d40] sm:$0xf]  ;;  %v3132_v53 = vadd.f32 %v3131_v50, %v12481_v46  ;;  %4976 = vmatpush.bf16.msra.mxu1 %v9903_v32  ;;  %v11741_v46 = vld [vmem:[#allocation5 + $0x1104] sm:$0xf]  ;;  %v3304_v9 = vmul.f32 %v3296_v0, %v12538_v40 }
 0x219   :  { %v11939_v48 = vld [vmem:[#allocation5 + $0x1d5c] sm:$0xf0]  ;;  %v3144_v55 = vpop.f32.mrf.mxu3  ;;  %v9331_v11 = vor.u32 %v11741_v46, %v9328_v37  ;;  %v11773_v33 = vld [vmem:[#allocation5 + $0x1304] sm:$0xf] }
 0x21a   :  { %4995 = vmatpush.bf16.msra.mxu3 %v10271_v43  ;;  %v10111_v60 = vor.u32 %v11939_v48, %v10110_v47  ;;  %v10254_v61 = vld [vmem:[#allocation5 + $0x1f80] sm:$0xf]  ;;  %v3145_v6 = vadd.f32 %v3144_v55, %v3132_v53  ;;  %5010 = vmatpush.bf16.msrb.mxu0 %v9347_v58  ;;  %v3312_v41 = vadd.f32 %v3304_v9, %v12538_v40  ;;  %v9456_v35 = vld [vmem:[#allocation5 + $0x1320] sm:$0xf0] }
 0x21b   :  { %v11975_v62 = vld [vmem:[#allocation5 + $0x1f9c] sm:$0xf0]  ;;  %v9459_v43 = vor.u32 %v11773_v33, %v9456_v35  ;;  %v11733_v47 = vld [vmem:[#allocation5 + $0x1084] sm:$0xf] }
 0x21c   :  { %5021 = vmatpush.bf16.msrb.mxu1 %v9507_v45  ;;  %v10255_v3 = vor.u32 %v11975_v62, %v10254_v61  ;;  %4984 = vmatpush.bf16.msra.mxu2 %v10111_v60  ;;  %v10094_v30 = vld [vmem:[#allocation5 + $0x1d00] sm:$0xf]  ;;  %v12548_v24 = vadd.f32 %v3257_v51, %v3145_v6  ;;  %v3320_v18 = vmul.f32 0.7978846, %v3312_v41  ;;  %v9299_v50 = vor.u32 %v11733_v47, %v9296_v49  ;;  %v9440_v55 = vld [vmem:[#allocation5 + $0x12e0] sm:$0xf0] }
 0x21d   :  { %v11935_v8 = vld [vmem:[#allocation5 + $0x1d1c] sm:$0xf0]  ;;  %v9443_v58 = vor.u32 %v11769_v52, %v9440_v55  ;;  %v11729_v2 = vld [vmem:[#allocation5 + $0x1044] sm:$0xf]  ;;  %v3280_v6 = vmul.f32 0.5, %v12538_v40 }
 0x21e   :  { %4996 = vmatpush.bf16.msra.mxu3 %v10255_v3  ;;  %v10095_v10 = vor.u32 %v11935_v8, %v10094_v30  ;;  %v10238_v27 = vld [vmem:[#allocation5 + $0x1f40] sm:$0xf]  ;;  %v3289_v15 = vmul.f32 0.044715, %v12548_v24  ;;  %5011 = vmatpush.bf16.msrb.mxu0 %v9331_v11  ;;  %12253 = vtanh.f32 %v3320_v18  ;;  %v9280_v3 = vld [vmem:[#allocation5 + $0x1060] sm:$0xf0] }
 0x21f   :  { %v11971_v39 = vld [vmem:[#allocation5 + $0x1f5c] sm:$0xf0]  ;;  %v3133_v19 = vpop.f32.mrf.mxu2  ;;  %v9283_v30 = vor.u32 %v11729_v2, %v9280_v3  ;;  %v11765_v46 = vld [vmem:[#allocation5 + $0x1284] sm:$0xf]  ;;  %v3259_v3 = vperm.slane %v12513_v59, 5 }
 0x220   :  { %5022 = vmatpush.bf16.msrb.mxu1 %v9491_v7  ;;  %v10239_v12 = vor.u32 %v11971_v39, %v10238_v27  ;;  %4985 = vmatpush.bf16.msra.mxu2 %v10095_v10  ;;  %v10078_v38 = vld [vmem:[#allocation5 + $0x1cc0] sm:$0xf]  ;;  %v3297_v25 = vmul.f32 %v3289_v15, %v12548_v24  ;;  %v9424_v10 = vld [vmem:[#allocation5 + $0x12a0] sm:$0xf0] }
 0x221   :  { %v11931_v21 = vld [vmem:[#allocation5 + $0x1cdc] sm:$0xf0]  ;;  %v3146_v26 = vpop.f32.mrf.mxu3  ;;  %v9427_v11 = vor.u32 %v11765_v46, %v9424_v10  ;;  %v9632_v15 = vld [vmem:[#allocation5 + $0x15e0] sm:$0xf0] }
 0x222   :  { %4997 = vmatpush.bf16.msra.mxu3 %v10239_v12  ;;  %v10079_v28 = vor.u32 %v11931_v21, %v10078_v38  ;;  %v10222_v29 = vld [vmem:[#allocation5 + $0x1f00] sm:$0xf]  ;;  %v3305_v36 = vmul.f32 %v3297_v25, %v12548_v24  ;;  %5012 = vmatpush.bf16.msrb.mxu0 %v9315_v57  ;;  %v9264_v12 = vld [vmem:[#allocation5 + $0x1020] sm:$0xf0]  ;;  %v9635_v38 = vor.u32 %v11817_v4, %v9632_v15 }
 0x223   :  { %v11967_v31 = vld [vmem:[#allocation5 + $0x1f1c] sm:$0xf0]  ;;  %v11761_v21 = vld [vmem:[#allocation5 + $0x1244] sm:$0xf] }
 0x224   :  { %5023 = vmatpush.bf16.msrb.mxu1 %v9475_v16  ;;  %v10223_v32 = vor.u32 %v11967_v31, %v10222_v29  ;;  %4986 = vmatpush.bf16.msra.mxu2 %v10079_v28  ;;  %v10062_v44 = vld [vmem:[#allocation5 + $0x1c80] sm:$0xf]  ;;  %v3313_v13 = vadd.f32 %v3305_v36, %v12548_v24  ;;  %v12254_v63 = vpop.eup %12253  ;;  %v9267_v16 = vor.u32 %v11725_v20, %v9264_v12  ;;  %v3258_v28 = vperm.slane %v12513_v59, 4  ;;  %v11813_v35 = vld [vmem:[#allocation5 + $0x1584] sm:$0xf] }
 0x225   :  { %v11927_v45 = vld [vmem:[#allocation5 + $0x1c9c] sm:$0xf0]  ;;  %v3336_v7 = vadd.f32 1.0, %v12254_v63  ;;  %v9411_v29 = vor.u32 %v11761_v21, %v9408_v22  ;;  %v9616_v36 = vld [vmem:[#allocation5 + $0x15a0] sm:$0xf0] }
 0x226   :  { %4998 = vmatpush.bf16.msra.mxu3 %v10223_v32  ;;  %v10063_v48 = vor.u32 %v11927_v45, %v10062_v44  ;;  %v10206_v51 = vld [vmem:[#allocation5 + $0x1ec0] sm:$0xf]  ;;  %v3321_v56 = vmul.f32 0.7978846, %v3313_v13  ;;  %5013 = vmatpush.bf16.msrb.mxu0 %v9299_v50  ;;  %v3281_v32 = vmul.f32 0.5, %v12548_v24 }
 0x227   :  { %v11963_v60 = vld [vmem:[#allocation5 + $0x1edc] sm:$0xf0]  ;;  %v3344_v37 = vmul.f32 %v3336_v7, %v3280_v6  ;;  %v11757_v49 = vld [vmem:[#allocation5 + $0x1204] sm:$0xf] }
 0x228   :  { %5024 = vmatpush.bf16.msrb.mxu1 %v9459_v43  ;;  %v10207_v53 = vor.u32 %v11963_v60, %v10206_v51  ;;  %4987 = vmatpush.bf16.msra.mxu2 %v10063_v48  ;;  %v10046_v61 = vld [vmem:[#allocation5 + $0x1c40] sm:$0xf]  ;;  %12255 = vtanh.f32 %v3321_v56  ;;  %v9619_v43 = vor.u32 %v11813_v35, %v9616_v36  ;;  %v9392_v13 = vld [vmem:[#allocation5 + $0x1220] sm:$0xf0] }
 0x229   :  { %v11923_v62 = vld [vmem:[#allocation5 + $0x1c5c] sm:$0xf0]  ;;  %v12556_v40 = vpack.c.bf16 %v3344_v37, %v3344_v37  ;;  %v11849_v51 = vld [vmem:[#allocation5 + $0x17c4] sm:$0xf] }
 0x22a   :  { %4999 = vmatpush.bf16.msra.mxu3 %v10207_v53  ;;  %v10047_v0 = vor.u32 %v11923_v62, %v10046_v61  ;;  %v10190_v5 = vld [vmem:[#allocation5 + $0x1e80] sm:$0xf]  ;;  %5014 = vmatpush.bf16.msrb.mxu0 %v9283_v30  ;;  %v9760_v60 = vld [vmem:[#allocation5 + $0x17e0] sm:$0xf0] }
 0x22b   :  { %v11959_v8 = vld [vmem:[#allocation5 + $0x1e9c] sm:$0xf0]  ;;  %4938 = vmatmul.bf16.vlgmr.msrb.gmra.mxu2 %v12556_v40  ;;  %v9763_v53 = vor.u32 %v11849_v51, %v9760_v60  ;;  %v11809_v55 = vld [vmem:[#allocation5 + $0x1544] sm:$0xf] }
 0x22c   :  { %5025 = vmatpush.bf16.msrb.mxu1 %v9443_v58  ;;  %v10191_v9 = vor.u32 %v11959_v8, %v10190_v5  ;;  %4988 = vmatpush.bf16.msra.mxu2 %v10047_v0  ;;  %v10030_v27 = vld [vmem:[#allocation5 + $0x1c00] sm:$0xf]  ;;  %v9600_v56 = vld [vmem:[#allocation5 + $0x1560] sm:$0xf0] }
 0x22d   :  { %v11919_v39 = vld [vmem:[#allocation5 + $0x1c1c] sm:$0xf0]  ;;  %v3157_v26 = vpop.f32.mrf.mxu0  ;;  %v9603_v58 = vor.u32 %v11809_v55, %v9600_v56  ;;  %v11845_v63 = vld [vmem:[#allocation5 + $0x1784] sm:$0xf] }
 0x22e   :  { %5000 = vmatpush.bf16.msra.mxu3 %v10191_v9  ;;  %v10031_v41 = vor.u32 %v11919_v39, %v10030_v27  ;;  %v10174_v18 = vld [vmem:[#allocation5 + $0x1e40] sm:$0xf]  ;;  %v12256_v25 = vpop.eup %12255  ;;  %v3158_v31 = vadd.f32 %v3157_v26, %v12493_v34  ;;  %5015 = vmatpush.bf16.msrb.mxu0 %v9267_v16  ;;  %v9395_v34 = vor.u32 %v11757_v49, %v9392_v13  ;;  %v9744_v6 = vld [vmem:[#allocation5 + $0x17a0] sm:$0xf0] }
 0x22f   :  { %v11955_v19 = vld [vmem:[#allocation5 + $0x1e5c] sm:$0xf0]  ;;  %v3170_v57 = vpop.f32.mrf.mxu1  ;;  %v3337_v33 = vadd.f32 1.0, %v12256_v25  ;;  %v9747_v8 = vor.u32 %v11845_v63, %v9744_v6  ;;  %v11805_v46 = vld [vmem:[#allocation5 + $0x1504] sm:$0xf] }
 0x230   :  { %5026 = vmatpush.bf16.msrb.mxu1 %v9427_v11  ;;  %v10175_v54 = vor.u32 %v11955_v19, %v10174_v18  ;;  %4989 = vmatpush.bf16.msra.mxu2 %v10031_v41  ;;  %v10158_v44 = vld [vmem:[#allocation5 + $0x1e00] sm:$0xf]  ;;  %v3171_v45 = vadd.f32 %v3170_v57, %v3158_v31  ;;  %v9584_v9 = vld [vmem:[#allocation5 + $0x1520] sm:$0xf0] }
 0x231   :  { %v3345_v47 = vmul.f32 %v3337_v33, %v3281_v32  ;;  %v11951_v48 = vld [vmem:[#allocation5 + $0x1e1c] sm:$0xf0]  ;;  %v9587_v37 = vor.u32 %v11805_v46, %v9584_v9  ;;  %v11841_v27 = vld [vmem:[#allocation5 + $0x1744] sm:$0xf] }
 0x232   :  { %5001 = vmatpush.bf16.msra.mxu3 %v10175_v54  ;;  %v10159_v50 = vor.u32 %v11951_v48, %v10158_v44  ;;  %v12562_v24 = vadd.f32 %v3258_v28, %v3171_v45  ;;  %v9728_v39 = vld [vmem:[#allocation5 + $0x1760] sm:$0xf0] }
 0x233   :  { %v12564_v52 = vpack.c.bf16 %v3345_v47, %v3345_v47  ;;  %v9731_v20 = vor.u32 %v11841_v27, %v9728_v39  ;;  %v11801_v12 = vld [vmem:[#allocation5 + $0x14c4] sm:$0xf] }
 0x234   :  { %5034 = vmatpush.bf16.msrb.mxu2 %v9635_v38  ;;  %5027 = vmatpush.bf16.msrb.mxu1 %v9411_v29  ;;  %v3290_v61 = vmul.f32 0.044715, %v12562_v24  ;;  %v9568_v4 = vld [vmem:[#allocation5 + $0x14e0] sm:$0xf0]  ;;  %v3282_v13 = vmul.f32 0.5, %v12562_v24 }
 0x235   :  { %4951 = vmatmul.bf16.vlgmr.msrb.gmra.mxu3 %v12564_v52  ;;  %v3159_v5 = vpop.f32.mrf.mxu0  ;;  %v9571_v16 = vor.u32 %v11801_v12, %v9568_v4  ;;  %v11837_v19 = vld [vmem:[#allocation5 + $0x1704] sm:$0xf] }
 0x236   :  { %5002 = vmatpush.bf16.msra.mxu3 %v10159_v50  ;;  %v3298_v7 = vmul.f32 %v3290_v61, %v12562_v24  ;;  %v9712_v21 = vld [vmem:[#allocation5 + $0x1720] sm:$0xf0] }
 0x237   :  { %v3183_v62 = vpop.f32.mrf.mxu2  ;;  %v3172_v30 = vpop.f32.mrf.mxu1  ;;  %v9715_v26 = vor.u32 %v11837_v19, %v9712_v21  ;;  %v11797_v28 = vld [vmem:[#allocation5 + $0x1484] sm:$0xf] }
 0x238   :  { %5035 = vmatpush.bf16.msrb.mxu2 %v9619_v43  ;;  %5028 = vmatpush.bf16.msrb.mxu1 %v9395_v34  ;;  %v3184_v0 = vadd.f32 %v3183_v62, %v12499_v23  ;;  %v3306_v11 = vmul.f32 %v3298_v7, %v12562_v24  ;;  %v9552_v54 = vld [vmem:[#allocation5 + $0x14a0] sm:$0xf0] }
 0x239   :  { %v3196_v2 = vpop.f32.mrf.mxu3  ;;  %v9555_v31 = vor.u32 %v11797_v28, %v9552_v54  ;;  %v11833_v57 = vld [vmem:[#allocation5 + $0x16c4] sm:$0xf] }
 0x23a   :  { %5047 = vmatpush.bf16.msrb.mxu3 %v9763_v53  ;;  %v3197_v10 = vadd.f32 %v3196_v2, %v3184_v0  ;;  %v3314_v41 = vadd.f32 %v3306_v11, %v12562_v24  ;;  %v9696_v32 = vld [vmem:[#allocation5 + $0x16e0] sm:$0xf0] }
 0x23b   :  { %v9699_v35 = vor.u32 %v11833_v57, %v9696_v32  ;;  %v11793_v36 = vld [vmem:[#allocation5 + $0x1444] sm:$0xf] }
 0x23c   :  { %5036 = vmatpush.bf16.msrb.mxu2 %v9603_v58  ;;  %v12572_v23 = vadd.f32 %v3259_v3, %v3197_v10  ;;  %v3322_v38 = vmul.f32 0.7978846, %v3314_v41  ;;  %v9536_v43 = vld [vmem:[#allocation5 + $0x1460] sm:$0xf0] }
 0x23d   :  { %v9539_v45 = vor.u32 %v11793_v36, %v9536_v43  ;;  %v11829_v48 = vld [vmem:[#allocation5 + $0x1684] sm:$0xf] }
 0x23e   :  { %5048 = vmatpush.bf16.msrb.mxu3 %v9747_v8  ;;  %v3291_v15 = vmul.f32 0.044715, %v12572_v23  ;;  %12257 = vtanh.f32 %v3322_v38  ;;  %v9680_v49 = vld [vmem:[#allocation5 + $0x16a0] sm:$0xf0]  ;;  %v3260_v8 = vperm.slane %v12513_v59, 6  ;;  %v3283_v10 = vmul.f32 0.5, %v12572_v23 }
 0x23f   :  { %v3185_v18 = vpop.f32.mrf.mxu2  ;;  %v11881_v34 = vld [vmem:[#allocation5 + $0x19c4] sm:$0xf]  ;;  %v9683_v60 = vor.u32 %v11829_v48, %v9680_v49 }
 0x240   :  { %5037 = vmatpush.bf16.msrb.mxu2 %v9587_v37  ;;  %v3299_v22 = vmul.f32 %v3291_v15, %v12572_v23  ;;  %v9888_v51 = vld [vmem:[#allocation5 + $0x19e0] sm:$0xf0] }
 0x241   :  { %v3198_v25 = vpop.f32.mrf.mxu3  ;;  %v11789_v53 = vld [vmem:[#allocation5 + $0x1404] sm:$0xf]  ;;  %v9891_v61 = vor.u32 %v11881_v34, %v9888_v51 }
 0x242   :  { %5049 = vmatpush.bf16.msrb.mxu3 %v9731_v20  ;;  %v3307_v29 = vmul.f32 %v3299_v22, %v12572_v23  ;;  %v9520_v55 = vld [vmem:[#allocation5 + $0x1420] sm:$0xf0] }
 0x243   :  { %v9523_v58 = vor.u32 %v11789_v53, %v9520_v55  ;;  %v11825_v62 = vld [vmem:[#allocation5 + $0x1644] sm:$0xf] }
 0x244   :  { %5038 = vmatpush.bf16.msrb.mxu2 %v9571_v16  ;;  %v3315_v33 = vadd.f32 %v3307_v29, %v12572_v23  ;;  %v12258_v47 = vpop.eup %12257  ;;  %v11877_v0 = vld [vmem:[#allocation5 + $0x1984] sm:$0xf]  ;;  %v3261_v29 = vperm.slane %v12513_v59, 7 }
 0x245   :  { %v3338_v50 = vadd.f32 1.0, %v12258_v47  ;;  %v9872_v2 = vld [vmem:[#allocation5 + $0x19a0] sm:$0xf0] }
 0x246   :  { %5050 = vmatpush.bf16.msrb.mxu3 %v9715_v26  ;;  %v3323_v44 = vmul.f32 0.7978846, %v3315_v33  ;;  %v9664_v3 = vld [vmem:[#allocation5 + $0x1660] sm:$0xf0]  ;;  %v9875_v9 = vor.u32 %v11877_v0, %v9872_v2 }
 0x247   :  { %v3346_v56 = vmul.f32 %v3338_v50, %v3282_v13  ;;  %v9667_v24 = vor.u32 %v11825_v62, %v9664_v3  ;;  %v11913_v46 = vld [vmem:[#allocation5 + $0x1bc4] sm:$0xf] }
 0x248   :  { %5039 = vmatpush.bf16.msrb.mxu2 %v9555_v31  ;;  %12259 = vtanh.f32 %v3323_v44  ;;  %v10016_v11 = vld [vmem:[#allocation5 + $0x1be0] sm:$0xf0] }
 0x249   :  { %v12580_v63 = vpack.c.bf16 %v3346_v56, %v3346_v56  ;;  %v11821_v27 = vld [vmem:[#allocation5 + $0x1604] sm:$0xf]  ;;  %v10019_v16 = vor.u32 %v11913_v46, %v10016_v11 }
 0x24a   :  { %5051 = vmatpush.bf16.msrb.mxu3 %v9699_v35  ;;  %v11873_v20 = vld [vmem:[#allocation5 + $0x1944] sm:$0xf] }
 0x24b   :  { %4964 = vmatmul.bf16.vlgmr.msra.gmra.mxu0 %v12580_v63  ;;  %v9856_v41 = vld [vmem:[#allocation5 + $0x1960] sm:$0xf0] }
 0x24c   :  { %5040 = vmatpush.bf16.msrb.mxu2 %v9539_v45  ;;  %5060 = vmatpush.bf16.msra.mxu0 %v9891_v61  ;;  %v9648_v12 = vld [vmem:[#allocation5 + $0x1620] sm:$0xf0]  ;;  %v9859_v18 = vor.u32 %v11873_v20, %v9856_v41 }
 0x24d   :  { %v3209_v5 = vpop.f32.mrf.mxu0  ;;  %v9651_v4 = vor.u32 %v11821_v27, %v9648_v12  ;;  %v11909_v19 = vld [vmem:[#allocation5 + $0x1b84] sm:$0xf] }
 0x24e   :  { %5052 = vmatpush.bf16.msrb.mxu3 %v9683_v60  ;;  %v12260_v6 = vpop.eup %12259  ;;  %v3210_v7 = vadd.f32 %v3209_v5, %v12505_v17  ;;  %v10000_v21 = vld [vmem:[#allocation5 + $0x1ba0] sm:$0xf0] }
 0x24f   :  { %v3222_v30 = vpop.f32.mrf.mxu1  ;;  %v3339_v37 = vadd.f32 1.0, %v12260_v6  ;;  %v11869_v25 = vld [vmem:[#allocation5 + $0x1904] sm:$0xf]  ;;  %v10003_v33 = vor.u32 %v11909_v19, %v10000_v21 }
 0x250   :  { %5041 = vmatpush.bf16.msrb.mxu2 %v9523_v58  ;;  %v3223_v39 = vadd.f32 %v3222_v30, %v3210_v7  ;;  %5061 = vmatpush.bf16.msra.mxu0 %v9875_v9  ;;  %v9840_v26 = vld [vmem:[#allocation5 + $0x1920] sm:$0xf0] }
 0x251   :  { %v3347_v17 = vmul.f32 %v3339_v37, %v3283_v10  ;;  %v9843_v36 = vor.u32 %v11869_v25, %v9840_v26  ;;  %v11905_v43 = vld [vmem:[#allocation5 + $0x1b44] sm:$0xf] }
 0x252   :  { %5053 = vmatpush.bf16.msrb.mxu3 %v9667_v24  ;;  %v12586_v15 = vadd.f32 %v3260_v8, %v3223_v39  ;;  %v9984_v44 = vld [vmem:[#allocation5 + $0x1b60] sm:$0xf0] }
 0x253   :  { %v12588_v38 = vpack.c.bf16 %v3347_v17, %v3347_v17  ;;  %v11865_v47 = vld [vmem:[#allocation5 + $0x18c4] sm:$0xf]  ;;  %v9987_v49 = vor.u32 %v11905_v43, %v9984_v44  ;;  %v9382_v17 = vld [vmem:[#allocation5 + $0x11c8] sm:$0xf] }
 0x254   :  { %v3292_v23 = vmul.f32 0.044715, %v12586_v15  ;;  %5062 = vmatpush.bf16.msra.mxu0 %v9859_v18  ;;  %v11901_v34 = vld [vmem:[#allocation5 + $0x1b04] sm:$0xf]  ;;  %v3284_v41 = vmul.f32 0.5, %v12586_v15 }
 0x255   :  { %4977 = vmatmul.bf16.vlgmr.msra.gmra.mxu1 %v12588_v38  ;;  %v3211_v31 = vpop.f32.mrf.mxu0  ;;  %v9968_v51 = vld [vmem:[#allocation5 + $0x1b20] sm:$0xf0]  ;;  %v9510_v43 = vld [vmem:[#allocation5 + $0x13c8] sm:$0xf] }
 0x256   :  { %5054 = vmatpush.bf16.msrb.mxu3 %v9651_v4  ;;  %v3300_v57 = vmul.f32 %v3292_v23, %v12586_v15  ;;  %5073 = vmatpush.bf16.msra.mxu1 %v10019_v16  ;;  %v11861_v55 = vld [vmem:[#allocation5 + $0x1884] sm:$0xf]  ;;  %v9971_v62 = vor.u32 %v11901_v34, %v9968_v51  ;;  %v11756_v4 = vld [vmem:[#allocation5 + $0x11e4] sm:$0xf0] }
 0x257   :  { %v3235_v22 = vpop.f32.mrf.mxu2  ;;  %v3224_v32 = vpop.f32.mrf.mxu1  ;;  %v9808_v56 = vld [vmem:[#allocation5 + $0x18a0] sm:$0xf0]  ;;  %v9383_v25 = vor.u32 %v11756_v4, %v9382_v17  ;;  %v11752_v31 = vld [vmem:[#allocation5 + $0x11a4] sm:$0xf0] }
 0x258   :  { %v3236_v28 = vadd.f32 %v3235_v22, %v12511_v14  ;;  %v3308_v45 = vmul.f32 %v3300_v57, %v12586_v15  ;;  %v9824_v14 = vld [vmem:[#allocation5 + $0x18e0] sm:$0xf0]  ;;  %5063 = vmatpush.bf16.msra.mxu0 %v9843_v36  ;;  %v9811_v2 = vor.u32 %v11861_v55, %v9808_v56  ;;  %v11748_v34 = vld [vmem:[#allocation5 + $0x1164] sm:$0xf0] }
 0x259   :  { %v3248_v54 = vpop.f32.mrf.mxu3  ;;  %v9827_v50 = vor.u32 %v11865_v47, %v9824_v14  ;;  %v11897_v3 = vld [vmem:[#allocation5 + $0x1ac4] sm:$0xf] }
 0x25a   :  { %v3249_v35 = vadd.f32 %v3248_v54, %v3236_v28  ;;  %v3316_v59 = vadd.f32 %v3308_v45, %v12586_v15  ;;  %5074 = vmatpush.bf16.msra.mxu1 %v10003_v33  ;;  %v9952_v5 = vld [vmem:[#allocation5 + $0x1ae0] sm:$0xf0] }
 0x25b   :  { %5016 = vmatmul.bf16.vlgmr.msrb.gmra.mxu0 %v12532_v1  ;;  %v11857_v24 = vld [vmem:[#allocation5 + $0x1844] sm:$0xf]  ;;  %v9955_v30 = vor.u32 %v11897_v3, %v9952_v5 }
 0x25c   :  { %v12596_v48 = vadd.f32 %v3261_v29, %v3249_v35  ;;  %v3324_v60 = vmul.f32 0.7978846, %v3316_v59  ;;  %5064 = vmatpush.bf16.msra.mxu0 %v9827_v50  ;;  %v9792_v6 = vld [vmem:[#allocation5 + $0x1860] sm:$0xf0]  ;;  %v9366_v29 = vld [vmem:[#allocation5 + $0x1188] sm:$0xf] }
 0x25d   :  { %v11893_v8 = vld [vmem:[#allocation5 + $0x1a84] sm:$0xf]  ;;  %v9795_v9 = vor.u32 %v11857_v24, %v9792_v6  ;;  %v9367_v45 = vor.u32 %v11752_v31, %v9366_v29  ;;  %v11788_v59 = vld [vmem:[#allocation5 + $0x13e4] sm:$0xf0] }
 0x25e   :  { %v3293_v13 = vmul.f32 0.044715, %v12596_v48  ;;  %12261 = vtanh.f32 %v3324_v60  ;;  %5075 = vmatpush.bf16.msra.mxu1 %v9987_v49  ;;  %v9936_v10 = vld [vmem:[#allocation5 + $0x1aa0] sm:$0xf0]  ;;  %v3285_v47 = vmul.f32 0.5, %v12596_v48  ;;  %v9511_v55 = vor.u32 %v11788_v59, %v9510_v43 }
 0x25f   :  { %v3237_v53 = vpop.f32.mrf.mxu2  ;;  %v11853_v37 = vld [vmem:[#allocation5 + $0x1804] sm:$0xf]  ;;  %v9939_v16 = vor.u32 %v11893_v8, %v9936_v10  ;;  %v9350_v50 = vld [vmem:[#allocation5 + $0x1148] sm:$0xf] }
 0x260   :  { %v3301_v58 = vmul.f32 %v3293_v13, %v12596_v48  ;;  %5065 = vmatpush.bf16.msra.mxu0 %v9811_v2  ;;  %v9776_v27 = vld [vmem:[#allocation5 + $0x1820] sm:$0xf0]  ;;  %v11784_v2 = vld [vmem:[#allocation5 + $0x13a4] sm:$0xf0] }
 0x261   :  { %v3250_v61 = vpop.f32.mrf.mxu3  ;;  %v11945_v39 = vld [vmem:[#allocation5 + $0x1dc4] sm:$0xf]  ;;  %v9779_v18 = vor.u32 %v11853_v37, %v9776_v27  ;;  %v9334_v24 = vld [vmem:[#allocation5 + $0x1108] sm:$0xf] }
 0x262   :  { %v3309_v0 = vmul.f32 %v3301_v58, %v12596_v48  ;;  %5076 = vmatpush.bf16.msra.mxu1 %v9971_v62  ;;  %v10144_v20 = vld [vmem:[#allocation5 + $0x1de0] sm:$0xf0]  ;;  %v9351_v62 = vor.u32 %v11748_v34, %v9350_v50  ;;  %v11744_v6 = vld [vmem:[#allocation5 + $0x1124] sm:$0xf0] }
 0x263   :  { %v11889_v21 = vld [vmem:[#allocation5 + $0x1a44] sm:$0xf]  ;;  %v10147_v22 = vor.u32 %v11945_v39, %v10144_v20  ;;  %v9478_v37 = vld [vmem:[#allocation5 + $0x1348] sm:$0xf] }
 0x264   :  { %v3317_v7 = vadd.f32 %v3309_v0, %v12596_v48  ;;  %v12262_v11 = vpop.eup %12261  ;;  %5066 = vmatpush.bf16.msra.mxu0 %v9795_v9  ;;  %v9920_v23 = vld [vmem:[#allocation5 + $0x1a60] sm:$0xf0]  ;;  %v9494_v0 = vld [vmem:[#allocation5 + $0x1388] sm:$0xf]  ;;  %v9335_v9 = vor.u32 %v11744_v6, %v9334_v24 }
 0x265   :  { %5029 = vmatmul.bf16.vlgmr.msrb.gmra.mxu1 %v12540_v42  ;;  %v3340_v12 = vadd.f32 1.0, %v12262_v11  ;;  %v11941_v26 = vld [vmem:[#allocation5 + $0x1d84] sm:$0xf]  ;;  %v9923_v15 = vor.u32 %v11889_v21, %v9920_v23  ;;  %v11780_v11 = vld [vmem:[#allocation5 + $0x1364] sm:$0xf0] }
 0x266   :  { %v3325_v46 = vmul.f32 0.7978846, %v3317_v7  ;;  %5077 = vmatpush.bf16.msra.mxu1 %v9955_v30  ;;  %v10128_v54 = vld [vmem:[#allocation5 + $0x1da0] sm:$0xf0]  ;;  %v9495_v30 = vor.u32 %v11784_v2, %v9494_v0  ;;  %v9318_v27 = vld [vmem:[#allocation5 + $0x10c8] sm:$0xf]  ;;  %v9479_v17 = vor.u32 %v11780_v11, %v9478_v37 }
 0x267   :  { %v3348_v19 = vmul.f32 %v3340_v12, %v3284_v41  ;;  %v11885_v57 = vld [vmem:[#allocation5 + $0x1a04] sm:$0xf]  ;;  %v10131_v44 = vor.u32 %v11941_v26, %v10128_v54  ;;  %v11740_v39 = vld [vmem:[#allocation5 + $0x10e4] sm:$0xf0] }
 0x268   :  { %12263 = vtanh.f32 %v3325_v46  ;;  %v9904_v32 = vld [vmem:[#allocation5 + $0x1a20] sm:$0xf0]  ;;  %5067 = vmatpush.bf16.msra.mxu0 %v9779_v18  ;;  %v11776_v21 = vld [vmem:[#allocation5 + $0x1324] sm:$0xf0] }
 0x269   :  { %v12606_v28 = vpack.c.bf16 %v3348_v19, %v3348_v19  ;;  %v11977_v35 = vld [vmem:[#allocation5 + $0x1fc4] sm:$0xf]  ;;  %v9907_v51 = vor.u32 %v11885_v57, %v9904_v32  ;;  %v9462_v19 = vld [vmem:[#allocation5 + $0x1308] sm:$0xf] }
 0x26a   :  { %5078 = vmatpush.bf16.msra.mxu1 %v9939_v16  ;;  %v10272_v36 = vld [vmem:[#allocation5 + $0x1fe0] sm:$0xf0]  ;;  %v9319_v16 = vor.u32 %v11740_v39, %v9318_v27  ;;  %v9463_v31 = vor.u32 %v11776_v21, %v9462_v19  ;;  %v9286_v43 = vld [vmem:[#allocation5 + $0x1048] sm:$0xf] }
 0x26b   :  { %4990 = vmatmul.bf16.vlgmr.msra.gmra.mxu2 %v12606_v28  ;;  %v11937_v49 = vld [vmem:[#allocation5 + $0x1d44] sm:$0xf]  ;;  %5068 = vmatmul.bf16.vlgmr.msra.gmra.mxu0 %v12580_v63  ;;  %v10275_v53 = vor.u32 %v11977_v35, %v10272_v36  ;;  %v11772_v35 = vld [vmem:[#allocation5 + $0x12e4] sm:$0xf0] }
 0x26c   :  { %5086 = vmatpush.bf16.msra.mxu2 %v10147_v22  ;;  %5112 = vmatpush.bf16.msrb.mxu0 %v9383_v25  ;;  %v10112_v13 = vld [vmem:[#allocation5 + $0x1d60] sm:$0xf0]  ;;  %v9302_v22 = vld [vmem:[#allocation5 + $0x1088] sm:$0xf] }
 0x26d   :  { %v11973_v56 = vld [vmem:[#allocation5 + $0x1f84] sm:$0xf]  ;;  %v10115_v48 = vor.u32 %v11937_v49, %v10112_v13  ;;  %v11736_v25 = vld [vmem:[#allocation5 + $0x10a4] sm:$0xf0] }
 0x26e   :  { %v12264_v33 = vpop.eup %12263  ;;  %5079 = vmatpush.bf16.msra.mxu1 %v9923_v15  ;;  %v10256_v58 = vld [vmem:[#allocation5 + $0x1fa0] sm:$0xf0]  ;;  %v9303_v57 = vor.u32 %v11736_v25, %v9302_v22  ;;  %v9430_v34 = vld [vmem:[#allocation5 + $0x1288] sm:$0xf] }
 0x26f   :  { %v3341_v14 = vadd.f32 1.0, %v12264_v33  ;;  %v11933_v3 = vld [vmem:[#allocation5 + $0x1d04] sm:$0xf]  ;;  %v10259_v7 = vor.u32 %v11973_v56, %v10256_v58  ;;  %v9446_v33 = vld [vmem:[#allocation5 + $0x12c8] sm:$0xf] }
 0x270   :  { %5087 = vmatpush.bf16.msra.mxu2 %v10131_v44  ;;  %5113 = vmatpush.bf16.msrb.mxu0 %v9367_v45  ;;  %v10096_v5 = vld [vmem:[#allocation5 + $0x1d20] sm:$0xf0]  ;;  %v11732_v44 = vld [vmem:[#allocation5 + $0x1064] sm:$0xf0]  ;;  %v9447_v59 = vor.u32 %v11772_v35, %v9446_v33 }
 0x271   :  { %v3349_v60 = vmul.f32 %v3341_v14, %v3285_v47  ;;  %v11969_v8 = vld [vmem:[#allocation5 + $0x1f44] sm:$0xf]  ;;  %v10099_v46 = vor.u32 %v11933_v3, %v10096_v5  ;;  %v9287_v13 = vor.u32 %v11732_v44, %v9286_v43  ;;  %v11728_v56 = vld [vmem:[#allocation5 + $0x1024] sm:$0xf0] }
 0x272   :  { %5080 = vmatpush.bf16.msra.mxu1 %v9907_v51  ;;  %v10240_v10 = vld [vmem:[#allocation5 + $0x1f60] sm:$0xf0]  ;;  %v11768_v51 = vld [vmem:[#allocation5 + $0x12a4] sm:$0xf0] }
 0x273   :  { %v12611_v61 = vpack.c.bf16 %v3349_v60, %v3349_v60  ;;  %v11929_v20 = vld [vmem:[#allocation5 + $0x1cc4] sm:$0xf]  ;;  %v10243_v12 = vor.u32 %v11969_v8, %v10240_v10  ;;  %v9431_v2 = vor.u32 %v11768_v51, %v9430_v34  ;;  %v9638_v3 = vld [vmem:[#allocation5 + $0x15c8] sm:$0xf] }
 0x274   :  { %5088 = vmatpush.bf16.msra.mxu2 %v10115_v48  ;;  %5114 = vmatpush.bf16.msrb.mxu0 %v9351_v62  ;;  %v10080_v41 = vld [vmem:[#allocation5 + $0x1ce0] sm:$0xf0]  ;;  %v9894_v48 = vld [vmem:[#allocation5 + $0x19c8] sm:$0xf] }
 0x275   :  { %5003 = vmatmul.bf16.vlgmr.msra.gmra.mxu3 %v12611_v61  ;;  %5081 = vmatmul.bf16.vlgmr.msra.gmra.mxu1 %v12588_v38  ;;  %v11965_v4 = vld [vmem:[#allocation5 + $0x1f04] sm:$0xf]  ;;  %v10083_v23 = vor.u32 %v11929_v20, %v10080_v41  ;;  %v11884_v62 = vld [vmem:[#allocation5 + $0x19e4] sm:$0xf0] }
 0x276   :  { %5099 = vmatpush.bf16.msra.mxu3 %v10275_v53  ;;  %5125 = vmatpush.bf16.msrb.mxu1 %v9511_v55  ;;  %v10224_v18 = vld [vmem:[#allocation5 + $0x1f20] sm:$0xf0]  ;;  %v9270_v55 = vld [vmem:[#allocation5 + $0x1008] sm:$0xf] }
 0x277   :  { %v11925_v26 = vld [vmem:[#allocation5 + $0x1c84] sm:$0xf]  ;;  %v10227_v29 = vor.u32 %v11965_v4, %v10224_v18  ;;  %v11820_v5 = vld [vmem:[#allocation5 + $0x15e4] sm:$0xf0]  ;;  %v9271_v6 = vor.u32 %v11728_v56, %v9270_v55 }
 0x278   :  { %5089 = vmatpush.bf16.msra.mxu2 %v10099_v46  ;;  %5115 = vmatpush.bf16.msrb.mxu0 %v9335_v9  ;;  %v10064_v54 = vld [vmem:[#allocation5 + $0x1ca0] sm:$0xf0]  ;;  %v11764_v8 = vld [vmem:[#allocation5 + $0x1264] sm:$0xf0]  ;;  %v9895_v9 = vor.u32 %v11884_v62, %v9894_v48  ;;  %v9639_v10 = vor.u32 %v11820_v5, %v9638_v3 }
 0x279   :  { %v11961_v15 = vld [vmem:[#allocation5 + $0x1ec4] sm:$0xf]  ;;  %v10067_v36 = vor.u32 %v11925_v26, %v10064_v54  ;;  %v9622_v37 = vld [vmem:[#allocation5 + $0x1588] sm:$0xf] }
 0x27a   :  { %5100 = vmatpush.bf16.msra.mxu3 %v10259_v7  ;;  %5126 = vmatpush.bf16.msrb.mxu1 %v9495_v30  ;;  %v10208_v32 = vld [vmem:[#allocation5 + $0x1ee0] sm:$0xf0]  ;;  %v9414_v30 = vld [vmem:[#allocation5 + $0x1248] sm:$0xf] }
 0x27b   :  { %5042 = vmatmul.bf16.vlgmr.msrb.gmra.mxu2 %v12556_v40  ;;  %v11921_v45 = vld [vmem:[#allocation5 + $0x1c44] sm:$0xf]  ;;  %v10211_v14 = vor.u32 %v11961_v15, %v10208_v32  ;;  %v9878_v11 = vld [vmem:[#allocation5 + $0x1988] sm:$0xf]  ;;  %v9415_v20 = vor.u32 %v11764_v8, %v9414_v30 }
 0x27c   :  { %5116 = vmatpush.bf16.msrb.mxu0 %v9319_v16  ;;  %5090 = vmatpush.bf16.msra.mxu2 %v10083_v23  ;;  %v10048_v47 = vld [vmem:[#allocation5 + $0x1c60] sm:$0xf0]  ;;  %v11880_v27 = vld [vmem:[#allocation5 + $0x19a4] sm:$0xf0] }
 0x27d   :  { %v11957_v49 = vld [vmem:[#allocation5 + $0x1e84] sm:$0xf]  ;;  %v10051_v60 = vor.u32 %v11921_v45, %v10048_v47  ;;  %v11816_v41 = vld [vmem:[#allocation5 + $0x15a4] sm:$0xf0]  ;;  %v9879_v19 = vor.u32 %v11880_v27, %v9878_v11 }
 0x27e   :  { %5101 = vmatpush.bf16.msra.mxu3 %v10243_v12  ;;  %5127 = vmatpush.bf16.msrb.mxu1 %v9479_v17  ;;  %v10192_v50 = vld [vmem:[#allocation5 + $0x1ea0] sm:$0xf0]  ;;  %v9398_v4 = vld [vmem:[#allocation5 + $0x1208] sm:$0xf]  ;;  %v9623_v25 = vor.u32 %v11816_v41, %v9622_v37 }
 0x27f   :  { %v11917_v53 = vld [vmem:[#allocation5 + $0x1c04] sm:$0xf]  ;;  %v10195_v0 = vor.u32 %v11957_v49, %v10192_v50  ;;  %v11760_v16 = vld [vmem:[#allocation5 + $0x1224] sm:$0xf0] }
 0x280   :  { %5117 = vmatpush.bf16.msrb.mxu0 %v9303_v57  ;;  %5091 = vmatpush.bf16.msra.mxu2 %v10067_v36  ;;  %v10032_v58 = vld [vmem:[#allocation5 + $0x1c20] sm:$0xf0]  ;;  %v9766_v18 = vld [vmem:[#allocation5 + $0x17c8] sm:$0xf] }
 0x281   :  { %v11953_v24 = vld [vmem:[#allocation5 + $0x1e44] sm:$0xf]  ;;  %v10035_v46 = vor.u32 %v11917_v53, %v10032_v58  ;;  %v11852_v21 = vld [vmem:[#allocation5 + $0x17e4] sm:$0xf0] }
 0x282   :  { %5102 = vmatpush.bf16.msra.mxu3 %v10227_v29  ;;  %5128 = vmatpush.bf16.msrb.mxu1 %v9463_v31  ;;  %v10176_v7 = vld [vmem:[#allocation5 + $0x1e60] sm:$0xf0]  ;;  %v10022_v23 = vld [vmem:[#allocation5 + $0x1bc8] sm:$0xf]  ;;  %v9399_v31 = vor.u32 %v11760_v16, %v9398_v4  ;;  %v9767_v32 = vor.u32 %v11852_v21, %v9766_v18 }
 0x283   :  { %v10179_v39 = vor.u32 %v11953_v24, %v10176_v7  ;;  %v11949_v12 = vld [vmem:[#allocation5 + $0x1e04] sm:$0xf]  ;;  %v11916_v22 = vld [vmem:[#allocation5 + $0x1be4] sm:$0xf0] }
 0x284   :  { %5118 = vmatpush.bf16.msrb.mxu0 %v9287_v13  ;;  %5092 = vmatpush.bf16.msra.mxu2 %v10051_v60  ;;  %v10160_v17 = vld [vmem:[#allocation5 + $0x1e20] sm:$0xf0]  ;;  %v9862_v26 = vld [vmem:[#allocation5 + $0x1948] sm:$0xf]  ;;  %v10023_v33 = vor.u32 %v11916_v22, %v10022_v23 }
 0x285   :  { %5055 = vmatmul.bf16.vlgmr.msrb.gmra.mxu3 %v12564_v52  ;;  %v11876_v54 = vld [vmem:[#allocation5 + $0x1964] sm:$0xf0]  ;;  %v10163_v29 = vor.u32 %v11949_v12, %v10160_v17 }
 0x286   :  { %5103 = vmatpush.bf16.msra.mxu3 %v10211_v14  ;;  %5129 = vmatpush.bf16.msrb.mxu1 %v9447_v59  ;;  %v9606_v15 = vld [vmem:[#allocation5 + $0x1548] sm:$0xf]  ;;  %v9863_v43 = vor.u32 %v11876_v54, %v9862_v26 }
 0x287   :  { %v11812_v57 = vld [vmem:[#allocation5 + $0x1564] sm:$0xf0] }
 0x288   :  { %5119 = vmatpush.bf16.msrb.mxu0 %v9271_v6  ;;  %5093 = vmatpush.bf16.msra.mxu2 %v10035_v46  ;;  %v3614_v35 = vld [vmem:[#allocation7 + $0xa] sm:$0xf]  ;;  %v9607_v14 = vor.u32 %v11812_v57, %v9606_v15  ;;  %v4913_v13 = vpop.f32.mrf.mxu0 }
 0x289   :  { %v9750_v36 = vld [vmem:[#allocation5 + $0x1788] sm:$0xf]  ;;  %v3616_v51 = vperm.slane %v3614_v35, 0 }
 0x28a   :  { %5104 = vmatpush.bf16.msra.mxu3 %v10195_v0  ;;  %5130 = vmatpush.bf16.msrb.mxu1 %v9431_v2  ;;  %v11848_v44 = vld [vmem:[#allocation5 + $0x17a4] sm:$0xf0] }
 0x28b   :  { %5120 = vmatmul.bf16.vlgmr.msrb.gmra.mxu0 %v12532_v1  ;;  %5094 = vmatmul.bf16.vlgmr.msra.gmra.mxu2 %v12606_v28  ;;  %v10006_v45 = vld [vmem:[#allocation5 + $0x1b88] sm:$0xf]  ;;  %v9751_v60 = vor.u32 %v11848_v44, %v9750_v36  ;;  %v4914_v8 = vadd.f32 %v4913_v13, %v3616_v51 }
 0x28c   :  { %5164 = vmatpush.bf16.msra.mxu0 %v9895_v9  ;;  %5138 = vmatpush.bf16.msrb.mxu2 %v9639_v10  ;;  %v11912_v47 = vld [vmem:[#allocation5 + $0x1ba4] sm:$0xf0] }
 0x28d   :  { %v9846_v59 = vld [vmem:[#allocation5 + $0x1908] sm:$0xf]  ;;  %v10007_v53 = vor.u32 %v11912_v47, %v10006_v45 }
 0x28e   :  { %5105 = vmatpush.bf16.msra.mxu3 %v10179_v39  ;;  %5131 = vmatpush.bf16.msrb.mxu1 %v9415_v20  ;;  %v11872_v49 = vld [vmem:[#allocation5 + $0x1924] sm:$0xf0] }
 0x28f   :  { %v9590_v50 = vld [vmem:[#allocation5 + $0x1508] sm:$0xf]  ;;  %v9847_v56 = vor.u32 %v11872_v49, %v9846_v59 }
 0x290   :  { %5165 = vmatpush.bf16.msra.mxu0 %v9879_v19  ;;  %5139 = vmatpush.bf16.msrb.mxu2 %v9623_v25  ;;  %v11808_v34 = vld [vmem:[#allocation5 + $0x1524] sm:$0xf0]  ;;  %v4915_v12 = vpop.f32.mrf.mxu0 }
 0x291   :  { %v9734_v55 = vld [vmem:[#allocation5 + $0x1748] sm:$0xf]  ;;  %v9591_v0 = vor.u32 %v11808_v34, %v9590_v50  ;;  %v11754_v50 = vld [vmem:[#allocation5 + $0x11cc] sm:$0xf] }
 0x292   :  { %5106 = vmatpush.bf16.msra.mxu3 %v10163_v29  ;;  %5132 = vmatpush.bf16.msrb.mxu1 %v9399_v31  ;;  %v11844_v58 = vld [vmem:[#allocation5 + $0x1764] sm:$0xf0]  ;;  %v4926_v11 = vpop.f32.mrf.mxu1  ;;  %v9384_v34 = vld [vmem:[#allocation5 + $0x11e8] sm:$0xf0] }
 0x293   :  { %v9990_v48 = vld [vmem:[#allocation5 + $0x1b48] sm:$0xf]  ;;  %v9735_v6 = vor.u32 %v11844_v58, %v9734_v55  ;;  %v12621_v41 = vadd.f32 %v4926_v11, %v4914_v8  ;;  %v11786_v12 = vld [vmem:[#allocation5 + $0x13cc] sm:$0xf] }
 0x294   :  { %5166 = vmatpush.bf16.msra.mxu0 %v9863_v43  ;;  %v11908_v62 = vld [vmem:[#allocation5 + $0x1b64] sm:$0xf0]  ;;  %5140 = vmatpush.bf16.msrb.mxu2 %v9607_v14 }
 0x295   :  { %5133 = vmatmul.bf16.vlgmr.msrb.gmra.mxu1 %v12540_v42  ;;  %v9830_v2 = vld [vmem:[#allocation5 + $0x18c8] sm:$0xf]  ;;  %5107 = vmatmul.bf16.vlgmr.msra.gmra.mxu3 %v12611_v61  ;;  %v9991_v7 = vor.u32 %v11908_v62, %v9990_v48 }
 0x296   :  { %5151 = vmatpush.bf16.msrb.mxu3 %v9767_v32  ;;  %5177 = vmatpush.bf16.msra.mxu1 %v10023_v33  ;;  %v11868_v3 = vld [vmem:[#allocation5 + $0x18e4] sm:$0xf0] }
 0x297   :  { %v9574_v5 = vld [vmem:[#allocation5 + $0x14c8] sm:$0xf]  ;;  %v9831_v46 = vor.u32 %v11868_v3, %v9830_v2  ;;  %v9387_v3 = vor.u32 %v11754_v50, %v9384_v34  ;;  %v11738_v50 = vld [vmem:[#allocation5 + $0x10cc] sm:$0xf] }
 0x298   :  { %v11804_v24 = vld [vmem:[#allocation5 + $0x14e4] sm:$0xf0]  ;;  %5167 = vmatpush.bf16.msra.mxu0 %v9847_v56  ;;  %5141 = vmatpush.bf16.msrb.mxu2 %v9591_v0  ;;  %v9320_v34 = vld [vmem:[#allocation5 + $0x10e8] sm:$0xf0] }
 0x299   :  { %v9718_v30 = vld [vmem:[#allocation5 + $0x1708] sm:$0xf]  ;;  %v9575_v27 = vor.u32 %v11804_v24, %v9574_v5 }
 0x29a   :  { %5152 = vmatpush.bf16.msrb.mxu3 %v9751_v60  ;;  %5178 = vmatpush.bf16.msra.mxu1 %v10007_v53  ;;  %v11840_v9 = vld [vmem:[#allocation5 + $0x1724] sm:$0xf0]  ;;  %v4928_v45 = vpop.f32.mrf.mxu1 }
 0x29b   :  { %v9974_v10 = vld [vmem:[#allocation5 + $0x1b08] sm:$0xf]  ;;  %v9719_v16 = vor.u32 %v11840_v9, %v9718_v30 }
 0x29c   :  { %v11904_v37 = vld [vmem:[#allocation5 + $0x1b24] sm:$0xf0]  ;;  %5168 = vmatpush.bf16.msra.mxu0 %v9831_v46  ;;  %5142 = vmatpush.bf16.msrb.mxu2 %v9575_v27 }
 0x29d   :  { %v9814_v39 = vld [vmem:[#allocation5 + $0x1888] sm:$0xf]  ;;  %v9975_v18 = vor.u32 %v11904_v37, %v9974_v10 }
 0x29e   :  { %v11864_v20 = vld [vmem:[#allocation5 + $0x18a4] sm:$0xf0]  ;;  %5153 = vmatpush.bf16.msrb.mxu3 %v9735_v6  ;;  %5179 = vmatpush.bf16.msra.mxu1 %v9991_v7  ;;  %v11750_v6 = vld [vmem:[#allocation5 + $0x118c] sm:$0xf] }
 0x29f   :  { %v9558_v17 = vld [vmem:[#allocation5 + $0x1488] sm:$0xf]  ;;  %v9815_v21 = vor.u32 %v11864_v20, %v9814_v39  ;;  %v9368_v7 = vld [vmem:[#allocation5 + $0x11a8] sm:$0xf0] }
 0x2a0   :  { %v11800_v4 = vld [vmem:[#allocation5 + $0x14a4] sm:$0xf0]  ;;  %v9371_v39 = vor.u32 %v11750_v6, %v9368_v7 }
 0x2a1   :  { %v9702_v19 = vld [vmem:[#allocation5 + $0x16c8] sm:$0xf]  ;;  %v9559_v26 = vor.u32 %v11800_v4, %v9558_v17  ;;  %5169 = vmatpush.bf16.msra.mxu0 %v9815_v21  ;;  %v9512_v17 = vld [vmem:[#allocation5 + $0x13e8] sm:$0xf0] }
 0x2a2   :  { %v11836_v23 = vld [vmem:[#allocation5 + $0x16e4] sm:$0xf0]  ;;  %5154 = vmatpush.bf16.msrb.mxu3 %v9719_v16  ;;  %5180 = vmatpush.bf16.msra.mxu1 %v9975_v18  ;;  %v11746_v16 = vld [vmem:[#allocation5 + $0x114c] sm:$0xf] }
 0x2a3   :  { %v9958_v22 = vld [vmem:[#allocation5 + $0x1ac8] sm:$0xf]  ;;  %v9703_v57 = vor.u32 %v11836_v23, %v9702_v19  ;;  %5143 = vmatpush.bf16.msrb.mxu2 %v9559_v26  ;;  %v9352_v18 = vld [vmem:[#allocation5 + $0x1168] sm:$0xf0] }
 0x2a4   :  { %v11900_v25 = vld [vmem:[#allocation5 + $0x1ae4] sm:$0xf0] }
 0x2a5   :  { %v9798_v54 = vld [vmem:[#allocation5 + $0x1848] sm:$0xf]  ;;  %v9959_v32 = vor.u32 %v11900_v25, %v9958_v22  ;;  %v9515_v22 = vor.u32 %v11786_v12, %v9512_v17 }
 0x2a6   :  { %v11860_v29 = vld [vmem:[#allocation5 + $0x1864] sm:$0xf0]  ;;  %5155 = vmatpush.bf16.msrb.mxu3 %v9703_v57  ;;  %v9496_v57 = vld [vmem:[#allocation5 + $0x13a8] sm:$0xf0] }
 0x2a7   :  { %v9542_v31 = vld [vmem:[#allocation5 + $0x1448] sm:$0xf]  ;;  %v9799_v35 = vor.u32 %v11860_v29, %v9798_v54  ;;  %5181 = vmatpush.bf16.msra.mxu1 %v9959_v32  ;;  %v9355_v29 = vor.u32 %v11746_v16, %v9352_v18  ;;  %v11742_v32 = vld [vmem:[#allocation5 + $0x110c] sm:$0xf] }
 0x2a8   :  { %v11796_v15 = vld [vmem:[#allocation5 + $0x1464] sm:$0xf0] }
 0x2a9   :  { %v9686_v33 = vld [vmem:[#allocation5 + $0x1688] sm:$0xf]  ;;  %v9543_v47 = vor.u32 %v11796_v15, %v9542_v31  ;;  %5170 = vmatpush.bf16.msra.mxu0 %v9799_v35  ;;  %v11782_v15 = vld [vmem:[#allocation5 + $0x138c] sm:$0xf] }
 0x2aa   :  { %v11832_v36 = vld [vmem:[#allocation5 + $0x16a4] sm:$0xf0] }
 0x2ab   :  { %v9942_v43 = vld [vmem:[#allocation5 + $0x1a88] sm:$0xf]  ;;  %v9687_v51 = vor.u32 %v11832_v36, %v9686_v33  ;;  %5144 = vmatpush.bf16.msrb.mxu2 %v9543_v47  ;;  %v9336_v33 = vld [vmem:[#allocation5 + $0x1128] sm:$0xf0] }
 0x2ac   :  { %v11896_v44 = vld [vmem:[#allocation5 + $0x1aa4] sm:$0xf0] }
 0x2ad   :  { %v9526_v14 = vld [vmem:[#allocation5 + $0x1408] sm:$0xf]  ;;  %v9943_v60 = vor.u32 %v11896_v44, %v9942_v43  ;;  %5156 = vmatpush.bf16.msrb.mxu3 %v9687_v51  ;;  %v9499_v43 = vor.u32 %v11782_v15, %v9496_v57  ;;  %v11882_v57 = vld [vmem:[#allocation5 + $0x19cc] sm:$0xf] }
 0x2ae   :  { %v9782_v59 = vld [vmem:[#allocation5 + $0x1808] sm:$0xf] }
 0x2af   :  { %v11856_v49 = vld [vmem:[#allocation5 + $0x1824] sm:$0xf0]  ;;  %5182 = vmatpush.bf16.msra.mxu1 %v9943_v60 }
 0x2b0   :  { %v11792_v13 = vld [vmem:[#allocation5 + $0x1424] sm:$0xf0]  ;;  %v9783_v58 = vor.u32 %v11856_v49, %v9782_v59  ;;  %v11778_v49 = vld [vmem:[#allocation5 + $0x134c] sm:$0xf] }
 0x2b1   :  { %v10150_v53 = vld [vmem:[#allocation5 + $0x1dc8] sm:$0xf]  ;;  %v9527_v2 = vor.u32 %v11792_v13, %v9526_v14  ;;  %v9339_v14 = vor.u32 %v11742_v32, %v9336_v33  ;;  %v9480_v13 = vld [vmem:[#allocation5 + $0x1368] sm:$0xf0] }
 0x2b2   :  { %v11948_v55 = vld [vmem:[#allocation5 + $0x1de4] sm:$0xf0]  ;;  %5171 = vmatpush.bf16.msra.mxu0 %v9783_v58  ;;  %v9896_v32 = vld [vmem:[#allocation5 + $0x19e8] sm:$0xf0] }
 0x2b3   :  { %v9670_v56 = vld [vmem:[#allocation5 + $0x1648] sm:$0xf]  ;;  %v10151_v5 = vor.u32 %v11948_v55, %v10150_v53  ;;  %5145 = vmatpush.bf16.msrb.mxu2 %v9527_v2  ;;  %v9483_v53 = vor.u32 %v11778_v49, %v9480_v13  ;;  %v9464_v2 = vld [vmem:[#allocation5 + $0x1328] sm:$0xf0]  ;;  %v9899_v49 = vor.u32 %v11882_v57, %v9896_v32 }
 0x2b4   :  { %v11828_v48 = vld [vmem:[#allocation5 + $0x1664] sm:$0xf0]  ;;  %v11762_v13 = vld [vmem:[#allocation5 + $0x124c] sm:$0xf] }
 0x2b5   :  { %v9926_v62 = vld [vmem:[#allocation5 + $0x1a48] sm:$0xf]  ;;  %v9671_v30 = vor.u32 %v11828_v48, %v9670_v56  ;;  %5172 = vmatmul.bf16.vlgmr.msra.gmra.mxu0 %v12580_v63  ;;  %v9323_v48 = vor.u32 %v11738_v50, %v9320_v34  ;;  %v9416_v50 = vld [vmem:[#allocation5 + $0x1268] sm:$0xf0] }
 0x2b6   :  { %v11892_v0 = vld [vmem:[#allocation5 + $0x1a64] sm:$0xf0]  ;;  %5216 = vmatpush.bf16.msrb.mxu0 %v9387_v3  ;;  %5146 = vmatmul.bf16.vlgmr.msrb.gmra.mxu2 %v12556_v40  ;;  %v12627_v3 = vpop.f32.mrf.mxu2  ;;  %v11842_v32 = vld [vmem:[#allocation5 + $0x174c] sm:$0xf] }
 0x2b7   :  { %v10134_v24 = vld [vmem:[#allocation5 + $0x1d88] sm:$0xf]  ;;  %v9927_v8 = vor.u32 %v11892_v0, %v9926_v62  ;;  %5190 = vmatpush.bf16.msra.mxu2 %v10151_v5  ;;  %5157 = vmatpush.bf16.msrb.mxu3 %v9671_v30  ;;  %v11774_v0 = vld [vmem:[#allocation5 + $0x130c] sm:$0xf] }
 0x2b8   :  { %v11944_v46 = vld [vmem:[#allocation5 + $0x1da4] sm:$0xf0]  ;;  %v11734_v5 = vld [vmem:[#allocation5 + $0x108c] sm:$0xf]  ;;  %v9467_v30 = vor.u32 %v11774_v0, %v9464_v2  ;;  %v9419_v0 = vor.u32 %v11762_v13, %v9416_v50 }
 0x2b9   :  { %v9654_v9 = vld [vmem:[#allocation5 + $0x1608] sm:$0xf]  ;;  %v10135_v4 = vor.u32 %v11944_v46, %v10134_v24  ;;  %5183 = vmatpush.bf16.msra.mxu1 %v9927_v8  ;;  %v9304_v24 = vld [vmem:[#allocation5 + $0x10a8] sm:$0xf0] }
 0x2ba   :  { %v11824_v10 = vld [vmem:[#allocation5 + $0x1624] sm:$0xf0]  ;;  %5217 = vmatpush.bf16.msrb.mxu0 %v9371_v39  ;;  %v11730_v39 = vld [vmem:[#allocation5 + $0x104c] sm:$0xf] }
 0x2bb   :  { %v9910_v37 = vld [vmem:[#allocation5 + $0x1a08] sm:$0xf]  ;;  %v9655_v19 = vor.u32 %v11824_v10, %v9654_v9  ;;  %5191 = vmatpush.bf16.msra.mxu2 %v10135_v4  ;;  %v9307_v10 = vor.u32 %v11734_v5, %v9304_v24  ;;  %v11758_v5 = vld [vmem:[#allocation5 + $0x120c] sm:$0xf] }
 0x2bc   :  { %v11888_v11 = vld [vmem:[#allocation5 + $0x1a24] sm:$0xf0]  ;;  %v9400_v24 = vld [vmem:[#allocation5 + $0x1228] sm:$0xf0] }
 0x2bd   :  { %v10278_v27 = vld [vmem:[#allocation5 + $0x1fc8] sm:$0xf]  ;;  %v9911_v21 = vor.u32 %v11888_v11, %v9910_v37  ;;  %5158 = vmatpush.bf16.msrb.mxu3 %v9655_v19  ;;  %v11770_v11 = vld [vmem:[#allocation5 + $0x12cc] sm:$0xf] }
 0x2be   :  { %v11980_v20 = vld [vmem:[#allocation5 + $0x1fe4] sm:$0xf0]  ;;  %5218 = vmatpush.bf16.msrb.mxu0 %v9355_v29  ;;  %v11726_v29 = vld [vmem:[#allocation5 + $0x100c] sm:$0xf] }
 0x2bf   :  { %v10279_v23 = vor.u32 %v11980_v20, %v10278_v27  ;;  %v10118_v25 = vld [vmem:[#allocation5 + $0x1d48] sm:$0xf]  ;;  %5184 = vmatpush.bf16.msra.mxu1 %v9911_v21  ;;  %v9448_v27 = vld [vmem:[#allocation5 + $0x12e8] sm:$0xf0]  ;;  %v12629_v21 = vpop.f32.mrf.mxu3 }
 0x2c0   :  { %v11940_v26 = vld [vmem:[#allocation5 + $0x1d64] sm:$0xf0]  ;;  %5159 = vmatmul.bf16.vlgmr.msrb.gmra.mxu3 %v12564_v52  ;;  %v9288_v20 = vld [vmem:[#allocation5 + $0x1068] sm:$0xf0]  ;;  %v9451_v4 = vor.u32 %v11770_v11, %v9448_v27  ;;  %v9403_v27 = vor.u32 %v11758_v5, %v9400_v24 }
 0x2c1   :  { %v10262_v54 = vld [vmem:[#allocation5 + $0x1f88] sm:$0xf]  ;;  %v10119_v35 = vor.u32 %v11940_v26, %v10118_v25  ;;  %5203 = vmatpush.bf16.msra.mxu3 %v10279_v23  ;;  %v9291_v23 = vor.u32 %v11730_v39, %v9288_v20  ;;  %v11766_v25 = vld [vmem:[#allocation5 + $0x128c] sm:$0xf] }
 0x2c2   :  { %v11976_v31 = vld [vmem:[#allocation5 + $0x1fa4] sm:$0xf0]  ;;  %5185 = vmatmul.bf16.vlgmr.msra.gmra.mxu1 %v12588_v38  ;;  %5219 = vmatpush.bf16.msrb.mxu0 %v9339_v14  ;;  %v9432_v26 = vld [vmem:[#allocation5 + $0x12a8] sm:$0xf0] }
 0x2c3   :  { %5229 = vmatpush.bf16.msrb.mxu1 %v9515_v22  ;;  %v10263_v36 = vor.u32 %v11976_v31, %v10262_v54  ;;  %v10102_v44 = vld [vmem:[#allocation5 + $0x1d08] sm:$0xf]  ;;  %5192 = vmatpush.bf16.msra.mxu2 %v10119_v35  ;;  %v4941_v54 = vpop.f32.mrf.mxu2  ;;  %v9272_v31 = vld [vmem:[#allocation5 + $0x1028] sm:$0xf0]  ;;  %v9435_v35 = vor.u32 %v11766_v25, %v9432_v26 }
 0x2c4   :  { %v11936_v45 = vld [vmem:[#allocation5 + $0x1d24] sm:$0xf0]  ;;  %v11810_v20 = vld [vmem:[#allocation5 + $0x154c] sm:$0xf] }
 0x2c5   :  { %v10246_v47 = vld [vmem:[#allocation5 + $0x1f48] sm:$0xf]  ;;  %v10103_v51 = vor.u32 %v11936_v45, %v10102_v44  ;;  %5204 = vmatpush.bf16.msra.mxu3 %v10263_v36  ;;  %v11818_v44 = vld [vmem:[#allocation5 + $0x15cc] sm:$0xf]  ;;  %v9275_v45 = vor.u32 %v11726_v29, %v9272_v31 }
 0x2c6   :  { %v11972_v59 = vld [vmem:[#allocation5 + $0x1f64] sm:$0xf0]  ;;  %5220 = vmatpush.bf16.msrb.mxu0 %v9323_v48  ;;  %v9848_v25 = vld [vmem:[#allocation5 + $0x1928] sm:$0xf0] }
 0x2c7   :  { %5230 = vmatpush.bf16.msrb.mxu1 %v9499_v43  ;;  %v10247_v60 = vor.u32 %v11972_v59, %v10246_v47  ;;  %v10086_v55 = vld [vmem:[#allocation5 + $0x1cc8] sm:$0xf]  ;;  %5193 = vmatpush.bf16.msra.mxu2 %v10103_v51  ;;  %v9640_v47 = vld [vmem:[#allocation5 + $0x15e8] sm:$0xf0] }
 0x2c8   :  { %v11932_v56 = vld [vmem:[#allocation5 + $0x1ce4] sm:$0xf0]  ;;  %v11878_v51 = vld [vmem:[#allocation5 + $0x198c] sm:$0xf]  ;;  %v12633_v31 = vpop.f32.mrf.mxu0 }
 0x2c9   :  { %v10230_v58 = vld [vmem:[#allocation5 + $0x1f08] sm:$0xf]  ;;  %v10087_v6 = vor.u32 %v11932_v56, %v10086_v55  ;;  %5205 = vmatpush.bf16.msra.mxu3 %v10247_v60  ;;  %v9880_v60 = vld [vmem:[#allocation5 + $0x19a8] sm:$0xf0] }
 0x2ca   :  { %v11968_v62 = vld [vmem:[#allocation5 + $0x1f24] sm:$0xf0]  ;;  %5221 = vmatpush.bf16.msrb.mxu0 %v9307_v10  ;;  %v11814_v56 = vld [vmem:[#allocation5 + $0x158c] sm:$0xf] }
 0x2cb   :  { %5231 = vmatpush.bf16.msrb.mxu1 %v9483_v53  ;;  %v10231_v7 = vor.u32 %v11968_v62, %v10230_v58  ;;  %v10070_v8 = vld [vmem:[#allocation5 + $0x1c88] sm:$0xf]  ;;  %5194 = vmatpush.bf16.msra.mxu2 %v10087_v6  ;;  %v9643_v53 = vor.u32 %v11818_v44, %v9640_v47  ;;  %v9624_v58 = vld [vmem:[#allocation5 + $0x15a8] sm:$0xf0]  ;;  %v4954_v62 = vpop.f32.mrf.mxu3  ;;  %v9883_v6 = vor.u32 %v11878_v51, %v9880_v60 }
 0x2cc   :  { %v11928_v46 = vld [vmem:[#allocation5 + $0x1ca4] sm:$0xf0]  ;;  %v9864_v10 = vld [vmem:[#allocation5 + $0x1968] sm:$0xf0] }
 0x2cd   :  { %v10214_v9 = vld [vmem:[#allocation5 + $0x1ec8] sm:$0xf]  ;;  %v10071_v12 = vor.u32 %v11928_v46, %v10070_v8  ;;  %5206 = vmatpush.bf16.msra.mxu3 %v10231_v7  ;;  %v11850_v7 = vld [vmem:[#allocation5 + $0x17cc] sm:$0xf] }
 0x2ce   :  { %v11964_v37 = vld [vmem:[#allocation5 + $0x1ee4] sm:$0xf0]  ;;  %5222 = vmatpush.bf16.msrb.mxu0 %v9291_v23  ;;  %v11914_v8 = vld [vmem:[#allocation5 + $0x1bcc] sm:$0xf] }
 0x2cf   :  { %5232 = vmatpush.bf16.msrb.mxu1 %v9467_v30  ;;  %v10215_v17 = vor.u32 %v11964_v37, %v10214_v9  ;;  %v10054_v16 = vld [vmem:[#allocation5 + $0x1c48] sm:$0xf]  ;;  %5195 = vmatpush.bf16.msra.mxu2 %v10071_v12  ;;  %v9768_v30 = vld [vmem:[#allocation5 + $0x17e8] sm:$0xf0]  ;;  %v9627_v37 = vor.u32 %v11814_v56, %v9624_v58 }
 0x2d0   :  { %v11924_v18 = vld [vmem:[#allocation5 + $0x1c64] sm:$0xf0]  ;;  %v10024_v46 = vld [vmem:[#allocation5 + $0x1be8] sm:$0xf0]  ;;  %v9771_v39 = vor.u32 %v11850_v7, %v9768_v30 }
 0x2d1   :  { %v10198_v19 = vld [vmem:[#allocation5 + $0x1e88] sm:$0xf]  ;;  %v10055_v15 = vor.u32 %v11924_v18, %v10054_v16  ;;  %5207 = vmatpush.bf16.msra.mxu3 %v10215_v17  ;;  %v11874_v9 = vld [vmem:[#allocation5 + $0x194c] sm:$0xf]  ;;  %v10027_v17 = vor.u32 %v11914_v8, %v10024_v46 }
 0x2d2   :  { %v11960_v22 = vld [vmem:[#allocation5 + $0x1ea4] sm:$0xf0]  ;;  %5223 = vmatpush.bf16.msrb.mxu0 %v9275_v45  ;;  %v9608_v12 = vld [vmem:[#allocation5 + $0x1568] sm:$0xf0] }
 0x2d3   :  { %5233 = vmatpush.bf16.msrb.mxu1 %v9451_v4  ;;  %v10199_v33 = vor.u32 %v11960_v22, %v10198_v19  ;;  %v10038_v36 = vld [vmem:[#allocation5 + $0x1c08] sm:$0xf]  ;;  %5196 = vmatpush.bf16.msra.mxu2 %v10055_v15  ;;  %v9867_v4 = vor.u32 %v11874_v9, %v9864_v10  ;;  %v11846_v16 = vld [vmem:[#allocation5 + $0x178c] sm:$0xf]  ;;  %v9611_v26 = vor.u32 %v11810_v20, %v9608_v12 }
 0x2d4   :  { %v11920_v43 = vld [vmem:[#allocation5 + $0x1c24] sm:$0xf0]  ;;  %v9752_v18 = vld [vmem:[#allocation5 + $0x17a8] sm:$0xf0] }
 0x2d5   :  { %v10182_v14 = vld [vmem:[#allocation5 + $0x1e48] sm:$0xf]  ;;  %v10039_v34 = vor.u32 %v11920_v43, %v10038_v36  ;;  %5208 = vmatpush.bf16.msra.mxu3 %v10199_v33  ;;  %5224 = vmatmul.bf16.vlgmr.msrb.gmra.mxu0 %v12532_v1  ;;  %v11910_v19 = vld [vmem:[#allocation5 + $0x1b8c] sm:$0xf]  ;;  %v9755_v1 = vor.u32 %v11846_v16, %v9752_v18 }
 0x2d6   :  { %v11956_v59 = vld [vmem:[#allocation5 + $0x1e64] sm:$0xf0]  ;;  %5268 = vmatpush.bf16.msra.mxu0 %v9899_v49  ;;  %v10008_v23 = vld [vmem:[#allocation5 + $0x1ba8] sm:$0xf0] }
 0x2d7   :  { %5234 = vmatpush.bf16.msrb.mxu1 %v9435_v35  ;;  %v10183_v55 = vor.u32 %v11956_v59, %v10182_v14  ;;  %v10166_v48 = vld [vmem:[#allocation5 + $0x1e08] sm:$0xf]  ;;  %5197 = vmatpush.bf16.msra.mxu2 %v10039_v34  ;;  %v11870_v22 = vld [vmem:[#allocation5 + $0x190c] sm:$0xf]  ;;  %v10011_v15 = vor.u32 %v11910_v19, %v10008_v23  ;;  %v10342_v23 = vld [vmem:[#allocation5 + $0x11d0] sm:$0xf] }
 0x2d8   :  { %v11952_v2 = vld [vmem:[#allocation5 + $0x1e24] sm:$0xf0]  ;;  %v11806_v54 = vld [vmem:[#allocation5 + $0x150c] sm:$0xf]  ;;  %v9851_v57 = vor.u32 %v11870_v22, %v9848_v25  ;;  %v11996_v22 = vld [vmem:[#allocation5 + $0x11ec] sm:$0xf0] }
 0x2d9   :  { %5209 = vmatpush.bf16.msra.mxu3 %v10183_v55  ;;  %v10167_v11 = vor.u32 %v11952_v2, %v10166_v48  ;;  %v9592_v29 = vld [vmem:[#allocation5 + $0x1528] sm:$0xf0] }
 0x2da   :  { %5198 = vmatmul.bf16.vlgmr.msra.gmra.mxu2 %v12606_v28  ;;  %5269 = vmatpush.bf16.msra.mxu0 %v9883_v6  ;;  %v9736_v33 = vld [vmem:[#allocation5 + $0x1768] sm:$0xf0]  ;;  %v9595_v45 = vor.u32 %v11806_v54, %v9592_v29 }
 0x2db   :  { %5242 = vmatpush.bf16.msrb.mxu2 %v9643_v53  ;;  %5235 = vmatpush.bf16.msrb.mxu1 %v9419_v0  ;;  %v11906_v35 = vld [vmem:[#allocation5 + $0x1b4c] sm:$0xf]  ;;  %v9739_v47 = vor.u32 %v11842_v32, %v9736_v33  ;;  %v4967_v0 = vpop.f32.mrf.mxu0 }
 0x2dc   :  { %v9992_v36 = vld [vmem:[#allocation5 + $0x1b68] sm:$0xf0]  ;;  %v10326_v0 = vld [vmem:[#allocation5 + $0x1150] sm:$0xf] }
 0x2dd   :  { %5210 = vmatpush.bf16.msra.mxu3 %v10167_v11  ;;  %v11866_v43 = vld [vmem:[#allocation5 + $0x18cc] sm:$0xf]  ;;  %v9995_v49 = vor.u32 %v11906_v35, %v9992_v36 }
 0x2de   :  { %5270 = vmatpush.bf16.msra.mxu0 %v9867_v4  ;;  %v9832_v44 = vld [vmem:[#allocation5 + $0x18e8] sm:$0xf0] }
 0x2df   :  { %5243 = vmatpush.bf16.msrb.mxu2 %v9627_v37  ;;  %5236 = vmatpush.bf16.msrb.mxu1 %v9403_v27  ;;  %v11802_v14 = vld [vmem:[#allocation5 + $0x14cc] sm:$0xf]  ;;  %v9835_v13 = vor.u32 %v11866_v43, %v9832_v44 }
 0x2e0   :  { %5211 = vmatmul.bf16.vlgmr.msra.gmra.mxu3 %v12611_v61  ;;  %v9576_v59 = vld [vmem:[#allocation5 + $0x14e8] sm:$0xf0] }
 0x2e1   :  { %5255 = vmatpush.bf16.msrb.mxu3 %v9771_v39  ;;  %v11838_v50 = vld [vmem:[#allocation5 + $0x170c] sm:$0xf]  ;;  %v9579_v56 = vor.u32 %v11802_v14, %v9576_v59  ;;  %v10334_v14 = vld [vmem:[#allocation5 + $0x1190] sm:$0xf] }
 0x2e2   :  { %5237 = vmatmul.bf16.vlgmr.msrb.gmra.mxu1 %v12540_v42  ;;  %5271 = vmatpush.bf16.msra.mxu0 %v9851_v57  ;;  %v9720_v34 = vld [vmem:[#allocation5 + $0x1728] sm:$0xf0]  ;;  %v12637_v42 = vpop.f32.mrf.mxu1  ;;  %v11994_v59 = vld [vmem:[#allocation5 + $0x11ac] sm:$0xf0] }
 0x2e3   :  { %5281 = vmatpush.bf16.msra.mxu1 %v10027_v17  ;;  %5244 = vmatpush.bf16.msrb.mxu2 %v9611_v26  ;;  %v11902_v51 = vld [vmem:[#allocation5 + $0x1b0c] sm:$0xf]  ;;  %v9723_v58 = vor.u32 %v11838_v50, %v9720_v34 }
 0x2e4   :  { %v9976_v60 = vld [vmem:[#allocation5 + $0x1b28] sm:$0xf0] }
 0x2e5   :  { %5256 = vmatpush.bf16.msrb.mxu3 %v9755_v1  ;;  %v11862_v53 = vld [vmem:[#allocation5 + $0x188c] sm:$0xf]  ;;  %v9979_v2 = vor.u32 %v11902_v51, %v9976_v60 }
 0x2e6   :  { %v9816_v55 = vld [vmem:[#allocation5 + $0x18a8] sm:$0xf0]  ;;  %5272 = vmatpush.bf16.msra.mxu0 %v9835_v13 }
 0x2e7   :  { %5282 = vmatpush.bf16.msra.mxu1 %v10011_v15  ;;  %5245 = vmatpush.bf16.msrb.mxu2 %v9595_v45  ;;  %v11798_v48 = vld [vmem:[#allocation5 + $0x148c] sm:$0xf]  ;;  %v9819_v5 = vor.u32 %v11862_v53, %v9816_v55  ;;  %v12639_v15 = vpop.f32.mrf.mxu0  ;;  %v10343_v45 = vor.u32 %v11996_v22, %v10342_v23 }
 0x2e8   :  { %v9560_v62 = vld [vmem:[#allocation5 + $0x14a8] sm:$0xf0] }
 0x2e9   :  { %5257 = vmatpush.bf16.msrb.mxu3 %v9739_v47  ;;  %v11834_v24 = vld [vmem:[#allocation5 + $0x16cc] sm:$0xf]  ;;  %v9563_v9 = vor.u32 %v11798_v48, %v9560_v62  ;;  %v10335_v62 = vor.u32 %v11994_v59, %v10334_v14  ;;  %v10302_v59 = vld [vmem:[#allocation5 + $0x1090] sm:$0xf] }
 0x2ea   :  { %v9704_v6 = vld [vmem:[#allocation5 + $0x16e8] sm:$0xf0]  ;;  %5273 = vmatpush.bf16.msra.mxu0 %v9819_v5  ;;  %v4980_v25 = vpop.f32.mrf.mxu1 }
 0x2eb   :  { %5283 = vmatpush.bf16.msra.mxu1 %v9995_v49  ;;  %v11898_v7 = vld [vmem:[#allocation5 + $0x1acc] sm:$0xf]  ;;  %5246 = vmatpush.bf16.msrb.mxu2 %v9579_v56  ;;  %v9707_v10 = vor.u32 %v11834_v24, %v9704_v6 }
 0x2ec   :  { %v9960_v30 = vld [vmem:[#allocation5 + $0x1ae8] sm:$0xf0] }
 0x2ed   :  { %v11858_v8 = vld [vmem:[#allocation5 + $0x184c] sm:$0xf]  ;;  %5258 = vmatpush.bf16.msrb.mxu3 %v9723_v58  ;;  %v9963_v27 = vor.u32 %v11898_v7, %v9960_v30  ;;  %v10406_v7 = vld [vmem:[#allocation5 + $0x13d0] sm:$0xf] }
 0x2ee   :  { %v9800_v46 = vld [vmem:[#allocation5 + $0x1868] sm:$0xf0]  ;;  %v12012_v30 = vld [vmem:[#allocation5 + $0x13ec] sm:$0xf0] }
 0x2ef   :  { %v11794_v37 = vld [vmem:[#allocation5 + $0x144c] sm:$0xf]  ;;  %5284 = vmatpush.bf16.msra.mxu1 %v9979_v2  ;;  %v9803_v39 = vor.u32 %v11858_v8, %v9800_v46  ;;  %5247 = vmatpush.bf16.msrb.mxu2 %v9563_v9  ;;  %v11992_v2 = vld [vmem:[#allocation5 + $0x116c] sm:$0xf0]  ;;  %v5019_v8 = vpop.f32.mrf.mxu0 }
 0x2f0   :  { %v9544_v11 = vld [vmem:[#allocation5 + $0x1468] sm:$0xf0] }
 0x2f1   :  { %v11830_v20 = vld [vmem:[#allocation5 + $0x168c] sm:$0xf]  ;;  %v9547_v19 = vor.u32 %v11794_v37, %v9544_v11  ;;  %5259 = vmatpush.bf16.msrb.mxu3 %v9707_v10  ;;  %5274 = vmatpush.bf16.msra.mxu0 %v9803_v39  ;;  %v10327_v39 = vor.u32 %v11992_v2, %v10326_v0  ;;  %v11984_v2 = vld [vmem:[#allocation5 + $0x106c] sm:$0xf0] }
 0x2f2   :  { %v9688_v12 = vld [vmem:[#allocation5 + $0x16a8] sm:$0xf0]  ;;  %v12641_v5 = vpop.f32.mrf.mxu1 }
 0x2f3   :  { %v11894_v17 = vld [vmem:[#allocation5 + $0x1a8c] sm:$0xf]  ;;  %v9691_v26 = vor.u32 %v11830_v20, %v9688_v12  ;;  %5285 = vmatpush.bf16.msra.mxu1 %v9963_v27  ;;  %5248 = vmatpush.bf16.msrb.mxu2 %v9547_v19  ;;  %v10407_v20 = vor.u32 %v12012_v30, %v10406_v7  ;;  %v10318_v12 = vld [vmem:[#allocation5 + $0x1110] sm:$0xf] }
 0x2f4   :  { %v9944_v4 = vld [vmem:[#allocation5 + $0x1aa8] sm:$0xf0] }
 0x2f5   :  { %v11854_v16 = vld [vmem:[#allocation5 + $0x180c] sm:$0xf]  ;;  %v9947_v57 = vor.u32 %v11894_v17, %v9944_v4  ;;  %5260 = vmatpush.bf16.msrb.mxu3 %v9691_v26  ;;  %v11990_v17 = vld [vmem:[#allocation5 + $0x112c] sm:$0xf0] }
 0x2f6   :  { %v9784_v18 = vld [vmem:[#allocation5 + $0x1828] sm:$0xf0]  ;;  %v10319_v25 = vor.u32 %v11990_v17, %v10318_v12  ;;  %v10286_v12 = vld [vmem:[#allocation5 + $0x1010] sm:$0xf] }
 0x2f7   :  { %v11790_v1 = vld [vmem:[#allocation5 + $0x140c] sm:$0xf]  ;;  %v9787_v32 = vor.u32 %v11854_v16, %v9784_v18  ;;  %5286 = vmatpush.bf16.msra.mxu1 %v9947_v57  ;;  %v10398_v16 = vld [vmem:[#allocation5 + $0x1390] sm:$0xf] }
 0x2f8   :  { %v9528_v54 = vld [vmem:[#allocation5 + $0x1428] sm:$0xf0]  ;;  %v12010_v18 = vld [vmem:[#allocation5 + $0x13ac] sm:$0xf0] }
 0x2f9   :  { %v11946_v29 = vld [vmem:[#allocation5 + $0x1dcc] sm:$0xf]  ;;  %v9531_v47 = vor.u32 %v11790_v1, %v9528_v54  ;;  %5275 = vmatpush.bf16.msra.mxu0 %v9787_v32  ;;  %v10399_v26 = vor.u32 %v12010_v18, %v10398_v16  ;;  %v10310_v1 = vld [vmem:[#allocation5 + $0x10d0] sm:$0xf] }
 0x2fa   :  { %v10152_v33 = vld [vmem:[#allocation5 + $0x1de8] sm:$0xf0]  ;;  %v11988_v54 = vld [vmem:[#allocation5 + $0x10ec] sm:$0xf0] }
 0x2fb   :  { %v11826_v35 = vld [vmem:[#allocation5 + $0x164c] sm:$0xf]  ;;  %v10155_v49 = vor.u32 %v11946_v29, %v10152_v33  ;;  %5249 = vmatpush.bf16.msrb.mxu2 %v9531_v47  ;;  %v5032_v29 = vpop.f32.mrf.mxu1  ;;  %v10390_v32 = vld [vmem:[#allocation5 + $0x1350] sm:$0xf]  ;;  %v10311_v14 = vor.u32 %v11988_v54, %v10310_v1 }
 0x2fc   :  { %v9672_v36 = vld [vmem:[#allocation5 + $0x1668] sm:$0xf0]  ;;  %5276 = vmatmul.bf16.vlgmr.msra.gmra.mxu0 %v12580_v63  ;;  %v12008_v33 = vld [vmem:[#allocation5 + $0x136c] sm:$0xf0] }
 0x2fd   :  { %v11890_v43 = vld [vmem:[#allocation5 + $0x1a4c] sm:$0xf]  ;;  %v9675_v13 = vor.u32 %v11826_v35, %v9672_v36  ;;  %5750 = vmatpush.bf16.msrb.mxu0 %v10343_v45  ;;  %v12647_v35 = vpop.f32.mrf.mxu0  ;;  %v4940_v45 = vadd.f32 %v12627_v3, %v12621_v41  ;;  %v11982_v17 = vld [vmem:[#allocation5 + $0x102c] sm:$0xf0] }
 0x2fe   :  { %v9928_v44 = vld [vmem:[#allocation5 + $0x1a68] sm:$0xf0]  ;;  %5250 = vmatmul.bf16.vlgmr.msrb.gmra.mxu2 %v12556_v40  ;;  %v10287_v29 = vor.u32 %v11982_v17, %v10286_v12 }
 0x2ff   :  { %v11942_v50 = vld [vmem:[#allocation5 + $0x1d8c] sm:$0xf]  ;;  %v9931_v51 = vor.u32 %v11890_v43, %v9928_v44  ;;  %5294 = vmatpush.bf16.msra.mxu2 %v10155_v49  ;;  %5261 = vmatpush.bf16.msrb.mxu3 %v9675_v13  ;;  %v11986_v49 = vld [vmem:[#allocation5 + $0x10ac] sm:$0xf0]  ;;  %v4953_v13 = vadd.f32 %v12629_v21, %v4940_v45  ;;  %v10336_v45 = vld [vmem:[#allocation5 + $0x11b0] sm:$0xf0] }
 0x300   :  { %v10136_v34 = vld [vmem:[#allocation5 + $0x1da8] sm:$0xf0]  ;;  %v10374_v21 = vld [vmem:[#allocation5 + $0x12d0] sm:$0xf] }
 0x301   :  { %v11822_v60 = vld [vmem:[#allocation5 + $0x160c] sm:$0xf]  ;;  %v10139_v24 = vor.u32 %v11942_v50, %v10136_v34  ;;  %5287 = vmatpush.bf16.msra.mxu1 %v9931_v51  ;;  %5751 = vmatpush.bf16.msrb.mxu0 %v10335_v62  ;;  %v4991_v50 = vpop.f32.mrf.mxu2  ;;  %v10382_v51 = vld [vmem:[#allocation5 + $0x1310] sm:$0xf]  ;;  %v4966_v41 = vadd.f32 %v12633_v31, %v4953_v13 }
 0x302   :  { %v9656_v53 = vld [vmem:[#allocation5 + $0x1628] sm:$0xf0]  ;;  %v10294_v62 = vld [vmem:[#allocation5 + $0x1050] sm:$0xf] }
 0x303   :  { %v11886_v55 = vld [vmem:[#allocation5 + $0x1a0c] sm:$0xf]  ;;  %v9659_v6 = vor.u32 %v11822_v60, %v9656_v53  ;;  %5295 = vmatpush.bf16.msra.mxu2 %v10139_v24  ;;  %v12006_v60 = vld [vmem:[#allocation5 + $0x132c] sm:$0xf0]  ;;  %v12654_v7 = vpop.f32.mrf.mxu1 }
 0x304   :  { %v9912_v56 = vld [vmem:[#allocation5 + $0x1a28] sm:$0xf0]  ;;  %v10383_v0 = vor.u32 %v12006_v60, %v10382_v51  ;;  %v12004_v24 = vld [vmem:[#allocation5 + $0x12ec] sm:$0xf0]  ;;  %v11991_v51 = vld [vmem:[#allocation5 + $0x1154] sm:$0xf] }
 0x305   :  { %v11978_v58 = vld [vmem:[#allocation5 + $0x1fcc] sm:$0xf]  ;;  %v9915_v46 = vor.u32 %v11886_v55, %v9912_v56  ;;  %5262 = vmatpush.bf16.msrb.mxu3 %v9659_v6  ;;  %5752 = vmatpush.bf16.msrb.mxu0 %v10327_v39  ;;  %v4979_v6 = vadd.f32 %v12637_v42, %v4966_v41  ;;  %v5071_v8 = vpop.f32.mrf.mxu0  ;;  %v10375_v39 = vor.u32 %v12004_v24, %v10374_v21  ;;  %v11995_v42 = vld [vmem:[#allocation5 + $0x11d4] sm:$0xf] }
 0x306   :  { %v10280_v48 = vld [vmem:[#allocation5 + $0x1fe8] sm:$0xf0]  ;;  %v10320_v8 = vld [vmem:[#allocation5 + $0x1130] sm:$0xf0] }
 0x307   :  { %v10283_v9 = vor.u32 %v11978_v58, %v10280_v48  ;;  %v11938_v10 = vld [vmem:[#allocation5 + $0x1d4c] sm:$0xf]  ;;  %5288 = vmatpush.bf16.msra.mxu1 %v9915_v46  ;;  %v10303_v48 = vor.u32 %v11986_v49, %v10302_v59 }
 0x308   :  { %v10120_v37 = vld [vmem:[#allocation5 + $0x1d68] sm:$0xf0]  ;;  %5263 = vmatmul.bf16.vlgmr.msrb.gmra.mxu3 %v12564_v52 }
 0x309   :  { %v11974_v11 = vld [vmem:[#allocation5 + $0x1f8c] sm:$0xf]  ;;  %v10123_v4 = vor.u32 %v11938_v10, %v10120_v37  ;;  %5307 = vmatpush.bf16.msra.mxu3 %v10283_v9  ;;  %5753 = vmatpush.bf16.msrb.mxu0 %v10319_v25  ;;  %v4992_v10 = vadd.f32 %v4991_v50, %v4979_v6  ;;  %v4993_v16 = vpop.f32.mrf.mxu2 }
 0x30a   :  { %v10264_v27 = vld [vmem:[#allocation5 + $0x1fa8] sm:$0xf0]  ;;  %5289 = vmatmul.bf16.vlgmr.msra.gmra.mxu1 %v12588_v38  ;;  %v10391_v38 = vor.u32 %v12008_v33, %v10390_v32  ;;  %v11993_v33 = vld [vmem:[#allocation5 + $0x1194] sm:$0xf] }
 0x30b   :  { %v10267_v63 = vor.u32 %v11974_v11, %v10264_v27  ;;  %v11934_v19 = vld [vmem:[#allocation5 + $0x1d0c] sm:$0xf]  ;;  %5763 = vmatpush.bf16.msrb.mxu1 %v10407_v20  ;;  %5296 = vmatpush.bf16.msra.mxu2 %v10123_v4  ;;  %v10295_v27 = vor.u32 %v11984_v2, %v10294_v62  ;;  %v5004_v20 = vpop.f32.mrf.mxu3 }
 0x30c   :  { %v10104_v23 = vld [vmem:[#allocation5 + $0x1d28] sm:$0xf0]  ;;  %v12656_v4 = vadd.f32 %v5004_v20, %v4992_v10  ;;  %v10392_v20 = vld [vmem:[#allocation5 + $0x1370] sm:$0xf0] }
 0x30d   :  { %v11970_v22 = vld [vmem:[#allocation5 + $0x1f4c] sm:$0xf]  ;;  %v10107_v57 = vor.u32 %v11934_v19, %v10104_v23  ;;  %5308 = vmatpush.bf16.msra.mxu3 %v10267_v63  ;;  %5754 = vmatpush.bf16.msrb.mxu0 %v10311_v14  ;;  %v10344_v63 = vld [vmem:[#allocation5 + $0x11f0] sm:$0xf0]  ;;  %v10366_v19 = vld [vmem:[#allocation5 + $0x1290] sm:$0xf] }
 0x30e   :  { %v10248_v40 = vld [vmem:[#allocation5 + $0x1f68] sm:$0xf0]  ;;  %v12002_v23 = vld [vmem:[#allocation5 + $0x12ac] sm:$0xf0]  ;;  %v10347_v32 = vor.u32 %v11995_v42, %v10344_v63 }
 0x30f   :  { %v10251_v36 = vor.u32 %v11970_v22, %v10248_v40  ;;  %v11930_v43 = vld [vmem:[#allocation5 + $0x1ccc] sm:$0xf]  ;;  %5764 = vmatpush.bf16.msrb.mxu1 %v10399_v26  ;;  %5297 = vmatpush.bf16.msra.mxu2 %v10107_v57  ;;  %v5324_v26 = vmul.f32 0.044715, %v12656_v4  ;;  %v10367_v57 = vor.u32 %v12002_v23, %v10366_v19 }
 0x310   :  { %v10088_v44 = vld [vmem:[#allocation5 + $0x1ce8] sm:$0xf0] }
 0x311   :  { %v11966_v52 = vld [vmem:[#allocation5 + $0x1f0c] sm:$0xf]  ;;  %v10091_v34 = vor.u32 %v11930_v43, %v10088_v44  ;;  %5309 = vmatpush.bf16.msra.mxu3 %v10251_v36  ;;  %5755 = vmatpush.bf16.msrb.mxu0 %v10303_v48  ;;  %v5328_v36 = vmul.f32 %v5324_v26, %v12656_v4  ;;  %v5084_v43 = vpop.f32.mrf.mxu1  ;;  %v5043_v41 = vpop.f32.mrf.mxu2  ;;  %v10408_v48 = vld [vmem:[#allocation5 + $0x13f0] sm:$0xf0] }
 0x312   :  { %v10232_v47 = vld [vmem:[#allocation5 + $0x1f28] sm:$0xf0]  ;;  %v12005_v26 = vld [vmem:[#allocation5 + $0x1314] sm:$0xf] }
 0x313   :  { %v10235_v53 = vor.u32 %v11966_v52, %v10232_v47  ;;  %v11926_v55 = vld [vmem:[#allocation5 + $0x1c8c] sm:$0xf]  ;;  %5765 = vmatpush.bf16.msrb.mxu1 %v10391_v38  ;;  %5298 = vmatpush.bf16.msra.mxu2 %v10091_v34  ;;  %v10358_v52 = vld [vmem:[#allocation5 + $0x1250] sm:$0xf]  ;;  %v5332_v38 = vmul.f32 %v5328_v36, %v12656_v4  ;;  %v5006_v50 = vpop.f32.mrf.mxu3  ;;  %v10339_v34 = vor.u32 %v11993_v33, %v10336_v45  ;;  %v10376_v45 = vld [vmem:[#allocation5 + $0x12f0] sm:$0xf0] }
 0x314   :  { %v10072_v56 = vld [vmem:[#allocation5 + $0x1ca8] sm:$0xf0]  ;;  %v12000_v47 = vld [vmem:[#allocation5 + $0x126c] sm:$0xf0]  ;;  %v10368_v50 = vld [vmem:[#allocation5 + $0x12b0] sm:$0xf0] }
 0x315   :  { %v11962_v3 = vld [vmem:[#allocation5 + $0x1ecc] sm:$0xf]  ;;  %v10075_v30 = vor.u32 %v11926_v55, %v10072_v56  ;;  %5310 = vmatpush.bf16.msra.mxu3 %v10235_v53  ;;  %5756 = vmatpush.bf16.msrb.mxu0 %v10295_v27  ;;  %v10359_v13 = vor.u32 %v12000_v47, %v10358_v52  ;;  %v5336_v60 = vadd.f32 %v5332_v38, %v12656_v4  ;;  %v10328_v53 = vld [vmem:[#allocation5 + $0x1170] sm:$0xf0]  ;;  %v10350_v55 = vld [vmem:[#allocation5 + $0x1210] sm:$0xf] }
 0x316   :  { %v10216_v58 = vld [vmem:[#allocation5 + $0x1ee8] sm:$0xf0]  ;;  %v11998_v56 = vld [vmem:[#allocation5 + $0x122c] sm:$0xf0]  ;;  %v10331_v24 = vor.u32 %v11991_v51, %v10328_v53  ;;  %v10312_v27 = vld [vmem:[#allocation5 + $0x10f0] sm:$0xf0] }
 0x317   :  { %v10219_v46 = vor.u32 %v11962_v3, %v10216_v58  ;;  %v11922_v31 = vld [vmem:[#allocation5 + $0x1c4c] sm:$0xf]  ;;  %5766 = vmatpush.bf16.msrb.mxu1 %v10383_v0  ;;  %5299 = vmatpush.bf16.msra.mxu2 %v10075_v30  ;;  %v12011_v58 = vld [vmem:[#allocation5 + $0x13d4] sm:$0xf]  ;;  %v5340_v62 = vmul.f32 0.7978846, %v5336_v60  ;;  %v10351_v0 = vor.u32 %v11998_v56, %v10350_v55 }
 0x318   :  { %v10056_v9 = vld [vmem:[#allocation5 + $0x1c68] sm:$0xf0]  ;;  %v10411_v6 = vor.u32 %v12011_v58, %v10408_v48  ;;  %v11989_v30 = vld [vmem:[#allocation5 + $0x1114] sm:$0xf] }
 0x319   :  { %v11958_v37 = vld [vmem:[#allocation5 + $0x1e8c] sm:$0xf]  ;;  %v10059_v18 = vor.u32 %v11922_v31, %v10056_v9  ;;  %5311 = vmatpush.bf16.msra.mxu3 %v10219_v46  ;;  %5757 = vmatpush.bf16.msrb.mxu0 %v10287_v29  ;;  %12265 = vtanh.f32 %v5340_v62  ;;  %v12009_v46 = vld [vmem:[#allocation5 + $0x1394] sm:$0xf]  ;;  %v5045_v17 = vpop.f32.mrf.mxu2  ;;  %v12673_v36 = vpop.f32.mrf.mxu1  ;;  %v10470_v62 = vld [vmem:[#allocation5 + $0x15d0] sm:$0xf] }
 0x31a   :  { %v10200_v11 = vld [vmem:[#allocation5 + $0x1ea8] sm:$0xf0]  ;;  %v10400_v31 = vld [vmem:[#allocation5 + $0x13b0] sm:$0xf0]  ;;  %v12022_v17 = vld [vmem:[#allocation5 + $0x152c] sm:$0xf0] }
 0x31b   :  { %v10203_v22 = vor.u32 %v11958_v37, %v10200_v11  ;;  %v11918_v40 = vld [vmem:[#allocation5 + $0x1c0c] sm:$0xf]  ;;  %5767 = vmatpush.bf16.msrb.mxu1 %v10375_v39  ;;  %5300 = vmatpush.bf16.msra.mxu2 %v10059_v18  ;;  %v5056_v10 = vpop.f32.mrf.mxu3  ;;  %v10323_v37 = vor.u32 %v11989_v30, %v10320_v8  ;;  %v11987_v11 = vld [vmem:[#allocation5 + $0x10d4] sm:$0xf]  ;;  %v10403_v39 = vor.u32 %v12009_v46, %v10400_v31  ;;  %v5320_v18 = vmul.f32 0.5, %v12656_v4 }
 0x31c   :  { %v10040_v25 = vld [vmem:[#allocation5 + $0x1c28] sm:$0xf0]  ;;  %v10315_v16 = vor.u32 %v11987_v11, %v10312_v27  ;;  %v11983_v4 = vld [vmem:[#allocation5 + $0x1054] sm:$0xf]  ;;  %v10454_v27 = vld [vmem:[#allocation5 + $0x1550] sm:$0xf] }
 0x31d   :  { %v11954_v1 = vld [vmem:[#allocation5 + $0x1e4c] sm:$0xf]  ;;  %v10043_v44 = vor.u32 %v11918_v40, %v10040_v25  ;;  %5312 = vmatpush.bf16.msra.mxu3 %v10203_v22  ;;  %5802 = vmatpush.bf16.msra.mxu0 %v10347_v32  ;;  %v11985_v22 = vld [vmem:[#allocation5 + $0x1094] sm:$0xf] }
 0x31e   :  { %v10184_v54 = vld [vmem:[#allocation5 + $0x1e68] sm:$0xf0]  ;;  %v10304_v40 = vld [vmem:[#allocation5 + $0x10b0] sm:$0xf0] }
 0x31f   :  { %v10187_v14 = vor.u32 %v11954_v1, %v10184_v54  ;;  %v11950_v59 = vld [vmem:[#allocation5 + $0x1e0c] sm:$0xf]  ;;  %5768 = vmatpush.bf16.msrb.mxu1 %v10367_v57  ;;  %5301 = vmatpush.bf16.msra.mxu2 %v10043_v44  ;;  %v12266_v42 = vpop.eup %12265  ;;  %v10384_v1 = vld [vmem:[#allocation5 + $0x1330] sm:$0xf0]  ;;  %v10307_v29 = vor.u32 %v11985_v22, %v10304_v40 }
 0x320   :  { %v10168_v49 = vld [vmem:[#allocation5 + $0x1e28] sm:$0xf0]  ;;  %v5348_v19 = vadd.f32 1.0, %v12266_v42  ;;  %v10387_v57 = vor.u32 %v12005_v26, %v10384_v1  ;;  %v10296_v32 = vld [vmem:[#allocation5 + $0x1070] sm:$0xf0] }
 0x321   :  { %5313 = vmatpush.bf16.msra.mxu3 %v10187_v14  ;;  %v10171_v3 = vor.u32 %v11950_v59, %v10168_v49  ;;  %v12662_v2 = vld [vmem:[#allocation7 + $0xa] sm:$0xf]  ;;  %5803 = vmatpush.bf16.msra.mxu0 %v10339_v34  ;;  %v5095_v43 = vpop.f32.mrf.mxu2  ;;  %v12003_v44 = vld [vmem:[#allocation5 + $0x12d4] sm:$0xf]  ;;  %v10299_v47 = vor.u32 %v11983_v4, %v10296_v32  ;;  %v10422_v4 = vld [vmem:[#allocation5 + $0x1450] sm:$0xf] }
 0x322   :  { %v3617_v21 = vperm.slane %v12662_v2, 1  ;;  %5302 = vmatmul.bf16.vlgmr.msra.gmra.mxu2 %v12606_v28  ;;  %v12007_v28 = vld [vmem:[#allocation5 + $0x1354] sm:$0xf]  ;;  %v10379_v14 = vor.u32 %v12003_v44, %v10376_v45  ;;  %v12016_v32 = vld [vmem:[#allocation5 + $0x146c] sm:$0xf0] }
 0x323   :  { %5769 = vmatpush.bf16.msrb.mxu1 %v10359_v13  ;;  %v10395_v23 = vor.u32 %v12007_v28, %v10392_v20  ;;  %v5058_v54 = vpop.f32.mrf.mxu3  ;;  %v11981_v38 = vld [vmem:[#allocation5 + $0x1014] sm:$0xf]  ;;  %v10423_v44 = vor.u32 %v12016_v32, %v10422_v4  ;;  %v10414_v45 = vld [vmem:[#allocation5 + $0x1410] sm:$0xf] }
 0x324   :  { %v5018_v9 = vadd.f32 %v12639_v15, %v3617_v21  ;;  %v12670_v15 = vpop.f32.mrf.mxu0  ;;  %v10288_v59 = vld [vmem:[#allocation5 + $0x1030] sm:$0xf0]  ;;  %v10430_v54 = vld [vmem:[#allocation5 + $0x1490] sm:$0xf] }
 0x325   :  { %5314 = vmatpush.bf16.msra.mxu3 %v10171_v3  ;;  %5804 = vmatpush.bf16.msra.mxu0 %v10331_v24  ;;  %v12001_v13 = vld [vmem:[#allocation5 + $0x1294] sm:$0xf] }
 0x326   :  { %v5031_v12 = vadd.f32 %v12641_v5, %v5018_v9  ;;  %v10371_v51 = vor.u32 %v12001_v13, %v10368_v50  ;;  %v11999_v53 = vld [vmem:[#allocation5 + $0x1254] sm:$0xf]  ;;  %v10462_v9 = vld [vmem:[#allocation5 + $0x1590] sm:$0xf] }
 0x327   :  { %5770 = vmatpush.bf16.msrb.mxu1 %v10351_v0  ;;  %v10360_v55 = vld [vmem:[#allocation5 + $0x1270] sm:$0xf0]  ;;  %v12028_v0 = vld [vmem:[#allocation5 + $0x15ec] sm:$0xf0] }
 0x328   :  { %5315 = vmatmul.bf16.vlgmr.msra.gmra.mxu3 %v12611_v61  ;;  %v5044_v63 = vadd.f32 %v5043_v41, %v5031_v12  ;;  %v5352_v61 = vmul.f32 %v5348_v19, %v5320_v18  ;;  %v5136_v41 = vpop.f32.mrf.mxu1  ;;  %v10363_v48 = vor.u32 %v11999_v53, %v10360_v55  ;;  %v10471_v24 = vor.u32 %v12028_v0, %v10470_v62  ;;  %v10446_v12 = vld [vmem:[#allocation5 + $0x1510] sm:$0xf]  ;;  %v12025_v50 = vld [vmem:[#allocation5 + $0x1594] sm:$0xf] }
 0x329   :  { %5805 = vmatpush.bf16.msra.mxu0 %v10323_v37  ;;  %v5097_v3 = vpop.f32.mrf.mxu2  ;;  %v10447_v42 = vor.u32 %v12022_v17, %v10446_v12  ;;  %v10438_v19 = vld [vmem:[#allocation5 + $0x14d0] sm:$0xf]  ;;  %v12023_v53 = vld [vmem:[#allocation5 + $0x1554] sm:$0xf] }
 0x32a   :  { %v5057_v25 = vadd.f32 %v5056_v10, %v5044_v63  ;;  %v5356_v5 = vpack.c.bf16 %v5352_v61, %v5352_v61  ;;  %5776 = vmatpush.bf16.msrb.mxu2 %v10471_v24  ;;  %v12026_v10 = vld [vmem:[#allocation5 + $0x15ac] sm:$0xf0]  ;;  %v10456_v55 = vld [vmem:[#allocation5 + $0x1570] sm:$0xf0] }
 0x32b   :  { %5815 = vmatpush.bf16.msra.mxu1 %v10411_v6  ;;  %v5108_v60 = vpop.f32.mrf.mxu3  ;;  %v10352_v6 = vld [vmem:[#allocation5 + $0x1230] sm:$0xf0]  ;;  %v10463_v37 = vor.u32 %v12026_v10, %v10462_v9 }
 0x32c   :  { %v5070_v33 = vadd.f32 %v12647_v35, %v5057_v25  ;;  %5758 = vmatmul.bf16.vlgmr.msrb.gmra.mxu0 %v5356_v5  ;;  %v5123_v52 = vpop.f32.mrf.mxu0  ;;  %v10291_v35 = vor.u32 %v11981_v38, %v10288_v59  ;;  %v10472_v38 = vld [vmem:[#allocation5 + $0x15f0] sm:$0xf0] }
 0x32d   :  { %5806 = vmatpush.bf16.msra.mxu0 %v10315_v16  ;;  %v12014_v52 = vld [vmem:[#allocation5 + $0x142c] sm:$0xf0]  ;;  %v10448_v62 = vld [vmem:[#allocation5 + $0x1530] sm:$0xf0] }
 0x32e   :  { %v5083_v49 = vadd.f32 %v12654_v7, %v5070_v33  ;;  %v11997_v7 = vld [vmem:[#allocation5 + $0x1214] sm:$0xf]  ;;  %5777 = vmatpush.bf16.msrb.mxu2 %v10463_v37 }
 0x32f   :  { %5816 = vmatpush.bf16.msra.mxu1 %v10403_v39  ;;  %v10355_v8 = vor.u32 %v11997_v7, %v10352_v6  ;;  %v12024_v39 = vld [vmem:[#allocation5 + $0x156c] sm:$0xf0]  ;;  %v10440_v24 = vld [vmem:[#allocation5 + $0x14f0] sm:$0xf0] }
 0x330   :  { %v5096_v34 = vadd.f32 %v5095_v43, %v5083_v49  ;;  %v10455_v28 = vor.u32 %v12024_v39, %v10454_v27  ;;  %v3618_v49 = vperm.slane %v12662_v2, 2  ;;  %v10424_v27 = vld [vmem:[#allocation5 + $0x1470] sm:$0xf0] }
 0x331   :  { %5807 = vmatpush.bf16.msra.mxu0 %v10307_v29 }
 0x332   :  { %v5109_v56 = vadd.f32 %v5108_v60, %v5096_v34  ;;  %5778 = vmatpush.bf16.msrb.mxu2 %v10455_v28  ;;  %v10464_v34 = vld [vmem:[#allocation5 + $0x15b0] sm:$0xf0] }
 0x333   :  { %5817 = vmatpush.bf16.msra.mxu1 %v10395_v23  ;;  %v5110_v46 = vpop.f32.mrf.mxu3  ;;  %v12020_v23 = vld [vmem:[#allocation5 + $0x14ec] sm:$0xf0] }
 0x334   :  { %v5325_v58 = vmul.f32 0.044715, %v5109_v56  ;;  %v5173_v20 = vpop.f32.mrf.mxu0  ;;  %v5321_v18 = vmul.f32 0.5, %v5109_v56  ;;  %v10439_v61 = vor.u32 %v12020_v23, %v10438_v19  ;;  %v12017_v46 = vld [vmem:[#allocation5 + $0x1494] sm:$0xf] }
 0x335   :  { %5808 = vmatpush.bf16.msra.mxu0 %v10299_v47  ;;  %v10415_v47 = vor.u32 %v12014_v52, %v10414_v45  ;;  %v12044_v23 = vld [vmem:[#allocation5 + $0x17ec] sm:$0xf0] }
 0x336   :  { %v5329_v21 = vmul.f32 %v5325_v58, %v5109_v56  ;;  %5779 = vmatpush.bf16.msrb.mxu2 %v10447_v42 }
 0x337   :  { %5818 = vmatpush.bf16.msra.mxu1 %v10387_v57 }
 0x338   :  { %v5333_v30 = vmul.f32 %v5329_v21, %v5109_v56  ;;  %v12019_v21 = vld [vmem:[#allocation5 + $0x14d4] sm:$0xf] }
 0x339   :  { %5809 = vmatpush.bf16.msra.mxu0 %v10291_v35  ;;  %v5147_v22 = vpop.f32.mrf.mxu2  ;;  %v10467_v35 = vor.u32 %v12025_v50, %v10464_v34 }
 0x33a   :  { %v5337_v31 = vadd.f32 %v5333_v30, %v5109_v56  ;;  %5780 = vmatpush.bf16.msrb.mxu2 %v10439_v61  ;;  %v10459_v56 = vor.u32 %v12023_v53, %v10456_v55 }
 0x33b   :  { %5819 = vmatpush.bf16.msra.mxu1 %v10379_v14  ;;  %v12027_v14 = vld [vmem:[#allocation5 + $0x15d4] sm:$0xf] }
 0x33c   :  { %5810 = vmatmul.bf16.vlgmr.msra.gmra.mxu0 %v5356_v5  ;;  %v5341_v11 = vmul.f32 0.7978846, %v5337_v31  ;;  %v5175_v26 = vpop.f32.mrf.mxu0  ;;  %v12018_v5 = vld [vmem:[#allocation5 + $0x14ac] sm:$0xf0]  ;;  %v10475_v59 = vor.u32 %v12027_v14, %v10472_v38  ;;  %v10432_v31 = vld [vmem:[#allocation5 + $0x14b0] sm:$0xf0] }
 0x33d   :  { %v10431_v29 = vor.u32 %v12018_v5, %v10430_v54  ;;  %v10435_v9 = vor.u32 %v12017_v46, %v10432_v31  ;;  %v10526_v26 = vld [vmem:[#allocation5 + $0x1790] sm:$0xf]  ;;  %v12041_v46 = vld [vmem:[#allocation5 + $0x1794] sm:$0xf] }
 0x33e   :  { %12267 = vtanh.f32 %v5341_v11  ;;  %v12015_v11 = vld [vmem:[#allocation5 + $0x1454] sm:$0xf]  ;;  %v10518_v54 = vld [vmem:[#allocation5 + $0x1750] sm:$0xf] }
 0x33f   :  { %5820 = vmatpush.bf16.msra.mxu1 %v10371_v51  ;;  %v5186_v40 = vpop.f32.mrf.mxu1  ;;  %5781 = vmatpush.bf16.msrb.mxu2 %v10431_v29  ;;  %v5122_v51 = vadd.f32 %v12670_v15, %v3618_v49  ;;  %v10443_v15 = vor.u32 %v12019_v21, %v10440_v24  ;;  %v10427_v28 = vor.u32 %v12015_v11, %v10424_v27  ;;  %v10502_v38 = vld [vmem:[#allocation5 + $0x16d0] sm:$0xf]  ;;  %v12043_v24 = vld [vmem:[#allocation5 + $0x17d4] sm:$0xf] }
 0x340   :  { %v10528_v31 = vld [vmem:[#allocation5 + $0x17b0] sm:$0xf0] }
 0x341   :  { %v5149_v33 = vpop.f32.mrf.mxu2  ;;  %v5135_v60 = vadd.f32 %v12673_v36, %v5122_v51  ;;  %v10494_v51 = vld [vmem:[#allocation5 + $0x1690] sm:$0xf] }
 0x342   :  { %v10510_v33 = vld [vmem:[#allocation5 + $0x1710] sm:$0xf] }
 0x343   :  { %5821 = vmatpush.bf16.msra.mxu1 %v10363_v48  ;;  %v5160_v57 = vpop.f32.mrf.mxu3  ;;  %5782 = vmatpush.bf16.msrb.mxu2 %v10423_v44  ;;  %v5148_v41 = vadd.f32 %v5147_v22, %v5135_v60  ;;  %v12021_v48 = vld [vmem:[#allocation5 + $0x1514] sm:$0xf]  ;;  %v12034_v60 = vld [vmem:[#allocation5 + $0x16ac] sm:$0xf0] }
 0x344   :  { %v12268_v16 = vpop.eup %12267  ;;  %v10451_v0 = vor.u32 %v12021_v48, %v10448_v62  ;;  %v10495_v53 = vor.u32 %v12034_v60, %v10494_v51  ;;  %v5424_v51 = vld [vmem:[#allocation7 + $0xe] sm:$0x3] }
 0x345   :  { %v5349_v63 = vadd.f32 1.0, %v12268_v16  ;;  %v5161_v58 = vadd.f32 %v5160_v57, %v5148_v41  ;;  %v12013_v16 = vld [vmem:[#allocation5 + $0x1414] sm:$0xf]  ;;  %v12040_v57 = vld [vmem:[#allocation5 + $0x176c] sm:$0xf0]  ;;  %v5426_v60 = vperm.slane %v5424_v51, 0 }
 0x346   :  { %v10519_v4 = vor.u32 %v12040_v57, %v10518_v54  ;;  %v12032_v41 = vld [vmem:[#allocation5 + $0x166c] sm:$0xf0] }
 0x347   :  { %5822 = vmatpush.bf16.msra.mxu1 %v10355_v8  ;;  %v5353_v25 = vmul.f32 %v5349_v63, %v5321_v18  ;;  %v5188_v43 = vpop.f32.mrf.mxu1  ;;  %5783 = vmatpush.bf16.msrb.mxu2 %v10415_v47  ;;  %v5174_v7 = vadd.f32 %v5173_v20, %v5161_v58  ;;  %v10416_v18 = vld [vmem:[#allocation5 + $0x1430] sm:$0xf0]  ;;  %v10534_v63 = vld [vmem:[#allocation5 + $0x17d0] sm:$0xf] }
 0x348   :  { %v10419_v19 = vor.u32 %v12013_v16, %v10416_v18  ;;  %v12038_v43 = vld [vmem:[#allocation5 + $0x172c] sm:$0xf0]  ;;  %v12035_v16 = vld [vmem:[#allocation5 + $0x16d4] sm:$0xf] }
 0x349   :  { %v5357_v1 = vpack.c.bf16 %v5353_v25, %v5353_v25  ;;  %v5187_v8 = vadd.f32 %v5186_v40, %v5174_v7  ;;  %v10535_v40 = vor.u32 %v12044_v23, %v10534_v63  ;;  %v10511_v45 = vor.u32 %v12038_v43, %v10510_v33  ;;  %v12030_v7 = vld [vmem:[#allocation5 + $0x162c] sm:$0xf0]  ;;  %v10504_v18 = vld [vmem:[#allocation5 + $0x16f0] sm:$0xf0] }
 0x34a   :  { %v10507_v63 = vor.u32 %v12035_v16, %v10504_v18  ;;  %v12033_v23 = vld [vmem:[#allocation5 + $0x1694] sm:$0xf]  ;;  %v12065_v16 = vld [vmem:[#allocation5 + $0x2104] sm:$0xf] }
 0x34b   :  { %5771 = vmatmul.bf16.vlgmr.msrb.gmra.mxu1 %v5357_v1  ;;  %v5162_v13 = vpop.f32.mrf.mxu3  ;;  %5828 = vmatpush.bf16.msra.mxu2 %v10475_v59  ;;  %v12036_v59 = vld [vmem:[#allocation5 + $0x16ec] sm:$0xf0]  ;;  %v10480_v33 = vld [vmem:[#allocation5 + $0x1630] sm:$0xf0] }
 0x34c   :  { %5789 = vmatpush.bf16.msrb.mxu3 %v10535_v40  ;;  %v10503_v49 = vor.u32 %v12036_v59, %v10502_v38 }
 0x34f   :  { %5829 = vmatpush.bf16.msra.mxu2 %v10467_v35 }
 0x352   :  { %v12679_v3 = vpop.f32.mrf.mxu0 }
 0x353   :  { %5830 = vmatpush.bf16.msra.mxu2 %v10459_v56  ;;  %v10486_v56 = vld [vmem:[#allocation5 + $0x1650] sm:$0xf] }
 0x354   :  { %v10487_v58 = vor.u32 %v12032_v41, %v10486_v56 }
 0x357   :  { %5831 = vmatpush.bf16.msra.mxu2 %v10451_v0  ;;  %v10478_v0 = vld [vmem:[#allocation5 + $0x1610] sm:$0xf] }
 0x358   :  { %v10479_v21 = vor.u32 %v12030_v7, %v10478_v0 }
 0x35a   :  { %v5227_v36 = vpop.f32.mrf.mxu0 }
 0x35b   :  { %5823 = vmatmul.bf16.vlgmr.msra.gmra.mxu1 %v5357_v1  ;;  %5832 = vmatpush.bf16.msra.mxu2 %v10443_v15  ;;  %v12042_v1 = vld [vmem:[#allocation5 + $0x17ac] sm:$0xf0]  ;;  %v10536_v15 = vld [vmem:[#allocation5 + $0x17f0] sm:$0xf0]  ;;  %v3619_v36 = vperm.slane %v12662_v2, 3 }
 0x35c   :  { %v10527_v29 = vor.u32 %v12042_v1, %v10526_v26 }
 0x35d   :  { %v5199_v6 = vpop.f32.mrf.mxu2  ;;  %v5226_v11 = vadd.f32 %v12679_v3, %v3619_v36  ;;  %v10684_v36 = vld [vmem:[#allocation5 + $0x21e0] sm:$0xf0] }
 0x35e   :  { %v5200_v10 = vadd.f32 %v5199_v6, %v5187_v8  ;;  %5790 = vmatpush.bf16.msrb.mxu3 %v10527_v29  ;;  %v10539_v6 = vor.u32 %v12043_v24, %v10536_v15  ;;  %v12082_v24 = vld [vmem:[#allocation5 + $0x21dc] sm:$0xf0]  ;;  %v12080_v15 = vld [vmem:[#allocation5 + $0x21c4] sm:$0xf] }
 0x35f   :  { %v12681_v30 = vpop.f32.mrf.mxu1  ;;  %5833 = vmatpush.bf16.msra.mxu2 %v10435_v9  ;;  %v12039_v9 = vld [vmem:[#allocation5 + $0x1754] sm:$0xf] }
 0x362   :  { %5791 = vmatpush.bf16.msrb.mxu3 %v10519_v4 }
 0x363   :  { %v5212_v37 = vpop.f32.mrf.mxu3  ;;  %5834 = vmatpush.bf16.msra.mxu2 %v10427_v28 }
 0x364   :  { %v5213_v39 = vadd.f32 %v5212_v37, %v5200_v10  ;;  %v10531_v10 = vor.u32 %v12041_v46, %v10528_v31  ;;  %v10520_v37 = vld [vmem:[#allocation5 + $0x1770] sm:$0xf0]  ;;  %v10662_v46 = vld [vmem:[#allocation5 + $0x2180] sm:$0xf] }
 0x365   :  { %v5201_v12 = vpop.f32.mrf.mxu2  ;;  %v10523_v27 = vor.u32 %v12039_v9, %v10520_v37  ;;  %v12077_v31 = vld [vmem:[#allocation5 + $0x219c] sm:$0xf0]  ;;  %v12075_v9 = vld [vmem:[#allocation5 + $0x2184] sm:$0xf] }
 0x366   :  { %v5326_v20 = vmul.f32 0.044715, %v5213_v39  ;;  %v5322_v52 = vmul.f32 0.5, %v5213_v39  ;;  %5792 = vmatpush.bf16.msrb.mxu3 %v10511_v45  ;;  %v10512_v12 = vld [vmem:[#allocation5 + $0x1730] sm:$0xf0] }
 0x367   :  { %v5240_v17 = vpop.f32.mrf.mxu1  ;;  %5835 = vmatpush.bf16.msra.mxu2 %v10419_v19  ;;  %v10664_v37 = vld [vmem:[#allocation5 + $0x21a0] sm:$0xf0] }
 0x368   :  { %v5330_v42 = vmul.f32 %v5326_v20, %v5213_v39  ;;  %v12037_v20 = vld [vmem:[#allocation5 + $0x1714] sm:$0xf] }
 0x369   :  { %v10515_v17 = vor.u32 %v12037_v20, %v10512_v12  ;;  %v10644_v20 = vld [vmem:[#allocation5 + $0x2160] sm:$0xf0] }
 0x36a   :  { %v5334_v22 = vmul.f32 %v5330_v42, %v5213_v39  ;;  %5793 = vmatpush.bf16.msrb.mxu3 %v10503_v49 }
 0x36b   :  { %v5214_v25 = vpop.f32.mrf.mxu3 }
 0x36c   :  { %v5338_v61 = vadd.f32 %v5334_v22, %v5213_v39  ;;  %v5239_v39 = vadd.f32 %v12681_v30, %v5226_v11  ;;  %v10496_v22 = vld [vmem:[#allocation5 + $0x16b0] sm:$0xf0]  ;;  %v10642_v11 = vld [vmem:[#allocation5 + $0x2140] sm:$0xf] }
 0x36d   :  { %v10499_v3 = vor.u32 %v12033_v23, %v10496_v22  ;;  %v12031_v25 = vld [vmem:[#allocation5 + $0x1654] sm:$0xf]  ;;  %v12062_v23 = vld [vmem:[#allocation5 + $0x20dc] sm:$0xf0] }
 0x36e   :  { %v5342_v5 = vmul.f32 0.7978846, %v5338_v61  ;;  %5794 = vmatpush.bf16.msrb.mxu3 %v10495_v53  ;;  %v10488_v61 = vld [vmem:[#allocation5 + $0x1670] sm:$0xf0] }
 0x36f   :  { %v10491_v1 = vor.u32 %v12031_v25, %v10488_v61  ;;  %v12060_v25 = vld [vmem:[#allocation5 + $0x20c4] sm:$0xf] }
 0x370   :  { %12269 = vtanh.f32 %v5342_v5 }
 0x372   :  { %5795 = vmatpush.bf16.msrb.mxu3 %v10487_v58  ;;  %v5427_v58 = vperm.slane %v5424_v51, 1 }
 0x376   :  { %v12270_v44 = vpop.eup %12269  ;;  %5796 = vmatpush.bf16.msrb.mxu3 %v10479_v21  ;;  %v10682_v21 = vld [vmem:[#allocation5 + $0x21c0] sm:$0xf] }
 0x377   :  { %v5350_v47 = vadd.f32 1.0, %v12270_v44 }
 0x379   :  { %v5277_v32 = vpop.f32.mrf.mxu0  ;;  %v5354_v14 = vmul.f32 %v5350_v47, %v5322_v52 }
 0x37a   :  { %5841 = vmatpush.bf16.msra.mxu3 %v10539_v6  ;;  %v10683_v6 = vor.u32 %v12082_v24, %v10682_v21  ;;  %v10782_v21 = vld [vmem:[#allocation5 + $0x2300] sm:$0xf] }
 0x37b   :  { %v5358_v34 = vpack.c.bf16 %v5354_v14, %v5354_v14  ;;  %v12107_v24 = vld [vmem:[#allocation5 + $0x231c] sm:$0xf0] }
 0x37c   :  { %6380 = vmatpush.bf16.msrb.mxu0 %v10683_v6 }
 0x37d   :  { %5784 = vmatmul.bf16.vlgmr.msrb.gmra.mxu2 %v5358_v34 }
 0x37e   :  { %5842 = vmatpush.bf16.msra.mxu3 %v10531_v10  ;;  %v10663_v10 = vor.u32 %v12077_v31, %v10662_v46  ;;  %v10784_v46 = vld [vmem:[#allocation5 + $0x2320] sm:$0xf0] }
 0x380   :  { %6381 = vmatpush.bf16.msrb.mxu0 %v10663_v10 }
 0x381   :  { %v5251_v13 = vpop.f32.mrf.mxu2  ;;  %v5279_v35 = vpop.f32.mrf.mxu0 }
 0x382   :  { %v5252_v28 = vadd.f32 %v5251_v13, %v5239_v39  ;;  %5843 = vmatpush.bf16.msra.mxu3 %v10523_v27  ;;  %v12072_v27 = vld [vmem:[#allocation5 + $0x215c] sm:$0xf0]  ;;  %v10667_v39 = vor.u32 %v12075_v9, %v10664_v37  ;;  %v10783_v9 = vor.u32 %v12107_v24, %v10782_v21  ;;  %v10690_v37 = vld [vmem:[#allocation5 + $0x21c8] sm:$0xf]  ;;  %v12061_v21 = vld [vmem:[#allocation5 + $0x20cc] sm:$0xf] }
 0x383   :  { %v10643_v12 = vor.u32 %v12072_v27, %v10642_v11  ;;  %v12083_v11 = vld [vmem:[#allocation5 + $0x21e4] sm:$0xf0]  ;;  %v12081_v27 = vld [vmem:[#allocation5 + $0x21cc] sm:$0xf] }
 0x384   :  { %v10612_v24 = vld [vmem:[#allocation5 + $0x20e8] sm:$0xf0] }
 0x385   :  { %6382 = vmatpush.bf16.msrb.mxu0 %v10643_v12  ;;  %v10762_v12 = vld [vmem:[#allocation5 + $0x22c0] sm:$0xf] }
 0x386   :  { %5844 = vmatpush.bf16.msra.mxu3 %v10515_v17  ;;  %v10622_v17 = vld [vmem:[#allocation5 + $0x2100] sm:$0xf] }
 0x387   :  { %v5290_v50 = vpop.f32.mrf.mxu1 }
 0x389   :  { %v5253_v48 = vpop.f32.mrf.mxu2 }
 0x38a   :  { %5845 = vmatpush.bf16.msra.mxu3 %v10507_v63  ;;  %v10624_v63 = vld [vmem:[#allocation5 + $0x2120] sm:$0xf0] }
 0x38b   :  { %v5264_v55 = vpop.f32.mrf.mxu3  ;;  %v10627_v22 = vor.u32 %v12065_v16, %v10624_v63  ;;  %v10764_v16 = vld [vmem:[#allocation5 + $0x22e0] sm:$0xf0]  ;;  %v12078_v63 = vld [vmem:[#allocation5 + $0x21a4] sm:$0xf0] }
 0x38c   :  { %v5265_v2 = vadd.f32 %v5264_v55, %v5252_v28  ;;  %v12070_v28 = vld [vmem:[#allocation5 + $0x2144] sm:$0xf] }
 0x38d   :  { %5836 = vmatmul.bf16.vlgmr.msra.gmra.mxu2 %v5358_v34 }
 0x38e   :  { %v5278_v42 = vadd.f32 %v5277_v32, %v5265_v2  ;;  %5846 = vmatpush.bf16.msra.mxu3 %v10499_v3  ;;  %v12029_v32 = vld [vmem:[#allocation5 + $0x1614] sm:$0xf]  ;;  %v10647_v2 = vor.u32 %v12070_v28, %v10644_v20  ;;  %v10842_v3 = vld [vmem:[#allocation5 + $0x23c0] sm:$0xf]  ;;  %v10691_v28 = vor.u32 %v12083_v11, %v10690_v37  ;;  %v10692_v20 = vld [vmem:[#allocation5 + $0x21e8] sm:$0xf0]  ;;  %v10615_v37 = vor.u32 %v12061_v21, %v10612_v24 }
 0x38f   :  { %v5292_v62 = vpop.f32.mrf.mxu1  ;;  %v10483_v43 = vor.u32 %v12029_v32, %v10480_v33  ;;  %v10822_v32 = vld [vmem:[#allocation5 + $0x2380] sm:$0xf]  ;;  %v10590_v11 = vld [vmem:[#allocation5 + $0x2088] sm:$0xf]  ;;  %v12091_v24 = vld [vmem:[#allocation5 + $0x224c] sm:$0xf] }
 0x390   :  { %v5291_v40 = vadd.f32 %v5290_v50, %v5278_v42  ;;  %v12067_v42 = vld [vmem:[#allocation5 + $0x211c] sm:$0xf0]  ;;  %v12093_v21 = vld [vmem:[#allocation5 + $0x2264] sm:$0xf0] }
 0x391   :  { %v10623_v18 = vor.u32 %v12067_v42, %v10622_v17  ;;  %v10695_v17 = vor.u32 %v12081_v27, %v10692_v20  ;;  %v12100_v42 = vld [vmem:[#allocation5 + $0x22c4] sm:$0xf]  ;;  %v12058_v27 = vld [vmem:[#allocation5 + $0x20a4] sm:$0xf0] }
 0x392   :  { %5847 = vmatpush.bf16.msra.mxu3 %v10491_v1  ;;  %v12120_v1 = vld [vmem:[#allocation5 + $0x23c4] sm:$0xf]  ;;  %v12118_v20 = vld [vmem:[#allocation5 + $0x23a4] sm:$0xf0] }
 0x393   :  { %v5266_v8 = vpop.f32.mrf.mxu3  ;;  %6383 = vmatpush.bf16.msrb.mxu0 %v10623_v18  ;;  %v10670_v18 = vld [vmem:[#allocation5 + $0x2188] sm:$0xf] }
 0x394   :  { %v10687_v8 = vor.u32 %v12080_v15, %v10684_v36  ;;  %v12045_v15 = vld [vmem:[#allocation5 + $0x2004] sm:$0xf] }
 0x395   :  { %v10544_v36 = vld [vmem:[#allocation5 + $0x2020] sm:$0xf0] }
 0x396   :  { %5848 = vmatpush.bf16.msra.mxu3 %v10483_v43  ;;  %6406 = vmatpush.bf16.msrb.mxu2 %v10687_v8  ;;  %v12117_v43 = vld [vmem:[#allocation5 + $0x239c] sm:$0xf0]  ;;  %v12105_v8 = vld [vmem:[#allocation5 + $0x2304] sm:$0xf]  ;;  %v10547_v10 = vor.u32 %v12045_v15, %v10544_v36  ;;  %v12121_v36 = vld [vmem:[#allocation5 + $0x23cc] sm:$0xf] }
 0x39a   :  { %6407 = vmatpush.bf16.msrb.mxu2 %v10667_v39  ;;  %v10787_v39 = vor.u32 %v12105_v8, %v10784_v46  ;;  %v10852_v8 = vld [vmem:[#allocation5 + $0x23e8] sm:$0xf0] }
 0x39e   :  { %6408 = vmatpush.bf16.msrb.mxu2 %v10647_v2  ;;  %v12102_v2 = vld [vmem:[#allocation5 + $0x22dc] sm:$0xf0] }
 0x3a2   :  { %6409 = vmatpush.bf16.msrb.mxu2 %v10627_v22  ;;  %v10763_v22 = vor.u32 %v12102_v2, %v10762_v12  ;;  %v12056_v12 = vld [vmem:[#allocation5 + $0x208c] sm:$0xf] }
 0x3a3   :  { %v10592_v2 = vld [vmem:[#allocation5 + $0x20a8] sm:$0xf0] }
 0x3a5   :  { %v5303_v19 = vpop.f32.mrf.mxu2 }
 0x3a6   :  { %v5304_v30 = vadd.f32 %v5303_v19, %v5291_v40  ;;  %v10602_v19 = vld [vmem:[#allocation5 + $0x20c0] sm:$0xf] }
 0x3a7   :  { %v12122_v40 = vld [vmem:[#allocation5 + $0x23dc] sm:$0xf0]  ;;  %v10603_v61 = vor.u32 %v12062_v23, %v10602_v19  ;;  %v12076_v19 = vld [vmem:[#allocation5 + $0x218c] sm:$0xf] }
 0x3a8   :  { %v10672_v23 = vld [vmem:[#allocation5 + $0x21a8] sm:$0xf0] }
 0x3a9   :  { %v5759_v57 = vpop.f32.mrf.mxu0  ;;  %6384 = vmatpush.bf16.msrb.mxu0 %v10603_v61  ;;  %v12097_v61 = vld [vmem:[#allocation5 + $0x229c] sm:$0xf0] }
 0x3aa   :  { %v5760_v53 = vadd.f32 %v5759_v57, %v5426_v60  ;;  %v10582_v57 = vld [vmem:[#allocation5 + $0x2080] sm:$0xf]  ;;  %v12050_v60 = vld [vmem:[#allocation5 + $0x2044] sm:$0xf] }
 0x3ab   :  { %v5316_v26 = vpop.f32.mrf.mxu3 }
 0x3ac   :  { %v5317_v54 = vadd.f32 %v5316_v26, %v5304_v30  ;;  %v10843_v30 = vor.u32 %v12122_v40, %v10842_v3  ;;  %v10604_v26 = vld [vmem:[#allocation5 + $0x20e0] sm:$0xf0]  ;;  %v10767_v3 = vor.u32 %v12100_v42, %v10764_v16  ;;  %v10671_v40 = vor.u32 %v12078_v63, %v10670_v18  ;;  %v10832_v42 = vld [vmem:[#allocation5 + $0x23a8] sm:$0xf0] }
 0x3ad   :  { %v5305_v29 = vpop.f32.mrf.mxu2  ;;  %v10591_v16 = vor.u32 %v12058_v27, %v10590_v11  ;;  %v10595_v63 = vor.u32 %v12056_v12, %v10592_v2  ;;  %v10712_v11 = vld [vmem:[#allocation5 + $0x2228] sm:$0xf0]  ;;  %v10890_v12 = vld [vmem:[#allocation5 + $0x21d4] sm:$0xf] }
 0x3ae   :  { %v5327_v5 = vmul.f32 0.044715, %v5317_v54  ;;  %v5323_v49 = vmul.f32 0.5, %v5317_v54  ;;  %6393 = vmatpush.bf16.msrb.mxu1 %v10843_v30  ;;  %v12095_v30 = vld [vmem:[#allocation5 + $0x2284] sm:$0xf] }
 0x3af   :  { %v12132_v2 = vld [vmem:[#allocation5 + $0x21f0] sm:$0xf0] }
 0x3b0   :  { %v5331_v4 = vmul.f32 %v5327_v5, %v5317_v54  ;;  %v10607_v5 = vor.u32 %v12060_v25, %v10604_v26  ;;  %v10742_v25 = vld [vmem:[#allocation5 + $0x2280] sm:$0xf]  ;;  %v10675_v26 = vor.u32 %v12076_v19, %v10672_v23 }
 0x3b1   :  { %v5761_v14 = vpop.f32.mrf.mxu0 }
 0x3b2   :  { %v5335_v44 = vmul.f32 %v5331_v4, %v5317_v54  ;;  %6410 = vmatpush.bf16.msrb.mxu2 %v10607_v5  ;;  %v12057_v4 = vld [vmem:[#allocation5 + $0x209c] sm:$0xf0]  ;;  %v12115_v14 = vld [vmem:[#allocation5 + $0x2384] sm:$0xf]  ;;  %v12073_v5 = vld [vmem:[#allocation5 + $0x2164] sm:$0xf0] }
 0x3b3   :  { %v5318_v45 = vpop.f32.mrf.mxu3  ;;  %v10583_v33 = vor.u32 %v12057_v4, %v10582_v57  ;;  %v10652_v57 = vld [vmem:[#allocation5 + $0x2168] sm:$0xf0] }
 0x3b4   :  { %v5339_v52 = vadd.f32 %v5335_v44, %v5317_v54  ;;  %v10844_v54 = vld [vmem:[#allocation5 + $0x23e0] sm:$0xf0] }
 0x3b5   :  { %v10847_v29 = vor.u32 %v12120_v1, %v10844_v54  ;;  %v12055_v44 = vld [vmem:[#allocation5 + $0x2084] sm:$0xf]  ;;  %6385 = vmatpush.bf16.msrb.mxu0 %v10583_v33  ;;  %v10650_v54 = vld [vmem:[#allocation5 + $0x2148] sm:$0xf] }
 0x3b6   :  { %v5343_v47 = vmul.f32 0.7978846, %v5339_v52  ;;  %v10584_v45 = vld [vmem:[#allocation5 + $0x20a0] sm:$0xf0]  ;;  %v10823_v52 = vor.u32 %v12117_v43, %v10822_v32  ;;  %v10743_v32 = vor.u32 %v12097_v61, %v10742_v25  ;;  %v10651_v43 = vor.u32 %v12073_v5, %v10650_v54  ;;  %v12113_v61 = vld [vmem:[#allocation5 + $0x2364] sm:$0xf0] }
 0x3b7   :  { %v10744_v1 = vld [vmem:[#allocation5 + $0x22a0] sm:$0xf0]  ;;  %v12111_v5 = vld [vmem:[#allocation5 + $0x234c] sm:$0xf] }
 0x3b8   :  { %12271 = vtanh.f32 %v5343_v47  ;;  %v10587_v47 = vor.u32 %v12055_v44, %v10584_v45  ;;  %6394 = vmatpush.bf16.msrb.mxu1 %v10823_v52  ;;  %v10747_v33 = vor.u32 %v12095_v30, %v10744_v1  ;;  %v10722_v44 = vld [vmem:[#allocation5 + $0x2240] sm:$0xf]  ;;  %v12090_v52 = vld [vmem:[#allocation5 + $0x2244] sm:$0xf]  ;;  %v12051_v30 = vld [vmem:[#allocation5 + $0x204c] sm:$0xf] }
 0x3b9   :  { %v5811_v59 = vpop.f32.mrf.mxu0  ;;  %v12092_v45 = vld [vmem:[#allocation5 + $0x225c] sm:$0xf0] }
 0x3ba   :  { %v5812_v48 = vadd.f32 %v5811_v59, %v5427_v58  ;;  %v10562_v59 = vld [vmem:[#allocation5 + $0x2040] sm:$0xf]  ;;  %6411 = vmatpush.bf16.msrb.mxu2 %v10587_v47  ;;  %v10804_v58 = vld [vmem:[#allocation5 + $0x2360] sm:$0xf0] }
 0x3be   :  { %v12272_v38 = vpop.eup %12271 }
 0x3bf   :  { %v5351_v13 = vadd.f32 1.0, %v12272_v38  ;;  %v10824_v38 = vld [vmem:[#allocation5 + $0x23a0] sm:$0xf0] }
 0x3c1   :  { %v5355_v50 = vmul.f32 %v5351_v13, %v5323_v49  ;;  %v5813_v35 = vpop.f32.mrf.mxu0  ;;  %v10827_v49 = vor.u32 %v12115_v14, %v10824_v38  ;;  %v12052_v13 = vld [vmem:[#allocation5 + $0x205c] sm:$0xf0]  ;;  %v10724_v14 = vld [vmem:[#allocation5 + $0x2260] sm:$0xf0]  ;;  %v10630_v38 = vld [vmem:[#allocation5 + $0x2108] sm:$0xf] }
 0x3c2   :  { %v10563_v35 = vor.u32 %v12052_v13, %v10562_v59  ;;  %v12068_v59 = vld [vmem:[#allocation5 + $0x2124] sm:$0xf0]  ;;  %v10632_v13 = vld [vmem:[#allocation5 + $0x2128] sm:$0xf0] }
 0x3c3   :  { %v5359_v34 = vpack.c.bf16 %v5355_v50, %v5355_v50  ;;  %v10802_v50 = vld [vmem:[#allocation5 + $0x2340] sm:$0xf] }
 0x3c4   :  { %6386 = vmatpush.bf16.msrb.mxu0 %v10563_v35  ;;  %v10727_v35 = vor.u32 %v12090_v52, %v10724_v14  ;;  %v10552_v52 = vld [vmem:[#allocation5 + $0x2028] sm:$0xf0] }
 0x3c5   :  { %5797 = vmatmul.bf16.vlgmr.msrb.gmra.mxu3 %v5359_v34 }
 0x3c6   :  { %6419 = vmatpush.bf16.msrb.mxu3 %v10847_v29  ;;  %v12071_v29 = vld [vmem:[#allocation5 + $0x214c] sm:$0xf] }
 0x3c7   :  { %v10655_v47 = vor.u32 %v12071_v29, %v10652_v57  ;;  %v10812_v29 = vld [vmem:[#allocation5 + $0x2368] sm:$0xf0] }
 0x3c8   :  { %v5772_v55 = vpop.f32.mrf.mxu1  ;;  %v10815_v57 = vor.u32 %v12111_v5, %v10812_v29  ;;  %v10638_v5 = vld [vmem:[#allocation5 + $0x2110] sm:$0xf] }
 0x3c9   :  { %v12686_v56 = vadd.f32 %v5772_v55, %v5760_v53  ;;  %v10564_v53 = vld [vmem:[#allocation5 + $0x2060] sm:$0xf0]  ;;  %v12069_v29 = vld [vmem:[#allocation5 + $0x212c] sm:$0xf0] }
 0x3ca   :  { %v12110_v55 = vld [vmem:[#allocation5 + $0x2344] sm:$0xf]  ;;  %6420 = vmatpush.bf16.msrb.mxu3 %v10827_v49  ;;  %v12066_v49 = vld [vmem:[#allocation5 + $0x210c] sm:$0xf] }
 0x3d0   :  { %v5774_v41 = vpop.f32.mrf.mxu1 }
 0x3d1   :  { %v10567_v41 = vor.u32 %v12050_v60, %v10564_v53  ;;  %v12087_v60 = vld [vmem:[#allocation5 + $0x221c] sm:$0xf0]  ;;  %v12085_v53 = vld [vmem:[#allocation5 + $0x2204] sm:$0xf] }
 0x3d3   :  { %6412 = vmatpush.bf16.msrb.mxu2 %v10567_v41  ;;  %v10635_v41 = vor.u32 %v12066_v49, %v10632_v13  ;;  %v10770_v13 = vld [vmem:[#allocation5 + $0x22c8] sm:$0xf] }
 0x3d5   :  { %5849 = vmatmul.bf16.vlgmr.msra.gmra.mxu3 %v5359_v34  ;;  %v12112_v34 = vld [vmem:[#allocation5 + $0x235c] sm:$0xf0] }
 0x3d6   :  { %v10803_v51 = vor.u32 %v12112_v34, %v10802_v50  ;;  %v10723_v50 = vor.u32 %v12092_v45, %v10722_v44  ;;  %v10702_v34 = vld [vmem:[#allocation5 + $0x2200] sm:$0xf]  ;;  %v12108_v44 = vld [vmem:[#allocation5 + $0x2324] sm:$0xf0]  ;;  %v12046_v45 = vld [vmem:[#allocation5 + $0x200c] sm:$0xf] }
 0x3d7   :  { %6413 = vmatpush.bf16.msrb.mxu2 %v10547_v10  ;;  %v10555_v14 = vor.u32 %v12046_v45, %v10552_v52  ;;  %v12064_v45 = vld [vmem:[#allocation5 + $0x20ec] sm:$0xf0] }
 0x3d8   :  { %v5824_v62 = vpop.f32.mrf.mxu1  ;;  %6395 = vmatpush.bf16.msrb.mxu1 %v10803_v51  ;;  %v10631_v51 = vor.u32 %v12068_v59, %v10630_v38  ;;  %v12106_v38 = vld [vmem:[#allocation5 + $0x230c] sm:$0xf] }
 0x3d9   :  { %v12688_v0 = vadd.f32 %v5824_v62, %v5812_v48  ;;  %v10542_v48 = vld [vmem:[#allocation5 + $0x2000] sm:$0xf]  ;;  %v10792_v59 = vld [vmem:[#allocation5 + $0x2328] sm:$0xf0] }
 0x3da   :  { %v12047_v62 = vld [vmem:[#allocation5 + $0x201c] sm:$0xf0]  ;;  %v10795_v49 = vor.u32 %v12106_v38, %v10792_v59  ;;  %v10874_v38 = vld [vmem:[#allocation5 + $0x20d4] sm:$0xf] }
 0x3db   :  { %v10543_v6 = vor.u32 %v12047_v62, %v10542_v48  ;;  %6458 = vmatpush.bf16.msra.mxu2 %v10695_v17  ;;  %v12063_v48 = vld [vmem:[#allocation5 + $0x20e4] sm:$0xf0]  ;;  %v12116_v17 = vld [vmem:[#allocation5 + $0x238c] sm:$0xf] }
 0x3dc   :  { %6396 = vmatpush.bf16.msrb.mxu1 %v10783_v9  ;;  %v10850_v62 = vld [vmem:[#allocation5 + $0x23c8] sm:$0xf]  ;;  %v10835_v19 = vor.u32 %v12116_v17, %v10832_v42 }
 0x3dd   :  { %6387 = vmatpush.bf16.msrb.mxu0 %v10543_v6  ;;  %v10703_v6 = vor.u32 %v12087_v60, %v10702_v34  ;;  %v12101_v34 = vld [vmem:[#allocation5 + $0x22cc] sm:$0xf] }
 0x3df   :  { %6459 = vmatpush.bf16.msra.mxu2 %v10675_v26  ;;  %v10572_v26 = vld [vmem:[#allocation5 + $0x2068] sm:$0xf0] }
 0x3e0   :  { %v5826_v7 = vpop.f32.mrf.mxu1  ;;  %6397 = vmatpush.bf16.msrb.mxu1 %v10763_v22  ;;  %v10570_v22 = vld [vmem:[#allocation5 + $0x2048] sm:$0xf]  ;;  %v10575_v54 = vor.u32 %v12051_v30, %v10572_v26  ;;  %v12130_v30 = vld [vmem:[#allocation5 + $0x2170] sm:$0xf0] }
 0x3e1   :  { %v10807_v7 = vor.u32 %v12110_v55, %v10804_v58  ;;  %6432 = vmatpush.bf16.msra.mxu0 %v10691_v28  ;;  %v10704_v55 = vld [vmem:[#allocation5 + $0x2220] sm:$0xf0]  ;;  %v10610_v58 = vld [vmem:[#allocation5 + $0x20c8] sm:$0xf]  ;;  %v10855_v28 = vor.u32 %v12121_v36, %v10852_v8  ;;  %v10732_v36 = vld [vmem:[#allocation5 + $0x2268] sm:$0xf0] }
 0x3e2   :  { %v10707_v46 = vor.u32 %v12085_v53, %v10704_v55  ;;  %v10611_v9 = vor.u32 %v12063_v48, %v10610_v58  ;;  %v10750_v53 = vld [vmem:[#allocation5 + $0x2288] sm:$0xf]  ;;  %v10752_v58 = vld [vmem:[#allocation5 + $0x22a8] sm:$0xf0]  ;;  %v10735_v8 = vor.u32 %v12091_v24, %v10732_v36  ;;  %v12054_v36 = vld [vmem:[#allocation5 + $0x206c] sm:$0xf0] }
 0x3e3   :  { %6421 = vmatpush.bf16.msrb.mxu3 %v10807_v7  ;;  %6460 = vmatpush.bf16.msra.mxu2 %v10655_v47  ;;  %v12123_v7 = vld [vmem:[#allocation5 + $0x23e4] sm:$0xf0] }
 0x3e4   :  { %6398 = vmatpush.bf16.msrb.mxu1 %v10743_v32  ;;  %v10851_v10 = vor.u32 %v12123_v7, %v10850_v62  ;;  %v12048_v32 = vld [vmem:[#allocation5 + $0x2024] sm:$0xf0] }
 0x3e5   :  { %6433 = vmatpush.bf16.msra.mxu0 %v10671_v40  ;;  %v10810_v40 = vld [vmem:[#allocation5 + $0x2348] sm:$0xf] }
 0x3e6   :  { %v10811_v1 = vor.u32 %v12113_v61, %v10810_v40  ;;  %v12098_v55 = vld [vmem:[#allocation5 + $0x22a4] sm:$0xf0]  ;;  %v10658_v40 = vld [vmem:[#allocation5 + $0x2150] sm:$0xf]  ;;  %v10882_v61 = vld [vmem:[#allocation5 + $0x2154] sm:$0xf] }
 0x3e7   :  { %6422 = vmatpush.bf16.msrb.mxu3 %v10787_v39  ;;  %6461 = vmatpush.bf16.msra.mxu2 %v10635_v41  ;;  %v10830_v39 = vld [vmem:[#allocation5 + $0x2388] sm:$0xf]  ;;  %v12096_v41 = vld [vmem:[#allocation5 + $0x228c] sm:$0xf]  ;;  %v10751_v48 = vor.u32 %v12098_v55, %v10750_v53  ;;  %v12059_v53 = vld [vmem:[#allocation5 + $0x20ac] sm:$0xf0] }
 0x3e8   :  { %6399 = vmatpush.bf16.msrb.mxu1 %v10723_v50  ;;  %v10831_v18 = vor.u32 %v12118_v20, %v10830_v39  ;;  %v12103_v50 = vld [vmem:[#allocation5 + $0x22e4] sm:$0xf0]  ;;  %v10755_v62 = vor.u32 %v12096_v41, %v10752_v58  ;;  %v10698_v39 = vld [vmem:[#allocation5 + $0x21d0] sm:$0xf]  ;;  %v10870_v58 = vld [vmem:[#allocation5 + $0x2094] sm:$0xf] }
 0x3e9   :  { %6434 = vmatpush.bf16.msra.mxu0 %v10651_v43  ;;  %v10730_v7 = vld [vmem:[#allocation5 + $0x2248] sm:$0xf]  ;;  %v12084_v20 = vld [vmem:[#allocation5 + $0x21ec] sm:$0xf0] }
 0x3ea   :  { %v10838_v55 = vld [vmem:[#allocation5 + $0x2390] sm:$0xf] }
 0x3eb   :  { %6423 = vmatpush.bf16.msrb.mxu3 %v10767_v3  ;;  %6462 = vmatpush.bf16.msra.mxu2 %v10615_v37  ;;  %v12053_v3 = vld [vmem:[#allocation5 + $0x2064] sm:$0xf0]  ;;  %v12119_v41 = vld [vmem:[#allocation5 + $0x23ac] sm:$0xf0] }
 0x3ec   :  { %6400 = vmatpush.bf16.msrb.mxu1 %v10703_v6  ;;  %v10571_v25 = vor.u32 %v12053_v3, %v10570_v22  ;;  %v10731_v6 = vor.u32 %v12093_v21, %v10730_v7  ;;  %v10886_v22 = vld [vmem:[#allocation5 + $0x2194] sm:$0xf]  ;;  %v10839_v24 = vor.u32 %v12119_v41, %v10838_v55  ;;  %v12089_v55 = vld [vmem:[#allocation5 + $0x222c] sm:$0xf0] }
 0x3ed   :  { %6435 = vmatpush.bf16.msra.mxu0 %v10631_v51  ;;  %v10772_v51 = vld [vmem:[#allocation5 + $0x22e8] sm:$0xf0]  ;;  %v12131_v3 = vld [vmem:[#allocation5 + $0x21b0] sm:$0xf0] }
 0x3ee   :  { %v10775_v60 = vor.u32 %v12101_v34, %v10772_v51  ;;  %v12139_v7 = vld [vmem:[#allocation5 + $0x23b0] sm:$0xf0] }
 0x3ef   :  { %6424 = vmatpush.bf16.msrb.mxu3 %v10747_v33  ;;  %6463 = vmatpush.bf16.msra.mxu2 %v10595_v63  ;;  %v10790_v33 = vld [vmem:[#allocation5 + $0x2308] sm:$0xf]  ;;  %v10678_v63 = vld [vmem:[#allocation5 + $0x2190] sm:$0xf]  ;;  %v10894_v41 = vld [vmem:[#allocation5 + $0x2214] sm:$0xf] }
 0x3f0   :  { %6445 = vmatpush.bf16.msra.mxu1 %v10851_v10  ;;  %v10791_v47 = vor.u32 %v12108_v44, %v10790_v33  ;;  %v12086_v10 = vld [vmem:[#allocation5 + $0x220c] sm:$0xf]  ;;  %v10618_v44 = vld [vmem:[#allocation5 + $0x20d0] sm:$0xf] }
 0x3f1   :  { %6436 = vmatpush.bf16.msra.mxu0 %v10611_v9  ;;  %v12088_v9 = vld [vmem:[#allocation5 + $0x2224] sm:$0xf0]  ;;  %v10715_v27 = vor.u32 %v12086_v10, %v10712_v11  ;;  %v10818_v10 = vld [vmem:[#allocation5 + $0x2350] sm:$0xf]  ;;  %v10866_v11 = vld [vmem:[#allocation5 + $0x2054] sm:$0xf] }
 0x3f3   :  { %6425 = vmatpush.bf16.msrb.mxu3 %v10727_v35  ;;  %6464 = vmatpush.bf16.msra.mxu2 %v10575_v54  ;;  %v10771_v35 = vor.u32 %v12103_v50, %v10770_v13  ;;  %v10883_v54 = vor.u32 %v12130_v30, %v10882_v61  ;;  %v10922_v13 = vld [vmem:[#allocation5 + $0x23d4] sm:$0xf]  ;;  %v10778_v30 = vld [vmem:[#allocation5 + $0x22d0] sm:$0xf] }
 0x3f4   :  { %6446 = vmatpush.bf16.msra.mxu1 %v10831_v18  ;;  %v10891_v18 = vor.u32 %v12132_v2, %v10890_v12  ;;  %v12140_v50 = vld [vmem:[#allocation5 + $0x23f0] sm:$0xf0]  ;;  %v10558_v2 = vld [vmem:[#allocation5 + $0x2010] sm:$0xf] }
 0x3f5   :  { %6437 = vmatpush.bf16.msra.mxu0 %v10591_v16  ;;  %v10699_v16 = vor.u32 %v12084_v20, %v10698_v39  ;;  %v10914_v39 = vld [vmem:[#allocation5 + $0x2354] sm:$0xf] }
 0x3f7   :  { %6426 = vmatpush.bf16.msrb.mxu3 %v10707_v46  ;;  %6465 = vmatpush.bf16.msra.mxu2 %v10555_v14  ;;  %v10710_v46 = vld [vmem:[#allocation5 + $0x2208] sm:$0xf]  ;;  %v12124_v14 = vld [vmem:[#allocation5 + $0x23ec] sm:$0xf0] }
 0x3f8   :  { %6447 = vmatpush.bf16.msra.mxu1 %v10811_v1  ;;  %v10711_v37 = vor.u32 %v12088_v9, %v10710_v46 }
 0x3f9   :  { %6438 = vmatpush.bf16.msra.mxu0 %v10571_v25  ;;  %v12074_v25 = vld [vmem:[#allocation5 + $0x216c] sm:$0xf0] }
 0x3fa   :  { %v10659_v1 = vor.u32 %v12074_v25, %v10658_v40 }
 0x3fb   :  { %6471 = vmatpush.bf16.msra.mxu3 %v10855_v28 }
 0x3fc   :  { %6448 = vmatpush.bf16.msra.mxu1 %v10791_v47  ;;  %v10858_v47 = vld [vmem:[#allocation5 + $0x23d0] sm:$0xf] }
 0x3fd   :  { %v10859_v51 = vor.u32 %v12124_v14, %v10858_v47  ;;  %v12154_v47 = vld [vmem:[#allocation5 + $0x19ac] sm:$0xf0] }
 0x3ff   :  { %6472 = vmatpush.bf16.msra.mxu3 %v10835_v19  ;;  %v12079_v19 = vld [vmem:[#allocation5 + $0x21ac] sm:$0xf0] }
 0x400   :  { %v12690_v31 = vpop.f32.mrf.mxu2  ;;  %6449 = vmatpush.bf16.msra.mxu1 %v10771_v35  ;;  %v10619_v35 = vor.u32 %v12064_v45, %v10618_v44  ;;  %v12135_v45 = vld [vmem:[#allocation5 + $0x22b0] sm:$0xf0] }
 0x401   :  { %v5786_v28 = vadd.f32 %v12690_v31, %v12686_v56  ;;  %v10679_v56 = vor.u32 %v12079_v19, %v10678_v63  ;;  %v10887_v31 = vor.u32 %v12131_v3, %v10886_v22  ;;  %v12109_v63 = vld [vmem:[#allocation5 + $0x232c] sm:$0xf0]  ;;  %v10862_v19 = vld [vmem:[#allocation5 + $0x2014] sm:$0xf] }
 0x402   :  { %v12125_v22 = vld [vmem:[#allocation5 + $0x2030] sm:$0xf0] }
 0x403   :  { %6473 = vmatpush.bf16.msra.mxu3 %v10815_v57  ;;  %v10878_v57 = vld [vmem:[#allocation5 + $0x2114] sm:$0xf]  ;;  %v10863_v25 = vor.u32 %v12125_v22, %v10862_v19  ;;  %v11030_v19 = vld [vmem:[#allocation5 + $0x1b50] sm:$0xf] }
 0x404   :  { %6450 = vmatpush.bf16.msra.mxu1 %v10751_v48  ;;  %v12127_v48 = vld [vmem:[#allocation5 + $0x20b0] sm:$0xf0]  ;;  %v12168_v22 = vld [vmem:[#allocation5 + $0x1b6c] sm:$0xf0] }
 0x405   :  { %v10871_v46 = vor.u32 %v12127_v48, %v10870_v58  ;;  %v10910_v3 = vld [vmem:[#allocation5 + $0x2314] sm:$0xf]  ;;  %v10958_v48 = vld [vmem:[#allocation5 + $0x1910] sm:$0xf] }
 0x406   :  { %v12133_v58 = vld [vmem:[#allocation5 + $0x2230] sm:$0xf0] }
 0x407   :  { %6474 = vmatpush.bf16.msra.mxu3 %v10795_v49  ;;  %v12128_v49 = vld [vmem:[#allocation5 + $0x20f0] sm:$0xf0] }
 0x408   :  { %v5787_v4 = vpop.f32.mrf.mxu2  ;;  %6451 = vmatpush.bf16.msra.mxu1 %v10731_v6  ;;  %v10578_v6 = vld [vmem:[#allocation5 + $0x2050] sm:$0xf] }
 0x409   :  { %v10550_v4 = vld [vmem:[#allocation5 + $0x2008] sm:$0xf]  ;;  %v10579_v20 = vor.u32 %v12054_v36, %v10578_v6  ;;  %v10950_v6 = vld [vmem:[#allocation5 + $0x18d0] sm:$0xf] }
 0x40a   :  { %v10551_v43 = vor.u32 %v12048_v32, %v10550_v4  ;;  %v12129_v4 = vld [vmem:[#allocation5 + $0x2130] sm:$0xf0]  ;;  %v10639_v32 = vor.u32 %v12069_v29, %v10638_v5  ;;  %v10982_v5 = vld [vmem:[#allocation5 + $0x19d0] sm:$0xf] }
 0x40b   :  { %6475 = vmatpush.bf16.msra.mxu3 %v10775_v60  ;;  %v10879_v33 = vor.u32 %v12129_v4, %v10878_v57  ;;  %v10598_v60 = vld [vmem:[#allocation5 + $0x2090] sm:$0xf] }
 0x40c   :  { %6439 = vmatpush.bf16.msra.mxu0 %v10551_v43  ;;  %6452 = vmatpush.bf16.msra.mxu1 %v10711_v37  ;;  %v10599_v21 = vor.u32 %v12059_v53, %v10598_v60  ;;  %v12114_v37 = vld [vmem:[#allocation5 + $0x236c] sm:$0xf0] }
 0x40d   :  { %v10819_v12 = vor.u32 %v12114_v37, %v10818_v10  ;;  %v12156_v29 = vld [vmem:[#allocation5 + $0x19ec] sm:$0xf0] }
 0x40e   :  { %v10983_v44 = vor.u32 %v12156_v29, %v10982_v5  ;;  %v12152_v60 = vld [vmem:[#allocation5 + $0x196c] sm:$0xf0] }
 0x40f   :  { %6476 = vmatpush.bf16.msra.mxu3 %v10755_v62  ;;  %v10918_v62 = vld [vmem:[#allocation5 + $0x2394] sm:$0xf]  ;;  %v12148_v36 = vld [vmem:[#allocation5 + $0x18ec] sm:$0xf0] }
 0x410   :  { %v12692_v15 = vpop.f32.mrf.mxu2  ;;  %v10919_v9 = vor.u32 %v12139_v7, %v10918_v62  ;;  %v12150_v62 = vld [vmem:[#allocation5 + $0x192c] sm:$0xf0] }
 0x411   :  { %v5838_v43 = vadd.f32 %v12692_v15, %v12688_v0  ;;  %v10875_v0 = vor.u32 %v12128_v49, %v10874_v38  ;;  %v10923_v15 = vor.u32 %v12140_v50, %v10922_v13  ;;  %v12094_v49 = vld [vmem:[#allocation5 + $0x226c] sm:$0xf0]  ;;  %v10898_v13 = vld [vmem:[#allocation5 + $0x2254] sm:$0xf] }
 0x412   :  { %v10942_v10 = vld [vmem:[#allocation5 + $0x1890] sm:$0xf] }
 0x413   :  { %6477 = vmatpush.bf16.msra.mxu3 %v10735_v8  ;;  %v11158_v5 = vld [vmem:[#allocation5 + $0x1f50] sm:$0xf] }
 0x414   :  { %v12200_v29 = vld [vmem:[#allocation5 + $0x1f6c] sm:$0xf0] }
 0x417   :  { %6478 = vmatpush.bf16.msra.mxu3 %v10715_v27  ;;  %v12126_v27 = vld [vmem:[#allocation5 + $0x2070] sm:$0xf0] }
 0x418   :  { %v5839_v23 = vpop.f32.mrf.mxu2 }
 0x448   :  { %v5798_v17 = vpop.f32.mrf.mxu3 }
 0x449   :  { %v5799_v42 = vadd.f32 %v5798_v17, %v5786_v28  ;;  %v12138_v28 = vld [vmem:[#allocation5 + $0x2370] sm:$0xf0]  ;;  %v12049_v17 = vld [vmem:[#allocation5 + $0x202c] sm:$0xf0] }
 0x44b   :  { %v12696_v23 = vpack.c.bf16 %v5799_v42, %v5799_v42  ;;  %7575 = vst [vmem:[#allocation8] sm:$0xff] %v5799_v42  ;;  %v10867_v42 = vor.u32 %v12126_v27, %v10866_v11  ;;  %v12146_v11 = vld [vmem:[#allocation5 + $0x18ac] sm:$0xf0] }
 0x44c   :  { %v10943_v27 = vor.u32 %v12146_v11, %v10942_v10  ;;  %v12194_v10 = vld [vmem:[#allocation5 + $0x1eac] sm:$0xf0] }
 0x44d   :  { %6388 = vmatmul.bf16.vlgmr.msrb.gmra.mxu0 %v12696_v23  ;;  %6414 = vmatmul.bf16.vlgmr.msrb.gmra.mxu2 %v12696_v23 }
 0x44e   :  { %6484 = vmatpush.bf16.msrb.mxu0 %v10699_v16  ;;  %6687 = vmatpush.bf16.msrb.mxu2 %v10891_v18  ;;  %v10915_v16 = vor.u32 %v12138_v28, %v10914_v39  ;;  %v10798_v18 = vld [vmem:[#allocation5 + $0x2310] sm:$0xf] }
 0x44f   :  { %v10799_v40 = vor.u32 %v12109_v63, %v10798_v18  ;;  %v11174_v39 = vld [vmem:[#allocation5 + $0x1fd0] sm:$0xf] }
 0x450   :  { %v5800_v26 = vpop.f32.mrf.mxu3  ;;  %v12204_v28 = vld [vmem:[#allocation5 + $0x1fec] sm:$0xf0] }
 0x451   :  { %v12104_v26 = vld [vmem:[#allocation5 + $0x22ec] sm:$0xf0] }
 0x452   :  { %6485 = vmatpush.bf16.msrb.mxu0 %v10679_v56  ;;  %6688 = vmatpush.bf16.msrb.mxu2 %v10887_v31  ;;  %v12137_v56 = vld [vmem:[#allocation5 + $0x2330] sm:$0xf0]  ;;  %v10559_v31 = vor.u32 %v12049_v17, %v10558_v2  ;;  %v10779_v57 = vor.u32 %v12104_v26, %v10778_v30  ;;  %v12170_v2 = vld [vmem:[#allocation5 + $0x1bac] sm:$0xf0] }
 0x453   :  { %v10911_v61 = vor.u32 %v12137_v56, %v10910_v3  ;;  %v12202_v63 = vld [vmem:[#allocation5 + $0x1fac] sm:$0xf0]  ;;  %v11031_v56 = vor.u32 %v12168_v22, %v11030_v19  ;;  %v12155_v26 = vld [vmem:[#allocation5 + $0x19d4] sm:$0xf] }
 0x454   :  { %v12188_v30 = vld [vmem:[#allocation5 + $0x1dec] sm:$0xf0] }
 0x455   :  { %v10990_v19 = vld [vmem:[#allocation5 + $0x1a10] sm:$0xf] }
 0x456   :  { %6486 = vmatpush.bf16.msrb.mxu0 %v10659_v1  ;;  %6689 = vmatpush.bf16.msrb.mxu2 %v10883_v54  ;;  %v10906_v1 = vld [vmem:[#allocation5 + $0x22d4] sm:$0xf]  ;;  %v12158_v22 = vld [vmem:[#allocation5 + $0x1a2c] sm:$0xf0] }
 0x457   :  { %v12136_v54 = vld [vmem:[#allocation5 + $0x22f0] sm:$0xf0] }
 0x458   :  { %v5850_v52 = vpop.f32.mrf.mxu3  ;;  %v10907_v4 = vor.u32 %v12136_v54, %v10906_v1  ;;  %v10984_v54 = vld [vmem:[#allocation5 + $0x19f0] sm:$0xf0] }
 0x459   :  { %v5851_v59 = vadd.f32 %v5850_v52, %v5838_v43  ;;  %v10902_v43 = vld [vmem:[#allocation5 + $0x2294] sm:$0xf]  ;;  %v10974_v52 = vld [vmem:[#allocation5 + $0x1990] sm:$0xf] }
 0x45a   :  { %6487 = vmatpush.bf16.msrb.mxu0 %v10639_v32  ;;  %6690 = vmatpush.bf16.msrb.mxu2 %v10879_v33  ;;  %v10758_v32 = vld [vmem:[#allocation5 + $0x2290] sm:$0xf]  ;;  %v10903_v38 = vor.u32 %v12135_v45, %v10902_v43  ;;  %v10975_v50 = vor.u32 %v12154_v47, %v10974_v52  ;;  %v12153_v47 = vld [vmem:[#allocation5 + $0x1994] sm:$0xf] }
 0x45b   :  { %v12702_v34 = vpack.c.bf16 %v5851_v59, %v5851_v59  ;;  %7576 = vst [vmem:[#allocation8 + $0x8] sm:$0xff] %v5851_v59  ;;  %v12099_v33 = vld [vmem:[#allocation5 + $0x22ac] sm:$0xf0] }
 0x45c   :  { %v10759_v14 = vor.u32 %v12099_v33, %v10758_v32  ;;  %v10738_v59 = vld [vmem:[#allocation5 + $0x2250] sm:$0xf] }
 0x45d   :  { %6401 = vmatmul.bf16.vlgmr.msrb.gmra.mxu1 %v12702_v34  ;;  %6427 = vmatmul.bf16.vlgmr.msrb.gmra.mxu3 %v12702_v34  ;;  %v10739_v53 = vor.u32 %v12094_v49, %v10738_v59  ;;  %v11022_v32 = vld [vmem:[#allocation5 + $0x1b10] sm:$0xf] }
 0x45e   :  { %6440 = vmatmul.bf16.vlgmr.msra.gmra.mxu0 %v12696_v23  ;;  %6466 = vmatmul.bf16.vlgmr.msra.gmra.mxu2 %v12696_v23  ;;  %v12166_v33 = vld [vmem:[#allocation5 + $0x1b2c] sm:$0xf0] }
 0x45f   :  { %6488 = vmatpush.bf16.msrb.mxu0 %v10619_v35  ;;  %6497 = vmatpush.bf16.msrb.mxu1 %v10859_v51  ;;  %v12134_v35 = vld [vmem:[#allocation5 + $0x2270] sm:$0xf0]  ;;  %v10966_v51 = vld [vmem:[#allocation5 + $0x1950] sm:$0xf]  ;;  %v11023_v43 = vor.u32 %v12166_v33, %v11022_v32 }
 0x460   :  { %6691 = vmatpush.bf16.msrb.mxu2 %v10875_v0  ;;  %6700 = vmatpush.bf16.msrb.mxu3 %v10923_v15  ;;  %v5852_v8 = vpop.f32.mrf.mxu3  ;;  %v10899_v0 = vor.u32 %v12134_v35, %v10898_v13  ;;  %v10718_v15 = vld [vmem:[#allocation5 + $0x2210] sm:$0xf]  ;;  %v11176_v32 = vld [vmem:[#allocation5 + $0x1ff0] sm:$0xf0] }
 0x461   :  { %v10719_v7 = vor.u32 %v12089_v55, %v10718_v15  ;;  %v10951_v8 = vor.u32 %v12148_v36, %v10950_v6  ;;  %v12186_v45 = vld [vmem:[#allocation5 + $0x1dac] sm:$0xf0]  ;;  %v10968_v55 = vld [vmem:[#allocation5 + $0x1970] sm:$0xf0] }
 0x462   :  { %v12198_v49 = vld [vmem:[#allocation5 + $0x1f2c] sm:$0xf0]  ;;  %v12149_v36 = vld [vmem:[#allocation5 + $0x1914] sm:$0xf] }
 0x463   :  { %6489 = vmatpush.bf16.msrb.mxu0 %v10599_v21  ;;  %6498 = vmatpush.bf16.msrb.mxu1 %v10839_v24  ;;  %v10895_v21 = vor.u32 %v12133_v58, %v10894_v41  ;;  %v10959_v24 = vor.u32 %v12150_v62, %v10958_v48  ;;  %v11014_v13 = vld [vmem:[#allocation5 + $0x1ad0] sm:$0xf] }
 0x464   :  { %6692 = vmatpush.bf16.msrb.mxu2 %v10871_v46  ;;  %6701 = vmatpush.bf16.msrb.mxu3 %v10919_v9  ;;  %v11046_v46 = vld [vmem:[#allocation5 + $0x1bd0] sm:$0xf] }
 0x465   :  { %v12172_v9 = vld [vmem:[#allocation5 + $0x1bec] sm:$0xf0] }
 0x466   :  { %v11047_v37 = vor.u32 %v12172_v9, %v11046_v46  ;;  %v11142_v41 = vld [vmem:[#allocation5 + $0x1ed0] sm:$0xf]  ;;  %v10960_v46 = vld [vmem:[#allocation5 + $0x1930] sm:$0xf0] }
 0x467   :  { %6490 = vmatpush.bf16.msrb.mxu0 %v10579_v20  ;;  %6499 = vmatpush.bf16.msrb.mxu1 %v10819_v12  ;;  %v11175_v20 = vor.u32 %v12204_v28, %v11174_v39  ;;  %v11038_v12 = vld [vmem:[#allocation5 + $0x1b90] sm:$0xf] }
 0x468   :  { %6693 = vmatpush.bf16.msrb.mxu2 %v10867_v42  ;;  %6702 = vmatpush.bf16.msrb.mxu3 %v10915_v16  ;;  %v11039_v17 = vor.u32 %v12170_v2, %v11038_v12  ;;  %v10934_v42 = vld [vmem:[#allocation5 + $0x1850] sm:$0xf]  ;;  %v12147_v2 = vld [vmem:[#allocation5 + $0x18d4] sm:$0xf] }
 0x469   :  { %v11166_v16 = vld [vmem:[#allocation5 + $0x1f90] sm:$0xf] }
 0x46a   :  { %v11167_v3 = vor.u32 %v12202_v63, %v11166_v16  ;;  %v11006_v62 = vld [vmem:[#allocation5 + $0x1a90] sm:$0xf] }
 0x46b   :  { %6491 = vmatpush.bf16.msrb.mxu0 %v10559_v31  ;;  %6500 = vmatpush.bf16.msrb.mxu1 %v10799_v40  ;;  %v10926_v31 = vld [vmem:[#allocation5 + $0x1810] sm:$0xf] }
 0x46c   :  { %6694 = vmatpush.bf16.msrb.mxu2 %v10863_v25  ;;  %6703 = vmatpush.bf16.msrb.mxu3 %v10911_v61  ;;  %v12142_v40 = vld [vmem:[#allocation5 + $0x182c] sm:$0xf0] }
 0x46d   :  { %6453 = vmatmul.bf16.vlgmr.msra.gmra.mxu1 %v12702_v34  ;;  %6479 = vmatmul.bf16.vlgmr.msra.gmra.mxu3 %v12702_v34  ;;  %v10927_v25 = vor.u32 %v12142_v40, %v10926_v31  ;;  %v11110_v61 = vld [vmem:[#allocation5 + $0x1dd0] sm:$0xf]  ;;  %v12171_v31 = vld [vmem:[#allocation5 + $0x1bd4] sm:$0xf] }
 0x46e   :  { %6492 = vmatmul.bf16.vlgmr.msrb.gmra.mxu0 %v12696_v23  ;;  %v11111_v1 = vor.u32 %v12188_v30, %v11110_v61  ;;  %v12182_v6 = vld [vmem:[#allocation5 + $0x1d2c] sm:$0xf0]  ;;  %v11048_v40 = vld [vmem:[#allocation5 + $0x1bf0] sm:$0xf0] }
 0x46f   :  { %6695 = vmatmul.bf16.vlgmr.msrb.gmra.mxu2 %v12696_v23  ;;  %6501 = vmatpush.bf16.msrb.mxu1 %v10779_v57  ;;  %v10967_v23 = vor.u32 %v12152_v60, %v10966_v51  ;;  %v10987_v57 = vor.u32 %v12155_v26, %v10984_v54  ;;  %v11094_v60 = vld [vmem:[#allocation5 + $0x1d50] sm:$0xf]  ;;  %v10944_v54 = vld [vmem:[#allocation5 + $0x18b0] sm:$0xf0] }
 0x470   :  { %6704 = vmatpush.bf16.msrb.mxu3 %v10907_v4  ;;  %7117 = vmatpush.bf16.msra.mxu0 %v10983_v44  ;;  %v11159_v4 = vor.u32 %v12200_v29, %v11158_v5  ;;  %v11102_v44 = vld [vmem:[#allocation5 + $0x1d90] sm:$0xf] }
 0x471   :  { %7143 = vmatpush.bf16.msra.mxu2 %v11111_v1  ;;  %v11103_v52 = vor.u32 %v12186_v45, %v11102_v44  ;;  %v11134_v9 = vld [vmem:[#allocation5 + $0x1e90] sm:$0xf]  ;;  %v12145_v1 = vld [vmem:[#allocation5 + $0x1894] sm:$0xf] }
 0x472   :  { %v11135_v11 = vor.u32 %v12194_v10, %v11134_v9  ;;  %v12160_v39 = vld [vmem:[#allocation5 + $0x1a6c] sm:$0xf0]  ;;  %v10947_v29 = vor.u32 %v12145_v1, %v10944_v54  ;;  %v12169_v44 = vld [vmem:[#allocation5 + $0x1b94] sm:$0xf] }
 0x473   :  { %6502 = vmatpush.bf16.msrb.mxu1 %v10759_v14  ;;  %v10976_v14 = vld [vmem:[#allocation5 + $0x19b0] sm:$0xf0]  ;;  %v12180_v12 = vld [vmem:[#allocation5 + $0x1cec] sm:$0xf0] }
 0x474   :  { %6705 = vmatpush.bf16.msrb.mxu3 %v10903_v38  ;;  %7118 = vmatpush.bf16.msra.mxu0 %v10975_v50  ;;  %v11150_v38 = vld [vmem:[#allocation5 + $0x1f10] sm:$0xf]  ;;  %v10979_v59 = vor.u32 %v12153_v47, %v10976_v14  ;;  %v11040_v45 = vld [vmem:[#allocation5 + $0x1bb0] sm:$0xf0] }
 0x475   :  { %v12164_v50 = vld [vmem:[#allocation5 + $0x1aec] sm:$0xf0]  ;;  %7144 = vmatpush.bf16.msra.mxu2 %v11103_v52  ;;  %v11151_v35 = vor.u32 %v12198_v49, %v11150_v38  ;;  %v11043_v52 = vor.u32 %v12169_v44, %v11040_v45  ;;  %v12143_v38 = vld [vmem:[#allocation5 + $0x1854] sm:$0xf] }
 0x476   :  { %v11015_v51 = vor.u32 %v12164_v50, %v11014_v13  ;;  %v12192_v16 = vld [vmem:[#allocation5 + $0x1e6c] sm:$0xf0]  ;;  %v10936_v13 = vld [vmem:[#allocation5 + $0x1870] sm:$0xf0] }
 0x477   :  { %6503 = vmatpush.bf16.msrb.mxu1 %v10739_v53  ;;  %v12184_v53 = vld [vmem:[#allocation5 + $0x1d6c] sm:$0xf0]  ;;  %v10939_v50 = vor.u32 %v12143_v38, %v10936_v13  ;;  %v11160_v9 = vld [vmem:[#allocation5 + $0x1f70] sm:$0xf0] }
 0x478   :  { %6706 = vmatpush.bf16.msrb.mxu3 %v10899_v0  ;;  %7119 = vmatpush.bf16.msra.mxu0 %v10967_v23  ;;  %v12151_v0 = vld [vmem:[#allocation5 + $0x1954] sm:$0xf]  ;;  %v11095_v15 = vor.u32 %v12184_v53, %v11094_v60  ;;  %v12196_v23 = vld [vmem:[#allocation5 + $0x1eec] sm:$0xf0] }
 0x479   :  { %v10971_v58 = vor.u32 %v12151_v0, %v10968_v55  ;;  %v11143_v48 = vor.u32 %v12196_v23, %v11142_v41  ;;  %v11070_v61 = vld [vmem:[#allocation5 + $0x1c90] sm:$0xf]  ;;  %v11032_v55 = vld [vmem:[#allocation5 + $0x1b70] sm:$0xf0] }
 0x47a   :  { %7145 = vmatpush.bf16.msra.mxu2 %v11095_v15  ;;  %v12178_v30 = vld [vmem:[#allocation5 + $0x1cac] sm:$0xf0]  ;;  %v12167_v15 = vld [vmem:[#allocation5 + $0x1b54] sm:$0xf] }
 0x47b   :  { %6504 = vmatpush.bf16.msrb.mxu1 %v10719_v7  ;;  %v12162_v7 = vld [vmem:[#allocation5 + $0x1aac] sm:$0xf0]  ;;  %v11071_v26 = vor.u32 %v12178_v30, %v11070_v61  ;;  %v11035_v41 = vor.u32 %v12167_v15, %v11032_v55  ;;  %v12165_v10 = vld [vmem:[#allocation5 + $0x1b14] sm:$0xf] }
 0x47c   :  { %6707 = vmatpush.bf16.msrb.mxu3 %v10895_v21  ;;  %7120 = vmatpush.bf16.msra.mxu0 %v10959_v24  ;;  %v11007_v21 = vor.u32 %v12162_v7, %v11006_v62  ;;  %v11086_v24 = vld [vmem:[#allocation5 + $0x1d10] sm:$0xf]  ;;  %v10928_v7 = vld [vmem:[#allocation5 + $0x1830] sm:$0xf0] }
 0x47d   :  { %v11118_v5 = vld [vmem:[#allocation5 + $0x1e10] sm:$0xf]  ;;  %v12195_v30 = vld [vmem:[#allocation5 + $0x1ed4] sm:$0xf] }
 0x47e   :  { %6505 = vmatmul.bf16.vlgmr.msrb.gmra.mxu1 %v12702_v34  ;;  %v11062_v47 = vld [vmem:[#allocation5 + $0x1c50] sm:$0xf]  ;;  %v12161_v1 = vld [vmem:[#allocation5 + $0x1a94] sm:$0xf] }
 0x47f   :  { %6708 = vmatmul.bf16.vlgmr.msrb.gmra.mxu3 %v12702_v34  ;;  %7130 = vmatpush.bf16.msra.mxu1 %v11047_v37  ;;  %v12144_v34 = vld [vmem:[#allocation5 + $0x186c] sm:$0xf0]  ;;  %v10963_v37 = vor.u32 %v12149_v36, %v10960_v46  ;;  %v12199_v46 = vld [vmem:[#allocation5 + $0x1f54] sm:$0xf] }
 0x480   :  { %7121 = vmatpush.bf16.msra.mxu0 %v10951_v8  ;;  %7156 = vmatpush.bf16.msra.mxu3 %v11175_v20  ;;  %v10935_v18 = vor.u32 %v12144_v34, %v10934_v42  ;;  %v11087_v8 = vor.u32 %v12182_v6, %v11086_v24  ;;  %v11078_v20 = vld [vmem:[#allocation5 + $0x1cd0] sm:$0xf]  ;;  %v10952_v42 = vld [vmem:[#allocation5 + $0x18f0] sm:$0xf0] }
 0x481   :  { %v11126_v34 = vld [vmem:[#allocation5 + $0x1e50] sm:$0xf]  ;;  %v11112_v24 = vld [vmem:[#allocation5 + $0x1df0] sm:$0xf0] }
 0x482   :  { %7146 = vmatpush.bf16.msra.mxu2 %v11087_v8  ;;  %v11127_v63 = vor.u32 %v12192_v16, %v11126_v34  ;;  %v12176_v14 = vld [vmem:[#allocation5 + $0x1c6c] sm:$0xf0]  ;;  %v11136_v38 = vld [vmem:[#allocation5 + $0x1eb0] sm:$0xf0] }
 0x483   :  { %7131 = vmatpush.bf16.msra.mxu1 %v11039_v17  ;;  %v11079_v17 = vor.u32 %v12180_v12, %v11078_v20  ;;  %v11063_v49 = vor.u32 %v12176_v14, %v11062_v47  ;;  %v12718_v60 = vld [vmem:[#allocation7 + $0x10] sm:$0x1f] }
 0x484   :  { %7122 = vmatpush.bf16.msra.mxu0 %v10943_v27  ;;  %7157 = vmatpush.bf16.msra.mxu3 %v11167_v3  ;;  %v10998_v27 = vld [vmem:[#allocation5 + $0x1a50] sm:$0xf]  ;;  %v5954_v6 = vperm.slane %v12718_v60, 0  ;;  %v11104_v20 = vld [vmem:[#allocation5 + $0x1db0] sm:$0xf0] }
 0x485   :  { %v10999_v28 = vor.u32 %v12160_v39, %v10998_v27  ;;  %v11054_v23 = vld [vmem:[#allocation5 + $0x1c10] sm:$0xf]  ;;  %v12193_v14 = vld [vmem:[#allocation5 + $0x1e94] sm:$0xf] }
 0x486   :  { %7147 = vmatpush.bf16.msra.mxu2 %v11079_v17  ;;  %v12197_v17 = vld [vmem:[#allocation5 + $0x1f14] sm:$0xf] }
 0x487   :  { %7132 = vmatpush.bf16.msra.mxu1 %v11031_v56  ;;  %v10991_v56 = vor.u32 %v12158_v22, %v10990_v19  ;;  %v5955_v19 = vperm.slane %v12718_v60, 1  ;;  %v12159_v13 = vld [vmem:[#allocation5 + $0x1a54] sm:$0xf] }
 0x488   :  { %7123 = vmatpush.bf16.msra.mxu0 %v10935_v18  ;;  %7158 = vmatpush.bf16.msra.mxu3 %v11159_v4  ;;  %v10955_v18 = vor.u32 %v12147_v2, %v10952_v42  ;;  %v12203_v4 = vld [vmem:[#allocation5 + $0x1fd4] sm:$0xf] }
 0x489   :  { %v11152_v42 = vld [vmem:[#allocation5 + $0x1f30] sm:$0xf0] }
 0x48a   :  { %7148 = vmatpush.bf16.msra.mxu2 %v11071_v26  ;;  %v11155_v16 = vor.u32 %v12197_v17, %v11152_v42  ;;  %v11144_v26 = vld [vmem:[#allocation5 + $0x1ef0] sm:$0xf0]  ;;  %v5957_v42 = vperm.slane %v12718_v60, 3 }
 0x48b   :  { %7133 = vmatpush.bf16.msra.mxu1 %v11023_v43  ;;  %v11179_v43 = vor.u32 %v12203_v4, %v11176_v32  ;;  %v12179_v15 = vld [vmem:[#allocation5 + $0x1cd4] sm:$0xf] }
 0x48c   :  { %7124 = vmatpush.bf16.msra.mxu0 %v10927_v25  ;;  %7159 = vmatpush.bf16.msra.mxu3 %v11151_v35  ;;  %v11051_v25 = vor.u32 %v12171_v31, %v11048_v40  ;;  %v12201_v35 = vld [vmem:[#allocation5 + $0x1f94] sm:$0xf] }
 0x48d   :  { %v12183_v40 = vld [vmem:[#allocation5 + $0x1d54] sm:$0xf] }
 0x48e   :  { %7149 = vmatpush.bf16.msra.mxu2 %v11063_v49  ;;  %v11080_v55 = vld [vmem:[#allocation5 + $0x1cf0] sm:$0xf0] }
 0x48f   :  { %7134 = vmatpush.bf16.msra.mxu1 %v11015_v51  ;;  %v11168_v51 = vld [vmem:[#allocation5 + $0x1fb0] sm:$0xf0] }
 0x490   :  { %7169 = vmatpush.bf16.msrb.mxu0 %v10987_v57  ;;  %7160 = vmatpush.bf16.msra.mxu3 %v11143_v48  ;;  %v12190_v57 = vld [vmem:[#allocation5 + $0x1e2c] sm:$0xf0]  ;;  %v11171_v0 = vor.u32 %v12201_v35, %v11168_v51  ;;  %v12141_v48 = vld [vmem:[#allocation5 + $0x1814] sm:$0xf] }
 0x491   :  { %v11119_v33 = vor.u32 %v12190_v57, %v11118_v5  ;;  %v10931_v36 = vor.u32 %v12141_v48, %v10928_v7  ;;  %v11008_v57 = vld [vmem:[#allocation5 + $0x1ab0] sm:$0xf0]  ;;  %v11083_v48 = vor.u32 %v12179_v15, %v11080_v55  ;;  %v11202_v55 = vld [vmem:[#allocation5 + $0x1558] sm:$0xf] }
 0x492   :  { %v11011_v32 = vor.u32 %v12161_v1, %v11008_v57  ;;  %v11128_v7 = vld [vmem:[#allocation5 + $0x1e70] sm:$0xf0] }
 0x493   :  { %7135 = vmatpush.bf16.msra.mxu1 %v11007_v21  ;;  %v12187_v21 = vld [vmem:[#allocation5 + $0x1dd4] sm:$0xf] }
 0x494   :  { %7170 = vmatpush.bf16.msrb.mxu0 %v10979_v59  ;;  %7161 = vmatpush.bf16.msra.mxu3 %v11135_v11  ;;  %v11115_v8 = vor.u32 %v12187_v21, %v11112_v24  ;;  %v11163_v11 = vor.u32 %v12199_v46, %v11160_v9  ;;  %v12157_v21 = vld [vmem:[#allocation5 + $0x1a14] sm:$0xf] }
 0x495   :  { %v10992_v24 = vld [vmem:[#allocation5 + $0x1a30] sm:$0xf0] }
 0x496   :  { %v12177_v9 = vld [vmem:[#allocation5 + $0x1c94] sm:$0xf] }
 0x497   :  { %7136 = vmatpush.bf16.msra.mxu1 %v10999_v28  ;;  %v12185_v28 = vld [vmem:[#allocation5 + $0x1d94] sm:$0xf] }
 0x498   :  { %7171 = vmatpush.bf16.msrb.mxu0 %v10971_v58  ;;  %7162 = vmatpush.bf16.msra.mxu3 %v11127_v63  ;;  %v12174_v58 = vld [vmem:[#allocation5 + $0x1c2c] sm:$0xf0]  ;;  %v11107_v2 = vor.u32 %v12185_v28, %v11104_v20  ;;  %v11016_v63 = vld [vmem:[#allocation5 + $0x1af0] sm:$0xf0] }
 0x499   :  { %v11055_v62 = vor.u32 %v12174_v58, %v11054_v23  ;;  %v5956_v23 = vperm.slane %v12718_v60, 2  ;;  %v12189_v28 = vld [vmem:[#allocation5 + $0x1e14] sm:$0xf] }
 0x49a   :  { %v11120_v20 = vld [vmem:[#allocation5 + $0x1e30] sm:$0xf0] }
 0x49b   :  { %7137 = vmatpush.bf16.msra.mxu1 %v10991_v56  ;;  %7150 = vmatpush.bf16.msra.mxu2 %v11055_v62  ;;  %v12191_v62 = vld [vmem:[#allocation5 + $0x1e54] sm:$0xf] }
 0x49c   :  { %7172 = vmatpush.bf16.msrb.mxu0 %v10963_v37  ;;  %7163 = vmatpush.bf16.msra.mxu3 %v11119_v33  ;;  %v11024_v37 = vld [vmem:[#allocation5 + $0x1b30] sm:$0xf0] }
 0x49d   :  { %v11027_v27 = vor.u32 %v12165_v10, %v11024_v37  ;;  %v12181_v33 = vld [vmem:[#allocation5 + $0x1d14] sm:$0xf] }
 0x49e   :  { %v11072_v10 = vld [vmem:[#allocation5 + $0x1cb0] sm:$0xf0] }
 0x49f   :  { %7182 = vmatpush.bf16.msrb.mxu1 %v11051_v25  ;;  %7195 = vmatpush.bf16.msrb.mxu2 %v11115_v8  ;;  %v11096_v25 = vld [vmem:[#allocation5 + $0x1d70] sm:$0xf0]  ;;  %v10995_v8 = vor.u32 %v12157_v21, %v10992_v24  ;;  %v11198_v24 = vld [vmem:[#allocation5 + $0x1518] sm:$0xf] }
 0x4a0   :  { %7173 = vmatpush.bf16.msrb.mxu0 %v10955_v18  ;;  %7208 = vmatpush.bf16.msrb.mxu3 %v11179_v43  ;;  %v12163_v18 = vld [vmem:[#allocation5 + $0x1ad4] sm:$0xf]  ;;  %v11099_v61 = vor.u32 %v12183_v40, %v11096_v25 }
 0x4a1   :  { %v11019_v31 = vor.u32 %v12163_v18, %v11016_v63  ;;  %v11088_v43 = vld [vmem:[#allocation5 + $0x1d30] sm:$0xf0] }
 0x4a2   :  { %v11091_v47 = vor.u32 %v12181_v33, %v11088_v43  ;;  %v12175_v18 = vld [vmem:[#allocation5 + $0x1c54] sm:$0xf] }
 0x4a3   :  { %7183 = vmatpush.bf16.msrb.mxu1 %v11043_v52  ;;  %7196 = vmatpush.bf16.msrb.mxu2 %v11107_v2  ;;  %v11123_v2 = vor.u32 %v12189_v28, %v11120_v20  ;;  %v11064_v63 = vld [vmem:[#allocation5 + $0x1c70] sm:$0xf0]  ;;  %v12224_v28 = vld [vmem:[#allocation5 + $0x14f4] sm:$0xf0] }
 0x4a4   :  { %7174 = vmatpush.bf16.msrb.mxu0 %v10947_v29  ;;  %7209 = vmatpush.bf16.msrb.mxu3 %v11171_v0  ;;  %v11147_v29 = vor.u32 %v12195_v30, %v11144_v26  ;;  %v12173_v1 = vld [vmem:[#allocation5 + $0x1c14] sm:$0xf] }
 0x4a7   :  { %7184 = vmatpush.bf16.msrb.mxu1 %v11035_v41  ;;  %7197 = vmatpush.bf16.msrb.mxu2 %v11099_v61  ;;  %v12228_v61 = vld [vmem:[#allocation5 + $0x15f4] sm:$0xf0] }
 0x4a8   :  { %7175 = vmatpush.bf16.msrb.mxu0 %v10939_v50  ;;  %7210 = vmatpush.bf16.msrb.mxu3 %v11163_v11  ;;  %v11000_v50 = vld [vmem:[#allocation5 + $0x1a70] sm:$0xf0] }
 0x4a9   :  { %v11003_v0 = vor.u32 %v12159_v13, %v11000_v50 }
 0x4ab   :  { %7185 = vmatpush.bf16.msrb.mxu1 %v11027_v27  ;;  %7198 = vmatpush.bf16.msrb.mxu2 %v11091_v47 }
 0x4ac   :  { %7176 = vmatpush.bf16.msrb.mxu0 %v10931_v36  ;;  %7211 = vmatpush.bf16.msrb.mxu3 %v11155_v16  ;;  %v11131_v36 = vor.u32 %v12191_v62, %v11128_v7 }
 0x4af   :  { %7186 = vmatpush.bf16.msrb.mxu1 %v11019_v31  ;;  %7199 = vmatpush.bf16.msrb.mxu2 %v11083_v48  ;;  %v11067_v31 = vor.u32 %v12175_v18, %v11064_v63  ;;  %v11190_v63 = vld [vmem:[#allocation5 + $0x1498] sm:$0xf] }
 0x4b0   :  { %7212 = vmatpush.bf16.msrb.mxu3 %v11147_v29 }
 0x4b3   :  { %7187 = vmatpush.bf16.msrb.mxu1 %v11011_v32 }
 0x4b7   :  { %7188 = vmatpush.bf16.msrb.mxu1 %v11003_v0  ;;  %v5958_v0 = vperm.slane %v12718_v60, 4  ;;  %v12243_v60 = vld [vmem:[#allocation7 + $0x15] ss:$0 sm:$0xff] }
 0x4bb   :  { %7189 = vmatpush.bf16.msrb.mxu1 %v10995_v8 }
 0x4ca   :  { %v12714_v3 = vpop.f32.mrf.mxu0 }
 0x4cb   :  { %v6390_v12 = vadd.f32 %v12714_v3, %v5954_v6 }
 0x4d0   :  { %v12716_v59 = vpop.f32.mrf.mxu2 }
 0x4d1   :  { %v6416_v54 = vadd.f32 %v12716_v59, %v5955_v19  ;;  %v11139_v59 = vor.u32 %v12193_v14, %v11136_v38  ;;  %v12227_v14 = vld [vmem:[#allocation5 + $0x15b4] sm:$0xf0] }
 0x4d2   :  { %v6391_v53 = vpop.f32.mrf.mxu0 }
 0x4d3   :  { %7213 = vmatpush.bf16.msrb.mxu3 %v11139_v59 }
 0x4d7   :  { %7214 = vmatpush.bf16.msrb.mxu3 %v11131_v36 }
 0x4d8   :  { %v6417_v39 = vpop.f32.mrf.mxu2 }
 0x4d9   :  { %v11075_v39 = vor.u32 %v12177_v9, %v11072_v10 }
 0x4da   :  { %v6402_v34 = vpop.f32.mrf.mxu1 }
 0x4db   :  { %v12723_v22 = vadd.f32 %v6402_v34, %v6390_v12  ;;  %v6441_v56 = vpop.f32.mrf.mxu0  ;;  %7200 = vmatpush.bf16.msrb.mxu2 %v11075_v39  ;;  %7215 = vmatpush.bf16.msrb.mxu3 %v11123_v2 }
 0x4dc   :  { %v6442_v37 = vadd.f32 %v6441_v56, %v5956_v23 }
 0x4dd   :  { %v6515_v3 = vmul.f32 0.044715, %v12723_v22  ;;  %v6510_v40 = vmul.f32 0.5, %v12723_v22 }
 0x4df   :  { %v6520_v5 = vmul.f32 %v6515_v3, %v12723_v22  ;;  %v11210_v3 = vld [vmem:[#allocation5 + $0x15d8] sm:$0xf]  ;;  %7201 = vmatpush.bf16.msrb.mxu2 %v11067_v31 }
 0x4e0   :  { %v6428_v4 = vpop.f32.mrf.mxu3  ;;  %v11211_v33 = vor.u32 %v12228_v61, %v11210_v3  ;;  %v11306_v61 = vld [vmem:[#allocation5 + $0x17d8] sm:$0xf] }
 0x4e1   :  { %v6525_v44 = vmul.f32 %v6520_v5, %v12723_v22  ;;  %v12729_v45 = vadd.f32 %v6428_v4, %v6416_v54  ;;  %v6467_v52 = vpop.f32.mrf.mxu2  ;;  %v11056_v54 = vld [vmem:[#allocation5 + $0x1c30] sm:$0xf0] }
 0x4e2   :  { %v6404_v49 = vpop.f32.mrf.mxu1  ;;  %v6468_v30 = vadd.f32 %v6467_v52, %v5957_v42  ;;  %v11059_v57 = vor.u32 %v12173_v1, %v11056_v54 }
 0x4e3   :  { %v6530_v35 = vadd.f32 %v6525_v44, %v12723_v22  ;;  %v6516_v51 = vmul.f32 0.044715, %v12729_v45  ;;  %v6443_v53 = vpop.f32.mrf.mxu0  ;;  %v11206_v22 = vld [vmem:[#allocation5 + $0x1598] sm:$0xf]  ;;  %v6511_v13 = vmul.f32 0.5, %v12729_v45 }
 0x4e4   :  { %7202 = vmatpush.bf16.msrb.mxu2 %v11059_v57  ;;  %v11207_v53 = vor.u32 %v12227_v14, %v11206_v22  ;;  %v12222_v57 = vld [vmem:[#allocation5 + $0x1474] sm:$0xf0] }
 0x4e5   :  { %v6535_v41 = vmul.f32 0.7978846, %v6530_v35  ;;  %v6521_v58 = vmul.f32 %v6516_v51, %v12729_v45  ;;  %v11182_v14 = vld [vmem:[#allocation5 + $0x1418] sm:$0xf] }
 0x4e7   :  { %12273 = vtanh.f32 %v6535_v41  ;;  %v6526_v6 = vmul.f32 %v6521_v58, %v12729_v45  ;;  %v12226_v41 = vld [vmem:[#allocation5 + $0x1574] sm:$0xf0] }
 0x4e8   :  { %v6430_v46 = vpop.f32.mrf.mxu3  ;;  %v11203_v7 = vor.u32 %v12226_v41, %v11202_v55  ;;  %v11294_v55 = vld [vmem:[#allocation5 + $0x1718] sm:$0xf] }
 0x4e9   :  { %v6531_v11 = vadd.f32 %v6526_v6, %v12729_v45  ;;  %v6469_v27 = vpop.f32.mrf.mxu2  ;;  %v12225_v6 = vld [vmem:[#allocation5 + $0x1534] sm:$0xf0] }
 0x4ea   :  { %v6454_v12 = vpop.f32.mrf.mxu1  ;;  %v11199_v10 = vor.u32 %v12225_v6, %v11198_v24  ;;  %v12233_v41 = vld [vmem:[#allocation5 + $0x1734] sm:$0xf0] }
 0x4eb   :  { %v6536_v17 = vmul.f32 0.7978846, %v6531_v11  ;;  %v12738_v34 = vadd.f32 %v6454_v12, %v6442_v37  ;;  %v6493_v16 = vpop.f32.mrf.mxu0  ;;  %v11194_v37 = vld [vmem:[#allocation5 + $0x14d8] sm:$0xf] }
 0x4ec   :  { %v6494_v21 = vadd.f32 %v6493_v16, %v5958_v0  ;;  %v11286_v24 = vld [vmem:[#allocation5 + $0x1698] sm:$0xf] }
 0x4ed   :  { %v12274_v19 = vpop.eup %12273  ;;  %12275 = vtanh.f32 %v6536_v17  ;;  %v6517_v56 = vmul.f32 0.044715, %v12738_v34  ;;  %v6512_v11 = vmul.f32 0.5, %v12738_v34  ;;  %v11195_v17 = vor.u32 %v12224_v28, %v11194_v37  ;;  %v12231_v6 = vld [vmem:[#allocation5 + $0x16b4] sm:$0xf0] }
 0x4ee   :  { %v6545_v25 = vadd.f32 1.0, %v12274_v19  ;;  %v12223_v19 = vld [vmem:[#allocation5 + $0x14b4] sm:$0xf0] }
 0x4ef   :  { %v6522_v26 = vmul.f32 %v6517_v56, %v12738_v34  ;;  %v11191_v1 = vor.u32 %v12223_v19, %v11190_v63  ;;  %v12229_v37 = vld [vmem:[#allocation5 + $0x1634] sm:$0xf0] }
 0x4f0   :  { %v6480_v5 = vpop.f32.mrf.mxu3  ;;  %v6550_v29 = vmul.f32 %v6545_v25, %v6510_v40  ;;  %v11234_v63 = vld [vmem:[#allocation5 + $0x1158] sm:$0xf] }
 0x4f1   :  { %v6527_v4 = vmul.f32 %v6522_v26, %v12738_v34  ;;  %v6481_v32 = vadd.f32 %v6480_v5, %v6468_v30  ;;  %v12236_v30 = vld [vmem:[#allocation5 + $0x17f4] sm:$0xf0] }
 0x4f2   :  { %v6696_v43 = vpop.f32.mrf.mxu2  ;;  %v6456_v44 = vpop.f32.mrf.mxu1  ;;  %v6723_v47 = vpack.c.bf16 %v6550_v29, %v6550_v29  ;;  %v11186_v29 = vld [vmem:[#allocation5 + $0x1458] sm:$0xf] }
 0x4f3   :  { %v12276_v38 = vpop.eup %12275  ;;  %v6532_v52 = vadd.f32 %v6527_v4, %v12738_v34  ;;  %v6518_v49 = vmul.f32 0.044715, %v6481_v32  ;;  %v6495_v59 = vpop.f32.mrf.mxu0  ;;  %v6697_v2 = vadd.f32 %v12243_v60, %v6696_v43  ;;  %v6513_v25 = vmul.f32 0.5, %v6481_v32  ;;  %v12235_v44 = vld [vmem:[#allocation5 + $0x17b4] sm:$0xf0] }
 0x4f4   :  { %7125 = vmatmul.bf16.vlgmr.msra.gmra.mxu0 %v6723_v47  ;;  %v6546_v50 = vadd.f32 1.0, %v12276_v38  ;;  %v12221_v38 = vld [vmem:[#allocation5 + $0x1434] sm:$0xf0] }
 0x4f5   :  { %v6537_v35 = vmul.f32 0.7978846, %v6532_v52  ;;  %v6523_v51 = vmul.f32 %v6518_v49, %v6481_v32  ;;  %7338 = vmatpush.bf16.msra.mxu0 %v11211_v33  ;;  %v11307_v33 = vor.u32 %v12236_v30, %v11306_v61  ;;  %v11298_v59 = vld [vmem:[#allocation5 + $0x1758] sm:$0xf] }
 0x4f6   :  { %v6551_v15 = vmul.f32 %v6546_v50, %v6511_v13  ;;  %v12234_v13 = vld [vmem:[#allocation5 + $0x1774] sm:$0xf0]  ;;  %v11183_v50 = vor.u32 %v12221_v38, %v11182_v14 }
 0x4f7   :  { %12277 = vtanh.f32 %v6537_v35  ;;  %v6528_v23 = vmul.f32 %v6523_v51, %v6481_v32  ;;  %v11299_v0 = vor.u32 %v12234_v13, %v11298_v59  ;;  %v12210_v19 = vld [vmem:[#allocation5 + $0x1174] sm:$0xf0]  ;;  %v6791_v59 = vld [vmem:[#allocation7 + $0x16] sm:$0x3] }
 0x4f8   :  { %v6482_v58 = vpop.f32.mrf.mxu3  ;;  %v6724_v48 = vpack.c.bf16 %v6551_v15, %v6551_v15  ;;  %v11226_v61 = vld [vmem:[#allocation5 + $0x10d8] sm:$0xf] }
 0x4f9   :  { %v6533_v62 = vadd.f32 %v6528_v23, %v6481_v32  ;;  %7339 = vmatpush.bf16.msra.mxu0 %v11207_v53  ;;  %v11302_v32 = vld [vmem:[#allocation5 + $0x1798] sm:$0xf] }
 0x4fa   :  { %v6698_v45 = vpop.f32.mrf.mxu2  ;;  %7138 = vmatmul.bf16.vlgmr.msra.gmra.mxu1 %v6724_v48  ;;  %v11303_v49 = vor.u32 %v12235_v44, %v11302_v32  ;;  %v12208_v30 = vld [vmem:[#allocation5 + $0x10f4] sm:$0xf0] }
 0x4fb   :  { %v6538_v36 = vmul.f32 0.7978846, %v6533_v62  ;;  %v6506_v8 = vpop.f32.mrf.mxu1  ;;  %v11295_v62 = vor.u32 %v12233_v41, %v11294_v55  ;;  %v12219_v32 = vld [vmem:[#allocation5 + $0x13b4] sm:$0xf0] }
 0x4fc   :  { %v6507_v46 = vadd.f32 %v6506_v8, %v6494_v21  ;;  %v12232_v21 = vld [vmem:[#allocation5 + $0x16f4] sm:$0xf0] }
 0x4fd   :  { %v12278_v9 = vpop.eup %12277  ;;  %12279 = vtanh.f32 %v6538_v36  ;;  %7340 = vmatpush.bf16.msra.mxu0 %v11203_v7  ;;  %v11290_v7 = vld [vmem:[#allocation5 + $0x16d8] sm:$0xf]  ;;  %v11287_v36 = vor.u32 %v12231_v6, %v11286_v24 }
 0x4fe   :  { %v6519_v27 = vmul.f32 0.044715, %v6507_v46  ;;  %v6547_v39 = vadd.f32 1.0, %v12278_v9  ;;  %v6514_v51 = vmul.f32 0.5, %v6507_v46  ;;  %v11291_v45 = vor.u32 %v12232_v21, %v11290_v7  ;;  %v11282_v8 = vld [vmem:[#allocation5 + $0x1658] sm:$0xf] }
 0x4ff   :  { %v12206_v14 = vld [vmem:[#allocation5 + $0x1074] sm:$0xf0] }
 0x500   :  { %v6524_v20 = vmul.f32 %v6519_v27, %v6507_v46  ;;  %v6552_v12 = vmul.f32 %v6547_v39, %v6512_v11  ;;  %v11266_v38 = vld [vmem:[#allocation5 + $0x1358] sm:$0xf] }
 0x501   :  { %7341 = vmatpush.bf16.msra.mxu0 %v11199_v10  ;;  %v11278_v10 = vld [vmem:[#allocation5 + $0x1618] sm:$0xf] }
 0x502   :  { %v6529_v42 = vmul.f32 %v6524_v20, %v6507_v46  ;;  %v6709_v16 = vpop.f32.mrf.mxu3  ;;  %v6725_v18 = vpack.c.bf16 %v6552_v12, %v6552_v12  ;;  %v11279_v39 = vor.u32 %v12229_v37, %v11278_v10  ;;  %v11242_v12 = vld [vmem:[#allocation5 + $0x11d8] sm:$0xf] }
 0x503   :  { %v12280_v56 = vpop.eup %12279  ;;  %v12748_v31 = vadd.f32 %v6709_v16, %v6697_v2  ;;  %v6508_v40 = vpop.f32.mrf.mxu1  ;;  %v12212_v2 = vld [vmem:[#allocation5 + $0x11f4] sm:$0xf0] }
 0x504   :  { %v6534_v3 = vadd.f32 %v6529_v42, %v6507_v46  ;;  %7151 = vmatmul.bf16.vlgmr.msra.gmra.mxu2 %v6725_v18  ;;  %7177 = vmatmul.bf16.vlgmr.msrb.gmra.mxu0 %v6723_v47  ;;  %v6548_v34 = vadd.f32 1.0, %v12280_v56  ;;  %v11187_v47 = vor.u32 %v12222_v57, %v11186_v29  ;;  %v12230_v46 = vld [vmem:[#allocation5 + $0x1674] sm:$0xf0]  ;;  %v11235_v56 = vor.u32 %v12210_v19, %v11234_v63 }
 0x505   :  { %v6714_v26 = vmul.f32 0.044715, %v12748_v31  ;;  %7342 = vmatpush.bf16.msra.mxu0 %v11195_v17  ;;  %v11283_v60 = vor.u32 %v12230_v46, %v11282_v8  ;;  %v6713_v27 = vmul.f32 0.5, %v12748_v31  ;;  %v11243_v17 = vor.u32 %v12212_v2, %v11242_v12  ;;  %v11238_v42 = vld [vmem:[#allocation5 + $0x1198] sm:$0xf] }
 0x506   :  { %v6539_v54 = vmul.f32 0.7978846, %v6534_v3  ;;  %v6553_v5 = vmul.f32 %v6548_v34, %v6513_v25  ;;  %v12211_v16 = vld [vmem:[#allocation5 + $0x11b4] sm:$0xf0] }
 0x507   :  { %v6715_v4 = vmul.f32 %v6714_v26, %v12748_v31  ;;  %7447 = vmatpush.bf16.msra.mxu1 %v11243_v17  ;;  %v12209_v25 = vld [vmem:[#allocation5 + $0x1134] sm:$0xf0] }
 0x508   :  { %12281 = vtanh.f32 %v6539_v54  ;;  %v6726_v43 = vpack.c.bf16 %v6553_v5, %v6553_v5  ;;  %v11274_v26 = vld [vmem:[#allocation5 + $0x13d8] sm:$0xf] }
 0x509   :  { %7343 = vmatpush.bf16.msra.mxu0 %v11191_v1  ;;  %v6716_v52 = vmul.f32 %v6715_v4, %v12748_v31  ;;  %v11227_v1 = vor.u32 %v12208_v30, %v11226_v61  ;;  %v12220_v54 = vld [vmem:[#allocation5 + $0x13f4] sm:$0xf0] }
 0x50a   :  { %v6711_v22 = vpop.f32.mrf.mxu3  ;;  %7164 = vmatmul.bf16.vlgmr.msra.gmra.mxu3 %v6726_v43  ;;  %7190 = vmatmul.bf16.vlgmr.msrb.gmra.mxu1 %v6724_v48  ;;  %v11275_v29 = vor.u32 %v12220_v54, %v11274_v26  ;;  %v11222_v57 = vld [vmem:[#allocation5 + $0x1098] sm:$0xf] }
 0x50b   :  { %7537 = vmatpush.bf16.msra.mxu3 %v11307_v33  ;;  %v6717_v53 = vadd.f32 %v6716_v52, %v12748_v31  ;;  %v11230_v31 = vld [vmem:[#allocation5 + $0x1118] sm:$0xf] }
 0x50c   :  { %v11231_v3 = vor.u32 %v12209_v25, %v11230_v31  ;;  %v12207_v4 = vld [vmem:[#allocation5 + $0x10b4] sm:$0xf0]  ;;  %7460 = vmatpush.bf16.msra.mxu2 %v11275_v29 }
 0x50d   :  { %7344 = vmatpush.bf16.msra.mxu0 %v11187_v47  ;;  %v6718_v58 = vmul.f32 0.7978846, %v6717_v53  ;;  %v11270_v33 = vld [vmem:[#allocation5 + $0x1398] sm:$0xf] }
 0x50e   :  { %v12282_v35 = vpop.eup %12281  ;;  %v11271_v44 = vor.u32 %v12219_v32, %v11270_v33  ;;  %v11218_v22 = vld [vmem:[#allocation5 + $0x1058] sm:$0xf] }
 0x50f   :  { %7538 = vmatpush.bf16.msra.mxu3 %v11303_v49  ;;  %v6549_v15 = vadd.f32 1.0, %v12282_v35  ;;  %12283 = vtanh.f32 %v6718_v58  ;;  %v11219_v52 = vor.u32 %v12206_v14, %v11218_v22  ;;  %v12218_v49 = vld [vmem:[#allocation5 + $0x1374] sm:$0xf0] }
 0x510   :  { %7461 = vmatpush.bf16.msra.mxu2 %v11271_v44  ;;  %v11214_v35 = vld [vmem:[#allocation5 + $0x1018] sm:$0xf] }
 0x511   :  { %7345 = vmatpush.bf16.msra.mxu0 %v11183_v50  ;;  %v6554_v23 = vmul.f32 %v6549_v15, %v6514_v51  ;;  %v11267_v50 = vor.u32 %v12218_v49, %v11266_v38  ;;  %v12205_v51 = vld [vmem:[#allocation5 + $0x1034] sm:$0xf0] }
 0x512   :  { %v11262_v53 = vld [vmem:[#allocation5 + $0x1318] sm:$0xf]  ;;  %v11215_v15 = vor.u32 %v12205_v51, %v11214_v35 }
 0x513   :  { %7539 = vmatpush.bf16.msra.mxu3 %v11299_v0  ;;  %v7241_v48 = vpack.c.bf16 %v6554_v23, %v6554_v23  ;;  %v6793_v0 = vperm.slane %v6791_v59, 0  ;;  %v12217_v55 = vld [vmem:[#allocation5 + $0x1334] sm:$0xf0] }
 0x514   :  { %7203 = vmatmul.bf16.vlgmr.msrb.gmra.mxu2 %v6725_v18  ;;  %v11239_v18 = vor.u32 %v12211_v16, %v11238_v42  ;;  %v11263_v41 = vor.u32 %v12217_v55, %v11262_v53  ;;  %v11254_v6 = vld [vmem:[#allocation5 + $0x1298] sm:$0xf]  ;;  %v6794_v16 = vperm.slane %v6791_v59, 1 }
 0x515   :  { %7346 = vmatmul.bf16.vlgmr.msra.gmra.mxu0 %v7241_v48  ;;  %v12284_v9 = vpop.eup %12283  ;;  %7462 = vmatpush.bf16.msra.mxu2 %v11267_v50  ;;  %v11258_v48 = vld [vmem:[#allocation5 + $0x12d8] sm:$0xf] }
 0x516   :  { %v6720_v11 = vadd.f32 1.0, %v12284_v9  ;;  %7448 = vmatpush.bf16.msra.mxu1 %v11239_v18  ;;  %v12214_v10 = vld [vmem:[#allocation5 + $0x1274] sm:$0xf0] }
 0x517   :  { %7540 = vmatpush.bf16.msra.mxu3 %v11295_v62  ;;  %v12216_v62 = vld [vmem:[#allocation5 + $0x12f4] sm:$0xf0] }
 0x518   :  { %v6721_v28 = vmul.f32 %v6720_v11, %v6713_v27  ;;  %v11259_v21 = vor.u32 %v12216_v62, %v11258_v48  ;;  %v12213_v12 = vld [vmem:[#allocation5 + $0x1234] sm:$0xf0] }
 0x519   :  { %7463 = vmatpush.bf16.msra.mxu2 %v11263_v41 }
 0x51a   :  { %7216 = vmatmul.bf16.vlgmr.msrb.gmra.mxu3 %v6726_v43  ;;  %v6722_v20 = vpack.c.bf16 %v6721_v28, %v6721_v28  ;;  %7449 = vmatpush.bf16.msra.mxu1 %v11235_v56  ;;  %v11223_v43 = vor.u32 %v12207_v4, %v11222_v57 }
 0x51b   :  { %7541 = vmatpush.bf16.msra.mxu3 %v11291_v45 }
 0x51d   :  { %7464 = vmatpush.bf16.msra.mxu2 %v11259_v21 }
 0x51e   :  { %7450 = vmatpush.bf16.msra.mxu1 %v11231_v3 }
 0x51f   :  { %7542 = vmatpush.bf16.msra.mxu3 %v11287_v36  ;;  %v12215_v36 = vld [vmem:[#allocation5 + $0x12b4] sm:$0xf0] }
 0x520   :  { %v11255_v8 = vor.u32 %v12215_v36, %v11254_v6 }
 0x522   :  { %7451 = vmatpush.bf16.msra.mxu1 %v11227_v1  ;;  %7465 = vmatpush.bf16.msra.mxu2 %v11255_v8 }
 0x523   :  { %7543 = vmatpush.bf16.msra.mxu3 %v11283_v60  ;;  %v11250_v60 = vld [vmem:[#allocation5 + $0x1258] sm:$0xf] }
 0x526   :  { %7452 = vmatpush.bf16.msra.mxu1 %v11223_v43 }
 0x527   :  { %7544 = vmatpush.bf16.msra.mxu3 %v11279_v39  ;;  %v11251_v39 = vor.u32 %v12214_v10, %v11250_v60 }
 0x529   :  { %7466 = vmatpush.bf16.msra.mxu2 %v11251_v39 }
 0x52a   :  { %7545 = vmatmul.bf16.vlgmr.msra.gmra.mxu3 %v6722_v20  ;;  %7453 = vmatpush.bf16.msra.mxu1 %v11219_v52  ;;  %v11246_v20 = vld [vmem:[#allocation5 + $0x1218] sm:$0xf] }
 0x52b   :  { %v11247_v42 = vor.u32 %v12213_v12, %v11246_v20 }
 0x52d   :  { %7467 = vmatpush.bf16.msra.mxu2 %v11247_v42 }
 0x52e   :  { %7454 = vmatpush.bf16.msra.mxu1 %v11215_v15  ;;  %v12244_v15 = vld [vmem:[#allocation7 + $0x18] ss:$0 sm:$0xff] }
 0x571   :  { %v7126_v40 = vpop.f32.mrf.mxu0 }
 0x572   :  { %v7127_v7 = vadd.f32 %v7126_v40, %v6793_v0 }
 0x577   :  { %v7139_v34 = vpop.f32.mrf.mxu1 }
 0x578   :  { %v7140_v24 = vadd.f32 %v7139_v34, %v7127_v7 }
 0x579   :  { %v7128_v5 = vpop.f32.mrf.mxu0 }
 0x57f   :  { %v7141_v47 = vpop.f32.mrf.mxu1 }
 0x581   :  { %v7178_v13 = vpop.f32.mrf.mxu0 }
 0x582   :  { %v7179_v40 = vadd.f32 %v7178_v13, %v6794_v16 }
 0x587   :  { %v7152_v23 = vpop.f32.mrf.mxu2  ;;  %v7191_v58 = vpop.f32.mrf.mxu1 }
 0x588   :  { %v7153_v46 = vadd.f32 %v7152_v23, %v7140_v24  ;;  %v7192_v25 = vadd.f32 %v7191_v58, %v7179_v40 }
 0x589   :  { %v7180_v45 = vpop.f32.mrf.mxu0 }
 0x58d   :  { %v7165_v9 = vpop.f32.mrf.mxu3 }
 0x58e   :  { %v7166_v37 = vadd.f32 %v7165_v9, %v7153_v46 }
 0x58f   :  { %v7154_v11 = vpop.f32.mrf.mxu2  ;;  %v7193_v27 = vpop.f32.mrf.mxu1 }
 0x590   :  { %v7223_v28 = vmul.f32 0.044715, %v7166_v37  ;;  %v7221_v5 = vmul.f32 0.5, %v7166_v37 }
 0x592   :  { %v7225_v2 = vmul.f32 %v7223_v28, %v7166_v37  ;;  %v7347_v17 = vpop.f32.mrf.mxu0 }
 0x594   :  { %v7227_v18 = vmul.f32 %v7225_v2, %v7166_v37 }
 0x595   :  { %v7167_v63 = vpop.f32.mrf.mxu3 }
 0x596   :  { %v7229_v19 = vadd.f32 %v7227_v18, %v7166_v37 }
 0x597   :  { %v7204_v56 = vpop.f32.mrf.mxu2 }
 0x598   :  { %v7231_v31 = vmul.f32 0.7978846, %v7229_v19  ;;  %v7205_v34 = vadd.f32 %v7204_v56, %v7192_v25 }
 0x59a   :  { %12285 = vtanh.f32 %v7231_v31  ;;  %v7349_v3 = vpop.f32.mrf.mxu0 }
 0x59d   :  { %v7217_v61 = vpop.f32.mrf.mxu3 }
 0x59e   :  { %v7218_v30 = vadd.f32 %v7217_v61, %v7205_v34 }
 0x59f   :  { %v7206_v26 = vpop.f32.mrf.mxu2 }
 0x5a0   :  { %v12286_v1 = vpop.eup %12285  ;;  %v7224_v54 = vmul.f32 0.044715, %v7218_v30  ;;  %v7222_v38 = vmul.f32 0.5, %v7218_v30 }
 0x5a1   :  { %v7235_v29 = vadd.f32 1.0, %v12286_v1 }
 0x5a2   :  { %v7226_v57 = vmul.f32 %v7224_v54, %v7218_v30 }
 0x5a3   :  { %v7237_v4 = vmul.f32 %v7235_v29, %v7221_v5 }
 0x5a4   :  { %v7228_v33 = vmul.f32 %v7226_v57, %v7218_v30 }
 0x5a5   :  { %v7219_v43 = vpop.f32.mrf.mxu3  ;;  %v7239_v32 = vpack.c.bf16 %v7237_v4, %v7237_v4 }
 0x5a6   :  { %v7230_v44 = vadd.f32 %v7228_v33, %v7218_v30 }
 0x5a7   :  { %7455 = vmatmul.bf16.vlgmr.msra.gmra.mxu1 %v7239_v32 }
 0x5a8   :  { %v7232_v47 = vmul.f32 0.7978846, %v7230_v44 }
 0x5aa   :  { %12287 = vtanh.f32 %v7232_v47 }
 0x5ad   :  { %v7546_v22 = vpop.f32.mrf.mxu3 }
 0x5b0   :  { %v12288_v14 = vpop.eup %12287 }
 0x5b1   :  { %v7236_v52 = vadd.f32 1.0, %v12288_v14 }
 0x5b3   :  { %v7238_v49 = vmul.f32 %v7236_v52, %v7222_v38 }
 0x5b5   :  { %v7548_v59 = vpop.f32.mrf.mxu3  ;;  %v7240_v13 = vpack.c.bf16 %v7238_v49, %v7238_v49 }
 0x5b7   :  { %7468 = vmatmul.bf16.vlgmr.msra.gmra.mxu2 %v7240_v13 }
 0x624   :  { %v7456_v50 = vpop.f32.mrf.mxu1 }
 0x625   :  { %v7457_v51 = vadd.f32 %v7456_v50, %v7347_v17 }
 0x62c   :  { %v7458_v35 = vpop.f32.mrf.mxu1 }
 0x63a   :  { %v7469_v53 = vpop.f32.mrf.mxu2 }
 0x63b   :  { %v7470_v0 = vadd.f32 %v7469_v53, %v7457_v51 }
 0x63d   :  { %v7550_v55 = vadd.f32 %v7546_v22, %v7470_v0 }
 0x63f   :  { %v7555_v41 = vadd.f32 %v12244_v15, %v7550_v55 }
 0x641   :  { %v11308_v23 = vmul.f32 -1.442695, %v7555_v41 }
 0x642   :  { %v7471_v58 = vpop.f32.mrf.mxu2 }
 0x643   :  { %12289 = vpow2.f32 %v11308_v23 }
 0x649   :  { %v12290_v48 = vpop.eup %12289 }
 0x64a   :  { %v7559_v62 = vadd.f32 1.0, %v12290_v48 }
 0x64c   :  { %12291 = vrcp.f32 %v7559_v62  ;;  %v7571_v24 = vand.u32 2147483648, %v7559_v62  ;;  %v7569_v36 = vand.u32 2147483647, %v7559_v62  ;;  %vm7565_vm1 = vweird.f32 %v7559_v62 }
 0x64e   :  { %v7572_v46 = vor.u32 1.1754944e-38, %v7571_v24  ;;  %vm7570_vm3 = vcmp.eq.f32.partialorder %v7569_v36, 8.507059e+37 }
 0x652   :  { %v12292_v7 = vpop.eup %12291 }
 0x653   :  { %v7561_v21 = vmul.f32 %v12292_v7, %v7559_v62  ;;  %vm7566_vm0 = vweird.f32 %v12292_v7 }
 0x654   :  { %vm7567_vm2 = vmor %vm7565_vm1, %vm7566_vm0 }
 0x655   :  { %v7562_v45 = vsub.f32 1.0, %v7561_v21 }
 0x657   :  { %v7563_v6 = vmul.f32 %v12292_v7, %v7562_v45 }
 0x659   :  { %v7564_v8 = vadd.f32 %v12292_v7, %v7563_v6 }
 0x65b   :  { %v7568_v9 = vsel %vm7567_vm2, %v12292_v7, %v7564_v8 }
 0x65c   :  { %v7573_v60 = vsel %vm7570_vm3, %v7572_v46, %v7568_v9 }
 0x65d   :  { %7577 = vst [vmem:[#allocation8 + $0x10] sm:$0xff] %v7573_v60 }
 0x65e   :  { %7588 = dma.vmem_to_hbm [thread:$0]  %s7584_s2, 384, %s7586_s30, [#allocation4]  }
 0x65f   :  { %12394 = dma.done.wait [#allocation4], 384  }
 0x660   :  { %12395 = vsyncadd [#allocation4], 4294966912 }
 0x661   :  { %7593 = vsyncpa [#allocation3], 1 }
 0x662   :  { %7594 = vsyncpa [#allocation6], 1 }
 0x663   :  { %7595 = vsyncpa [#allocation4], 1 }

</bundles_post_ra>
